<compile_context>
chip_gen: v7x
topology: tpu7x:2x2x1
jax: 0.10.0
libtpu: 0.0.40
codegen_flags: <defaults>
</compile_context>

<pallas_src>
import functools

import jax
import jax.numpy as jnp
from jax.experimental import pallas as pl
from jax.experimental.pallas import tpu as pltpu


# ----------------------------------------------------------------------------
# Fused Pallas kernel: all conv stages + residual add + final ReLU, per group.
# ----------------------------------------------------------------------------
def _fused_block_kernel(*refs, n_stages, D, H, W):
    x_ref = refs[0]                                    # (FC, S)   folded input
    hw_ref = refs[1]                                   # (9*FC, S) in-plane masks
    w_refs = refs[2:2 + n_stages]                      # each (FCout, 27*FC)
    b_refs = refs[2 + n_stages:2 + 2 * n_stages]       # each (FCout, 1)
    out_ref = refs[2 + 2 * n_stages]                   # (FCout, S)
    patches = refs[3 + 2 * n_stages]                   # scratch (27*FC, S) f32

    FC, S = x_ref.shape
    HW = H * W

    x = x_ref[...].astype(jnp.float32)
    residual = x
    h_cur = x

    zero_slab = jnp.zeros((FC, HW), jnp.float32)       # depth-boundary filler

    for stage in range(n_stages):
        # --- im2col straight into the patches scratch -----------------------
        # Outer loop: 9 in-plane (dh, dw) offsets -> 8 general lane-rolls (XLU)
        # + 8 mask multiplies (VPU). Inner loop: 3 depth offsets -> cheap
        # +-HW-lane rolls (128-aligned for HW % 128 == 0) + static stores.
        for kh in range(3):
            for kw in range(3):
                j = kh * 3 + kw
                shift = (kh - 1) * W + (kw - 1)
                if j == 4:                             # center: no roll, no mask
                    y = h_cur
                else:
                    y = pltpu.roll(h_cur, (-shift) % S, 1)
                    y = y * hw_ref[pl.ds(j * FC, FC), :]
                for kd in range(3):
                    dd = kd - 1
                    row0 = (kd * 9 + j) * FC           # tap-major row order
                    if dd == 0:
                        patches[pl.ds(row0, FC), :] = y
                    else:
                        patches[pl.ds(row0, FC), :] = pltpu.roll(y, (-dd * HW) % S, 1)
                        # Implicit zero padding in depth: the only invalid lanes
                        # are the first (dd=-1) / last (dd=+1) plane of the volume.
                        if dd < 0:
                            patches[pl.ds(row0, FC), pl.ds(0, HW)] = zero_slab
                        else:
                            patches[pl.ds(row0, FC), pl.ds(S - HW, HW)] = zero_slab

        # --- one MXU matmul per stage: (FCout, 27*FC) x (27*FC, S) ----------
        acc = jnp.dot(w_refs[stage][...].astype(jnp.float32), patches[...],
                      preferred_element_type=jnp.float32)
        acc = acc + b_refs[stage][...].astype(jnp.float32)

        if stage < n_stages - 1:
            h_cur = jnp.maximum(acc, 0.0)              # inter-stage ReLU
        else:
            h_cur = jnp.maximum(acc + residual, 0.0)   # + residual, final ReLU

    out_ref[...] = h_cur.astype(out_ref.dtype)


# ----------------------------------------------------------------------------
# Host-side parameter / mask re-layout (all cheap, done once).
# ----------------------------------------------------------------------------
def _weight_to_folded_matrix(w, fold):
    """(3,3,3,Cin,Cout) DHWIO -> block-diagonal (fold*Cout, 27*fold*Cin).

    Patch rows are ordered t*(fold*Cin) + f*Cin + ci with t = kd*9+kh*3+kw and
    f the folded-sample index; output rows are f*Cout + co.
    """
    _, _, _, cin, cout = w.shape
    m = jnp.transpose(w.reshape(27, cin, cout), (2, 0, 1))     # (Cout, 27, Cin)
    eye = jnp.eye(fold, dtype=w.dtype)
    mf = jnp.einsum('fg,cti->fctgi', eye, m)                   # (F,Cout,27,F,Cin)
    return mf.reshape(fold * cout, 27 * fold * cin)


def _build_inplane_masks(D, H, W, rows):
    """(9*rows, S) 0/1 f32: row block j*rows..(j+1)*rows is the validity mask of
    in-plane offset j = kh*3 + kw (dh=kh-1, dw=kw-1), replicated over the folded
    channel axis so the in-kernel multiply needs no sublane broadcast."""
    S = D * H * W
    s = jnp.arange(S, dtype=jnp.int32)
    hw = s % (H * W)
    h_idx = hw // W
    w_idx = hw % W
    cols = []
    for kh in range(3):
        for kw in range(3):
            dh, dw = kh - 1, kw - 1
            valid = ((h_idx + dh >= 0) & (h_idx + dh < H) &
                     (w_idx + dw >= 0) & (w_idx + dw < W))
            cols.append(valid.astype(jnp.float32))
    m = jnp.stack(cols, axis=0)                                # (9, S)
    return jnp.repeat(m[:, None, :], rows, axis=1).reshape(9 * rows, S)


def residual_conv_block(x_ncdhw, weights, biases):
    """Forward pass of ResidualConvBlock (normalization='none').

    x_ncdhw: (N, C, D, H, W) float32 — PyTorch layout.
    weights: list of (3, 3, 3, Cin_i, Cout) arrays (DHWIO).
    biases:  list of (Cout,) arrays.
    """
    N, C, D, H, W = x_ncdhw.shape
    S = D * H * W
    n_stages = len(weights)
    Cout = weights[0].shape[-1]
    assert Cout == C, "residual add requires n_filters_in == n_filters_out"

    # Fold pairs of samples onto the channel (sublane) axis: fills 8/8 sublanes
    # at C=4 and halves the grid steps. NOTE(v7x): keep N // fold >= 2 so both
    # TensorCores receive work from the 'parallel' grid axis.
    fold = 2 if N % 2 == 0 else 1
    FC = fold * C
    FCout = fold * Cout
    G = N // fold

    x_fold = x_ncdhw.reshape(G, FC, S)                 # free reshape of NCDHW
    hw_masks = _build_inplane_masks(D, H, W, FC)       # (9*FC, S)
    w_mats = [_weight_to_folded_matrix(w, fold) for w in weights]
    b_cols = [jnp.tile(b, fold).reshape(FCout, 1) for b in biases]

    kernel = functools.partial(_fused_block_kernel,
                               n_stages=n_stages, D=D, H=H, W=W)

    in_specs = [pl.BlockSpec((None, FC, S), lambda n: (n, 0, 0)),
                pl.BlockSpec((9 * FC, S), lambda n: (0, 0))]       # resident
    in_specs += [pl.BlockSpec(w.shape, lambda n: (0, 0)) for w in w_mats]
    in_specs += [pl.BlockSpec(b.shape, lambda n: (0, 0)) for b in b_cols]

    out_fold = pl.pallas_call(
        kernel,
        out_shape=jax.ShapeDtypeStruct((G, FCout, S), x_ncdhw.dtype),
        grid=(G,),
        in_specs=in_specs,
        out_specs=pl.BlockSpec((None, FCout, S), lambda n: (n, 0, 0)),
        scratch_shapes=[pltpu.VMEM((27 * FC, S), jnp.float32)],
        compiler_params=pltpu.CompilerParams(
            dimension_semantics=("parallel",),
            vmem_limit_bytes=32 * 1024 * 1024,
        ),
    )(x_fold, hw_masks, *w_mats, *b_cols)

    return out_fold.reshape(N, Cout, D, H, W)


# ----------------------------------------------------------------------------
# Pure-JAX reference (correctness check only).
# ----------------------------------------------------------------------------
def reference_forward(x_ncdhw, weights, biases):
    x = jnp.transpose(x_ncdhw, (0, 2, 3, 4, 1))
    h = x
    n_stages = len(weights)
    for i, (w, b) in enumerate(zip(weights, biases)):
        h = jax.lax.conv_general_dilated(
            h, w, window_strides=(1, 1, 1), padding='SAME',
            dimension_numbers=('NDHWC', 'DHWIO', 'NDHWC'),
            precision=jax.lax.Precision.HIGHEST) + b
        if i != n_stages - 1:
            h = jnp.maximum(h, 0.0)
    h = jnp.maximum(h + x, 0.0)
    return jnp.transpose(h, (0, 4, 1, 2, 3))


# ----------------------------------------------------------------------------
# Deterministic parameter init (mimics PyTorch Conv3d default uniform init).
# ----------------------------------------------------------------------------
def init_params(key, n_stages, n_filters_in, n_filters_out):
    weights, biases = [], []
    for i in range(n_stages):
        cin = n_filters_in if i == 0 else n_filters_out
        fan_in = cin * 3 * 3 * 3
        bound = 1.0 / jnp.sqrt(fan_in)
        key, kw, kb = jax.random.split(key, 3)
        w = jax.random.uniform(kw, (3, 3, 3, cin, n_filters_out),
                               jnp.float32, -bound, bound)
        b = jax.random.uniform(kb, (n_filters_out,), jnp.float32, -bound, bound)
        weights.append(w)
        biases.append(b)
    return weights, biases


if __name__ == "__main__":
    # Residual add requires n_filters_in == n_filters_out (as in PyTorch usage).
    # N=4 exercises the sample-folding path and keeps 2 parallel grid steps.
    N, C, D, H, W = 4, 4, 16, 16, 16
    n_stages = 2

    key = jax.random.PRNGKey(0)
    key, kx = jax.random.split(key)
    x = jax.random.normal(kx, (N, C, D, H, W), jnp.float32)
    weights, biases = init_params(key, n_stages, C, C)

    out = jax.block_until_ready(residual_conv_block(x, weights, biases))
    ref = jax.block_until_ready(reference_forward(x, weights, biases))

    assert out.shape == (N, C, D, H, W)
    max_err = float(jnp.max(jnp.abs(out - ref)))
    assert jnp.allclose(out, ref, rtol=2e-3, atol=2e-3), f"max abs err = {max_err}"

    print("KERNEL_OK")
</pallas_src>

<mosaic_0001>
module attributes {stable_mosaic.version = 11 : i64} {
  func.func @_fused_block_kernel(%arg0: i32, %arg1: memref<1x8x4096xf32, #tpu.memory_space<vmem>>, %arg2: memref<72x4096xf32, #tpu.memory_space<vmem>>, %arg3: memref<8x216xf32, #tpu.memory_space<vmem>>, %arg4: memref<8x216xf32, #tpu.memory_space<vmem>>, %arg5: memref<8x1xf32, #tpu.memory_space<vmem>>, %arg6: memref<8x1xf32, #tpu.memory_space<vmem>>, %arg7: memref<1x8x4096xf32, #tpu.memory_space<vmem>>, %arg8: memref<216x4096xf32, #tpu.memory_space<vmem>>) attributes {dimension_semantics = [#tpu.dimension_semantics<parallel>], iteration_bounds = array<i64: 2>, scalar_prefetch = 0 : i64, scratch_operands = 1 : i64, tpu.core_type = #tpu.core_type<tc>, window_params = [{transform_indices = @transform_0, window_bounds = array<i64: 1, 8, 4096>}, {pipeline_mode = #tpu.pipeline_mode<synchronous>, transform_indices = @transform_1, window_bounds = array<i64: 72, 4096>}, {pipeline_mode = #tpu.pipeline_mode<synchronous>, transform_indices = @transform_2, window_bounds = array<i64: 8, 216>}, {pipeline_mode = #tpu.pipeline_mode<synchronous>, transform_indices = @transform_3, window_bounds = array<i64: 8, 216>}, {pipeline_mode = #tpu.pipeline_mode<synchronous>, transform_indices = @transform_4, window_bounds = array<i64: 8, 1>}, {pipeline_mode = #tpu.pipeline_mode<synchronous>, transform_indices = @transform_5, window_bounds = array<i64: 8, 1>}, {transform_indices = @transform_6, window_bounds = array<i64: 1, 8, 4096>}]} {
    %c0 = arith.constant 0 : index
    %c0_0 = arith.constant 0 : index
    %c0_1 = arith.constant 0 : index
    %0 = vector.load %arg1[%c0, %c0_0, %c0_1] : memref<1x8x4096xf32, #tpu.memory_space<vmem>>, vector<1x8x4096xf32>
    %1 = vector.shape_cast %0 : vector<1x8x4096xf32> to vector<8x4096xf32>
    %cst = arith.constant 0.000000e+00 : f32
    %2 = vector.broadcast %cst : f32 to vector<8x256xf32>
    %c17_i32 = arith.constant 17 : i32
    %3 = tpu.dynamic_rotate %1 by %c17_i32 dim 1 : vector<8x4096xf32>, i32 -> vector<8x4096xf32>
    %c0_2 = arith.constant 0 : index
    %c0_3 = arith.constant 0 : index
    %4 = vector.load %arg2[%c0_2, %c0_3] : memref<72x4096xf32, #tpu.memory_space<vmem>>, vector<8x4096xf32>
    %5 = arith.mulf %3, %4 : vector<8x4096xf32>
    %c256_i32 = arith.constant 256 : i32
    %6 = tpu.dynamic_rotate %5 by %c256_i32 dim 1 : vector<8x4096xf32>, i32 -> vector<8x4096xf32>
    %c0_4 = arith.constant 0 : index
    %c0_5 = arith.constant 0 : index
    %7 = vector.load %arg8[%c0_4, %c0_5] : memref<216x4096xf32, #tpu.memory_space<vmem>>, vector<8x4096xf32>
    tpu.vector_store %arg8[%c0_4, %c0_5], %6 {strides = array<i32>} : memref<216x4096xf32, #tpu.memory_space<vmem>>, vector<8x4096xf32>,
    %c0_6 = arith.constant 0 : index
    %c0_7 = arith.constant 0 : index
    %8 = vector.load %arg8[%c0_6, %c0_7] : memref<216x4096xf32, #tpu.memory_space<vmem>>, vector<8x256xf32>
    tpu.vector_store %arg8[%c0_6, %c0_7], %2 {strides = array<i32>} : memref<216x4096xf32, #tpu.memory_space<vmem>>, vector<8x256xf32>,
    %c72 = arith.constant 72 : index
    %c0_8 = arith.constant 0 : index
    %9 = vector.load %arg8[%c72, %c0_8] : memref<216x4096xf32, #tpu.memory_space<vmem>>, vector<8x4096xf32>
    tpu.vector_store %arg8[%c72, %c0_8], %5 {strides = array<i32>} : memref<216x4096xf32, #tpu.memory_space<vmem>>, vector<8x4096xf32>,
    %c3840_i32 = arith.constant 3840 : i32
    %10 = tpu.dynamic_rotate %5 by %c3840_i32 dim 1 : vector<8x4096xf32>, i32 -> vector<8x4096xf32>
    %c144 = arith.constant 144 : index
    %c0_9 = arith.constant 0 : index
    %11 = vector.load %arg8[%c144, %c0_9] : memref<216x4096xf32, #tpu.memory_space<vmem>>, vector<8x4096xf32>
    tpu.vector_store %arg8[%c144, %c0_9], %10 {strides = array<i32>} : memref<216x4096xf32, #tpu.memory_space<vmem>>, vector<8x4096xf32>,
    %c144_10 = arith.constant 144 : index
    %c3840 = arith.constant 3840 : index
    %12 = vector.load %arg8[%c144_10, %c3840] : memref<216x4096xf32, #tpu.memory_space<vmem>>, vector<8x256xf32>
    tpu.vector_store %arg8[%c144_10, %c3840], %2 {strides = array<i32>} : memref<216x4096xf32, #tpu.memory_space<vmem>>, vector<8x256xf32>,
    %c16_i32 = arith.constant 16 : i32
    %13 = tpu.dynamic_rotate %1 by %c16_i32 dim 1 : vector<8x4096xf32>, i32 -> vector<8x4096xf32>
    %c8 = arith.constant 8 : index
    %c0_11 = arith.constant 0 : index
    %14 = vector.load %arg2[%c8, %c0_11] : memref<72x4096xf32, #tpu.memory_space<vmem>>, vector<8x4096xf32>
    %15 = arith.mulf %13, %14 : vector<8x4096xf32>
    %c256_i32_12 = arith.constant 256 : i32
    %16 = tpu.dynamic_rotate %15 by %c256_i32_12 dim 1 : vector<8x4096xf32>, i32 -> vector<8x4096xf32>
    %c8_13 = arith.constant 8 : index
    %c0_14 = arith.constant 0 : index
    %17 = vector.load %arg8[%c8_13, %c0_14] : memref<216x4096xf32, #tpu.memory_space<vmem>>, vector<8x4096xf32>
    tpu.vector_store %arg8[%c8_13, %c0_14], %16 {strides = array<i32>} : memref<216x4096xf32, #tpu.memory_space<vmem>>, vector<8x4096xf32>,
    %c8_15 = arith.constant 8 : index
    %c0_16 = arith.constant 0 : index
    %18 = vector.load %arg8[%c8_15, %c0_16] : memref<216x4096xf32, #tpu.memory_space<vmem>>, vector<8x256xf32>
    tpu.vector_store %arg8[%c8_15, %c0_16], %2 {strides = array<i32>} : memref<216x4096xf32, #tpu.memory_space<vmem>>, vector<8x256xf32>,
    %c80 = arith.constant 80 : index
    %c0_17 = arith.constant 0 : index
    %19 = vector.load %arg8[%c80, %c0_17] : memref<216x4096xf32, #tpu.memory_space<vmem>>, vector<8x4096xf32>
    tpu.vector_store %arg8[%c80, %c0_17], %15 {strides = array<i32>} : memref<216x4096xf32, #tpu.memory_space<vmem>>, vector<8x4096xf32>,
    %c3840_i32_18 = arith.constant 3840 : i32
    %20 = tpu.dynamic_rotate %15 by %c3840_i32_18 dim 1 : vector<8x4096xf32>, i32 -> vector<8x4096xf32>
    %c152 = arith.constant 152 : index
    %c0_19 = arith.constant 0 : index
    %21 = vector.load %arg8[%c152, %c0_19] : memref<216x4096xf32, #tpu.memory_space<vmem>>, vector<8x4096xf32>
    tpu.vector_store %arg8[%c152, %c0_19], %20 {strides = array<i32>} : memref<216x4096xf32, #tpu.memory_space<vmem>>, vector<8x4096xf32>,
    %c152_20 = arith.constant 152 : index
    %c3840_21 = arith.constant 3840 : index
    %22 = vector.load %arg8[%c152_20, %c3840_21] : memref<216x4096xf32, #tpu.memory_space<vmem>>, vector<8x256xf32>
    tpu.vector_store %arg8[%c152_20, %c3840_21], %2 {strides = array<i32>} : memref<216x4096xf32, #tpu.memory_space<vmem>>, vector<8x256xf32>,
    %c15_i32 = arith.constant 15 : i32
    %23 = tpu.dynamic_rotate %1 by %c15_i32 dim 1 : vector<8x4096xf32>, i32 -> vector<8x4096xf32>
    %c16 = arith.constant 16 : index
    %c0_22 = arith.constant 0 : index
    %24 = vector.load %arg2[%c16, %c0_22] : memref<72x4096xf32, #tpu.memory_space<vmem>>, vector<8x4096xf32>
    %25 = arith.mulf %23, %24 : vector<8x4096xf32>
    %c256_i32_23 = arith.constant 256 : i32
    %26 = tpu.dynamic_rotate %25 by %c256_i32_23 dim 1 : vector<8x4096xf32>, i32 -> vector<8x4096xf32>
    %c16_24 = arith.constant 16 : index
    %c0_25 = arith.constant 0 : index
    %27 = vector.load %arg8[%c16_24, %c0_25] : memref<216x4096xf32, #tpu.memory_space<vmem>>, vector<8x4096xf32>
    tpu.vector_store %arg8[%c16_24, %c0_25], %26 {strides = array<i32>} : memref<216x4096xf32, #tpu.memory_space<vmem>>, vector<8x4096xf32>,
    %c16_26 = arith.constant 16 : index
    %c0_27 = arith.constant 0 : index
    %28 = vector.load %arg8[%c16_26, %c0_27] : memref<216x4096xf32, #tpu.memory_space<vmem>>, vector<8x256xf32>
    tpu.vector_store %arg8[%c16_26, %c0_27], %2 {strides = array<i32>} : memref<216x4096xf32, #tpu.memory_space<vmem>>, vector<8x256xf32>,
    %c88 = arith.constant 88 : index
    %c0_28 = arith.constant 0 : index
    %29 = vector.load %arg8[%c88, %c0_28] : memref<216x4096xf32, #tpu.memory_space<vmem>>, vector<8x4096xf32>
    tpu.vector_store %arg8[%c88, %c0_28], %25 {strides = array<i32>} : memref<216x4096xf32, #tpu.memory_space<vmem>>, vector<8x4096xf32>,
    %c3840_i32_29 = arith.constant 3840 : i32
    %30 = tpu.dynamic_rotate %25 by %c3840_i32_29 dim 1 : vector<8x4096xf32>, i32 -> vector<8x4096xf32>
    %c160 = arith.constant 160 : index
    %c0_30 = arith.constant 0 : index
    %31 = vector.load %arg8[%c160, %c0_30] : memref<216x4096xf32, #tpu.memory_space<vmem>>, vector<8x4096xf32>
    tpu.vector_store %arg8[%c160, %c0_30], %30 {strides = array<i32>} : memref<216x4096xf32, #tpu.memory_space<vmem>>, vector<8x4096xf32>,
    %c160_31 = arith.constant 160 : index
    %c3840_32 = arith.constant 3840 : index
    %32 = vector.load %arg8[%c160_31, %c3840_32] : memref<216x4096xf32, #tpu.memory_space<vmem>>, vector<8x256xf32>
    tpu.vector_store %arg8[%c160_31, %c3840_32], %2 {strides = array<i32>} : memref<216x4096xf32, #tpu.memory_space<vmem>>, vector<8x256xf32>,
    %c1_i32 = arith.constant 1 : i32
    %33 = tpu.dynamic_rotate %1 by %c1_i32 dim 1 : vector<8x4096xf32>, i32 -> vector<8x4096xf32>
    %c24 = arith.constant 24 : index
    %c0_33 = arith.constant 0 : index
    %34 = vector.load %arg2[%c24, %c0_33] : memref<72x4096xf32, #tpu.memory_space<vmem>>, vector<8x4096xf32>
    %35 = arith.mulf %33, %34 : vector<8x4096xf32>
    %c256_i32_34 = arith.constant 256 : i32
    %36 = tpu.dynamic_rotate %35 by %c256_i32_34 dim 1 : vector<8x4096xf32>, i32 -> vector<8x4096xf32>
    %c24_35 = arith.constant 24 : index
    %c0_36 = arith.constant 0 : index
    %37 = vector.load %arg8[%c24_35, %c0_36] : memref<216x4096xf32, #tpu.memory_space<vmem>>, vector<8x4096xf32>
    tpu.vector_store %arg8[%c24_35, %c0_36], %36 {strides = array<i32>} : memref<216x4096xf32, #tpu.memory_space<vmem>>, vector<8x4096xf32>,
    %c24_37 = arith.constant 24 : index
    %c0_38 = arith.constant 0 : index
    %38 = vector.load %arg8[%c24_37, %c0_38] : memref<216x4096xf32, #tpu.memory_space<vmem>>, vector<8x256xf32>
    tpu.vector_store %arg8[%c24_37, %c0_38], %2 {strides = array<i32>} : memref<216x4096xf32, #tpu.memory_space<vmem>>, vector<8x256xf32>,
    %c96 = arith.constant 96 : index
    %c0_39 = arith.constant 0 : index
    %39 = vector.load %arg8[%c96, %c0_39] : memref<216x4096xf32, #tpu.memory_space<vmem>>, vector<8x4096xf32>
    tpu.vector_store %arg8[%c96, %c0_39], %35 {strides = array<i32>} : memref<216x4096xf32, #tpu.memory_space<vmem>>, vector<8x4096xf32>,
    %c3840_i32_40 = arith.constant 3840 : i32
    %40 = tpu.dynamic_rotate %35 by %c3840_i32_40 dim 1 : vector<8x4096xf32>, i32 -> vector<8x4096xf32>
    %c168 = arith.constant 168 : index
    %c0_41 = arith.constant 0 : index
    %41 = vector.load %arg8[%c168, %c0_41] : memref<216x4096xf32, #tpu.memory_space<vmem>>, vector<8x4096xf32>
    tpu.vector_store %arg8[%c168, %c0_41], %40 {strides = array<i32>} : memref<216x4096xf32, #tpu.memory_space<vmem>>, vector<8x4096xf32>,
    %c168_42 = arith.constant 168 : index
    %c3840_43 = arith.constant 3840 : index
    %42 = vector.load %arg8[%c168_42, %c3840_43] : memref<216x4096xf32, #tpu.memory_space<vmem>>, vector<8x256xf32>
    tpu.vector_store %arg8[%c168_42, %c3840_43], %2 {strides = array<i32>} : memref<216x4096xf32, #tpu.memory_space<vmem>>, vector<8x256xf32>,
    %c256_i32_44 = arith.constant 256 : i32
    %43 = tpu.dynamic_rotate %1 by %c256_i32_44 dim 1 : vector<8x4096xf32>, i32 -> vector<8x4096xf32>
    %c32 = arith.constant 32 : index
    %c0_45 = arith.constant 0 : index
    %44 = vector.load %arg8[%c32, %c0_45] : memref<216x4096xf32, #tpu.memory_space<vmem>>, vector<8x4096xf32>
    tpu.vector_store %arg8[%c32, %c0_45], %43 {strides = array<i32>} : memref<216x4096xf32, #tpu.memory_space<vmem>>, vector<8x4096xf32>,
    %c32_46 = arith.constant 32 : index
    %c0_47 = arith.constant 0 : index
    %45 = vector.load %arg8[%c32_46, %c0_47] : memref<216x4096xf32, #tpu.memory_space<vmem>>, vector<8x256xf32>
    tpu.vector_store %arg8[%c32_46, %c0_47], %2 {strides = array<i32>} : memref<216x4096xf32, #tpu.memory_space<vmem>>, vector<8x256xf32>,
    %c104 = arith.constant 104 : index
    %c0_48 = arith.constant 0 : index
    %46 = vector.load %arg8[%c104, %c0_48] : memref<216x4096xf32, #tpu.memory_space<vmem>>, vector<8x4096xf32>
    tpu.vector_store %arg8[%c104, %c0_48], %1 {strides = array<i32>} : memref<216x4096xf32, #tpu.memory_space<vmem>>, vector<8x4096xf32>,
    %c3840_i32_49 = arith.constant 3840 : i32
    %47 = tpu.dynamic_rotate %1 by %c3840_i32_49 dim 1 : vector<8x4096xf32>, i32 -> vector<8x4096xf32>
    %c176 = arith.constant 176 : index
    %c0_50 = arith.constant 0 : index
    %48 = vector.load %arg8[%c176, %c0_50] : memref<216x4096xf32, #tpu.memory_space<vmem>>, vector<8x4096xf32>
    tpu.vector_store %arg8[%c176, %c0_50], %47 {strides = array<i32>} : memref<216x4096xf32, #tpu.memory_space<vmem>>, vector<8x4096xf32>,
    %c176_51 = arith.constant 176 : index
    %c3840_52 = arith.constant 3840 : index
    %49 = vector.load %arg8[%c176_51, %c3840_52] : memref<216x4096xf32, #tpu.memory_space<vmem>>, vector<8x256xf32>
    tpu.vector_store %arg8[%c176_51, %c3840_52], %2 {strides = array<i32>} : memref<216x4096xf32, #tpu.memory_space<vmem>>, vector<8x256xf32>,
    %c4095_i32 = arith.constant 4095 : i32
    %50 = tpu.dynamic_rotate %1 by %c4095_i32 dim 1 : vector<8x4096xf32>, i32 -> vector<8x4096xf32>
    %c40 = arith.constant 40 : index
    %c0_53 = arith.constant 0 : index
    %51 = vector.load %arg2[%c40, %c0_53] : memref<72x4096xf32, #tpu.memory_space<vmem>>, vector<8x4096xf32>
    %52 = arith.mulf %50, %51 : vector<8x4096xf32>
    %c256_i32_54 = arith.constant 256 : i32
    %53 = tpu.dynamic_rotate %52 by %c256_i32_54 dim 1 : vector<8x4096xf32>, i32 -> vector<8x4096xf32>
    %c40_55 = arith.constant 40 : index
    %c0_56 = arith.constant 0 : index
    %54 = vector.load %arg8[%c40_55, %c0_56] : memref<216x4096xf32, #tpu.memory_space<vmem>>, vector<8x4096xf32>
    tpu.vector_store %arg8[%c40_55, %c0_56], %53 {strides = array<i32>} : memref<216x4096xf32, #tpu.memory_space<vmem>>, vector<8x4096xf32>,
    %c40_57 = arith.constant 40 : index
    %c0_58 = arith.constant 0 : index
    %55 = vector.load %arg8[%c40_57, %c0_58] : memref<216x4096xf32, #tpu.memory_space<vmem>>, vector<8x256xf32>
    tpu.vector_store %arg8[%c40_57, %c0_58], %2 {strides = array<i32>} : memref<216x4096xf32, #tpu.memory_space<vmem>>, vector<8x256xf32>,
    %c112 = arith.constant 112 : index
    %c0_59 = arith.constant 0 : index
    %56 = vector.load %arg8[%c112, %c0_59] : memref<216x4096xf32, #tpu.memory_space<vmem>>, vector<8x4096xf32>
    tpu.vector_store %arg8[%c112, %c0_59], %52 {strides = array<i32>} : memref<216x4096xf32, #tpu.memory_space<vmem>>, vector<8x4096xf32>,
    %c3840_i32_60 = arith.constant 3840 : i32
    %57 = tpu.dynamic_rotate %52 by %c3840_i32_60 dim 1 : vector<8x4096xf32>, i32 -> vector<8x4096xf32>
    %c184 = arith.constant 184 : index
    %c0_61 = arith.constant 0 : index
    %58 = vector.load %arg8[%c184, %c0_61] : memref<216x4096xf32, #tpu.memory_space<vmem>>, vector<8x4096xf32>
    tpu.vector_store %arg8[%c184, %c0_61], %57 {strides = array<i32>} : memref<216x4096xf32, #tpu.memory_space<vmem>>, vector<8x4096xf32>,
    %c184_62 = arith.constant 184 : index
    %c3840_63 = arith.constant 3840 : index
    %59 = vector.load %arg8[%c184_62, %c3840_63] : memref<216x4096xf32, #tpu.memory_space<vmem>>, vector<8x256xf32>
    tpu.vector_store %arg8[%c184_62, %c3840_63], %2 {strides = array<i32>} : memref<216x4096xf32, #tpu.memory_space<vmem>>, vector<8x256xf32>,
    %c4081_i32 = arith.constant 4081 : i32
    %60 = tpu.dynamic_rotate %1 by %c4081_i32 dim 1 : vector<8x4096xf32>, i32 -> vector<8x4096xf32>
    %c48 = arith.constant 48 : index
    %c0_64 = arith.constant 0 : index
    %61 = vector.load %arg2[%c48, %c0_64] : memref<72x4096xf32, #tpu.memory_space<vmem>>, vector<8x4096xf32>
    %62 = arith.mulf %60, %61 : vector<8x4096xf32>
    %c256_i32_65 = arith.constant 256 : i32
    %63 = tpu.dynamic_rotate %62 by %c256_i32_65 dim 1 : vector<8x4096xf32>, i32 -> vector<8x4096xf32>
    %c48_66 = arith.constant 48 : index
    %c0_67 = arith.constant 0 : index
    %64 = vector.load %arg8[%c48_66, %c0_67] : memref<216x4096xf32, #tpu.memory_space<vmem>>, vector<8x4096xf32>
    tpu.vector_store %arg8[%c48_66, %c0_67], %63 {strides = array<i32>} : memref<216x4096xf32, #tpu.memory_space<vmem>>, vector<8x4096xf32>,
    %c48_68 = arith.constant 48 : index
    %c0_69 = arith.constant 0 : index
    %65 = vector.load %arg8[%c48_68, %c0_69] : memref<216x4096xf32, #tpu.memory_space<vmem>>, vector<8x256xf32>
    tpu.vector_store %arg8[%c48_68, %c0_69], %2 {strides = array<i32>} : memref<216x4096xf32, #tpu.memory_space<vmem>>, vector<8x256xf32>,
    %c120 = arith.constant 120 : index
    %c0_70 = arith.constant 0 : index
    %66 = vector.load %arg8[%c120, %c0_70] : memref<216x4096xf32, #tpu.memory_space<vmem>>, vector<8x4096xf32>
    tpu.vector_store %arg8[%c120, %c0_70], %62 {strides = array<i32>} : memref<216x4096xf32, #tpu.memory_space<vmem>>, vector<8x4096xf32>,
    %c3840_i32_71 = arith.constant 3840 : i32
    %67 = tpu.dynamic_rotate %62 by %c3840_i32_71 dim 1 : vector<8x4096xf32>, i32 -> vector<8x4096xf32>
    %c192 = arith.constant 192 : index
    %c0_72 = arith.constant 0 : index
    %68 = vector.load %arg8[%c192, %c0_72] : memref<216x4096xf32, #tpu.memory_space<vmem>>, vector<8x4096xf32>
    tpu.vector_store %arg8[%c192, %c0_72], %67 {strides = array<i32>} : memref<216x4096xf32, #tpu.memory_space<vmem>>, vector<8x4096xf32>,
    %c192_73 = arith.constant 192 : index
    %c3840_74 = arith.constant 3840 : index
    %69 = vector.load %arg8[%c192_73, %c3840_74] : memref<216x4096xf32, #tpu.memory_space<vmem>>, vector<8x256xf32>
    tpu.vector_store %arg8[%c192_73, %c3840_74], %2 {strides = array<i32>} : memref<216x4096xf32, #tpu.memory_space<vmem>>, vector<8x256xf32>,
    %c4080_i32 = arith.constant 4080 : i32
    %70 = tpu.dynamic_rotate %1 by %c4080_i32 dim 1 : vector<8x4096xf32>, i32 -> vector<8x4096xf32>
    %c56 = arith.constant 56 : index
    %c0_75 = arith.constant 0 : index
    %71 = vector.load %arg2[%c56, %c0_75] : memref<72x4096xf32, #tpu.memory_space<vmem>>, vector<8x4096xf32>
    %72 = arith.mulf %70, %71 : vector<8x4096xf32>
    %c256_i32_76 = arith.constant 256 : i32
    %73 = tpu.dynamic_rotate %72 by %c256_i32_76 dim 1 : vector<8x4096xf32>, i32 -> vector<8x4096xf32>
    %c56_77 = arith.constant 56 : index
    %c0_78 = arith.constant 0 : index
    %74 = vector.load %arg8[%c56_77, %c0_78] : memref<216x4096xf32, #tpu.memory_space<vmem>>, vector<8x4096xf32>
    tpu.vector_store %arg8[%c56_77, %c0_78], %73 {strides = array<i32>} : memref<216x4096xf32, #tpu.memory_space<vmem>>, vector<8x4096xf32>,
    %c56_79 = arith.constant 56 : index
    %c0_80 = arith.constant 0 : index
    %75 = vector.load %arg8[%c56_79, %c0_80] : memref<216x4096xf32, #tpu.memory_space<vmem>>, vector<8x256xf32>
    tpu.vector_store %arg8[%c56_79, %c0_80], %2 {strides = array<i32>} : memref<216x4096xf32, #tpu.memory_space<vmem>>, vector<8x256xf32>,
    %c128 = arith.constant 128 : index
    %c0_81 = arith.constant 0 : index
    %76 = vector.load %arg8[%c128, %c0_81] : memref<216x4096xf32, #tpu.memory_space<vmem>>, vector<8x4096xf32>
    tpu.vector_store %arg8[%c128, %c0_81], %72 {strides = array<i32>} : memref<216x4096xf32, #tpu.memory_space<vmem>>, vector<8x4096xf32>,
    %c3840_i32_82 = arith.constant 3840 : i32
    %77 = tpu.dynamic_rotate %72 by %c3840_i32_82 dim 1 : vector<8x4096xf32>, i32 -> vector<8x4096xf32>
    %c200 = arith.constant 200 : index
    %c0_83 = arith.constant 0 : index
    %78 = vector.load %arg8[%c200, %c0_83] : memref<216x4096xf32, #tpu.memory_space<vmem>>, vector<8x4096xf32>
    tpu.vector_store %arg8[%c200, %c0_83], %77 {strides = array<i32>} : memref<216x4096xf32, #tpu.memory_space<vmem>>, vector<8x4096xf32>,
    %c200_84 = arith.constant 200 : index
    %c3840_85 = arith.constant 3840 : index
    %79 = vector.load %arg8[%c200_84, %c3840_85] : memref<216x4096xf32, #tpu.memory_space<vmem>>, vector<8x256xf32>
    tpu.vector_store %arg8[%c200_84, %c3840_85], %2 {strides = array<i32>} : memref<216x4096xf32, #tpu.memory_space<vmem>>, vector<8x256xf32>,
    %c4079_i32 = arith.constant 4079 : i32
    %80 = tpu.dynamic_rotate %1 by %c4079_i32 dim 1 : vector<8x4096xf32>, i32 -> vector<8x4096xf32>
    %c64 = arith.constant 64 : index
    %c0_86 = arith.constant 0 : index
    %81 = vector.load %arg2[%c64, %c0_86] : memref<72x4096xf32, #tpu.memory_space<vmem>>, vector<8x4096xf32>
    %82 = arith.mulf %80, %81 : vector<8x4096xf32>
    %c256_i32_87 = arith.constant 256 : i32
    %83 = tpu.dynamic_rotate %82 by %c256_i32_87 dim 1 : vector<8x4096xf32>, i32 -> vector<8x4096xf32>
    %c64_88 = arith.constant 64 : index
    %c0_89 = arith.constant 0 : index
    %84 = vector.load %arg8[%c64_88, %c0_89] : memref<216x4096xf32, #tpu.memory_space<vmem>>, vector<8x4096xf32>
    tpu.vector_store %arg8[%c64_88, %c0_89], %83 {strides = array<i32>} : memref<216x4096xf32, #tpu.memory_space<vmem>>, vector<8x4096xf32>,
    %c64_90 = arith.constant 64 : index
    %c0_91 = arith.constant 0 : index
    %85 = vector.load %arg8[%c64_90, %c0_91] : memref<216x4096xf32, #tpu.memory_space<vmem>>, vector<8x256xf32>
    tpu.vector_store %arg8[%c64_90, %c0_91], %2 {strides = array<i32>} : memref<216x4096xf32, #tpu.memory_space<vmem>>, vector<8x256xf32>,
    %c136 = arith.constant 136 : index
    %c0_92 = arith.constant 0 : index
    %86 = vector.load %arg8[%c136, %c0_92] : memref<216x4096xf32, #tpu.memory_space<vmem>>, vector<8x4096xf32>
    tpu.vector_store %arg8[%c136, %c0_92], %82 {strides = array<i32>} : memref<216x4096xf32, #tpu.memory_space<vmem>>, vector<8x4096xf32>,
    %c3840_i32_93 = arith.constant 3840 : i32
    %87 = tpu.dynamic_rotate %82 by %c3840_i32_93 dim 1 : vector<8x4096xf32>, i32 -> vector<8x4096xf32>
    %c208 = arith.constant 208 : index
    %c0_94 = arith.constant 0 : index
    %88 = vector.load %arg8[%c208, %c0_94] : memref<216x4096xf32, #tpu.memory_space<vmem>>, vector<8x4096xf32>
    tpu.vector_store %arg8[%c208, %c0_94], %87 {strides = array<i32>} : memref<216x4096xf32, #tpu.memory_space<vmem>>, vector<8x4096xf32>,
    %c208_95 = arith.constant 208 : index
    %c3840_96 = arith.constant 3840 : index
    %89 = vector.load %arg8[%c208_95, %c3840_96] : memref<216x4096xf32, #tpu.memory_space<vmem>>, vector<8x256xf32>
    tpu.vector_store %arg8[%c208_95, %c3840_96], %2 {strides = array<i32>} : memref<216x4096xf32, #tpu.memory_space<vmem>>, vector<8x256xf32>,
    %c0_97 = arith.constant 0 : index
    %c0_98 = arith.constant 0 : index
    %90 = vector.load %arg3[%c0_97, %c0_98] : memref<8x216xf32, #tpu.memory_space<vmem>>, vector<8x216xf32>
    %c0_99 = arith.constant 0 : index
    %c0_100 = arith.constant 0 : index
    %91 = vector.load %arg8[%c0_99, %c0_100] : memref<216x4096xf32, #tpu.memory_space<vmem>>, vector<216x4096xf32>
    %cst_101 = arith.constant dense<0.000000e+00> : vector<8x4096xf32>
    %92 = tpu.matmul %90, %91, %cst_101 {dimension_numbers = #tpu.dot_dimension_numbers<[1], [0], [0], [1], [0, 0, 1, 1], [], []>} : vector<8x216xf32>, vector<216x4096xf32>, vector<8x4096xf32> -> vector<8x4096xf32>
    %c0_102 = arith.constant 0 : index
    %c0_103 = arith.constant 0 : index
    %93 = vector.load %arg5[%c0_102, %c0_103] : memref<8x1xf32, #tpu.memory_space<vmem>>, vector<8x1xf32>
    %94 = vector.broadcast %93 : vector<8x1xf32> to vector<8x4096xf32>
    %95 = arith.addf %92, %94 : vector<8x4096xf32>
    %cst_104 = arith.constant 0.000000e+00 : f32
    %96 = vector.broadcast %cst_104 : f32 to vector<8x4096xf32>
    %97 = arith.maximumf %95, %96 : vector<8x4096xf32>
    %c17_i32_105 = arith.constant 17 : i32
    %98 = tpu.dynamic_rotate %97 by %c17_i32_105 dim 1 : vector<8x4096xf32>, i32 -> vector<8x4096xf32>
    %c0_106 = arith.constant 0 : index
    %c0_107 = arith.constant 0 : index
    %99 = vector.load %arg2[%c0_106, %c0_107] : memref<72x4096xf32, #tpu.memory_space<vmem>>, vector<8x4096xf32>
    %100 = arith.mulf %98, %99 : vector<8x4096xf32>
    %c256_i32_108 = arith.constant 256 : i32
    %101 = tpu.dynamic_rotate %100 by %c256_i32_108 dim 1 : vector<8x4096xf32>, i32 -> vector<8x4096xf32>
    %c0_109 = arith.constant 0 : index
    %c0_110 = arith.constant 0 : index
    %102 = vector.load %arg8[%c0_109, %c0_110] : memref<216x4096xf32, #tpu.memory_space<vmem>>, vector<8x4096xf32>
    tpu.vector_store %arg8[%c0_109, %c0_110], %101 {strides = array<i32>} : memref<216x4096xf32, #tpu.memory_space<vmem>>, vector<8x4096xf32>,
    %c0_111 = arith.constant 0 : index
    %c0_112 = arith.constant 0 : index
    %103 = vector.load %arg8[%c0_111, %c0_112] : memref<216x4096xf32, #tpu.memory_space<vmem>>, vector<8x256xf32>
    tpu.vector_store %arg8[%c0_111, %c0_112], %2 {strides = array<i32>} : memref<216x4096xf32, #tpu.memory_space<vmem>>, vector<8x256xf32>,
    %c72_113 = arith.constant 72 : index
    %c0_114 = arith.constant 0 : index
    %104 = vector.load %arg8[%c72_113, %c0_114] : memref<216x4096xf32, #tpu.memory_space<vmem>>, vector<8x4096xf32>
    tpu.vector_store %arg8[%c72_113, %c0_114], %100 {strides = array<i32>} : memref<216x4096xf32, #tpu.memory_space<vmem>>, vector<8x4096xf32>,
    %c3840_i32_115 = arith.constant 3840 : i32
    %105 = tpu.dynamic_rotate %100 by %c3840_i32_115 dim 1 : vector<8x4096xf32>, i32 -> vector<8x4096xf32>
    %c144_116 = arith.constant 144 : index
    %c0_117 = arith.constant 0 : index
    %106 = vector.load %arg8[%c144_116, %c0_117] : memref<216x4096xf32, #tpu.memory_space<vmem>>, vector<8x4096xf32>
    tpu.vector_store %arg8[%c144_116, %c0_117], %105 {strides = array<i32>} : memref<216x4096xf32, #tpu.memory_space<vmem>>, vector<8x4096xf32>,
    %c144_118 = arith.constant 144 : index
    %c3840_119 = arith.constant 3840 : index
    %107 = vector.load %arg8[%c144_118, %c3840_119] : memref<216x4096xf32, #tpu.memory_space<vmem>>, vector<8x256xf32>
    tpu.vector_store %arg8[%c144_118, %c3840_119], %2 {strides = array<i32>} : memref<216x4096xf32, #tpu.memory_space<vmem>>, vector<8x256xf32>,
    %c16_i32_120 = arith.constant 16 : i32
    %108 = tpu.dynamic_rotate %97 by %c16_i32_120 dim 1 : vector<8x4096xf32>, i32 -> vector<8x4096xf32>
    %c8_121 = arith.constant 8 : index
    %c0_122 = arith.constant 0 : index
    %109 = vector.load %arg2[%c8_121, %c0_122] : memref<72x4096xf32, #tpu.memory_space<vmem>>, vector<8x4096xf32>
    %110 = arith.mulf %108, %109 : vector<8x4096xf32>
    %c256_i32_123 = arith.constant 256 : i32
    %111 = tpu.dynamic_rotate %110 by %c256_i32_123 dim 1 : vector<8x4096xf32>, i32 -> vector<8x4096xf32>
    %c8_124 = arith.constant 8 : index
    %c0_125 = arith.constant 0 : index
    %112 = vector.load %arg8[%c8_124, %c0_125] : memref<216x4096xf32, #tpu.memory_space<vmem>>, vector<8x4096xf32>
    tpu.vector_store %arg8[%c8_124, %c0_125], %111 {strides = array<i32>} : memref<216x4096xf32, #tpu.memory_space<vmem>>, vector<8x4096xf32>,
    %c8_126 = arith.constant 8 : index
    %c0_127 = arith.constant 0 : index
    %113 = vector.load %arg8[%c8_126, %c0_127] : memref<216x4096xf32, #tpu.memory_space<vmem>>, vector<8x256xf32>
    tpu.vector_store %arg8[%c8_126, %c0_127], %2 {strides = array<i32>} : memref<216x4096xf32, #tpu.memory_space<vmem>>, vector<8x256xf32>,
    %c80_128 = arith.constant 80 : index
    %c0_129 = arith.constant 0 : index
    %114 = vector.load %arg8[%c80_128, %c0_129] : memref<216x4096xf32, #tpu.memory_space<vmem>>, vector<8x4096xf32>
    tpu.vector_store %arg8[%c80_128, %c0_129], %110 {strides = array<i32>} : memref<216x4096xf32, #tpu.memory_space<vmem>>, vector<8x4096xf32>,
    %c3840_i32_130 = arith.constant 3840 : i32
    %115 = tpu.dynamic_rotate %110 by %c3840_i32_130 dim 1 : vector<8x4096xf32>, i32 -> vector<8x4096xf32>
    %c152_131 = arith.constant 152 : index
    %c0_132 = arith.constant 0 : index
    %116 = vector.load %arg8[%c152_131, %c0_132] : memref<216x4096xf32, #tpu.memory_space<vmem>>, vector<8x4096xf32>
    tpu.vector_store %arg8[%c152_131, %c0_132], %115 {strides = array<i32>} : memref<216x4096xf32, #tpu.memory_space<vmem>>, vector<8x4096xf32>,
    %c152_133 = arith.constant 152 : index
    %c3840_134 = arith.constant 3840 : index
    %117 = vector.load %arg8[%c152_133, %c3840_134] : memref<216x4096xf32, #tpu.memory_space<vmem>>, vector<8x256xf32>
    tpu.vector_store %arg8[%c152_133, %c3840_134], %2 {strides = array<i32>} : memref<216x4096xf32, #tpu.memory_space<vmem>>, vector<8x256xf32>,
    %c15_i32_135 = arith.constant 15 : i32
    %118 = tpu.dynamic_rotate %97 by %c15_i32_135 dim 1 : vector<8x4096xf32>, i32 -> vector<8x4096xf32>
    %c16_136 = arith.constant 16 : index
    %c0_137 = arith.constant 0 : index
    %119 = vector.load %arg2[%c16_136, %c0_137] : memref<72x4096xf32, #tpu.memory_space<vmem>>, vector<8x4096xf32>
    %120 = arith.mulf %118, %119 : vector<8x4096xf32>
    %c256_i32_138 = arith.constant 256 : i32
    %121 = tpu.dynamic_rotate %120 by %c256_i32_138 dim 1 : vector<8x4096xf32>, i32 -> vector<8x4096xf32>
    %c16_139 = arith.constant 16 : index
    %c0_140 = arith.constant 0 : index
    %122 = vector.load %arg8[%c16_139, %c0_140] : memref<216x4096xf32, #tpu.memory_space<vmem>>, vector<8x4096xf32>
    tpu.vector_store %arg8[%c16_139, %c0_140], %121 {strides = array<i32>} : memref<216x4096xf32, #tpu.memory_space<vmem>>, vector<8x4096xf32>,
    %c16_141 = arith.constant 16 : index
    %c0_142 = arith.constant 0 : index
    %123 = vector.load %arg8[%c16_141, %c0_142] : memref<216x4096xf32, #tpu.memory_space<vmem>>, vector<8x256xf32>
    tpu.vector_store %arg8[%c16_141, %c0_142], %2 {strides = array<i32>} : memref<216x4096xf32, #tpu.memory_space<vmem>>, vector<8x256xf32>,
    %c88_143 = arith.constant 88 : index
    %c0_144 = arith.constant 0 : index
    %124 = vector.load %arg8[%c88_143, %c0_144] : memref<216x4096xf32, #tpu.memory_space<vmem>>, vector<8x4096xf32>
    tpu.vector_store %arg8[%c88_143, %c0_144], %120 {strides = array<i32>} : memref<216x4096xf32, #tpu.memory_space<vmem>>, vector<8x4096xf32>,
    %c3840_i32_145 = arith.constant 3840 : i32
    %125 = tpu.dynamic_rotate %120 by %c3840_i32_145 dim 1 : vector<8x4096xf32>, i32 -> vector<8x4096xf32>
    %c160_146 = arith.constant 160 : index
    %c0_147 = arith.constant 0 : index
    %126 = vector.load %arg8[%c160_146, %c0_147] : memref<216x4096xf32, #tpu.memory_space<vmem>>, vector<8x4096xf32>
    tpu.vector_store %arg8[%c160_146, %c0_147], %125 {strides = array<i32>} : memref<216x4096xf32, #tpu.memory_space<vmem>>, vector<8x4096xf32>,
    %c160_148 = arith.constant 160 : index
    %c3840_149 = arith.constant 3840 : index
    %127 = vector.load %arg8[%c160_148, %c3840_149] : memref<216x4096xf32, #tpu.memory_space<vmem>>, vector<8x256xf32>
    tpu.vector_store %arg8[%c160_148, %c3840_149], %2 {strides = array<i32>} : memref<216x4096xf32, #tpu.memory_space<vmem>>, vector<8x256xf32>,
    %c1_i32_150 = arith.constant 1 : i32
    %128 = tpu.dynamic_rotate %97 by %c1_i32_150 dim 1 : vector<8x4096xf32>, i32 -> vector<8x4096xf32>
    %c24_151 = arith.constant 24 : index
    %c0_152 = arith.constant 0 : index
    %129 = vector.load %arg2[%c24_151, %c0_152] : memref<72x4096xf32, #tpu.memory_space<vmem>>, vector<8x4096xf32>
    %130 = arith.mulf %128, %129 : vector<8x4096xf32>
    %c256_i32_153 = arith.constant 256 : i32
    %131 = tpu.dynamic_rotate %130 by %c256_i32_153 dim 1 : vector<8x4096xf32>, i32 -> vector<8x4096xf32>
    %c24_154 = arith.constant 24 : index
    %c0_155 = arith.constant 0 : index
    %132 = vector.load %arg8[%c24_154, %c0_155] : memref<216x4096xf32, #tpu.memory_space<vmem>>, vector<8x4096xf32>
    tpu.vector_store %arg8[%c24_154, %c0_155], %131 {strides = array<i32>} : memref<216x4096xf32, #tpu.memory_space<vmem>>, vector<8x4096xf32>,
    %c24_156 = arith.constant 24 : index
    %c0_157 = arith.constant 0 : index
    %133 = vector.load %arg8[%c24_156, %c0_157] : memref<216x4096xf32, #tpu.memory_space<vmem>>, vector<8x256xf32>
    tpu.vector_store %arg8[%c24_156, %c0_157], %2 {strides = array<i32>} : memref<216x4096xf32, #tpu.memory_space<vmem>>, vector<8x256xf32>,
    %c96_158 = arith.constant 96 : index
    %c0_159 = arith.constant 0 : index
    %134 = vector.load %arg8[%c96_158, %c0_159] : memref<216x4096xf32, #tpu.memory_space<vmem>>, vector<8x4096xf32>
    tpu.vector_store %arg8[%c96_158, %c0_159], %130 {strides = array<i32>} : memref<216x4096xf32, #tpu.memory_space<vmem>>, vector<8x4096xf32>,
    %c3840_i32_160 = arith.constant 3840 : i32
    %135 = tpu.dynamic_rotate %130 by %c3840_i32_160 dim 1 : vector<8x4096xf32>, i32 -> vector<8x4096xf32>
    %c168_161 = arith.constant 168 : index
    %c0_162 = arith.constant 0 : index
    %136 = vector.load %arg8[%c168_161, %c0_162] : memref<216x4096xf32, #tpu.memory_space<vmem>>, vector<8x4096xf32>
    tpu.vector_store %arg8[%c168_161, %c0_162], %135 {strides = array<i32>} : memref<216x4096xf32, #tpu.memory_space<vmem>>, vector<8x4096xf32>,
    %c168_163 = arith.constant 168 : index
    %c3840_164 = arith.constant 3840 : index
    %137 = vector.load %arg8[%c168_163, %c3840_164] : memref<216x4096xf32, #tpu.memory_space<vmem>>, vector<8x256xf32>
    tpu.vector_store %arg8[%c168_163, %c3840_164], %2 {strides = array<i32>} : memref<216x4096xf32, #tpu.memory_space<vmem>>, vector<8x256xf32>,
    %c256_i32_165 = arith.constant 256 : i32
    %138 = tpu.dynamic_rotate %97 by %c256_i32_165 dim 1 : vector<8x4096xf32>, i32 -> vector<8x4096xf32>
    %c32_166 = arith.constant 32 : index
    %c0_167 = arith.constant 0 : index
    %139 = vector.load %arg8[%c32_166, %c0_167] : memref<216x4096xf32, #tpu.memory_space<vmem>>, vector<8x4096xf32>
    tpu.vector_store %arg8[%c32_166, %c0_167], %138 {strides = array<i32>} : memref<216x4096xf32, #tpu.memory_space<vmem>>, vector<8x4096xf32>,
    %c32_168 = arith.constant 32 : index
    %c0_169 = arith.constant 0 : index
    %140 = vector.load %arg8[%c32_168, %c0_169] : memref<216x4096xf32, #tpu.memory_space<vmem>>, vector<8x256xf32>
    tpu.vector_store %arg8[%c32_168, %c0_169], %2 {strides = array<i32>} : memref<216x4096xf32, #tpu.memory_space<vmem>>, vector<8x256xf32>,
    %c104_170 = arith.constant 104 : index
    %c0_171 = arith.constant 0 : index
    %141 = vector.load %arg8[%c104_170, %c0_171] : memref<216x4096xf32, #tpu.memory_space<vmem>>, vector<8x4096xf32>
    tpu.vector_store %arg8[%c104_170, %c0_171], %97 {strides = array<i32>} : memref<216x4096xf32, #tpu.memory_space<vmem>>, vector<8x4096xf32>,
    %c3840_i32_172 = arith.constant 3840 : i32
    %142 = tpu.dynamic_rotate %97 by %c3840_i32_172 dim 1 : vector<8x4096xf32>, i32 -> vector<8x4096xf32>
    %c176_173 = arith.constant 176 : index
    %c0_174 = arith.constant 0 : index
    %143 = vector.load %arg8[%c176_173, %c0_174] : memref<216x4096xf32, #tpu.memory_space<vmem>>, vector<8x4096xf32>
    tpu.vector_store %arg8[%c176_173, %c0_174], %142 {strides = array<i32>} : memref<216x4096xf32, #tpu.memory_space<vmem>>, vector<8x4096xf32>,
    %c176_175 = arith.constant 176 : index
    %c3840_176 = arith.constant 3840 : index
    %144 = vector.load %arg8[%c176_175, %c3840_176] : memref<216x4096xf32, #tpu.memory_space<vmem>>, vector<8x256xf32>
    tpu.vector_store %arg8[%c176_175, %c3840_176], %2 {strides = array<i32>} : memref<216x4096xf32, #tpu.memory_space<vmem>>, vector<8x256xf32>,
    %c4095_i32_177 = arith.constant 4095 : i32
    %145 = tpu.dynamic_rotate %97 by %c4095_i32_177 dim 1 : vector<8x4096xf32>, i32 -> vector<8x4096xf32>
    %c40_178 = arith.constant 40 : index
    %c0_179 = arith.constant 0 : index
    %146 = vector.load %arg2[%c40_178, %c0_179] : memref<72x4096xf32, #tpu.memory_space<vmem>>, vector<8x4096xf32>
    %147 = arith.mulf %145, %146 : vector<8x4096xf32>
    %c256_i32_180 = arith.constant 256 : i32
    %148 = tpu.dynamic_rotate %147 by %c256_i32_180 dim 1 : vector<8x4096xf32>, i32 -> vector<8x4096xf32>
    %c40_181 = arith.constant 40 : index
    %c0_182 = arith.constant 0 : index
    %149 = vector.load %arg8[%c40_181, %c0_182] : memref<216x4096xf32, #tpu.memory_space<vmem>>, vector<8x4096xf32>
    tpu.vector_store %arg8[%c40_181, %c0_182], %148 {strides = array<i32>} : memref<216x4096xf32, #tpu.memory_space<vmem>>, vector<8x4096xf32>,
    %c40_183 = arith.constant 40 : index
    %c0_184 = arith.constant 0 : index
    %150 = vector.load %arg8[%c40_183, %c0_184] : memref<216x4096xf32, #tpu.memory_space<vmem>>, vector<8x256xf32>
    tpu.vector_store %arg8[%c40_183, %c0_184], %2 {strides = array<i32>} : memref<216x4096xf32, #tpu.memory_space<vmem>>, vector<8x256xf32>,
    %c112_185 = arith.constant 112 : index
    %c0_186 = arith.constant 0 : index
    %151 = vector.load %arg8[%c112_185, %c0_186] : memref<216x4096xf32, #tpu.memory_space<vmem>>, vector<8x4096xf32>
    tpu.vector_store %arg8[%c112_185, %c0_186], %147 {strides = array<i32>} : memref<216x4096xf32, #tpu.memory_space<vmem>>, vector<8x4096xf32>,
    %c3840_i32_187 = arith.constant 3840 : i32
    %152 = tpu.dynamic_rotate %147 by %c3840_i32_187 dim 1 : vector<8x4096xf32>, i32 -> vector<8x4096xf32>
    %c184_188 = arith.constant 184 : index
    %c0_189 = arith.constant 0 : index
    %153 = vector.load %arg8[%c184_188, %c0_189] : memref<216x4096xf32, #tpu.memory_space<vmem>>, vector<8x4096xf32>
    tpu.vector_store %arg8[%c184_188, %c0_189], %152 {strides = array<i32>} : memref<216x4096xf32, #tpu.memory_space<vmem>>, vector<8x4096xf32>,
    %c184_190 = arith.constant 184 : index
    %c3840_191 = arith.constant 3840 : index
    %154 = vector.load %arg8[%c184_190, %c3840_191] : memref<216x4096xf32, #tpu.memory_space<vmem>>, vector<8x256xf32>
    tpu.vector_store %arg8[%c184_190, %c3840_191], %2 {strides = array<i32>} : memref<216x4096xf32, #tpu.memory_space<vmem>>, vector<8x256xf32>,
    %c4081_i32_192 = arith.constant 4081 : i32
    %155 = tpu.dynamic_rotate %97 by %c4081_i32_192 dim 1 : vector<8x4096xf32>, i32 -> vector<8x4096xf32>
    %c48_193 = arith.constant 48 : index
    %c0_194 = arith.constant 0 : index
    %156 = vector.load %arg2[%c48_193, %c0_194] : memref<72x4096xf32, #tpu.memory_space<vmem>>, vector<8x4096xf32>
    %157 = arith.mulf %155, %156 : vector<8x4096xf32>
    %c256_i32_195 = arith.constant 256 : i32
    %158 = tpu.dynamic_rotate %157 by %c256_i32_195 dim 1 : vector<8x4096xf32>, i32 -> vector<8x4096xf32>
    %c48_196 = arith.constant 48 : index
    %c0_197 = arith.constant 0 : index
    %159 = vector.load %arg8[%c48_196, %c0_197] : memref<216x4096xf32, #tpu.memory_space<vmem>>, vector<8x4096xf32>
    tpu.vector_store %arg8[%c48_196, %c0_197], %158 {strides = array<i32>} : memref<216x4096xf32, #tpu.memory_space<vmem>>, vector<8x4096xf32>,
    %c48_198 = arith.constant 48 : index
    %c0_199 = arith.constant 0 : index
    %160 = vector.load %arg8[%c48_198, %c0_199] : memref<216x4096xf32, #tpu.memory_space<vmem>>, vector<8x256xf32>
    tpu.vector_store %arg8[%c48_198, %c0_199], %2 {strides = array<i32>} : memref<216x4096xf32, #tpu.memory_space<vmem>>, vector<8x256xf32>,
    %c120_200 = arith.constant 120 : index
    %c0_201 = arith.constant 0 : index
    %161 = vector.load %arg8[%c120_200, %c0_201] : memref<216x4096xf32, #tpu.memory_space<vmem>>, vector<8x4096xf32>
    tpu.vector_store %arg8[%c120_200, %c0_201], %157 {strides = array<i32>} : memref<216x4096xf32, #tpu.memory_space<vmem>>, vector<8x4096xf32>,
    %c3840_i32_202 = arith.constant 3840 : i32
    %162 = tpu.dynamic_rotate %157 by %c3840_i32_202 dim 1 : vector<8x4096xf32>, i32 -> vector<8x4096xf32>
    %c192_203 = arith.constant 192 : index
    %c0_204 = arith.constant 0 : index
    %163 = vector.load %arg8[%c192_203, %c0_204] : memref<216x4096xf32, #tpu.memory_space<vmem>>, vector<8x4096xf32>
    tpu.vector_store %arg8[%c192_203, %c0_204], %162 {strides = array<i32>} : memref<216x4096xf32, #tpu.memory_space<vmem>>, vector<8x4096xf32>,
    %c192_205 = arith.constant 192 : index
    %c3840_206 = arith.constant 3840 : index
    %164 = vector.load %arg8[%c192_205, %c3840_206] : memref<216x4096xf32, #tpu.memory_space<vmem>>, vector<8x256xf32>
    tpu.vector_store %arg8[%c192_205, %c3840_206], %2 {strides = array<i32>} : memref<216x4096xf32, #tpu.memory_space<vmem>>, vector<8x256xf32>,
    %c4080_i32_207 = arith.constant 4080 : i32
    %165 = tpu.dynamic_rotate %97 by %c4080_i32_207 dim 1 : vector<8x4096xf32>, i32 -> vector<8x4096xf32>
    %c56_208 = arith.constant 56 : index
    %c0_209 = arith.constant 0 : index
    %166 = vector.load %arg2[%c56_208, %c0_209] : memref<72x4096xf32, #tpu.memory_space<vmem>>, vector<8x4096xf32>
    %167 = arith.mulf %165, %166 : vector<8x4096xf32>
    %c256_i32_210 = arith.constant 256 : i32
    %168 = tpu.dynamic_rotate %167 by %c256_i32_210 dim 1 : vector<8x4096xf32>, i32 -> vector<8x4096xf32>
    %c56_211 = arith.constant 56 : index
    %c0_212 = arith.constant 0 : index
    %169 = vector.load %arg8[%c56_211, %c0_212] : memref<216x4096xf32, #tpu.memory_space<vmem>>, vector<8x4096xf32>
    tpu.vector_store %arg8[%c56_211, %c0_212], %168 {strides = array<i32>} : memref<216x4096xf32, #tpu.memory_space<vmem>>, vector<8x4096xf32>,
    %c56_213 = arith.constant 56 : index
    %c0_214 = arith.constant 0 : index
    %170 = vector.load %arg8[%c56_213, %c0_214] : memref<216x4096xf32, #tpu.memory_space<vmem>>, vector<8x256xf32>
    tpu.vector_store %arg8[%c56_213, %c0_214], %2 {strides = array<i32>} : memref<216x4096xf32, #tpu.memory_space<vmem>>, vector<8x256xf32>,
    %c128_215 = arith.constant 128 : index
    %c0_216 = arith.constant 0 : index
    %171 = vector.load %arg8[%c128_215, %c0_216] : memref<216x4096xf32, #tpu.memory_space<vmem>>, vector<8x4096xf32>
    tpu.vector_store %arg8[%c128_215, %c0_216], %167 {strides = array<i32>} : memref<216x4096xf32, #tpu.memory_space<vmem>>, vector<8x4096xf32>,
    %c3840_i32_217 = arith.constant 3840 : i32
    %172 = tpu.dynamic_rotate %167 by %c3840_i32_217 dim 1 : vector<8x4096xf32>, i32 -> vector<8x4096xf32>
    %c200_218 = arith.constant 200 : index
    %c0_219 = arith.constant 0 : index
    %173 = vector.load %arg8[%c200_218, %c0_219] : memref<216x4096xf32, #tpu.memory_space<vmem>>, vector<8x4096xf32>
    tpu.vector_store %arg8[%c200_218, %c0_219], %172 {strides = array<i32>} : memref<216x4096xf32, #tpu.memory_space<vmem>>, vector<8x4096xf32>,
    %c200_220 = arith.constant 200 : index
    %c3840_221 = arith.constant 3840 : index
    %174 = vector.load %arg8[%c200_220, %c3840_221] : memref<216x4096xf32, #tpu.memory_space<vmem>>, vector<8x256xf32>
    tpu.vector_store %arg8[%c200_220, %c3840_221], %2 {strides = array<i32>} : memref<216x4096xf32, #tpu.memory_space<vmem>>, vector<8x256xf32>,
    %c4079_i32_222 = arith.constant 4079 : i32
    %175 = tpu.dynamic_rotate %97 by %c4079_i32_222 dim 1 : vector<8x4096xf32>, i32 -> vector<8x4096xf32>
    %c64_223 = arith.constant 64 : index
    %c0_224 = arith.constant 0 : index
    %176 = vector.load %arg2[%c64_223, %c0_224] : memref<72x4096xf32, #tpu.memory_space<vmem>>, vector<8x4096xf32>
    %177 = arith.mulf %175, %176 : vector<8x4096xf32>
    %c256_i32_225 = arith.constant 256 : i32
    %178 = tpu.dynamic_rotate %177 by %c256_i32_225 dim 1 : vector<8x4096xf32>, i32 -> vector<8x4096xf32>
    %c64_226 = arith.constant 64 : index
    %c0_227 = arith.constant 0 : index
    %179 = vector.load %arg8[%c64_226, %c0_227] : memref<216x4096xf32, #tpu.memory_space<vmem>>, vector<8x4096xf32>
    tpu.vector_store %arg8[%c64_226, %c0_227], %178 {strides = array<i32>} : memref<216x4096xf32, #tpu.memory_space<vmem>>, vector<8x4096xf32>,
    %c64_228 = arith.constant 64 : index
    %c0_229 = arith.constant 0 : index
    %180 = vector.load %arg8[%c64_228, %c0_229] : memref<216x4096xf32, #tpu.memory_space<vmem>>, vector<8x256xf32>
    tpu.vector_store %arg8[%c64_228, %c0_229], %2 {strides = array<i32>} : memref<216x4096xf32, #tpu.memory_space<vmem>>, vector<8x256xf32>,
    %c136_230 = arith.constant 136 : index
    %c0_231 = arith.constant 0 : index
    %181 = vector.load %arg8[%c136_230, %c0_231] : memref<216x4096xf32, #tpu.memory_space<vmem>>, vector<8x4096xf32>
    tpu.vector_store %arg8[%c136_230, %c0_231], %177 {strides = array<i32>} : memref<216x4096xf32, #tpu.memory_space<vmem>>, vector<8x4096xf32>,
    %c3840_i32_232 = arith.constant 3840 : i32
    %182 = tpu.dynamic_rotate %177 by %c3840_i32_232 dim 1 : vector<8x4096xf32>, i32 -> vector<8x4096xf32>
    %c208_233 = arith.constant 208 : index
    %c0_234 = arith.constant 0 : index
    %183 = vector.load %arg8[%c208_233, %c0_234] : memref<216x4096xf32, #tpu.memory_space<vmem>>, vector<8x4096xf32>
    tpu.vector_store %arg8[%c208_233, %c0_234], %182 {strides = array<i32>} : memref<216x4096xf32, #tpu.memory_space<vmem>>, vector<8x4096xf32>,
    %c208_235 = arith.constant 208 : index
    %c3840_236 = arith.constant 3840 : index
    %184 = vector.load %arg8[%c208_235, %c3840_236] : memref<216x4096xf32, #tpu.memory_space<vmem>>, vector<8x256xf32>
    tpu.vector_store %arg8[%c208_235, %c3840_236], %2 {strides = array<i32>} : memref<216x4096xf32, #tpu.memory_space<vmem>>, vector<8x256xf32>,
    %c0_237 = arith.constant 0 : index
    %c0_238 = arith.constant 0 : index
    %185 = vector.load %arg4[%c0_237, %c0_238] : memref<8x216xf32, #tpu.memory_space<vmem>>, vector<8x216xf32>
    %c0_239 = arith.constant 0 : index
    %c0_240 = arith.constant 0 : index
    %186 = vector.load %arg8[%c0_239, %c0_240] : memref<216x4096xf32, #tpu.memory_space<vmem>>, vector<216x4096xf32>
    %cst_241 = arith.constant dense<0.000000e+00> : vector<8x4096xf32>
    %187 = tpu.matmul %185, %186, %cst_241 {dimension_numbers = #tpu.dot_dimension_numbers<[1], [0], [0], [1], [0, 0, 1, 1], [], []>} : vector<8x216xf32>, vector<216x4096xf32>, vector<8x4096xf32> -> vector<8x4096xf32>
    %c0_242 = arith.constant 0 : index
    %c0_243 = arith.constant 0 : index
    %188 = vector.load %arg6[%c0_242, %c0_243] : memref<8x1xf32, #tpu.memory_space<vmem>>, vector<8x1xf32>
    %189 = vector.broadcast %188 : vector<8x1xf32> to vector<8x4096xf32>
    %190 = arith.addf %187, %189 : vector<8x4096xf32>
    %191 = arith.addf %190, %1 : vector<8x4096xf32>
    %cst_244 = arith.constant 0.000000e+00 : f32
    %192 = vector.broadcast %cst_244 : f32 to vector<8x4096xf32>
    %193 = arith.maximumf %191, %192 : vector<8x4096xf32>
    %c0_245 = arith.constant 0 : index
    %c0_246 = arith.constant 0 : index
    %c0_247 = arith.constant 0 : index
    %194 = vector.load %arg7[%c0_245, %c0_246, %c0_247] : memref<1x8x4096xf32, #tpu.memory_space<vmem>>, vector<1x8x4096xf32>
    %195 = vector.shape_cast %194 : vector<1x8x4096xf32> to vector<8x4096xf32>
    %196 = vector.shape_cast %193 : vector<8x4096xf32> to vector<1x8x4096xf32>
    tpu.vector_store %arg7[%c0_245, %c0_246, %c0_247], %196 {strides = array<i32>} : memref<1x8x4096xf32, #tpu.memory_space<vmem>>, vector<1x8x4096xf32>,
    return
  }
  func.func @transform_0(%arg0: i32) -> (i32, i32, i32) {
    %c0_i32 = arith.constant 0 : i32
    %c0_i32_0 = arith.constant 0 : i32
    %c0_i32_1 = arith.constant 0 : i32
    return %arg0, %c0_i32, %c0_i32_0 : i32, i32, i32
  }
  func.func @transform_1(%arg0: i32) -> (i32, i32) {
    %c0_i32 = arith.constant 0 : i32
    %c0_i32_0 = arith.constant 0 : i32
    %c0_i32_1 = arith.constant 0 : i32
    return %c0_i32, %c0_i32_0 : i32, i32
  }
  func.func @transform_2(%arg0: i32) -> (i32, i32) {
    %c0_i32 = arith.constant 0 : i32
    %c0_i32_0 = arith.constant 0 : i32
    %c0_i32_1 = arith.constant 0 : i32
    return %c0_i32, %c0_i32_0 : i32, i32
  }
  func.func @transform_3(%arg0: i32) -> (i32, i32) {
    %c0_i32 = arith.constant 0 : i32
    %c0_i32_0 = arith.constant 0 : i32
    %c0_i32_1 = arith.constant 0 : i32
    return %c0_i32, %c0_i32_0 : i32, i32
  }
  func.func @transform_4(%arg0: i32) -> (i32, i32) {
    %c0_i32 = arith.constant 0 : i32
    %c0_i32_0 = arith.constant 0 : i32
    %c0_i32_1 = arith.constant 0 : i32
    return %c0_i32, %c0_i32_0 : i32, i32
  }
  func.func @transform_5(%arg0: i32) -> (i32, i32) {
    %c0_i32 = arith.constant 0 : i32
    %c0_i32_0 = arith.constant 0 : i32
    %c0_i32_1 = arith.constant 0 : i32
    return %c0_i32, %c0_i32_0 : i32, i32
  }
  func.func @transform_6(%arg0: i32) -> (i32, i32, i32) {
    %c0_i32 = arith.constant 0 : i32
    %c0_i32_0 = arith.constant 0 : i32
    %c0_i32_1 = arith.constant 0 : i32
    return %arg0, %c0_i32, %c0_i32_0 : i32, i32, i32
  }
}

</mosaic_0001>

<bundles_post_ra>
// kernel: tpu_custom_call.1
= control target key start
LH: loop header
LB: loop body
LE: loop exit
PB: predicated region body
PF: predicated region fallthrough
CT: control target
= control target key end

     0   :  { %11 = vsyncpa [#allocation4], 0  ;;  %s17307_s0 = inlined_call_operand.hbm [shape: f32[2,8,4096], index: 0, kind: input, shape index: {}]   ;;  %s17308_s1 = inlined_call_operand.hbm [shape: f32[72,4096], index: 1, kind: input, shape index: {}]   ;;  %s17309_s2 = inlined_call_operand.hbm [shape: f32[8,216], index: 2, kind: input, shape index: {}]   ;;  %s17310_s3 = inlined_call_operand.hbm [shape: f32[8,216], index: 3, kind: input, shape index: {}]   ;;  %s17311_s4 = inlined_call_operand.vmem [shape: f32[8,1], index: 4, kind: input, shape index: {}]   ;;  %s17312_s5 = inlined_call_operand.vmem [shape: f32[8,1], index: 5, kind: input, shape index: {}]   ;;  %s17313_s6 = inlined_call_operand.hbm [shape: f32[2,8,4096], index: 6, kind: output, shape index: {}]  }
   0x1   :  { %13 = vsyncpa [#allocation4 + $0x1], 0 }
   0x2   :  { %14 = vsyncpa [#allocation7], 0 }
   0x3   :  { %15 = vsyncpa [#allocation10], 0 }
   0x4   :  { %16 = vsyncpa [#allocation5], 0 }
   0x5   :  { %18 = vsyncpa [#allocation5 + $0x1], 0  ;;  %s11048_s21 = smov 0   ;;  %s11050_s22 = smov 0  }
   0x6   :  { %s11052_s23 = smov 0   ;;  %s11054_s24 = smov 0  }
   0x7 LB: > { %s11069_s25 = sadd.s32 4294967295, %s10993_s24   ;;  %s8975_s26 = sadd.s32 4294967294, %s10993_s24   ;;  %s10993_s24 = sphi %s11054_s24, %s17646_s24   ;;  %s10989_s23 = sphi %s11052_s23, %s17645_s23   ;;  %s10985_s22 = sphi %s11050_s22, %s17644_s22   ;;  %s10981_s21 = sphi %s11048_s21, %s17643_s21  }
   0x8   : > { %p44_p0 = scmp.ne.s32.totalorder %s10985_s22, %s10981_s21  ;;  %p17314_p1 = scmp.eq.s32.totalorder %s11069_s25, 0 }
   0x9   : > { %p179_p3 = scmp.eq.s32.totalorder %s8975_s26, 1  ;;  %p8976_p5 = scmp.ge.s32.totalorder %s10993_s24, 1 }
   0xa   : > { %p11078_p4 = por %p17314_p1, %p44_p0  ;;  %p186_p7 = scmp.lt.s32.totalorder %s10993_s24, 3 }
   0xb   : > { %p11083_p6 = por %p179_p3, %p44_p0  ;;  %s10995_s30 = smov [#allocation6]  }
   0xc   : > { %s17426_s27 = scalar_select %p11078_p4, 1, 0 }
   0xd   : > { %s17427_s28 = scalar_select %p11083_p6, 1, 0 }
   0xe   : > { %p11088_p8 = pnand %p8976_p5, %p186_p7  ;;  %s198_s7 = sshll.u32 %s10995_s30, 4  ;;  %s11092_s7 = int_to_ptr.vmem [resolvable:$true] %s198_s7 }
   0xf   : > { %s10996_s9 = smov [#allocation8]   ;;  %s10997_s11 = smov [#allocation9]  }
  0x10   : > { %s17428_s29 = scalar_select %p11088_p8, 1, 0 }
  0x11   : > { %p10661_p9 = pneg %p11088_p8  ;;  %s212_s10 = sshll.u32 %s10996_s9, 4  ;;  %s11103_s10 = int_to_ptr.vmem [resolvable:$true] %s212_s10 }
  0x12   : > { %s11105_s12 = sshll.u32 %s10997_s11, 4  ;;  %s10805_s15 = scalar_lea.hbm %s17308_s1, 36864  ;;  %s224_s12 = int_to_ptr.vmem [resolvable:$true] %s11105_s12 }
  0x13   : > { %p11099_p11 = pnand %p10661_p9, %p17314_p1  ;;  %p10806_p12 = scmp.ne.s32.totalorder %s17308_s1, %s10805_s15 }
  0x14   : > { %p10812_p5 = scmp.lt.u32.totalorder %s10805_s15, %s17308_s1 }
  0x15   : > { %p11115_p13 = pneg %p11099_p11 }
  0x17   : > { %p10808_p0 = pnand %p11115_p13, %p10806_p12 }
  0x19   : > { %p10809_p3 = pneg %p10808_p0 }
  0x1b   : > { %p10814_p7 = pnand %p10812_p5, %p10809_p3 }
  0x1d   : > { %10817 = shalt.err (!%p10814_p7)
}
  0x1e   : > { %s10818_s26 = scalar_lea.vmem %s11092_s7, 36864  ;;  %p10826_p2 = scmp.lt.s32.totalorder %s11092_s7, %s11092_s7 }
  0x1f   : > { %p10819_p9 = scmp.ne.s32.totalorder %s11092_s7, %s10818_s26  ;;  %p10827_p6 = scmp.lt.s32.totalorder %s10818_s26, %s10818_s26 }
  0x21   : > { %p10821_p10 = pnand %p10819_p9, %p11115_p13  ;;  %p10828_p12 = por %p10827_p6, %p10826_p2 }
  0x23   : > { %p10822_p1 = pneg %p10821_p10 }
  0x25   : > { %p10829_p0 = pnand %p10828_p12, %p10822_p1 }
  0x27   : > { %10832 = shalt.err (!%p10829_p0)
}
  0x28   : > { %s10998_s30 = smov 4096   ;;  %s10999_s9 = smov 256  }
  0x29   : > { %10664 = dma.hbm_to_vmem [thread:$0]  (!%p11099_p11), %s17308_s1, 36864, %s11092_s7, [#allocation7], %s10998_s30, %s10998_s30, %s10999_s9  }
  0x2a   : > { %s10833_s16 = scalar_lea.hbm %s17309_s2, 256 }
  0x2b   : > { %p10834_p2 = scmp.ne.s32.totalorder %s17309_s2, %s10833_s16  ;;  %p10840_p10 = scmp.lt.u32.totalorder %s10833_s16, %s17309_s2 }
  0x2d   : > { %p10836_p1 = pnand %p10834_p2, %p11115_p13 }
  0x2f   : > { %p10837_p6 = pneg %p10836_p1 }
  0x31   : > { %p10842_p3 = pnand %p10840_p10, %p10837_p6 }
  0x33   : > { %10845 = shalt.err (!%p10842_p3)
}
  0x34   : > { %s10846_s7 = scalar_lea.vmem %s11103_s10, 256  ;;  %p10854_p12 = scmp.lt.s32.totalorder %s11103_s10, %s11103_s10 }
  0x35   : > { %p10847_p5 = scmp.ne.s32.totalorder %s11103_s10, %s10846_s7  ;;  %p10855_p0 = scmp.lt.s32.totalorder %s10846_s7, %s10846_s7 }
  0x37   : > { %p10849_p7 = pnand %p10847_p5, %p11115_p13  ;;  %p10856_p2 = por %p10855_p0, %p10854_p12 }
  0x39   : > { %p10850_p9 = pneg %p10849_p7 }
  0x3b   : > { %p10857_p1 = pnand %p10856_p2, %p10850_p9 }
  0x3d   : > { %10860 = shalt.err (!%p10857_p1)
}
  0x3e   : > { %10667 = dma.hbm_to_vmem [thread:$0]  (!%p11099_p11), %s17309_s2, 256, %s11103_s10, [#allocation7]  }
  0x3f   : > { %s10861_s14 = scalar_lea.hbm %s17310_s3, 256 }
  0x40   : > { %p10862_p6 = scmp.ne.s32.totalorder %s17310_s3, %s10861_s14  ;;  %p10868_p5 = scmp.lt.u32.totalorder %s10861_s14, %s17310_s3 }
  0x42   : > { %p10864_p10 = pnand %p10862_p6, %p11115_p13 }
  0x44   : > { %p10865_p3 = pneg %p10864_p10 }
  0x46   : > { %p10870_p7 = pnand %p10868_p5, %p10865_p3 }
  0x48   : > { %10873 = shalt.err (!%p10870_p7)
}
  0x49   : > { %s10874_s20 = scalar_lea.vmem %s224_s12, 256  ;;  %p10882_p2 = scmp.lt.s32.totalorder %s224_s12, %s224_s12 }
  0x4a   : > { %p10875_p9 = scmp.ne.s32.totalorder %s224_s12, %s10874_s20  ;;  %p10883_p1 = scmp.lt.s32.totalorder %s10874_s20, %s10874_s20 }
  0x4c   : > { %p10877_p12 = pnand %p10875_p9, %p11115_p13  ;;  %p10884_p4 = por %p10883_p1, %p10882_p2 }
  0x4e   : > { %p10878_p0 = pneg %p10877_p12 }
  0x50   : > { %p10885_p8 = pnand %p10884_p4, %p10878_p0 }
  0x52   : > { %10888 = shalt.err (!%p10885_p8)
}
  0x53   : > { %10670 = dma.hbm_to_vmem [thread:$0]  (!%p11099_p11), %s17310_s3, 256, %s224_s12, [#allocation10]  }
  0x54   : > { %s11179_s18 = sadd.s32 1, %s10993_s24   ;;  %s31_s8 = sadd.s32 1, %s10989_s23 }
  0x55   : > { %s28_s7 = ssub.s32 %s10993_s24, %s11179_s18  ;;  %p38_p8 = scmp.ne.s32.totalorder %s10989_s23, %s10985_s22 }
  0x56   : > { %p29_p4 = scmp.eq.s32.totalorder %s28_s7, 0  ;;  %p39_p13 = scmp.eq.s32.totalorder %s10993_s24, 0 }
  0x57   : > { %p10682_p6 = scmp.lt.s32.totalorder %s10993_s24, 2  ;;  %p17431_p3 = scmp.eq.s32.totalorder %s11069_s25, 1 }
  0x58   : > { %s11189_s30 = scalar_select %p29_p4, %s10989_s23, %s31_s8  }
  0x59   : > { %p40_p10 = por %p39_p13, %p38_p8  ;;  %p11193_p5 = por %p17431_p3, %p38_p8 }
  0x5a   : > { %s240_s11 = sand.u32 1, %s10989_s23   ;;  %s9027_s13 = sshll.u32 %s10993_s24, 12 }
  0x5b   : > { %s8981_s12 = sshll.u32 %s240_s11, 8  ;;  %s11202_s16 = scalar_lea.hbm %s17307_s0, %s9027_s13 }
  0x5c   : > { %s244_s17 = scalar_lea.vmem [#allocation3], %s8981_s12  ;;  %p11204_p11 = pnand %p10682_p6, %p40_p10 }
  0x5d   : > { %s252_s19 = sshll.u32 %s244_s17, 4  ;;  %s241_s10 = scalar_lea.sflag [#allocation4], %s240_s11  ;;  %s11208_s19 = int_to_ptr.vmem [resolvable:$true] %s252_s19 }
  0x5e   : > { %s10889_s26 = scalar_lea.hbm %s11202_s16, 4096  ;;  %p10891_p9 = pneg %p11204_p11 }
  0x5f   : > { %p10890_p7 = scmp.ne.s32.totalorder %s11202_s16, %s10889_s26  ;;  %s10894_s13 = scalar_lea.hbm %s17307_s0, 8192 }
  0x60   : > { %p10895_p2 = scmp.lt.u32.totalorder %s11202_s16, %s17307_s0  ;;  %p10896_p1 = scmp.lt.u32.totalorder %s10894_s13, %s10889_s26 }
  0x61   : > { %p10892_p12 = pnand %p10891_p9, %p10890_p7  ;;  %p10898_p8 = scmp.lt.u32.totalorder %s10889_s26, %s11202_s16 }
  0x62   : > { %p10897_p4 = por %p10896_p1, %p10895_p2 }
  0x63   : > { %p10893_p0 = pneg %p10892_p12 }
  0x64   : > { %p10899_p13 = por %p10898_p8, %p10897_p4 }
  0x66   : > { %p10900_p6 = pnand %p10899_p13, %p10893_p0 }
  0x68   : > { %10903 = shalt.err (!%p10900_p6)
}
  0x69   : > { %s10904_s11 = scalar_lea.vmem %s11208_s19, 4096  ;;  %s11000_s15 = smov [#allocation3]  }
  0x6a   : > { %p10905_p10 = scmp.ne.s32.totalorder %s11208_s19, %s10904_s11  ;;  %s10909_s17 = sshll.u32 %s11000_s15, 4  ;;  %s10910_s17 = int_to_ptr.vmem [resolvable:$false] %s10909_s17 }
  0x6b   : > { %s10911_s7 = scalar_lea.vmem %s10910_s17, 8192  ;;  %p10912_p12 = scmp.lt.s32.totalorder %s11208_s19, %s10910_s17 }
  0x6c   : > { %p10907_p3 = pnand %p10905_p10, %p10891_p9  ;;  %p10913_p2 = scmp.lt.s32.totalorder %s10911_s7, %s10904_s11 }
  0x6e   : > { %p10908_p7 = pneg %p10907_p3  ;;  %p10914_p1 = por %p10913_p2, %p10912_p12 }
  0x70   : > { %p10915_p4 = pnand %p10914_p1, %p10908_p7 }
  0x72   : > { %10918 = shalt.err (!%p10915_p4)
}
  0x73   : > { %10674 = dma.hbm_to_vmem [thread:$0]  (!%p11204_p11), %s11202_s16, 4096, %s11208_s19, %s241_s10  }
  0x74   : > { %p17434_p0 = scmp.ne.s32.totalorder %s17428_s29, 0 }
  0x76   : > { %261 = sbr.rel (%p17434_p0) target bundleno = 1783 (0x6f7), region = 44 }
  0x7d   : > { %s11238_s26 = sand.u32 1, %s10985_s22   ;;  %p17435_p9 = scmp.ne.s32.totalorder %s17426_s27, 0 }
  0x7e   : > { %s8985_s8 = sshll.u32 %s11238_s26, 8  ;;  %s264_s13 = scalar_lea.sflag [#allocation4], %s11238_s26 }
  0x7f   : > { %s11244_s12 = scalar_lea.vmem [#allocation3], %s8985_s8 }
  0x80   : > { %10964 = dma.done.wait (%p17435_p9), %s264_s13, 4096  }
  0x81   : > { %10966 = vsyncadd (%p17435_p9), %s264_s13, 4294963200  ;;  %p17436_p11 = scmp.eq.s32.totalorder %s11069_s25, 0 }
  0x83   : > { %10968 = dma.done.wait (%p17436_p11), [#allocation7], 37120   ;;  %p17437_p8 = pmov %p17436_p11 }
  0x85   : > { %10970 = vsyncadd (%p17437_p8), [#allocation7], 4294930176  ;;  %p17438_p13 = pmov %p17437_p8 }
  0x86   : > { %p17439_p6 = pmov %p17437_p8 }
  0x87   : > { %10972 = dma.done.wait (%p17438_p13), [#allocation10], 256  }
  0x88   : > { %10974 = vsyncadd (%p17439_p6), [#allocation10], 4294967040  ;;  %v11001_v0 = vmov 0.0|0.0   ;;  %v11263_v1 = vld [vmem:[%s11244_s12] sm:$0xff]  ;;  %s11002_s27 = smov 16   ;;  %s11003_s29 = smov 17   ;;  %v404_v10 = vlaneseq }
  0x89   : > { %9029 = vmatprep.subr.bf16.mxu0 %v11001_v0  ;;  %603 = vrot.lane.b32.xlu1 %v11263_v1, %s11002_s27  ;;  %v11271_v2 = vld [vmem:[%s11244_s12 + $0x8] sm:$0xff]  ;;  %v339_v3 = vld [vmem:[%s11244_s12 + $0xf8] sm:$0xff]  ;;  %s11004_s16 = smov 15   ;;  %s11005_s19 = smov 1   ;;  %v11294_v4 = vld [vmem:[%s11244_s12 + $0x10] sm:$0xff]  ;;  %vm3402_vm0 = vcmask 719872  }
  0x8a   : > { %9030 = vmatpush1.bf16.msra.mxu0 %v11001_v0  ;;  %340 = vrot.lane.b32.xlu0 %v11263_v1, %s11003_s29  ;;  %s11006_s20 = smov 127   ;;  %s11007_s10 = smov 113   ;;  %v11317_v5 = vld [vmem:[%s11244_s12 + $0x18] sm:$0xff]  ;;  %v11340_v6 = vld [vmem:[%s11244_s12 + $0x20] sm:$0xff]  ;;  %v11350_v7 = vld [vmem:[#allocation8 + $0x8] sm:$0xff]  ;;  %v11409_v12 = vand.u32 127, %v404_v10 }
  0x8b   : > { %9031 = vmatprep.subr.bf16.mxu0 %v11001_v0  ;;  %s11008_s14 = smov 112   ;;  %s11009_s11 = smov 111   ;;  %8990 = vmatprep.mubr.msk.f32.mxu0 %vm3402_vm0, %v11350_v7  ;;  %v11365_v8 = vld [vmem:[%s11244_s12 + $0x28] sm:$0xff]  ;;  %v11384_v9 = vld [vmem:[%s11244_s12 + $0x30] sm:$0xff]  ;;  %v11403_v11 = vld [vmem:[%s11244_s12 + $0x38] sm:$0xff]  ;;  %v17317_v27 = vmov 0.0  }
  0x8c   : > { %8991 = vmatprep.mubr.msk.f32.mxu1 %vm3402_vm0, %v11350_v7  ;;  %vm406_vm1 = vcmp.lt.s32.totalorder %v11409_v12, 17  ;;  %vm667_vm2 = vcmp.lt.s32.totalorder %v11409_v12, 16  ;;  %v440_v15 = vld [vmem:[#allocation6 + $0x8] sm:$0xff]  ;;  %v439_v23 = vld [vmem:[#allocation6] sm:$0xff]  ;;  %vm928_vm3 = vcmp.lt.s32.totalorder %v11409_v12, 15  ;;  %vm1189_vm4 = vcmp.lt.s32.totalorder %v11409_v12, 1 }
  0x8d   : > { %605 = vrot.lane.b32.xlu1 %v11271_v2, %s11002_s27  ;;  %v701_v16 = vld [vmem:[#allocation6 + $0x108] sm:$0xff]  ;;  %v700_v24 = vld [vmem:[#allocation6 + $0x100] sm:$0xff]  ;;  %vm1550_vm5 = vcmp.lt.s32.totalorder %v11409_v12, 127  ;;  %vm1811_vm6 = vcmp.lt.s32.totalorder %v11409_v12, 113  ;;  %vm2072_vm7 = vcmp.lt.s32.totalorder %v11409_v12, 112  ;;  %vm2333_vm8 = vcmp.lt.s32.totalorder %v11409_v12, 111 }
  0x8e   : > { %9032 = vmatpush1.bf16.msra.mxu0 %v11001_v0  ;;  %342 = vrot.lane.b32.xlu0 %v11271_v2, %s11003_s29  ;;  %v962_v34 = vld [vmem:[#allocation6 + $0x208] sm:$0xff]  ;;  %v11448_v35 = vld [vmem:[%s11244_s12 + $0x40] sm:$0xff] }
  0x8f   : > { %9033 = vmatprep.subr.bf16.mxu0 %v11001_v0  ;;  %v1223_v42 = vld [vmem:[#allocation6 + $0x308] sm:$0xff]  ;;  %v1222_v48 = vld [vmem:[#allocation6 + $0x300] sm:$0xff] }
  0x90   : > { %v961_v49 = vld [vmem:[#allocation6 + $0x200] sm:$0xff]  ;;  %v1584_v57 = vld [vmem:[#allocation6 + $0x508] sm:$0xff] }
  0x91   : > { %665 = vrot.lane.b32.xlu1 %v339_v3, %s11002_s27  ;;  %v1583_v10 = vld [vmem:[#allocation6 + $0x500] sm:$0xff] }
  0x92   : > { %9034 = vmatpush1.bf16.msra.mxu0 %v11001_v0  ;;  %402 = vrot.lane.b32.xlu0 %v339_v3, %s11003_s29 }
  0x93   : > { %9035 = vmatprep.subr.bf16.mxu0 %v11001_v0 }
  0x95   : > { %866 = vrot.lane.b32.xlu1 %v11271_v2, %s11004_s16 }
  0x96   : > { %9036 = vmatpush1.bf16.msra.mxu0 %v11001_v0  ;;  %864 = vrot.lane.b32.xlu0 %v11263_v1, %s11004_s16 }
  0x99   : > { %1127 = vrot.lane.b32.xlu1 %v11271_v2, %s11005_s19 }
  0x9a   : > { %1125 = vrot.lane.b32.xlu0 %v11263_v1, %s11005_s19 }
  0x9d   : > { %1187 = vrot.lane.b32.xlu1 %v339_v3, %s11005_s19 }
  0x9e   : > { %926 = vrot.lane.b32.xlu0 %v339_v3, %s11004_s16 }
  0xa1   : > { %1490 = vrot.lane.b32.xlu1 %v11294_v4, %s11006_s20 }
  0xa2   : > { %1488 = vrot.lane.b32.xlu0 %v11271_v2, %s11006_s20 }
  0xa5   : > { %1749 = vrot.lane.b32.xlu1 %v11271_v2, %s11007_s10 }
  0xa6   : > { %1486 = vrot.lane.b32.xlu0 %v11263_v1, %s11006_s20 }
  0xa9   : > { %2010 = vrot.lane.b32.xlu1 %v11271_v2, %s11008_s14 }
  0xaa   : > { %1751 = vrot.lane.b32.xlu0 %v11294_v4, %s11007_s10 }
  0xad   : > { %1747 = vrot.lane.b32.xlu1 %v11263_v1, %s11007_s10 }
  0xae   : > { %2012 = vrot.lane.b32.xlu0 %v11294_v4, %s11008_s14 }
  0xb1   : > { %344 = vrot.lane.b32.xlu1 %v11294_v4, %s11003_s29 }
  0xb2   : > { %2008 = vrot.lane.b32.xlu0 %v11263_v1, %s11008_s14 }
  0xb5   : > { %2271 = vrot.lane.b32.xlu1 %v11271_v2, %s11009_s11 }
  0xb6   : > { %346 = vrot.lane.b32.xlu0 %v11317_v5, %s11003_s29 }
  0xb9   : > { %2269 = vrot.lane.b32.xlu1 %v11263_v1, %s11009_s11 }
  0xba   : > { %2273 = vrot.lane.b32.xlu0 %v11294_v4, %s11009_s11 }
  0xbd   : > { %609 = vrot.lane.b32.xlu1 %v11317_v5, %s11002_s27 }
  0xbe   : > { %607 = vrot.lane.b32.xlu0 %v11294_v4, %s11002_s27 }
  0xc1   : > { %870 = vrot.lane.b32.xlu1 %v11317_v5, %s11004_s16 }
  0xc2   : > { %868 = vrot.lane.b32.xlu0 %v11294_v4, %s11004_s16 }
  0xc5   : > { %1131 = vrot.lane.b32.xlu1 %v11317_v5, %s11005_s19 }
  0xc6   : > { %1129 = vrot.lane.b32.xlu0 %v11294_v4, %s11005_s19 }
  0xc9   : > { %1494 = vrot.lane.b32.xlu1 %v11340_v6, %s11006_s20 }
  0xca   : > { %1492 = vrot.lane.b32.xlu0 %v11317_v5, %s11006_s20 }
  0xcd   : > { %1755 = vrot.lane.b32.xlu1 %v11340_v6, %s11007_s10 }
  0xce   : > { %1753 = vrot.lane.b32.xlu0 %v11317_v5, %s11007_s10 }
  0xd1   : > { %2016 = vrot.lane.b32.xlu1 %v11340_v6, %s11008_s14 }
  0xd2   : > { %2014 = vrot.lane.b32.xlu0 %v11317_v5, %s11008_s14 }
  0xd5   : > { %2277 = vrot.lane.b32.xlu1 %v11340_v6, %s11009_s11 }
  0xd6   : > { %2275 = vrot.lane.b32.xlu0 %v11317_v5, %s11009_s11 }
  0xd9   : > { %350 = vrot.lane.b32.xlu1 %v11365_v8, %s11003_s29 }
  0xda   : > { %348 = vrot.lane.b32.xlu0 %v11340_v6, %s11003_s29 }
  0xdd   : > { %613 = vrot.lane.b32.xlu1 %v11365_v8, %s11002_s27 }
  0xde   : > { %611 = vrot.lane.b32.xlu0 %v11340_v6, %s11002_s27 }
  0xe1   : > { %874 = vrot.lane.b32.xlu1 %v11365_v8, %s11004_s16 }
  0xe2   : > { %872 = vrot.lane.b32.xlu0 %v11340_v6, %s11004_s16 }
  0xe5   : > { %1135 = vrot.lane.b32.xlu1 %v11365_v8, %s11005_s19 }
  0xe6   : > { %1133 = vrot.lane.b32.xlu0 %v11340_v6, %s11005_s19 }
  0xe9   : > { %1498 = vrot.lane.b32.xlu1 %v11384_v9, %s11006_s20 }
  0xea   : > { %1496 = vrot.lane.b32.xlu0 %v11365_v8, %s11006_s20 }
  0xed   : > { %1759 = vrot.lane.b32.xlu1 %v11384_v9, %s11007_s10 }
  0xee   : > { %1757 = vrot.lane.b32.xlu0 %v11365_v8, %s11007_s10 }
  0xf1   : > { %2020 = vrot.lane.b32.xlu1 %v11384_v9, %s11008_s14 }
  0xf2   : > { %2018 = vrot.lane.b32.xlu0 %v11365_v8, %s11008_s14 }
  0xf5   : > { %2281 = vrot.lane.b32.xlu1 %v11384_v9, %s11009_s11 }
  0xf6   : > { %2279 = vrot.lane.b32.xlu0 %v11365_v8, %s11009_s11 }
  0xf9   : > { %354 = vrot.lane.b32.xlu1 %v11403_v11, %s11003_s29 }
  0xfa   : > { %352 = vrot.lane.b32.xlu0 %v11384_v9, %s11003_s29 }
  0xfb   : > { %v604_v13 = vpop.permute.xlu1 %603 }
  0xfc   : > { %v341_v14 = vpop.permute.xlu0 %340 }
  0xfd   : > { %617 = vrot.lane.b32.xlu1 %v11403_v11, %s11002_s27 }
  0xfe   : > { %615 = vrot.lane.b32.xlu0 %v11384_v9, %s11002_s27 }
  0xff   : > { %v11417_v17 = vpop.permute.xlu1 %605 }
 0x100   : > { %v11419_v18 = vpop.permute.xlu0 %342  ;;  %v698_v20 = vsel %vm667_vm2, %v604_v13, %v11417_v17 }
 0x101   : > { %v437_v19 = vsel %vm406_vm1, %v341_v14, %v11419_v18  ;;  %878 = vrot.lane.b32.xlu1 %v11403_v11, %s11004_s16  ;;  %v733_v22 = vmul.f32 %v701_v16, %v698_v20 }
 0x102   : > { %v472_v21 = vmul.f32 %v440_v15, %v437_v19  ;;  %876 = vrot.lane.b32.xlu0 %v11384_v9, %s11004_s16 }
 0x103   : > { %v11431_v25 = vpop.permute.xlu1 %665 }
 0x104   : > { %v11433_v26 = vpop.permute.xlu0 %402  ;;  %v9037_v28 = vpack.c.bf16 %v472_v21, %v17317_v27  ;;  %v9073_v29 = vpack.c.bf16 %v733_v22, %v472_v21  ;;  %v699_v30 = vsel %vm667_vm2, %v11431_v25, %v604_v13  ;;  %v11496_v13 = vld [vmem:[%s11244_s12 + $0x48] sm:$0xff] }
 0x105   : > { %v438_v31 = vsel %vm406_vm1, %v11433_v26, %v341_v14  ;;  %1139 = vrot.lane.b32.xlu1 %v11403_v11, %s11005_s19  ;;  %v732_v33 = vmul.f32 %v700_v24, %v699_v30  ;;  %v1844_v30 = vld [vmem:[#allocation6 + $0x600] sm:$0xff] }
 0x106   : > { %v471_v32 = vmul.f32 %v439_v23, %v438_v31  ;;  %1137 = vrot.lane.b32.xlu0 %v11384_v9, %s11005_s19  ;;  %9038 = vmatprep.subr.bf16.mxu0 %v9037_v28  ;;  %v2106_v31 = vld [vmem:[#allocation6 + $0x708] sm:$0xff] }
 0x107   : > { %9074 = vmatprep.subr.bf16.mxu1 %v9073_v29  ;;  %v11450_v36 = vpop.permute.xlu1 %866 }
 0x108   : > { %v865_v37 = vpop.permute.xlu0 %864  ;;  %v9039_v38 = vpack.c.bf16 %v471_v32, %v17317_v27  ;;  %v9075_v39 = vpack.c.bf16 %v732_v33, %v471_v32 }
 0x109   : > { %v959_v40 = vsel %vm928_vm3, %v865_v37, %v11450_v36  ;;  %1502 = vrot.lane.b32.xlu1 %v11448_v35, %s11006_s20 }
 0x10a   : > { %v994_v41 = vmul.f32 %v962_v34, %v959_v40  ;;  %1500 = vrot.lane.b32.xlu0 %v11403_v11, %s11006_s20  ;;  %9040 = vmatpush1.bf16.msra.mxu0 %v9039_v38  ;;  %v2105_v40 = vld [vmem:[#allocation6 + $0x700] sm:$0xff] }
 0x10b   : > { %9076 = vmatpush1.bf16.msra.mxu1 %v9075_v39  ;;  %v11461_v43 = vpop.permute.xlu1 %1127 }
 0x10c   : > { %v1126_v44 = vpop.permute.xlu0 %1125  ;;  %v9041_v45 = vpack.c.bf16 %v994_v41, %v733_v22  ;;  %v1845_v22 = vld [vmem:[#allocation6 + $0x608] sm:$0xff] }
 0x10d   : > { %v1220_v46 = vsel %vm1189_vm4, %v1126_v44, %v11461_v43  ;;  %1763 = vrot.lane.b32.xlu1 %v11448_v35, %s11007_s10 }
 0x10e   : > { %v1255_v47 = vmul.f32 %v1223_v42, %v1220_v46  ;;  %1761 = vrot.lane.b32.xlu0 %v11403_v11, %s11007_s10  ;;  %9042 = vmatprep.subr.bf16.mxu0 %v9041_v45 }
 0x10f   : > { %v11470_v50 = vpop.permute.xlu1 %1187 }
 0x110   : > { %v11472_v51 = vpop.permute.xlu0 %926  ;;  %v9077_v52 = vpack.c.bf16 %v1255_v47, %v994_v41  ;;  %v1221_v53 = vsel %vm1189_vm4, %v11470_v50, %v1126_v44  ;;  %v9045_v3 = vpack.c.bf16 %v11271_v2, %v1255_v47 }
 0x111   : > { %v960_v54 = vsel %vm928_vm3, %v11472_v51, %v865_v37  ;;  %v1254_v55 = vmul.f32 %v1222_v48, %v1221_v53  ;;  %2024 = vrot.lane.b32.xlu1 %v11448_v35, %s11008_s14  ;;  %v11545_v48 = vld [vmem:[%s11244_s12 + $0x50] sm:$0xff] }
 0x112   : > { %v993_v56 = vmul.f32 %v961_v49, %v960_v54  ;;  %2022 = vrot.lane.b32.xlu0 %v11403_v11, %s11008_s14  ;;  %9078 = vmatprep.subr.bf16.mxu1 %v9077_v52  ;;  %v441_v54 = vld [vmem:[#allocation6 + $0x10] sm:$0xff] }
 0x113   : > { %v11485_v58 = vpop.permute.xlu1 %1490  ;;  %v9047_v20 = vpack.c.bf16 %v11263_v1, %v1254_v55 }
 0x114   : > { %v1489_v59 = vpop.permute.xlu0 %1488  ;;  %v9043_v60 = vpack.c.bf16 %v993_v56, %v732_v33  ;;  %v9079_v61 = vpack.c.bf16 %v1254_v55, %v993_v56 }
 0x115   : > { %v1580_v62 = vsel %vm1550_vm5, %v1489_v59, %v11485_v58  ;;  %2285 = vrot.lane.b32.xlu1 %v11448_v35, %s11009_s11 }
 0x116   : > { %v1616_v63 = vmul.f32 %v1584_v57, %v1580_v62  ;;  %2283 = vrot.lane.b32.xlu0 %v11403_v11, %s11009_s11  ;;  %9044 = vmatpush1.bf16.msra.mxu0 %v9043_v60  ;;  %v2366_v57 = vld [vmem:[#allocation6 + $0x800] sm:$0xff] }
 0x117   : > { %9080 = vmatpush1.bf16.msra.mxu1 %v9079_v61  ;;  %9046 = vmatprep.subr.bf16.mxu0 %v9045_v3  ;;  %v1750_v14 = vpop.permute.xlu1 %1749 }
 0x118   : > { %v11498_v15 = vpop.permute.xlu0 %1486  ;;  %v9081_v16 = vpack.c.bf16 %v1616_v63, %v11271_v2 }
 0x119   : > { %v1581_v19 = vsel %vm1550_vm5, %v11498_v15, %v1489_v59  ;;  %358 = vrot.lane.b32.xlu1 %v11496_v13, %s11003_s29  ;;  %v2367_v59 = vld [vmem:[#allocation6 + $0x808] sm:$0xff] }
 0x11a   : > { %v1615_v21 = vmul.f32 %v1583_v10, %v1581_v19  ;;  %356 = vrot.lane.b32.xlu0 %v11448_v35, %s11003_s29  ;;  %9048 = vmatpush1.bf16.msra.mxu0 %v9047_v20  ;;  %v703_v19 = vld [vmem:[#allocation6 + $0x118] sm:$0xff] }
 0x11b   : > { %9082 = vmatprep.subr.bf16.mxu1 %v9081_v16  ;;  %v2011_v23 = vpop.permute.xlu1 %2010  ;;  %v702_v16 = vld [vmem:[#allocation6 + $0x110] sm:$0xff] }
 0x11c   : > { %v11510_v2 = vpop.permute.xlu0 %1751  ;;  %v9083_v24 = vpack.c.bf16 %v1615_v21, %v11263_v1 }
 0x11d   : > { %v1841_v28 = vsel %vm1811_vm6, %v1750_v14, %v11510_v2  ;;  %621 = vrot.lane.b32.xlu1 %v11496_v13, %s11002_s27 }
 0x11e   : > { %v1877_v29 = vmul.f32 %v1845_v22, %v1841_v28  ;;  %619 = vrot.lane.b32.xlu0 %v11448_v35, %s11002_s27  ;;  %9084 = vmatpush1.bf16.msra.mxu1 %v9083_v24 }
 0x11f   : > { %v11521_v32 = vpop.permute.xlu1 %1747 }
 0x120   : > { %v11523_v33 = vpop.permute.xlu0 %2012  ;;  %v9049_v1 = vpack.c.bf16 %v1877_v29, %v1616_v63  ;;  %v1842_v34 = vsel %vm1811_vm6, %v11521_v32, %v1750_v14 }
 0x121   : > { %v2102_v37 = vsel %vm2072_vm7, %v2011_v23, %v11523_v33  ;;  %v1876_v38 = vmul.f32 %v1844_v30, %v1842_v34  ;;  %882 = vrot.lane.b32.xlu1 %v11496_v13, %s11004_s16  ;;  %v963_v34 = vld [vmem:[#allocation6 + $0x210] sm:$0xff] }
 0x122   : > { %v2138_v39 = vmul.f32 %v2106_v31, %v2102_v37  ;;  %880 = vrot.lane.b32.xlu0 %v11448_v35, %s11004_s16  ;;  %9050 = vmatprep.subr.bf16.mxu0 %v9049_v1  ;;  %v964_v37 = vld [vmem:[#allocation6 + $0x218] sm:$0xff] }
 0x123   : > { %v345_v41 = vpop.permute.xlu1 %344  ;;  %v9051_v44 = vpack.c.bf16 %v1876_v38, %v1615_v21 }
 0x124   : > { %v11535_v42 = vpop.permute.xlu0 %2008  ;;  %v9085_v45 = vpack.c.bf16 %v2138_v39, %v1877_v29  ;;  %v436_v55 = vsel %vm406_vm1, %v11419_v18, %v345_v41 }
 0x125   : > { %v2103_v46 = vsel %vm2072_vm7, %v11535_v42, %v2011_v23  ;;  %1143 = vrot.lane.b32.xlu1 %v11496_v13, %s11005_s19  ;;  %9052 = vmatpush1.bf16.msra.mxu0 %v9051_v44  ;;  %v473_v18 = vmul.f32 %v441_v54, %v436_v55 }
 0x126   : > { %v2137_v47 = vmul.f32 %v2105_v40, %v2103_v46  ;;  %1141 = vrot.lane.b32.xlu0 %v11448_v35, %s11005_s19  ;;  %9086 = vmatprep.subr.bf16.mxu1 %v9085_v45  ;;  %v442_v35 = vld [vmem:[#allocation6 + $0x18] sm:$0xff] }
 0x127   : > { %v2272_v49 = vpop.permute.xlu1 %2271 }
 0x128   : > { %v11547_v52 = vpop.permute.xlu0 %346  ;;  %v9087_v53 = vpack.c.bf16 %v2137_v47, %v1876_v38 }
 0x129   : > { %1506 = vrot.lane.b32.xlu1 %v11545_v48, %s11006_s20  ;;  %v435_v56 = vsel %vm406_vm1, %v345_v41, %v11547_v52 }
 0x12a   : > { %1504 = vrot.lane.b32.xlu0 %v11496_v13, %s11006_s20  ;;  %9088 = vmatpush1.bf16.msra.mxu1 %v9087_v53  ;;  %v474_v3 = vmul.f32 %v442_v35, %v435_v56  ;;  %v11604_v53 = vld [vmem:[%s11244_s12 + $0x58] sm:$0xff] }
 0x12b   : > { %v11560_v60 = vpop.permute.xlu1 %2269 }
 0x12c   : > { %v11562_v61 = vpop.permute.xlu0 %2273  ;;  %v2364_v62 = vsel %vm2333_vm8, %v11560_v60, %v2272_v49 }
 0x12d   : > { %v2363_v63 = vsel %vm2333_vm8, %v2272_v49, %v11562_v61  ;;  %v2398_v10 = vmul.f32 %v2366_v57, %v2364_v62  ;;  %1767 = vrot.lane.b32.xlu1 %v11545_v48, %s11007_s10  ;;  %v1225_v49 = vld [vmem:[#allocation6 + $0x318] sm:$0xff] }
 0x12e   : > { %v2399_v14 = vmul.f32 %v2367_v59, %v2363_v63  ;;  %1765 = vrot.lane.b32.xlu0 %v11496_v13, %s11007_s10  ;;  %v1586_v62 = vld [vmem:[#allocation6 + $0x518] sm:$0xff] }
 0x12f   : > { %v11574_v20 = vpop.permute.xlu1 %609  ;;  %v9055_v24 = vpack.c.bf16 %v2398_v10, %v2137_v47  ;;  %v9091_v28 = vpack.c.bf16 %v473_v18, %v2398_v10  ;;  %v1224_v47 = vld [vmem:[#allocation6 + $0x310] sm:$0xff] }
 0x130   : > { %v608_v21 = vpop.permute.xlu0 %607  ;;  %v9053_v22 = vpack.c.bf16 %v2399_v14, %v2138_v39  ;;  %v9089_v23 = vpack.c.bf16 %v474_v3, %v2399_v14 }
 0x131   : > { %v696_v29 = vsel %vm667_vm2, %v608_v21, %v11574_v20  ;;  %v697_v30 = vsel %vm667_vm2, %v11417_v17, %v608_v21  ;;  %2028 = vrot.lane.b32.xlu1 %v11545_v48, %s11008_s14 }
 0x132   : > { %v734_v31 = vmul.f32 %v702_v16, %v697_v30  ;;  %v735_v1 = vmul.f32 %v703_v19, %v696_v29  ;;  %2026 = vrot.lane.b32.xlu0 %v11496_v13, %s11008_s14  ;;  %9054 = vmatprep.subr.bf16.mxu0 %v9053_v22 }
 0x133   : > { %9090 = vmatprep.subr.bf16.mxu1 %v9089_v23  ;;  %9056 = vmatpush1.bf16.msra.mxu0 %v9055_v24  ;;  %v11586_v38 = vpop.permute.xlu1 %870  ;;  %v1846_v24 = vld [vmem:[#allocation6 + $0x610] sm:$0xff] }
 0x134   : > { %9092 = vmatpush1.bf16.msra.mxu1 %v9091_v28  ;;  %v869_v39 = vpop.permute.xlu0 %868  ;;  %v11588_v40 = vpack.c.bf16 %v735_v1, %v474_v3  ;;  %v11590_v17 = vpack.c.bf16 %v734_v31, %v473_v18  ;;  %v1585_v18 = vld [vmem:[#allocation6 + $0x510] sm:$0xff]  ;;  %v1847_v28 = vld [vmem:[#allocation6 + $0x618] sm:$0xff] }
 0x135   : > { %v957_v41 = vsel %vm928_vm3, %v869_v39, %v11586_v38  ;;  %v958_v44 = vsel %vm928_vm3, %v11450_v36, %v869_v39  ;;  %2289 = vrot.lane.b32.xlu1 %v11545_v48, %s11009_s11 }
 0x136   : > { %v995_v45 = vmul.f32 %v963_v34, %v958_v44  ;;  %v996_v46 = vmul.f32 %v964_v37, %v957_v41  ;;  %2287 = vrot.lane.b32.xlu0 %v11496_v13, %s11009_s11  ;;  %9058 = vmatprep.subr.bf16.mxu0 %v11588_v40 }
 0x137   : > { %9060 = vmatpush1.bf16.msra.mxu0 %v11590_v17  ;;  %v11607_v54 = vpop.permute.xlu1 %1131 }
 0x138   : > { %v1130_v55 = vpop.permute.xlu0 %1129  ;;  %v9093_v36 = vpack.c.bf16 %v996_v46, %v735_v1  ;;  %v9095_v35 = vpack.c.bf16 %v995_v45, %v734_v31 }
 0x139   : > { %v1218_v56 = vsel %vm1189_vm4, %v1130_v55, %v11607_v54  ;;  %v1219_v13 = vsel %vm1189_vm4, %v11461_v43, %v1130_v55  ;;  %362 = vrot.lane.b32.xlu1 %v11604_v53, %s11003_s29 }
 0x13a   : > { %v1256_v57 = vmul.f32 %v1224_v47, %v1219_v13  ;;  %v1257_v59 = vmul.f32 %v1225_v49, %v1218_v56  ;;  %360 = vrot.lane.b32.xlu0 %v11545_v48, %s11003_s29  ;;  %9094 = vmatprep.subr.bf16.mxu1 %v9093_v36  ;;  %v11672_v36 = vld [vmem:[%s11244_s12 + $0x60] sm:$0xff]  ;;  %v2368_v56 = vld [vmem:[#allocation6 + $0x810] sm:$0xff] }
 0x13b   : > { %9096 = vmatpush1.bf16.msra.mxu1 %v9095_v35  ;;  %v11619_v63 = vpop.permute.xlu1 %1494  ;;  %v2369_v35 = vld [vmem:[#allocation6 + $0x818] sm:$0xff] }
 0x13c   : > { %v1493_v3 = vpop.permute.xlu0 %1492  ;;  %v11621_v10 = vpack.c.bf16 %v1257_v59, %v996_v46  ;;  %v9097_v14 = vpack.c.bf16 %v11317_v5, %v1257_v59  ;;  %v11624_v43 = vpack.c.bf16 %v1256_v57, %v995_v45  ;;  %v9099_v16 = vpack.c.bf16 %v11294_v4, %v1256_v57 }
 0x13d   : > { %v1578_v19 = vsel %vm1550_vm5, %v1493_v3, %v11619_v63  ;;  %v1579_v21 = vsel %vm1550_vm5, %v11485_v58, %v1493_v3  ;;  %625 = vrot.lane.b32.xlu1 %v11604_v53, %s11002_s27 }
 0x13e   : > { %v1617_v22 = vmul.f32 %v1585_v18, %v1579_v21  ;;  %v1618_v23 = vmul.f32 %v1586_v62, %v1578_v19  ;;  %623 = vrot.lane.b32.xlu0 %v11545_v48, %s11002_s27  ;;  %9062 = vmatprep.subr.bf16.mxu0 %v11621_v10  ;;  %v443_v21 = vld [vmem:[#allocation6 + $0x20] sm:$0xff] }
 0x13f   : > { %9098 = vmatprep.subr.bf16.mxu1 %v9097_v14  ;;  %9064 = vmatpush1.bf16.msra.mxu0 %v11624_v43  ;;  %v11639_v29 = vpop.permute.xlu1 %1755 }
 0x140   : > { %9100 = vmatpush1.bf16.msra.mxu1 %v9099_v16  ;;  %v1754_v30 = vpop.permute.xlu0 %1753  ;;  %v11642_v58 = vpack.c.bf16 %v1618_v23, %v11317_v5  ;;  %v11645_v31 = vpack.c.bf16 %v1617_v22, %v11294_v4  ;;  %v2107_v4 = vld [vmem:[#allocation6 + $0x710] sm:$0xff]  ;;  %v2108_v5 = vld [vmem:[#allocation6 + $0x718] sm:$0xff] }
 0x141   : > { %v1839_v1 = vsel %vm1811_vm6, %v1754_v30, %v11639_v29  ;;  %v1840_v34 = vsel %vm1811_vm6, %v11510_v2, %v1754_v30  ;;  %886 = vrot.lane.b32.xlu1 %v11604_v53, %s11004_s16  ;;  %v704_v30 = vld [vmem:[#allocation6 + $0x120] sm:$0xff] }
 0x142   : > { %v1878_v37 = vmul.f32 %v1846_v24, %v1840_v34  ;;  %v1879_v39 = vmul.f32 %v1847_v28, %v1839_v1  ;;  %884 = vrot.lane.b32.xlu0 %v11545_v48, %s11004_s16  ;;  %9066 = vmatprep.subr.bf16.mxu0 %v11642_v58  ;;  %v444_v24 = vld [vmem:[#allocation6 + $0x28] sm:$0xff] }
 0x143   : > { %9068 = vmatpush1.bf16.msra.mxu0 %v11645_v31  ;;  %v11659_v41 = vpop.permute.xlu1 %2016  ;;  %v705_v1 = vld [vmem:[#allocation6 + $0x128] sm:$0xff] }
 0x144   : > { %v2015_v44 = vpop.permute.xlu0 %2014  ;;  %v9101_v45 = vpack.c.bf16 %v1879_v39, %v1618_v23  ;;  %v9103_v2 = vpack.c.bf16 %v1878_v37, %v1617_v22  ;;  %v11708_v23 = vld [vmem:[#allocation8] sm:$0xff] }
 0x145   : > { %v2100_v46 = vsel %vm2072_vm7, %v2015_v44, %v11659_v41  ;;  %v2101_v47 = vsel %vm2072_vm7, %v11523_v33, %v2015_v44  ;;  %1147 = vrot.lane.b32.xlu1 %v11604_v53, %s11005_s19 }
 0x146   : > { %v2139_v49 = vmul.f32 %v2107_v4, %v2101_v47  ;;  %v2140_v55 = vmul.f32 %v2108_v5, %v2100_v46  ;;  %1145 = vrot.lane.b32.xlu0 %v11545_v48, %s11005_s19  ;;  %9102 = vmatprep.subr.bf16.mxu1 %v9101_v45  ;;  %v966_v47 = vld [vmem:[#allocation6 + $0x228] sm:$0xff] }
 0x147   : > { %9104 = vmatpush1.bf16.msra.mxu1 %v9103_v2  ;;  %v11674_v13 = vpop.permute.xlu1 %2277 }
 0x148   : > { %v2276_v57 = vpop.permute.xlu0 %2275  ;;  %v11676_v59 = vpack.c.bf16 %v2140_v55, %v1879_v39  ;;  %v11678_v33 = vpack.c.bf16 %v2139_v49, %v1878_v37 }
 0x149   : > { %v2361_v18 = vsel %vm2333_vm8, %v2276_v57, %v11674_v13  ;;  %v2362_v48 = vsel %vm2333_vm8, %v11562_v61, %v2276_v57  ;;  %1510 = vrot.lane.b32.xlu1 %v11672_v36, %s11006_s20 }
 0x14a   : > { %1508 = vrot.lane.b32.xlu0 %v11604_v53, %s11006_s20  ;;  %v11690_v62 = vmul.f32 %v2369_v35, %v2361_v18  ;;  %v11692_v3 = vmul.f32 %v2368_v56, %v2362_v48  ;;  %9070 = vmatprep.subr.bf16.mxu0 %v11676_v59  ;;  %v1227_v35 = vld [vmem:[#allocation6 + $0x328] sm:$0xff] }
 0x14b   : > { %9072 = vmatpush1.bf16.msra.mxu0 %v11678_v33  ;;  %v11696_v14 = vpop.permute.xlu1 %350  ;;  %v11760_v56 = vld [vmem:[%s11244_s12 + $0x68] sm:$0xff] }
 0x14c   : > { %v349_v16 = vpop.permute.xlu0 %348  ;;  %v9105_v19 = vpack.c.bf16 %v11690_v62, %v2140_v55  ;;  %v9107_v61 = vpack.c.bf16 %v11692_v3, %v2139_v49  ;;  %3458 = vmatprep.subr.mxu0 %v11690_v62  ;;  %v1226_v55 = vld [vmem:[#allocation6 + $0x320] sm:$0xff] }
 0x14d   : > { %v434_v22 = vsel %vm406_vm1, %v11547_v52, %v349_v16  ;;  %1771 = vrot.lane.b32.xlu1 %v11672_v36, %s11007_s10  ;;  %v433_v28 = vsel %vm406_vm1, %v349_v16, %v11696_v14 }
 0x14e   : > { %1769 = vrot.lane.b32.xlu0 %v11604_v53, %s11007_s10  ;;  %9106 = vmatprep.subr.bf16.mxu1 %v9105_v19  ;;  %v11716_v37 = vmul.f32 %v443_v21, %v434_v22  ;;  %v476_v5 = vmul.f32 %v444_v24, %v433_v28 }
 0x14f   : > { %3459 = vmatpush1.msra.mxu0 %v11692_v3  ;;  %9108 = vmatpush1.bf16.msra.mxu1 %v9107_v61  ;;  %v11714_v52 = vpop.permute.xlu1 %613  ;;  %v1588_v61 = vld [vmem:[#allocation6 + $0x528] sm:$0xff] }
 0x150   : > { %v612_v34 = vpop.permute.xlu0 %611  ;;  %9126 = vmatprep.subr.bf16.mxu0 %v11588_v40  ;;  %3471 = vmatmul.mubr.f32.vlgmr.msra.gmra.mrb[0].mxu0 %v11708_v23 }
 0x151   : > { %v694_v39 = vsel %vm667_vm2, %v612_v34, %v11714_v52  ;;  %v695_v4 = vsel %vm667_vm2, %v11574_v20, %v612_v34  ;;  %9128 = vmatpush1.bf16.msra.mxu0 %v11590_v17  ;;  %2032 = vrot.lane.b32.xlu1 %v11672_v36, %s11008_s14  ;;  %v965_v17 = vld [vmem:[#allocation6 + $0x220] sm:$0xff] }
 0x152   : > { %v11726_v44 = vmul.f32 %v704_v30, %v695_v4  ;;  %v11728_v45 = vmul.f32 %v705_v1, %v694_v39  ;;  %2030 = vrot.lane.b32.xlu0 %v11604_v53, %s11008_s14  ;;  %9130 = vmatprep.subr.bf16.mxu0 %v11621_v10  ;;  %v9141_v1 = vpack.c.bf16 %v476_v5, %v11690_v62  ;;  %v1848_v4 = vld [vmem:[#allocation6 + $0x620] sm:$0xff] }
 0x153   : > { %v11736_v40 = vpop.permute.xlu1 %874  ;;  %8992 = vmatprep.mubr.msk.f32.mxu0 %vm3402_vm0, %v11350_v7  ;;  %v9143_v39 = vpack.c.bf16 %v11716_v37, %v11692_v3 }
 0x154   : > { %v873_v20 = vpop.permute.xlu0 %872  ;;  %v11739_v2 = vpack.c.bf16 %v11728_v45, %v476_v5  ;;  %v11743_v46 = vpack.c.bf16 %v11726_v44, %v11716_v37  ;;  %v2109_v37 = vld [vmem:[#allocation6 + $0x720] sm:$0xff] }
 0x155   : > { %v956_v10 = vsel %vm928_vm3, %v11586_v38, %v873_v20  ;;  %9132 = vmatpush1.bf16.msra.mxu0 %v11624_v43  ;;  %2293 = vrot.lane.b32.xlu1 %v11672_v36, %s11009_s11  ;;  %v955_v49 = vsel %vm928_vm3, %v873_v20, %v11736_v40 }
 0x156   : > { %2291 = vrot.lane.b32.xlu0 %v11604_v53, %s11009_s11  ;;  %9110 = vmatprep.subr.bf16.mxu1 %v11739_v2  ;;  %v997_v57 = vmul.f32 %v965_v17, %v956_v10  ;;  %v998_v48 = vmul.f32 %v966_v47, %v955_v49  ;;  %v1849_v17 = vld [vmem:[#allocation6 + $0x628] sm:$0xff] }
 0x157   : > { %9134 = vmatprep.subr.bf16.mxu0 %v11642_v58  ;;  %9112 = vmatpush1.bf16.msra.mxu1 %v11743_v46  ;;  %v11764_v38 = vpop.permute.xlu1 %1135  ;;  %v1587_v58 = vld [vmem:[#allocation6 + $0x520] sm:$0xff]  ;;  %v2110_v47 = vld [vmem:[#allocation6 + $0x728] sm:$0xff] }
 0x158   : > { %v1134_v43 = vpop.permute.xlu0 %1133  ;;  %v9145_v20 = vpack.c.bf16 %v998_v48, %v11728_v45 }
 0x159   : > { %v1216_v18 = vsel %vm1189_vm4, %v1134_v43, %v11764_v38  ;;  %v1217_v53 = vsel %vm1189_vm4, %v11607_v54, %v1134_v43  ;;  %9136 = vmatpush1.bf16.msra.mxu0 %v11645_v31  ;;  %366 = vrot.lane.b32.xlu1 %v11760_v56, %s11003_s29 }
 0x15a   : > { %v11772_v16 = vmul.f32 %v1226_v55, %v1217_v53  ;;  %v1259_v19 = vmul.f32 %v1227_v35, %v1216_v18  ;;  %364 = vrot.lane.b32.xlu0 %v11672_v36, %s11003_s29  ;;  %9138 = vmatprep.subr.bf16.mxu0 %v11676_v59  ;;  %v11842_v53 = vld [vmem:[%s11244_s12 + $0x70] sm:$0xff] }
 0x15b   : > { %v11780_v21 = vpop.permute.xlu1 %1498 }
 0x15c   : > { %v1497_v22 = vpop.permute.xlu0 %1496  ;;  %v11782_v54 = vpack.c.bf16 %v1259_v19, %v998_v48  ;;  %v11785_v24 = vpack.c.bf16 %v11772_v16, %v997_v57  ;;  %v9149_v43 = vpack.c.bf16 %v11365_v8, %v1259_v19  ;;  %v2371_v48 = vld [vmem:[#allocation6 + $0x828] sm:$0xff] }
 0x15d   : > { %v1576_v31 = vsel %vm1550_vm5, %v1497_v22, %v11780_v21  ;;  %v1577_v28 = vsel %vm1550_vm5, %v11619_v63, %v1497_v22  ;;  %9140 = vmatpush1.bf16.msra.mxu0 %v11678_v33  ;;  %629 = vrot.lane.b32.xlu1 %v11760_v56, %s11002_s27 }
 0x15e   : > { %v11793_v30 = vmul.f32 %v1587_v58, %v1577_v28  ;;  %v1620_v59 = vmul.f32 %v1588_v61, %v1576_v31  ;;  %627 = vrot.lane.b32.xlu0 %v11672_v36, %s11002_s27  ;;  %9114 = vmatprep.subr.bf16.mxu1 %v11782_v54  ;;  %v9151_v58 = vpack.c.bf16 %v11340_v6, %v11772_v16  ;;  %v2370_v31 = vld [vmem:[#allocation6 + $0x820] sm:$0xff] }
 0x15f   : > { %9142 = vmatprep.subr.bf16.mxu0 %v9141_v1  ;;  %9116 = vmatpush1.bf16.msra.mxu1 %v11785_v24  ;;  %v11803_v34 = vpop.permute.xlu1 %1759 }
 0x160   : > { %v1758_v63 = vpop.permute.xlu0 %1757  ;;  %v11808_v33 = vpack.c.bf16 %v1620_v59, %v11365_v8  ;;  %v11812_v62 = vpack.c.bf16 %v11793_v30, %v11340_v6 }
 0x161   : > { %v1838_v5 = vsel %vm1811_vm6, %v11639_v29, %v1758_v63  ;;  %9144 = vmatpush1.bf16.msra.mxu0 %v9143_v39  ;;  %890 = vrot.lane.b32.xlu1 %v11760_v56, %s11004_s16  ;;  %v1837_v3 = vsel %vm1811_vm6, %v1758_v63, %v11803_v34  ;;  %v9147_v29 = vpack.c.bf16 %v997_v57, %v11726_v44 }
 0x162   : > { %888 = vrot.lane.b32.xlu0 %v11672_v36, %s11004_s16  ;;  %9118 = vmatprep.subr.bf16.mxu1 %v11808_v33  ;;  %v1880_v49 = vmul.f32 %v1848_v4, %v1838_v5  ;;  %v1881_v18 = vmul.f32 %v1849_v17, %v1837_v3  ;;  %v707_v17 = vld [vmem:[#allocation6 + $0x138] sm:$0xff] }
 0x163   : > { %9146 = vmatprep.subr.bf16.mxu0 %v9145_v20  ;;  %9120 = vmatpush1.bf16.msra.mxu1 %v11812_v62  ;;  %v11828_v10 = vpop.permute.xlu1 %2020  ;;  %v706_v20 = vld [vmem:[#allocation6 + $0x130] sm:$0xff] }
 0x164   : > { %v2019_v45 = vpop.permute.xlu0 %2018  ;;  %v9153_v6 = vpack.c.bf16 %v1881_v18, %v1620_v59  ;;  %v9155_v28 = vpack.c.bf16 %v1880_v49, %v11793_v30  ;;  %v445_v59 = vld [vmem:[#allocation6 + $0x30] sm:$0xff]  ;;  %v446_v30 = vld [vmem:[#allocation6 + $0x38] sm:$0xff] }
 0x165   : > { %v2098_v55 = vsel %vm2072_vm7, %v2019_v45, %v11828_v10  ;;  %v2099_v35 = vsel %vm2072_vm7, %v11659_v41, %v2019_v45  ;;  %9148 = vmatpush1.bf16.msra.mxu0 %v9147_v29  ;;  %1151 = vrot.lane.b32.xlu1 %v11760_v56, %s11005_s19 }
 0x166   : > { %v2141_v44 = vmul.f32 %v2109_v37, %v2099_v35  ;;  %v2142_v57 = vmul.f32 %v2110_v47, %v2098_v55  ;;  %1149 = vrot.lane.b32.xlu0 %v11672_v36, %s11005_s19  ;;  %9150 = vmatprep.subr.bf16.mxu0 %v9149_v43 }
 0x167   : > { %v11846_v41 = vpop.permute.xlu1 %2281 }
 0x168   : > { %v2280_v8 = vpop.permute.xlu0 %2279  ;;  %v11848_v19 = vpack.c.bf16 %v2142_v57, %v1881_v18  ;;  %v11850_v61 = vpack.c.bf16 %v2141_v44, %v1880_v49 }
 0x169   : > { %v2359_v22 = vsel %vm2333_vm8, %v2280_v8, %v11846_v41  ;;  %v2360_v36 = vsel %vm2333_vm8, %v11674_v13, %v2280_v8  ;;  %9152 = vmatpush1.bf16.msra.mxu0 %v9151_v58  ;;  %1514 = vrot.lane.b32.xlu1 %v11842_v53, %s11006_s20  ;;  %v11935_v8 = vld [vmem:[%s11244_s12 + $0x78] sm:$0xff] }
 0x16a   : > { %v11860_v16 = vmul.f32 %v2371_v48, %v2359_v22  ;;  %1512 = vrot.lane.b32.xlu0 %v11760_v56, %s11006_s20  ;;  %9122 = vmatprep.subr.bf16.mxu1 %v11848_v19  ;;  %v11870_v39 = vmul.f32 %v2370_v31, %v2360_v36  ;;  %v1229_v48 = vld [vmem:[#allocation6 + $0x338] sm:$0xff] }
 0x16b   : > { %9154 = vmatprep.subr.bf16.mxu0 %v9153_v6  ;;  %9124 = vmatpush1.bf16.msra.mxu1 %v11850_v61  ;;  %v11867_v1 = vpop.permute.xlu1 %354  ;;  %v1589_v6 = vld [vmem:[#allocation6 + $0x530] sm:$0xff] }
 0x16c   : > { %v353_v13 = vpop.permute.xlu0 %352  ;;  %v9157_v63 = vpack.c.bf16 %v11860_v16, %v2142_v57  ;;  %3529 = vmatprep.subr.mxu1 %v11860_v16  ;;  %v9159_v37 = vpack.c.bf16 %v11870_v39, %v2141_v44  ;;  %v968_v44 = vld [vmem:[#allocation6 + $0x238] sm:$0xff] }
 0x16d   : > { %v432_v4 = vsel %vm406_vm1, %v11696_v14, %v353_v13  ;;  %9156 = vmatpush1.bf16.msra.mxu0 %v9155_v28  ;;  %1775 = vrot.lane.b32.xlu1 %v11842_v53, %s11007_s10  ;;  %v431_v5 = vsel %vm406_vm1, %v353_v13, %v11867_v1  ;;  %v1590_v28 = vld [vmem:[#allocation6 + $0x538] sm:$0xff] }
 0x16e   : > { %1773 = vrot.lane.b32.xlu0 %v11760_v56, %s11007_s10  ;;  %9158 = vmatprep.subr.bf16.mxu0 %v9157_v63  ;;  %v11887_v47 = vmul.f32 %v445_v59, %v432_v4  ;;  %v478_v49 = vmul.f32 %v446_v30, %v431_v5 }
 0x16f   : > { %3530 = vmatpush1.msra.mxu1 %v11870_v39  ;;  %v11884_v3 = vpop.permute.xlu1 %617 }
 0x170   : > { %v616_v14 = vpop.permute.xlu0 %615  ;;  %9178 = vmatprep.subr.bf16.mxu1 %v11739_v2  ;;  %3542 = vmatmul.mubr.f32.vlgmr.msra.gmra.mrb[0].mxu1 %v11708_v23 }
 0x171   : > { %v692_v29 = vsel %vm667_vm2, %v616_v14, %v11884_v3  ;;  %v693_v45 = vsel %vm667_vm2, %v11714_v52, %v616_v14  ;;  %9160 = vmatpush1.bf16.msra.mxu0 %v9159_v37  ;;  %9180 = vmatpush1.bf16.msra.mxu1 %v11743_v46  ;;  %v967_v46 = vld [vmem:[#allocation6 + $0x230] sm:$0xff] }
 0x172   : > { %v11897_v55 = vmul.f32 %v706_v20, %v693_v45  ;;  %v11899_v35 = vmul.f32 %v707_v17, %v692_v29  ;;  %2036 = vrot.lane.b32.xlu1 %v11842_v53, %s11008_s14  ;;  %2034 = vrot.lane.b32.xlu0 %v11760_v56, %s11008_s14  ;;  %v9195_v17 = vpack.c.bf16 %v11887_v47, %v11870_v39  ;;  %v1850_v14 = vld [vmem:[#allocation6 + $0x630] sm:$0xff] }
 0x173   : > { %9182 = vmatprep.subr.bf16.mxu1 %v11782_v54  ;;  %v11911_v52 = vpop.permute.xlu1 %878  ;;  %8993 = vmatprep.mubr.msk.f32.mxu1 %vm3402_vm0, %v11350_v7  ;;  %v1228_v7 = vld [vmem:[#allocation6 + $0x330] sm:$0xff] }
 0x174   : > { %v11908_v2 = vpack.c.bf16 %v11897_v55, %v11887_v47  ;;  %v877_v43 = vpop.permute.xlu0 %876  ;;  %v11914_v18 = vpack.c.bf16 %v11899_v35, %v478_v49  ;;  %v2111_v39 = vld [vmem:[#allocation6 + $0x730] sm:$0xff]  ;;  %v2112_v47 = vld [vmem:[#allocation6 + $0x738] sm:$0xff] }
 0x175   : > { %9184 = vmatpush1.bf16.msra.mxu1 %v11785_v24  ;;  %v953_v54 = vsel %vm928_vm3, %v877_v43, %v11911_v52  ;;  %v954_v57 = vsel %vm928_vm3, %v11736_v40, %v877_v43 }
 0x176   : > { %9162 = vmatprep.subr.bf16.mxu0 %v11914_v18  ;;  %2297 = vrot.lane.b32.xlu1 %v11842_v53, %s11009_s11  ;;  %v1000_v36 = vmul.f32 %v968_v44, %v953_v54 }
 0x177   : > { %2295 = vrot.lane.b32.xlu0 %v11760_v56, %s11009_s11  ;;  %9186 = vmatprep.subr.bf16.mxu1 %v11808_v33  ;;  %v11932_v24 = vpop.permute.xlu1 %1139  ;;  %v999_v56 = vmul.f32 %v967_v46, %v954_v57 }
 0x178   : > { %9164 = vmatpush1.bf16.msra.mxu0 %v11908_v2  ;;  %v1138_v58 = vpop.permute.xlu0 %1137  ;;  %v9197_v37 = vpack.c.bf16 %v1000_v36, %v11899_v35 }
 0x179   : > { %v1214_v40 = vsel %vm1189_vm4, %v1138_v58, %v11932_v24  ;;  %v1215_v22 = vsel %vm1189_vm4, %v11764_v38, %v1138_v58  ;;  %9188 = vmatpush1.bf16.msra.mxu1 %v11812_v62  ;;  %v10736_v58 = vld [vmem:[%s11244_s12 + $0x30] sm:$0xff] }
 0x17a   : > { %v11943_v31 = vmul.f32 %v1228_v7, %v1215_v22  ;;  %v1261_v33 = vmul.f32 %v1229_v48, %v1214_v40  ;;  %370 = vrot.lane.b32.xlu1 %v11935_v8, %s11003_s29  ;;  %9190 = vmatprep.subr.bf16.mxu1 %v11848_v19  ;;  %v9193_v19 = vpack.c.bf16 %v478_v49, %v11860_v16  ;;  %v2373_v48 = vld [vmem:[#allocation6 + $0x838] sm:$0xff] }
 0x17b   : > { %368 = vrot.lane.b32.xlu0 %v11842_v53, %s11003_s29  ;;  %v11954_v38 = vpop.permute.xlu1 %1502  ;;  %v9199_v49 = vpack.c.bf16 %v999_v56, %v11897_v55 }
 0x17c   : > { %v11951_v13 = vpack.c.bf16 %v11943_v31, %v999_v56  ;;  %v1501_v63 = vpop.permute.xlu0 %1500  ;;  %v11956_v59 = vpack.c.bf16 %v1261_v33, %v1000_v36  ;;  %v9201_v44 = vpack.c.bf16 %v11403_v11, %v1261_v33  ;;  %v9203_v40 = vpack.c.bf16 %v10736_v58, %v11943_v31  ;;  %v12019_v56 = vld [vmem:[%s11244_s12 + $0x80] sm:$0xff]  ;;  %v2372_v33 = vld [vmem:[#allocation6 + $0x830] sm:$0xff] }
 0x17d   : > { %v1574_v62 = vsel %vm1550_vm5, %v1501_v63, %v11954_v38  ;;  %v1575_v4 = vsel %vm1550_vm5, %v11780_v21, %v1501_v63  ;;  %9192 = vmatpush1.bf16.msra.mxu1 %v11850_v61 }
 0x17e   : > { %v11964_v30 = vmul.f32 %v1589_v6, %v1575_v4  ;;  %v1622_v5 = vmul.f32 %v1590_v28, %v1574_v62  ;;  %9166 = vmatprep.subr.bf16.mxu0 %v11956_v59  ;;  %633 = vrot.lane.b32.xlu1 %v11935_v8, %s11002_s27 }
 0x17f   : > { %631 = vrot.lane.b32.xlu0 %v11842_v53, %s11002_s27  ;;  %9194 = vmatprep.subr.bf16.mxu1 %v9193_v19  ;;  %v11978_v21 = vpop.permute.xlu1 %1763  ;;  %v447_v19 = vld [vmem:[#allocation6 + $0x40] sm:$0xff] }
 0x180   : > { %v11975_v20 = vpack.c.bf16 %v11964_v30, %v11384_v9  ;;  %9168 = vmatpush1.bf16.msra.mxu0 %v11951_v13  ;;  %v1762_v61 = vpop.permute.xlu0 %1761  ;;  %v11983_v16 = vpack.c.bf16 %v1622_v5, %v11403_v11  ;;  %v1851_v9 = vld [vmem:[#allocation6 + $0x638] sm:$0xff] }
 0x181   : > { %9196 = vmatpush1.bf16.msra.mxu1 %v9195_v17  ;;  %v1835_v29 = vsel %vm1811_vm6, %v1762_v61, %v11978_v21  ;;  %v1836_v45 = vsel %vm1811_vm6, %v11803_v34, %v1762_v61  ;;  %v448_v17 = vld [vmem:[#allocation6 + $0x48] sm:$0xff] }
 0x182   : > { %9170 = vmatprep.subr.bf16.mxu0 %v11983_v16  ;;  %894 = vrot.lane.b32.xlu1 %v11935_v8, %s11004_s16  ;;  %v1882_v54 = vmul.f32 %v1850_v14, %v1836_v45  ;;  %v1883_v55 = vmul.f32 %v1851_v9, %v1835_v29  ;;  %v708_v14 = vld [vmem:[#allocation6 + $0x140] sm:$0xff] }
 0x183   : > { %892 = vrot.lane.b32.xlu0 %v11842_v53, %s11004_s16  ;;  %9198 = vmatprep.subr.bf16.mxu1 %v9197_v37  ;;  %v11999_v35 = vpop.permute.xlu1 %2024  ;;  %v709_v37 = vld [vmem:[#allocation6 + $0x148] sm:$0xff] }
 0x184   : > { %9172 = vmatpush1.bf16.msra.mxu0 %v11975_v20  ;;  %v2023_v43 = vpop.permute.xlu0 %2022  ;;  %v9205_v31 = vpack.c.bf16 %v1883_v55, %v1622_v5  ;;  %v9207_v63 = vpack.c.bf16 %v1882_v54, %v11964_v30 }
 0x185   : > { %v2096_v34 = vsel %vm2072_vm7, %v2023_v43, %v11999_v35  ;;  %v2097_v46 = vsel %vm2072_vm7, %v11828_v10, %v2023_v43  ;;  %9200 = vmatpush1.bf16.msra.mxu1 %v9199_v49 }
 0x186   : > { %v2143_v57 = vmul.f32 %v2111_v39, %v2097_v46  ;;  %v2144_v7 = vmul.f32 %v2112_v47, %v2096_v34  ;;  %1155 = vrot.lane.b32.xlu1 %v11935_v8, %s11005_s19  ;;  %9202 = vmatprep.subr.bf16.mxu1 %v9201_v44 }
 0x187   : > { %1153 = vrot.lane.b32.xlu0 %v11842_v53, %s11005_s19  ;;  %v12016_v10 = vpop.permute.xlu1 %2285 }
 0x188   : > { %v12014_v22 = vpack.c.bf16 %v2143_v57, %v1882_v54  ;;  %v2284_v11 = vpop.permute.xlu0 %2283  ;;  %v12021_v36 = vpack.c.bf16 %v2144_v7, %v1883_v55  ;;  %v12087_v54 = vld [vmem:[#allocation8 + $0x8] sm:$0xff] }
 0x189   : > { %v2357_v6 = vsel %vm2333_vm8, %v2284_v11, %v12016_v10  ;;  %v2358_v53 = vsel %vm2333_vm8, %v11846_v41, %v2284_v11  ;;  %9204 = vmatpush1.bf16.msra.mxu1 %v9203_v40  ;;  %v970_v55 = vld [vmem:[#allocation6 + $0x248] sm:$0xff] }
 0x18a   : > { %9174 = vmatprep.subr.bf16.mxu0 %v12021_v36  ;;  %v12030_v28 = vmul.f32 %v2373_v48, %v2357_v6  ;;  %1518 = vrot.lane.b32.xlu1 %v12019_v56, %s11006_s20  ;;  %v12037_v62 = vmul.f32 %v2372_v33, %v2358_v53  ;;  %v1231_v48 = vld [vmem:[#allocation6 + $0x348] sm:$0xff]  ;;  %v1591_v53 = vld [vmem:[#allocation6 + $0x540] sm:$0xff] }
 0x18b   : > { %1516 = vrot.lane.b32.xlu0 %v11935_v8, %s11006_s20  ;;  %9206 = vmatprep.subr.bf16.mxu1 %v9205_v31  ;;  %v12040_v41 = vpop.permute.xlu1 %358  ;;  %v12108_v40 = vld [vmem:[%s11244_s12 + $0x88] sm:$0xff] }
 0x18c   : > { %9176 = vmatpush1.bf16.msra.mxu0 %v12014_v22  ;;  %v357_v4 = vpop.permute.xlu0 %356  ;;  %v9209_v5 = vpack.c.bf16 %v12030_v28, %v2144_v7  ;;  %v9211_v29 = vpack.c.bf16 %v12037_v62, %v2143_v57  ;;  %v1230_v7 = vld [vmem:[#allocation6 + $0x340] sm:$0xff]  ;;  %v1592_v31 = vld [vmem:[#allocation6 + $0x548] sm:$0xff] }
 0x18d   : > { %3600 = vmatprep.subr.mxu0 %v12030_v28  ;;  %v430_v61 = vsel %vm406_vm1, %v11867_v1, %v357_v4  ;;  %9208 = vmatpush1.bf16.msra.mxu1 %v9207_v63  ;;  %v429_v30 = vsel %vm406_vm1, %v357_v4, %v12040_v41 }
 0x18e   : > { %1779 = vrot.lane.b32.xlu1 %v12019_v56, %s11007_s10  ;;  %9210 = vmatprep.subr.bf16.mxu1 %v9209_v5  ;;  %v12058_v45 = vmul.f32 %v447_v19, %v430_v61  ;;  %v480_v49 = vmul.f32 %v448_v17, %v429_v30 }
 0x18f   : > { %1777 = vrot.lane.b32.xlu0 %v11935_v8, %s11007_s10  ;;  %v12055_v9 = vpop.permute.xlu1 %621 }
 0x190   : > { %3601 = vmatpush1.msra.mxu0 %v12037_v62  ;;  %v620_v1 = vpop.permute.xlu0 %619  ;;  %v9247_v30 = vpack.c.bf16 %v12058_v45, %v12037_v62  ;;  %v1853_v62 = vld [vmem:[#allocation6 + $0x648] sm:$0xff] }
 0x191   : > { %9230 = vmatprep.subr.bf16.mxu0 %v11914_v18  ;;  %v690_v39 = vsel %vm667_vm2, %v620_v1, %v12055_v9  ;;  %v691_v47 = vsel %vm667_vm2, %v11884_v3, %v620_v1  ;;  %3613 = vmatmul.mubr.f32.vlgmr.msra.gmra.mrb[2].mxu0 %v11708_v23 }
 0x192   : > { %v12068_v43 = vmul.f32 %v708_v14, %v691_v47  ;;  %v12070_v34 = vmul.f32 %v709_v37, %v690_v39  ;;  %9212 = vmatpush1.bf16.msra.mxu1 %v9211_v29  ;;  %9232 = vmatpush1.bf16.msra.mxu0 %v11908_v2  ;;  %v969_v2 = vld [vmem:[#allocation6 + $0x240] sm:$0xff] }
 0x193   : > { %2040 = vrot.lane.b32.xlu1 %v12019_v56, %s11008_s14  ;;  %2038 = vrot.lane.b32.xlu0 %v11935_v8, %s11008_s14  ;;  %v12082_v3 = vpop.permute.xlu1 %882  ;;  %v10738_v14 = vld [vmem:[%s11244_s12 + $0x40] sm:$0xff] }
 0x194   : > { %v12079_v18 = vpack.c.bf16 %v12068_v43, %v12058_v45  ;;  %9234 = vmatprep.subr.bf16.mxu0 %v11956_v59  ;;  %v881_v46 = vpop.permute.xlu0 %880  ;;  %v12085_v44 = vpack.c.bf16 %v12070_v34, %v480_v49  ;;  %8994 = vmatprep.mubr.msk.f32.mxu0 %vm3402_vm0, %v12087_v54  ;;  %v1852_v29 = vld [vmem:[#allocation6 + $0x640] sm:$0xff] }
 0x195   : > { %v951_v59 = vsel %vm928_vm3, %v881_v46, %v12082_v3  ;;  %v952_v57 = vsel %vm928_vm3, %v11911_v52, %v881_v46  ;;  %v2114_v46 = vld [vmem:[#allocation6 + $0x748] sm:$0xff] }
 0x196   : > { %9236 = vmatpush1.bf16.msra.mxu0 %v11951_v13  ;;  %9214 = vmatprep.subr.bf16.mxu1 %v12085_v44  ;;  %v1002_v33 = vmul.f32 %v970_v55, %v951_v59 }
 0x197   : > { %2301 = vrot.lane.b32.xlu1 %v12019_v56, %s11009_s11  ;;  %2299 = vrot.lane.b32.xlu0 %v11935_v8, %s11009_s11  ;;  %v12105_v13 = vpop.permute.xlu1 %1143  ;;  %v1001_v8 = vmul.f32 %v969_v2, %v952_v57 }
 0x198   : > { %9238 = vmatprep.subr.bf16.mxu0 %v11983_v16  ;;  %9216 = vmatpush1.bf16.msra.mxu1 %v12079_v18  ;;  %v1142_v58 = vpop.permute.xlu0 %1141  ;;  %v9249_v39 = vpack.c.bf16 %v1002_v33, %v12070_v34 }
 0x199   : > { %v1212_v52 = vsel %vm1189_vm4, %v1142_v58, %v12105_v13  ;;  %v1213_v11 = vsel %vm1189_vm4, %v11932_v24, %v1142_v58  ;;  %v9251_v2 = vpack.c.bf16 %v1001_v8, %v12068_v43 }
 0x19a   : > { %v12116_v6 = vmul.f32 %v1230_v7, %v1213_v11  ;;  %v1263_v16 = vmul.f32 %v1231_v48, %v1212_v52  ;;  %9240 = vmatpush1.bf16.msra.mxu0 %v11975_v20  ;;  %v2375_v52 = vld [vmem:[#allocation6 + $0x848] sm:$0xff] }
 0x19b   : > { %374 = vrot.lane.b32.xlu1 %v12108_v40, %s11003_s29  ;;  %372 = vrot.lane.b32.xlu0 %v12019_v56, %s11003_s29  ;;  %v12127_v24 = vpop.permute.xlu1 %1506 }
 0x19c   : > { %v12124_v63 = vpack.c.bf16 %v12116_v6, %v1001_v8  ;;  %9242 = vmatprep.subr.bf16.mxu0 %v12021_v36  ;;  %v1505_v4 = vpop.permute.xlu0 %1504  ;;  %v12129_v5 = vpack.c.bf16 %v1263_v16, %v1002_v33  ;;  %v9245_v36 = vpack.c.bf16 %v480_v49, %v12030_v28  ;;  %v10739_v28 = vld [vmem:[%s11244_s12 + $0x48] sm:$0xff]  ;;  %v2113_v49 = vld [vmem:[#allocation6 + $0x740] sm:$0xff]  ;;  %v9255_v11 = vpack.c.bf16 %v10738_v14, %v12116_v6 }
 0x19d   : > { %v1572_v20 = vsel %vm1550_vm5, %v1505_v4, %v12127_v24  ;;  %v1573_v19 = vsel %vm1550_vm5, %v11954_v38, %v1505_v4  ;;  %v9253_v57 = vpack.c.bf16 %v10739_v28, %v1263_v16  ;;  %v12190_v16 = vld [vmem:[%s11244_s12 + $0x90] sm:$0xff] }
 0x19e   : > { %v12137_v61 = vmul.f32 %v1591_v53, %v1573_v19  ;;  %v1624_v17 = vmul.f32 %v1592_v31, %v1572_v20  ;;  %9244 = vmatpush1.bf16.msra.mxu0 %v12014_v22  ;;  %9218 = vmatprep.subr.bf16.mxu1 %v12129_v5  ;;  %v2374_v31 = vld [vmem:[#allocation6 + $0x840] sm:$0xff] }
 0x19f   : > { %637 = vrot.lane.b32.xlu1 %v12108_v40, %s11002_s27  ;;  %635 = vrot.lane.b32.xlu0 %v12019_v56, %s11002_s27  ;;  %v12153_v22 = vpop.permute.xlu1 %1767 }
 0x1a0   : > { %v12150_v38 = vpack.c.bf16 %v12137_v61, %v10738_v14  ;;  %9246 = vmatprep.subr.bf16.mxu0 %v9245_v36  ;;  %9220 = vmatpush1.bf16.msra.mxu1 %v12124_v63  ;;  %v1766_v37 = vpop.permute.xlu0 %1765  ;;  %v12156_v1 = vpack.c.bf16 %v1624_v17, %v10739_v28  ;;  %v449_v14 = vld [vmem:[#allocation6 + $0x50] sm:$0xff]  ;;  %v450_v28 = vld [vmem:[#allocation6 + $0x58] sm:$0xff] }
 0x1a1   : > { %v1833_v45 = vsel %vm1811_vm6, %v1766_v37, %v12153_v22  ;;  %v1834_v47 = vsel %vm1811_vm6, %v11978_v21, %v1766_v37 }
 0x1a2   : > { %9248 = vmatpush1.bf16.msra.mxu0 %v9247_v30  ;;  %9222 = vmatprep.subr.bf16.mxu1 %v12156_v1  ;;  %v1884_v7 = vmul.f32 %v1852_v29, %v1834_v47  ;;  %v1885_v48 = vmul.f32 %v1853_v62, %v1833_v45  ;;  %v710_v29 = vld [vmem:[#allocation6 + $0x150] sm:$0xff] }
 0x1a3   : > { %898 = vrot.lane.b32.xlu1 %v12108_v40, %s11004_s16  ;;  %896 = vrot.lane.b32.xlu0 %v12019_v56, %s11004_s16  ;;  %v12172_v34 = vpop.permute.xlu1 %2028 }
 0x1a4   : > { %9250 = vmatprep.subr.bf16.mxu0 %v9249_v39  ;;  %9224 = vmatpush1.bf16.msra.mxu1 %v12150_v38  ;;  %v2027_v55 = vpop.permute.xlu0 %2026  ;;  %v9257_v6 = vpack.c.bf16 %v1885_v48, %v1624_v17  ;;  %v9259_v19 = vpack.c.bf16 %v1884_v7, %v12137_v61  ;;  %v711_v39 = vld [vmem:[#allocation6 + $0x158] sm:$0xff] }
 0x1a5   : > { %v2094_v21 = vsel %vm2072_vm7, %v2027_v55, %v12172_v34  ;;  %v2095_v59 = vsel %vm2072_vm7, %v11999_v35, %v2027_v55 }
 0x1a6   : > { %v2145_v58 = vmul.f32 %v2113_v49, %v2095_v59  ;;  %v2146_v43 = vmul.f32 %v2114_v46, %v2094_v21  ;;  %9252 = vmatpush1.bf16.msra.mxu0 %v9251_v2 }
 0x1a7   : > { %1159 = vrot.lane.b32.xlu1 %v12108_v40, %s11005_s19  ;;  %1157 = vrot.lane.b32.xlu0 %v12019_v56, %s11005_s19  ;;  %v12187_v33 = vpop.permute.xlu1 %2289 }
 0x1a8   : > { %v12185_v8 = vpack.c.bf16 %v2145_v58, %v1884_v7  ;;  %9254 = vmatprep.subr.bf16.mxu0 %v9253_v57  ;;  %v2288_v35 = vpop.permute.xlu0 %2287  ;;  %v12192_v53 = vpack.c.bf16 %v2146_v43, %v1885_v48  ;;  %v972_v57 = vld [vmem:[#allocation6 + $0x258] sm:$0xff]  ;;  %v1232_v48 = vld [vmem:[#allocation6 + $0x350] sm:$0xff] }
 0x1a9   : > { %v2355_v4 = vsel %vm2333_vm8, %v2288_v35, %v12187_v33  ;;  %v2356_v56 = vsel %vm2333_vm8, %v12016_v10, %v2288_v35 }
 0x1aa   : > { %9256 = vmatpush1.bf16.msra.mxu0 %v9255_v11  ;;  %9226 = vmatprep.subr.bf16.mxu1 %v12192_v53  ;;  %v12201_v20 = vmul.f32 %v2375_v52, %v2355_v4  ;;  %v12208_v36 = vmul.f32 %v2374_v31, %v2356_v56  ;;  %v12277_v52 = vld [vmem:[%s11244_s12 + $0x98] sm:$0xff]  ;;  %v1593_v4 = vld [vmem:[#allocation6 + $0x550] sm:$0xff] }
 0x1ab   : > { %1522 = vrot.lane.b32.xlu1 %v12190_v16, %s11006_s20  ;;  %1520 = vrot.lane.b32.xlu0 %v12108_v40, %s11006_s20  ;;  %v12211_v10 = vpop.permute.xlu1 %362  ;;  %v1594_v56 = vld [vmem:[#allocation6 + $0x558] sm:$0xff] }
 0x1ac   : > { %9258 = vmatprep.subr.bf16.mxu0 %v9257_v6  ;;  %9228 = vmatpush1.bf16.msra.mxu1 %v12185_v8  ;;  %v361_v30 = vpop.permute.xlu0 %360  ;;  %v9261_v17 = vpack.c.bf16 %v12201_v20, %v2146_v43  ;;  %v9263_v45 = vpack.c.bf16 %v12208_v36, %v2145_v58  ;;  %v1233_v58 = vld [vmem:[#allocation6 + $0x358] sm:$0xff] }
 0x1ad   : > { %3671 = vmatprep.subr.mxu1 %v12201_v20  ;;  %v428_v37 = vsel %vm406_vm1, %v12040_v41, %v361_v30  ;;  %v427_v61 = vsel %vm406_vm1, %v361_v30, %v12211_v10 }
 0x1ae   : > { %9260 = vmatpush1.bf16.msra.mxu0 %v9259_v19  ;;  %v12229_v47 = vmul.f32 %v449_v14, %v428_v37  ;;  %v482_v2 = vmul.f32 %v450_v28, %v427_v61  ;;  %v10740_v61 = vld [vmem:[%s11244_s12 + $0x50] sm:$0xff] }
 0x1af   : > { %1783 = vrot.lane.b32.xlu1 %v12190_v16, %s11007_s10  ;;  %1781 = vrot.lane.b32.xlu0 %v12108_v40, %s11007_s10  ;;  %v12226_v62 = vpop.permute.xlu1 %625 }
 0x1b0   : > { %9262 = vmatprep.subr.bf16.mxu0 %v9261_v17  ;;  %3672 = vmatpush1.msra.mxu1 %v12208_v36  ;;  %v624_v41 = vpop.permute.xlu0 %623  ;;  %v9299_v28 = vpack.c.bf16 %v12229_v47, %v12208_v36 }
 0x1b1   : > { %9282 = vmatprep.subr.bf16.mxu1 %v12085_v44  ;;  %v688_v49 = vsel %vm667_vm2, %v624_v41, %v12226_v62  ;;  %v689_v46 = vsel %vm667_vm2, %v12055_v9, %v624_v41  ;;  %3684 = vmatmul.mubr.f32.vlgmr.msra.gmra.mrb[2].mxu1 %v11708_v23 }
 0x1b2   : > { %v12239_v55 = vmul.f32 %v710_v29, %v689_v46  ;;  %v12241_v21 = vmul.f32 %v711_v39, %v688_v49  ;;  %9264 = vmatpush1.bf16.msra.mxu0 %v9263_v45  ;;  %9284 = vmatpush1.bf16.msra.mxu1 %v12079_v18  ;;  %v971_v18 = vld [vmem:[#allocation6 + $0x250] sm:$0xff]  ;;  %v1855_v45 = vld [vmem:[#allocation6 + $0x658] sm:$0xff] }
 0x1b3   : > { %2044 = vrot.lane.b32.xlu1 %v12190_v16, %s11008_s14  ;;  %2042 = vrot.lane.b32.xlu0 %v12108_v40, %s11008_s14  ;;  %v12253_v23 = vpop.permute.xlu1 %886  ;;  %v1854_v49 = vld [vmem:[#allocation6 + $0x650] sm:$0xff] }
 0x1b4   : > { %v12250_v44 = vpack.c.bf16 %v12239_v55, %v12229_v47  ;;  %9286 = vmatprep.subr.bf16.mxu1 %v12129_v5  ;;  %v885_v9 = vpop.permute.xlu0 %884  ;;  %v12256_v59 = vpack.c.bf16 %v12241_v21, %v482_v2  ;;  %8995 = vmatprep.mubr.msk.f32.mxu1 %vm3402_vm0, %v12087_v54 }
 0x1b5   : > { %v949_v5 = vsel %vm928_vm3, %v885_v9, %v12253_v23  ;;  %v950_v7 = vsel %vm928_vm3, %v12082_v3, %v885_v9  ;;  %v2116_v9 = vld [vmem:[#allocation6 + $0x758] sm:$0xff] }
 0x1b6   : > { %9288 = vmatpush1.bf16.msra.mxu1 %v12124_v63  ;;  %9266 = vmatprep.subr.bf16.mxu0 %v12256_v59  ;;  %v1004_v35 = vmul.f32 %v972_v57, %v949_v5 }
 0x1b7   : > { %2305 = vrot.lane.b32.xlu1 %v12190_v16, %s11009_s11  ;;  %2303 = vrot.lane.b32.xlu0 %v12108_v40, %s11009_s11  ;;  %v12274_v63 = vpop.permute.xlu1 %1147  ;;  %v1003_v40 = vmul.f32 %v971_v18, %v950_v7 }
 0x1b8   : > { %9290 = vmatprep.subr.bf16.mxu1 %v12156_v1  ;;  %9268 = vmatpush1.bf16.msra.mxu0 %v12250_v44  ;;  %v1146_v43 = vpop.permute.xlu0 %1145  ;;  %v9301_v41 = vpack.c.bf16 %v1004_v35, %v12241_v21  ;;  %v2115_v21 = vld [vmem:[#allocation6 + $0x750] sm:$0xff] }
 0x1b9   : > { %v1210_v3 = vsel %vm1189_vm4, %v1146_v43, %v12274_v63  ;;  %v1211_v11 = vsel %vm1189_vm4, %v12105_v13, %v1146_v43  ;;  %v9303_v47 = vpack.c.bf16 %v1003_v40, %v12239_v55 }
 0x1ba   : > { %v12285_v31 = vmul.f32 %v1232_v48, %v1211_v11  ;;  %v1265_v1 = vmul.f32 %v1233_v58, %v1210_v3  ;;  %9292 = vmatpush1.bf16.msra.mxu1 %v12150_v38  ;;  %v12357_v11 = vld [vmem:[%s11244_s12 + $0xa0] sm:$0xff] }
 0x1bb   : > { %378 = vrot.lane.b32.xlu1 %v12277_v52, %s11003_s29  ;;  %376 = vrot.lane.b32.xlu0 %v12190_v16, %s11003_s29  ;;  %v12296_v13 = vpop.permute.xlu1 %1510 }
 0x1bc   : > { %v12293_v6 = vpack.c.bf16 %v12285_v31, %v1003_v40  ;;  %9294 = vmatprep.subr.bf16.mxu1 %v12192_v53  ;;  %v1509_v19 = vpop.permute.xlu0 %1508  ;;  %v12298_v30 = vpack.c.bf16 %v1265_v1, %v1004_v35  ;;  %v9297_v53 = vpack.c.bf16 %v482_v2, %v12201_v20  ;;  %v10741_v20 = vld [vmem:[%s11244_s12 + $0x58] sm:$0xff]  ;;  %v9307_v43 = vpack.c.bf16 %v10740_v61, %v12285_v31 }
 0x1bd   : > { %v1570_v38 = vsel %vm1550_vm5, %v1509_v19, %v12296_v13  ;;  %v1571_v17 = vsel %vm1550_vm5, %v12127_v24, %v1509_v19  ;;  %v2377_v40 = vld [vmem:[#allocation6 + $0x858] sm:$0xff] }
 0x1be   : > { %v12306_v14 = vmul.f32 %v1593_v4, %v1571_v17  ;;  %v1626_v37 = vmul.f32 %v1594_v56, %v1570_v38  ;;  %9296 = vmatpush1.bf16.msra.mxu1 %v12185_v8  ;;  %9270 = vmatprep.subr.bf16.mxu0 %v12298_v30  ;;  %v2376_v4 = vld [vmem:[#allocation6 + $0x850] sm:$0xff] }
 0x1bf   : > { %641 = vrot.lane.b32.xlu1 %v12277_v52, %s11002_s27  ;;  %639 = vrot.lane.b32.xlu0 %v12190_v16, %s11002_s27  ;;  %v12322_v8 = vpop.permute.xlu1 %1771 }
 0x1c0   : > { %v12319_v24 = vpack.c.bf16 %v12306_v14, %v10740_v61  ;;  %9298 = vmatprep.subr.bf16.mxu1 %v9297_v53  ;;  %9272 = vmatpush1.bf16.msra.mxu0 %v12293_v6  ;;  %v1770_v29 = vpop.permute.xlu0 %1769  ;;  %v12325_v39 = vpack.c.bf16 %v1626_v37, %v10741_v20  ;;  %v452_v61 = vld [vmem:[#allocation6 + $0x68] sm:$0xff] }
 0x1c1   : > { %v1831_v36 = vsel %vm1811_vm6, %v1770_v29, %v12322_v8  ;;  %v1832_v46 = vsel %vm1811_vm6, %v12153_v22, %v1770_v29  ;;  %v9305_v22 = vpack.c.bf16 %v10741_v20, %v1265_v1 }
 0x1c2   : > { %9300 = vmatpush1.bf16.msra.mxu1 %v9299_v28  ;;  %9274 = vmatprep.subr.bf16.mxu0 %v12325_v39  ;;  %v1887_v57 = vmul.f32 %v1855_v45, %v1831_v36  ;;  %v1886_v7 = vmul.f32 %v1854_v49, %v1832_v46  ;;  %v451_v28 = vld [vmem:[#allocation6 + $0x60] sm:$0xff]  ;;  %v713_v45 = vld [vmem:[#allocation6 + $0x168] sm:$0xff] }
 0x1c3   : > { %902 = vrot.lane.b32.xlu1 %v12277_v52, %s11004_s16  ;;  %900 = vrot.lane.b32.xlu0 %v12190_v16, %s11004_s16  ;;  %v12341_v2 = vpop.permute.xlu1 %2032 }
 0x1c4   : > { %9302 = vmatprep.subr.bf16.mxu1 %v9301_v41  ;;  %9276 = vmatpush1.bf16.msra.mxu0 %v12319_v24  ;;  %v2031_v18 = vpop.permute.xlu0 %2030  ;;  %v9309_v31 = vpack.c.bf16 %v1887_v57, %v1626_v37  ;;  %v9311_v38 = vpack.c.bf16 %v1886_v7, %v12306_v14  ;;  %v712_v41 = vld [vmem:[#allocation6 + $0x160] sm:$0xff] }
 0x1c5   : > { %v2092_v5 = vsel %vm2072_vm7, %v2031_v18, %v12341_v2  ;;  %v2093_v55 = vsel %vm2072_vm7, %v12172_v34, %v2031_v18 }
 0x1c6   : > { %9304 = vmatpush1.bf16.msra.mxu1 %v9303_v47  ;;  %v2147_v48 = vmul.f32 %v2115_v21, %v2093_v55  ;;  %v2148_v58 = vmul.f32 %v2116_v9, %v2092_v5  ;;  %v12407_v21 = vld [vmem:[#allocation8] sm:$0xff] }
 0x1c7   : > { %1163 = vrot.lane.b32.xlu1 %v12277_v52, %s11005_s19  ;;  %1161 = vrot.lane.b32.xlu0 %v12190_v16, %s11005_s19  ;;  %v12354_v3 = vpop.permute.xlu1 %2293 }
 0x1c8   : > { %9306 = vmatprep.subr.bf16.mxu1 %v9305_v22  ;;  %v12359_v34 = vpack.c.bf16 %v2147_v48, %v1886_v7  ;;  %v2292_v35 = vpop.permute.xlu0 %2291  ;;  %v12361_v1 = vpack.c.bf16 %v2148_v58, %v1887_v57  ;;  %v974_v22 = vld [vmem:[#allocation6 + $0x268] sm:$0xff] }
 0x1c9   : > { %v2353_v56 = vsel %vm2333_vm8, %v2292_v35, %v12354_v3  ;;  %v2354_v16 = vsel %vm2333_vm8, %v12187_v33, %v2292_v35 }
 0x1ca   : > { %9308 = vmatpush1.bf16.msra.mxu1 %v9307_v43  ;;  %v12373_v19 = vmul.f32 %v2377_v40, %v2353_v56  ;;  %9278 = vmatprep.subr.bf16.mxu0 %v12361_v1  ;;  %v12379_v53 = vmul.f32 %v2376_v4, %v2354_v16  ;;  %v12448_v40 = vld [vmem:[%s11244_s12 + $0xa8] sm:$0xff] }
 0x1cb   : > { %1526 = vrot.lane.b32.xlu1 %v12357_v11, %s11006_s20  ;;  %1524 = vrot.lane.b32.xlu0 %v12277_v52, %s11006_s20  ;;  %v12377_v17 = vpop.permute.xlu1 %366 }
 0x1cc   : > { %9310 = vmatprep.subr.bf16.mxu1 %v9309_v31  ;;  %9280 = vmatpush1.bf16.msra.mxu0 %v12359_v34  ;;  %v365_v33 = vpop.permute.xlu0 %364  ;;  %v9313_v37 = vpack.c.bf16 %v12373_v19, %v2148_v58  ;;  %v1235_v58 = vld [vmem:[#allocation6 + $0x368] sm:$0xff]  ;;  %v1595_v31 = vld [vmem:[#allocation6 + $0x560] sm:$0xff] }
 0x1cd   : > { %3742 = vmatprep.subr.mxu0 %v12373_v19  ;;  %v426_v14 = vsel %vm406_vm1, %v12211_v10, %v365_v33  ;;  %v425_v29 = vsel %vm406_vm1, %v365_v33, %v12377_v17  ;;  %v9315_v10 = vpack.c.bf16 %v12379_v53, %v2147_v48 }
 0x1ce   : > { %9312 = vmatpush1.bf16.msra.mxu1 %v9311_v38  ;;  %v12398_v47 = vmul.f32 %v451_v28, %v426_v14  ;;  %v484_v9 = vmul.f32 %v452_v61, %v425_v29  ;;  %v1596_v38 = vld [vmem:[#allocation6 + $0x568] sm:$0xff] }
 0x1cf   : > { %1787 = vrot.lane.b32.xlu1 %v12357_v11, %s11007_s10  ;;  %1785 = vrot.lane.b32.xlu0 %v12277_v52, %s11007_s10  ;;  %v12394_v20 = vpop.permute.xlu1 %629 }
 0x1d0   : > { %9314 = vmatprep.subr.bf16.mxu1 %v9313_v37  ;;  %3743 = vmatpush1.msra.mxu0 %v12379_v53  ;;  %v628_v36 = vpop.permute.xlu0 %627 }
 0x1d1   : > { %9334 = vmatprep.subr.bf16.mxu0 %v12256_v59  ;;  %v686_v49 = vsel %vm667_vm2, %v628_v36, %v12394_v20  ;;  %v687_v46 = vsel %vm667_vm2, %v12226_v62, %v628_v36  ;;  %3755 = vmatmul.mubr.f32.vlgmr.msra.gmra.mrb[4].mxu0 %v12407_v21 }
 0x1d2   : > { %v12410_v18 = vmul.f32 %v712_v41, %v687_v46  ;;  %v12412_v57 = vmul.f32 %v713_v45, %v686_v49  ;;  %9316 = vmatpush1.bf16.msra.mxu1 %v9315_v10  ;;  %9336 = vmatpush1.bf16.msra.mxu0 %v12250_v44  ;;  %v973_v44 = vld [vmem:[#allocation6 + $0x260] sm:$0xff]  ;;  %v1857_v46 = vld [vmem:[#allocation6 + $0x668] sm:$0xff] }
 0x1d3   : > { %2048 = vrot.lane.b32.xlu1 %v12357_v11, %s11008_s14  ;;  %2046 = vrot.lane.b32.xlu0 %v12277_v52, %s11008_s14  ;;  %v12419_v59 = vpop.permute.xlu1 %890  ;;  %v10743_v41 = vld [vmem:[%s11244_s12 + $0x60] sm:$0xff] }
 0x1d4   : > { %v12423_v62 = vpack.c.bf16 %v12410_v18, %v12398_v47  ;;  %9338 = vmatprep.subr.bf16.mxu0 %v12298_v30  ;;  %v889_v5 = vpop.permute.xlu0 %888  ;;  %v12427_v55 = vpack.c.bf16 %v12412_v57, %v484_v9  ;;  %8996 = vmatprep.mubr.msk.f32.mxu0 %vm3402_vm0, %v12087_v54  ;;  %v1856_v10 = vld [vmem:[#allocation6 + $0x660] sm:$0xff] }
 0x1d5   : > { %v947_v7 = vsel %vm928_vm3, %v889_v5, %v12419_v59  ;;  %v948_v30 = vsel %vm928_vm3, %v12253_v23, %v889_v5  ;;  %v2118_v5 = vld [vmem:[#allocation6 + $0x768] sm:$0xff] }
 0x1d6   : > { %9340 = vmatpush1.bf16.msra.mxu0 %v12293_v6  ;;  %9318 = vmatprep.subr.bf16.mxu1 %v12427_v55  ;;  %v1234_v6 = vld [vmem:[#allocation6 + $0x360] sm:$0xff]  ;;  %v1006_v4 = vmul.f32 %v974_v22, %v947_v7 }
 0x1d7   : > { %2309 = vrot.lane.b32.xlu1 %v12357_v11, %s11009_s11  ;;  %2307 = vrot.lane.b32.xlu0 %v12277_v52, %s11009_s11  ;;  %v12443_v48 = vpop.permute.xlu1 %1151  ;;  %v1005_v52 = vmul.f32 %v973_v44, %v948_v30 }
 0x1d8   : > { %9342 = vmatprep.subr.bf16.mxu0 %v12325_v39  ;;  %9320 = vmatpush1.bf16.msra.mxu1 %v12423_v62  ;;  %v1150_v43 = vpop.permute.xlu0 %1149  ;;  %v9353_v49 = vpack.c.bf16 %v1006_v4, %v12412_v57 }
 0x1d9   : > { %v1208_v23 = vsel %vm1189_vm4, %v1150_v43, %v12443_v48  ;;  %v1209_v35 = vsel %vm1189_vm4, %v12274_v63, %v1150_v43  ;;  %v9355_v44 = vpack.c.bf16 %v1005_v52, %v12410_v18 }
 0x1da   : > { %v12456_v56 = vmul.f32 %v1234_v6, %v1209_v35  ;;  %v1267_v16 = vmul.f32 %v1235_v58, %v1208_v23  ;;  %9344 = vmatpush1.bf16.msra.mxu0 %v12319_v24  ;;  %v2379_v23 = vld [vmem:[#allocation6 + $0x868] sm:$0xff] }
 0x1db   : > { %382 = vrot.lane.b32.xlu1 %v12448_v40, %s11003_s29  ;;  %380 = vrot.lane.b32.xlu0 %v12357_v11, %s11003_s29  ;;  %v12463_v39 = vpop.permute.xlu1 %1514 }
 0x1dc   : > { %v12466_v63 = vpack.c.bf16 %v12456_v56, %v1005_v52  ;;  %9346 = vmatprep.subr.bf16.mxu0 %v12361_v1  ;;  %v1513_v33 = vpop.permute.xlu0 %1512  ;;  %v12469_v37 = vpack.c.bf16 %v1267_v16, %v1006_v4  ;;  %v9349_v1 = vpack.c.bf16 %v484_v9, %v12373_v19  ;;  %v10744_v19 = vld [vmem:[%s11244_s12 + $0x68] sm:$0xff]  ;;  %v2117_v9 = vld [vmem:[#allocation6 + $0x760] sm:$0xff]  ;;  %v9359_v35 = vpack.c.bf16 %v10743_v41, %v12456_v56 }
 0x1dd   : > { %v1568_v24 = vsel %vm1550_vm5, %v1513_v33, %v12463_v39  ;;  %v1569_v28 = vsel %vm1550_vm5, %v12296_v13, %v1513_v33  ;;  %v9351_v13 = vpack.c.bf16 %v12398_v47, %v12379_v53  ;;  %v9357_v30 = vpack.c.bf16 %v10744_v19, %v1267_v16  ;;  %v12530_v16 = vld [vmem:[%s11244_s12 + $0xb0] sm:$0xff] }
 0x1de   : > { %v12477_v14 = vmul.f32 %v1595_v31, %v1569_v28  ;;  %v1628_v61 = vmul.f32 %v1596_v38, %v1568_v24  ;;  %9348 = vmatpush1.bf16.msra.mxu0 %v12359_v34  ;;  %9322 = vmatprep.subr.bf16.mxu1 %v12469_v37  ;;  %v2378_v38 = vld [vmem:[#allocation6 + $0x860] sm:$0xff] }
 0x1df   : > { %645 = vrot.lane.b32.xlu1 %v12448_v40, %s11002_s27  ;;  %643 = vrot.lane.b32.xlu0 %v12357_v11, %s11002_s27  ;;  %v12486_v29 = vpop.permute.xlu1 %1775 }
 0x1e0   : > { %v12492_v45 = vpack.c.bf16 %v12477_v14, %v10743_v41  ;;  %9350 = vmatprep.subr.bf16.mxu0 %v9349_v1  ;;  %9324 = vmatpush1.bf16.msra.mxu1 %v12466_v63  ;;  %v1774_v34 = vpop.permute.xlu0 %1773  ;;  %v12496_v36 = vpack.c.bf16 %v1628_v61, %v10744_v19  ;;  %v453_v41 = vld [vmem:[#allocation6 + $0x70] sm:$0xff]  ;;  %v454_v19 = vld [vmem:[#allocation6 + $0x78] sm:$0xff] }
 0x1e1   : > { %v1829_v53 = vsel %vm1811_vm6, %v1774_v34, %v12486_v29  ;;  %v1830_v47 = vsel %vm1811_vm6, %v12322_v8, %v1774_v34 }
 0x1e2   : > { %9352 = vmatpush1.bf16.msra.mxu0 %v9351_v13  ;;  %9326 = vmatprep.subr.bf16.mxu1 %v12496_v36  ;;  %v1888_v6 = vmul.f32 %v1856_v10, %v1830_v47  ;;  %v1889_v58 = vmul.f32 %v1857_v46, %v1829_v53  ;;  %v714_v10 = vld [vmem:[#allocation6 + $0x170] sm:$0xff] }
 0x1e3   : > { %906 = vrot.lane.b32.xlu1 %v12448_v40, %s11004_s16  ;;  %904 = vrot.lane.b32.xlu0 %v12357_v11, %s11004_s16 }
 0x1e4   : > { %9354 = vmatprep.subr.bf16.mxu0 %v9353_v49  ;;  %9328 = vmatpush1.bf16.msra.mxu1 %v12492_v45  ;;  %v12512_v57 = vpop.permute.xlu1 %2036  ;;  %v2035_v22 = vpop.permute.xlu0 %2034  ;;  %v9361_v56 = vpack.c.bf16 %v1889_v58, %v1628_v61  ;;  %v9363_v28 = vpack.c.bf16 %v1888_v6, %v12477_v14  ;;  %v715_v49 = vld [vmem:[#allocation6 + $0x178] sm:$0xff] }
 0x1e5   : > { %v2090_v8 = vsel %vm2072_vm7, %v2035_v22, %v12512_v57  ;;  %v2091_v7 = vsel %vm2072_vm7, %v12341_v2, %v2035_v22 }
 0x1e6   : > { %v2149_v43 = vmul.f32 %v2117_v9, %v2091_v7  ;;  %v2150_v18 = vmul.f32 %v2118_v5, %v2090_v8  ;;  %9356 = vmatpush1.bf16.msra.mxu0 %v9355_v44 }
 0x1e7   : > { %1167 = vrot.lane.b32.xlu1 %v12448_v40, %s11005_s19  ;;  %1165 = vrot.lane.b32.xlu0 %v12357_v11, %s11005_s19 }
 0x1e8   : > { %v12525_v52 = vpack.c.bf16 %v2149_v43, %v1888_v6  ;;  %9358 = vmatprep.subr.bf16.mxu0 %v9357_v30  ;;  %v12527_v4 = vpop.permute.xlu1 %2297  ;;  %v12532_v31 = vpack.c.bf16 %v2150_v18, %v1889_v58  ;;  %v976_v6 = vld [vmem:[#allocation6 + $0x278] sm:$0xff] }
 0x1e9   : > { %v2296_v2 = vpop.permute.xlu0 %2295 }
 0x1ea   : > { %v2351_v33 = vsel %vm2333_vm8, %v2296_v2, %v12527_v4  ;;  %v2352_v11 = vsel %vm2333_vm8, %v12354_v3, %v2296_v2  ;;  %9360 = vmatpush1.bf16.msra.mxu0 %v9359_v35  ;;  %9330 = vmatprep.subr.bf16.mxu1 %v12532_v31 }
 0x1eb   : > { %v12541_v24 = vmul.f32 %v2379_v23, %v2351_v33  ;;  %1530 = vrot.lane.b32.xlu1 %v12530_v16, %s11006_s20  ;;  %1528 = vrot.lane.b32.xlu0 %v12448_v40, %s11006_s20  ;;  %v12548_v1 = vmul.f32 %v2378_v38, %v2352_v11  ;;  %v12617_v23 = vld [vmem:[%s11244_s12 + $0xb8] sm:$0xff]  ;;  %v1597_v33 = vld [vmem:[#allocation6 + $0x570] sm:$0xff] }
 0x1ec   : > { %9362 = vmatprep.subr.bf16.mxu0 %v9361_v56  ;;  %9332 = vmatpush1.bf16.msra.mxu1 %v12525_v52  ;;  %v12551_v3 = vpop.permute.xlu1 %370  ;;  %v1598_v11 = vld [vmem:[#allocation6 + $0x578] sm:$0xff] }
 0x1ed   : > { %v369_v13 = vpop.permute.xlu0 %368  ;;  %v9365_v61 = vpack.c.bf16 %v12541_v24, %v2150_v18  ;;  %3813 = vmatprep.subr.mxu1 %v12541_v24  ;;  %v9367_v53 = vpack.c.bf16 %v12548_v1, %v2149_v43  ;;  %v1237_v43 = vld [vmem:[#allocation6 + $0x378] sm:$0xff] }
 0x1ee   : > { %v424_v34 = vsel %vm406_vm1, %v12377_v17, %v369_v13  ;;  %9364 = vmatpush1.bf16.msra.mxu0 %v9363_v28  ;;  %v423_v14 = vsel %vm406_vm1, %v369_v13, %v12551_v3 }
 0x1ef   : > { %1791 = vrot.lane.b32.xlu1 %v12530_v16, %s11007_s10  ;;  %1789 = vrot.lane.b32.xlu0 %v12448_v40, %s11007_s10  ;;  %v12569_v47 = vmul.f32 %v453_v41, %v424_v34  ;;  %v486_v44 = vmul.f32 %v454_v19, %v423_v14  ;;  %v10745_v14 = vld [vmem:[%s11244_s12 + $0x70] sm:$0xff] }
 0x1f0   : > { %9366 = vmatprep.subr.bf16.mxu0 %v9365_v61  ;;  %3814 = vmatpush1.msra.mxu1 %v12548_v1  ;;  %v12566_v46 = vpop.permute.xlu1 %633 }
 0x1f1   : > { %v632_v17 = vpop.permute.xlu0 %631  ;;  %9386 = vmatprep.subr.bf16.mxu1 %v12427_v55  ;;  %3826 = vmatmul.mubr.f32.vlgmr.msra.gmra.mrb[4].mxu1 %v12407_v21  ;;  %v9403_v19 = vpack.c.bf16 %v12569_v47, %v12548_v1  ;;  %v1859_v1 = vld [vmem:[#allocation6 + $0x678] sm:$0xff] }
 0x1f2   : > { %v684_v9 = vsel %vm667_vm2, %v632_v17, %v12566_v46  ;;  %v685_v5 = vsel %vm667_vm2, %v12394_v20, %v632_v17  ;;  %9368 = vmatpush1.bf16.msra.mxu0 %v9367_v53  ;;  %9388 = vmatpush1.bf16.msra.mxu1 %v12423_v62  ;;  %v975_v62 = vld [vmem:[#allocation6 + $0x270] sm:$0xff] }
 0x1f3   : > { %v12579_v22 = vmul.f32 %v714_v10, %v685_v5  ;;  %v12581_v8 = vmul.f32 %v715_v49, %v684_v9  ;;  %2052 = vrot.lane.b32.xlu1 %v12530_v16, %s11008_s14  ;;  %2050 = vrot.lane.b32.xlu0 %v12448_v40, %s11008_s14  ;;  %v1858_v17 = vld [vmem:[#allocation6 + $0x670] sm:$0xff] }
 0x1f4   : > { %9390 = vmatprep.subr.bf16.mxu1 %v12469_v37  ;;  %v12593_v20 = vpop.permute.xlu1 %894  ;;  %8997 = vmatprep.mubr.msk.f32.mxu1 %vm3402_vm0, %v12087_v54  ;;  %v1236_v54 = vld [vmem:[#allocation6 + $0x370] sm:$0xff] }
 0x1f5   : > { %v12590_v55 = vpack.c.bf16 %v12579_v22, %v12569_v47  ;;  %v893_v7 = vpop.permute.xlu0 %892  ;;  %v12596_v30 = vpack.c.bf16 %v12581_v8, %v486_v44  ;;  %v2119_v5 = vld [vmem:[#allocation6 + $0x770] sm:$0xff] }
 0x1f6   : > { %9392 = vmatpush1.bf16.msra.mxu1 %v12466_v63  ;;  %v945_v37 = vsel %vm928_vm3, %v893_v7, %v12593_v20  ;;  %v946_v58 = vsel %vm928_vm3, %v12419_v59, %v893_v7 }
 0x1f7   : > { %9370 = vmatprep.subr.bf16.mxu0 %v12596_v30  ;;  %2313 = vrot.lane.b32.xlu1 %v12530_v16, %s11009_s11  ;;  %v1008_v2 = vmul.f32 %v976_v6, %v945_v37 }
 0x1f8   : > { %2311 = vrot.lane.b32.xlu0 %v12448_v40, %s11009_s11  ;;  %9394 = vmatprep.subr.bf16.mxu1 %v12496_v36  ;;  %v12614_v63 = vpop.permute.xlu1 %1155  ;;  %v1007_v40 = vmul.f32 %v975_v62, %v946_v58 }
 0x1f9   : > { %9372 = vmatpush1.bf16.msra.mxu0 %v12590_v55  ;;  %v1154_v18 = vpop.permute.xlu0 %1153  ;;  %v9405_v53 = vpack.c.bf16 %v1008_v2, %v12581_v8 }
 0x1fa   : > { %v1206_v59 = vsel %vm1189_vm4, %v1154_v18, %v12614_v63  ;;  %v1207_v35 = vsel %vm1189_vm4, %v12443_v48, %v1154_v18  ;;  %9396 = vmatpush1.bf16.msra.mxu1 %v12492_v45  ;;  %v9407_v7 = vpack.c.bf16 %v1007_v40, %v12579_v22  ;;  %v2381_v18 = vld [vmem:[#allocation6 + $0x878] sm:$0xff] }
 0x1fb   : > { %v12625_v38 = vmul.f32 %v1236_v54, %v1207_v35  ;;  %v1269_v36 = vmul.f32 %v1237_v43, %v1206_v59  ;;  %386 = vrot.lane.b32.xlu1 %v12617_v23, %s11003_s29  ;;  %9398 = vmatprep.subr.bf16.mxu1 %v12532_v31  ;;  %v9401_v31 = vpack.c.bf16 %v486_v44, %v12541_v24  ;;  %v10746_v24 = vld [vmem:[%s11244_s12 + $0x78] sm:$0xff] }
 0x1fc   : > { %384 = vrot.lane.b32.xlu0 %v12530_v16, %s11003_s29  ;;  %v12636_v48 = vpop.permute.xlu1 %1518  ;;  %v2120_v44 = vld [vmem:[#allocation6 + $0x778] sm:$0xff] }
 0x1fd   : > { %v12633_v56 = vpack.c.bf16 %v12625_v38, %v1007_v40  ;;  %v1517_v28 = vpop.permute.xlu0 %1516  ;;  %v12638_v13 = vpack.c.bf16 %v1269_v36, %v1008_v2  ;;  %v9409_v37 = vpack.c.bf16 %v10746_v24, %v1269_v36  ;;  %v9411_v59 = vpack.c.bf16 %v10745_v14, %v12625_v38  ;;  %v12699_v2 = vld [vmem:[%s11244_s12 + $0xc0] sm:$0xff] }
 0x1fe   : > { %v1566_v45 = vsel %vm1550_vm5, %v1517_v28, %v12636_v48  ;;  %v1567_v61 = vsel %vm1550_vm5, %v12463_v39, %v1517_v28  ;;  %9400 = vmatpush1.bf16.msra.mxu1 %v12525_v52 }
 0x1ff   : > { %v12646_v41 = vmul.f32 %v1597_v33, %v1567_v61  ;;  %v1630_v34 = vmul.f32 %v1598_v11, %v1566_v45  ;;  %9374 = vmatprep.subr.bf16.mxu0 %v12638_v13  ;;  %649 = vrot.lane.b32.xlu1 %v12617_v23, %s11002_s27  ;;  %v2380_v33 = vld [vmem:[#allocation6 + $0x870] sm:$0xff] }
 0x200   : > { %647 = vrot.lane.b32.xlu0 %v12530_v16, %s11002_s27  ;;  %9402 = vmatprep.subr.bf16.mxu1 %v9401_v31  ;;  %v12662_v52 = vpop.permute.xlu1 %1779 }
 0x201   : > { %v12659_v39 = vpack.c.bf16 %v12646_v41, %v10745_v14  ;;  %9376 = vmatpush1.bf16.msra.mxu0 %v12633_v56  ;;  %v1778_v10 = vpop.permute.xlu0 %1777  ;;  %v12665_v49 = vpack.c.bf16 %v1630_v34, %v10746_v24  ;;  %v455_v14 = vld [vmem:[#allocation6 + $0x80] sm:$0xff] }
 0x202   : > { %9404 = vmatpush1.bf16.msra.mxu1 %v9403_v19  ;;  %v1827_v47 = vsel %vm1811_vm6, %v1778_v10, %v12662_v52  ;;  %v1828_v9 = vsel %vm1811_vm6, %v12486_v29, %v1778_v10  ;;  %v11011_v19 = vmov 0  }
 0x203   : > { %9378 = vmatprep.subr.bf16.mxu0 %v12665_v49  ;;  %910 = vrot.lane.b32.xlu1 %v12617_v23, %s11004_s16  ;;  %v1890_v58 = vmul.f32 %v1858_v17, %v1828_v9  ;;  %v1891_v54 = vmul.f32 %v1859_v1, %v1827_v47  ;;  %v716_v17 = vld [vmem:[#allocation6 + $0x180] sm:$0xff] }
 0x204   : > { %908 = vrot.lane.b32.xlu0 %v12530_v16, %s11004_s16  ;;  %9406 = vmatprep.subr.bf16.mxu1 %v9405_v53  ;;  %v717_v53 = vld [vmem:[#allocation6 + $0x188] sm:$0xff] }
 0x205   : > { %9380 = vmatpush1.bf16.msra.mxu0 %v12659_v39  ;;  %v12681_v8 = vpop.permute.xlu1 %2040  ;;  %v2039_v62 = vpop.permute.xlu0 %2038  ;;  %v9413_v38 = vpack.c.bf16 %v1891_v54, %v1630_v34  ;;  %v9415_v45 = vpack.c.bf16 %v1890_v58, %v12646_v41  ;;  %10735 = vset.pattern.permute.xlu0 %v11011_v19  ;;  %v456_v41 = vld [vmem:[#allocation6 + $0x88] sm:$0xff] }
 0x206   : > { %v2088_v29 = vsel %vm2072_vm7, %v2039_v62, %v12681_v8  ;;  %v2089_v6 = vsel %vm2072_vm7, %v12512_v57, %v2039_v62  ;;  %9408 = vmatpush1.bf16.msra.mxu1 %v9407_v7 }
 0x207   : > { %v2151_v43 = vmul.f32 %v2119_v5, %v2089_v6  ;;  %v2152_v22 = vmul.f32 %v2120_v44, %v2088_v29  ;;  %1171 = vrot.lane.b32.xlu1 %v12617_v23, %s11005_s19  ;;  %9410 = vmatprep.subr.bf16.mxu1 %v9409_v37 }
 0x208   : > { %1169 = vrot.lane.b32.xlu0 %v12530_v16, %s11005_s19 }
 0x209   : > { %v12694_v35 = vpack.c.bf16 %v2151_v43, %v1890_v58  ;;  %v12696_v40 = vpop.permute.xlu1 %2301  ;;  %v2300_v57 = vpop.permute.xlu0 %2299  ;;  %v12701_v36 = vpack.c.bf16 %v2152_v22, %v1891_v54  ;;  %v12767_v58 = vld [vmem:[#allocation8 + $0x8] sm:$0xff] }
 0x20a   : > { %v2349_v11 = vsel %vm2333_vm8, %v2300_v57, %v12696_v40  ;;  %v2350_v16 = vsel %vm2333_vm8, %v12527_v4, %v2300_v57  ;;  %9412 = vmatpush1.bf16.msra.mxu1 %v9411_v59  ;;  %v978_v54 = vld [vmem:[#allocation6 + $0x288] sm:$0xff] }
 0x20b   : > { %9382 = vmatprep.subr.bf16.mxu0 %v12701_v36  ;;  %v12710_v28 = vmul.f32 %v2381_v18, %v2349_v11  ;;  %1534 = vrot.lane.b32.xlu1 %v12699_v2, %s11006_s20  ;;  %v12717_v61 = vmul.f32 %v2380_v33, %v2350_v16  ;;  %v1239_v18 = vld [vmem:[#allocation6 + $0x388] sm:$0xff] }
 0x20c   : > { %1532 = vrot.lane.b32.xlu0 %v12617_v23, %s11006_s20  ;;  %9414 = vmatprep.subr.bf16.mxu1 %v9413_v38  ;;  %v12788_v57 = vld [vmem:[%s11244_s12 + $0xc8] sm:$0xff]  ;;  %v1599_v38 = vld [vmem:[#allocation6 + $0x580] sm:$0xff] }
 0x20d   : > { %9384 = vmatpush1.bf16.msra.mxu0 %v12694_v35  ;;  %v12720_v4 = vpop.permute.xlu1 %374  ;;  %v373_v31 = vpop.permute.xlu0 %372  ;;  %v9417_v34 = vpack.c.bf16 %v12710_v28, %v2152_v22  ;;  %v9419_v47 = vpack.c.bf16 %v12717_v61, %v2151_v43  ;;  %v1238_v22 = vld [vmem:[#allocation6 + $0x380] sm:$0xff] }
 0x20e   : > { %3884 = vmatprep.subr.mxu0 %v12710_v28  ;;  %v422_v10 = vsel %vm406_vm1, %v12551_v3, %v373_v31  ;;  %9416 = vmatpush1.bf16.msra.mxu1 %v9415_v45  ;;  %v421_v24 = vsel %vm406_vm1, %v373_v31, %v12720_v4  ;;  %v1600_v45 = vld [vmem:[#allocation6 + $0x588] sm:$0xff] }
 0x20f   : > { %1795 = vrot.lane.b32.xlu1 %v12699_v2, %s11007_s10  ;;  %9418 = vmatprep.subr.bf16.mxu1 %v9417_v34  ;;  %v12738_v9 = vmul.f32 %v455_v14, %v422_v10  ;;  %v488_v7 = vmul.f32 %v456_v41, %v421_v24 }
 0x210   : > { %1793 = vrot.lane.b32.xlu0 %v12617_v23, %s11007_s10 }
 0x211   : > { %3885 = vmatpush1.msra.mxu0 %v12717_v61  ;;  %v12735_v1 = vpop.permute.xlu1 %637  ;;  %v636_v3 = vpop.permute.xlu0 %635  ;;  %v9455_v24 = vpack.c.bf16 %v12738_v9, %v12717_v61  ;;  %v1861_v61 = vld [vmem:[#allocation6 + $0x688] sm:$0xff] }
 0x212   : > { %9438 = vmatprep.subr.bf16.mxu0 %v12596_v30  ;;  %v682_v5 = vsel %vm667_vm2, %v636_v3, %v12735_v1  ;;  %v683_v44 = vsel %vm667_vm2, %v12566_v46, %v636_v3  ;;  %3897 = vmatmul.mubr.f32.vlgmr.msra.gmra.mrb[6].mxu0 %v12407_v21 }
 0x213   : > { %v12748_v62 = vmul.f32 %v716_v17, %v683_v44  ;;  %v12750_v29 = vmul.f32 %v717_v53, %v682_v5  ;;  %9420 = vmatpush1.bf16.msra.mxu1 %v9419_v47  ;;  %9440 = vmatpush1.bf16.msra.mxu0 %v12590_v55  ;;  %v977_v55 = vld [vmem:[#allocation6 + $0x280] sm:$0xff] }
 0x214   : > { %2056 = vrot.lane.b32.xlu1 %v12699_v2, %s11008_s14  ;;  %2054 = vrot.lane.b32.xlu0 %v12617_v23, %s11008_s14  ;;  %v10748_v17 = vld [vmem:[%s11244_s12 + $0x80] sm:$0xff] }
 0x215   : > { %v12759_v30 = vpack.c.bf16 %v12748_v62, %v12738_v9  ;;  %9442 = vmatprep.subr.bf16.mxu0 %v12638_v13  ;;  %v12762_v46 = vpop.permute.xlu1 %898  ;;  %v897_v6 = vpop.permute.xlu0 %896  ;;  %v12765_v37 = vpack.c.bf16 %v12750_v29, %v488_v7  ;;  %8998 = vmatprep.mubr.msk.f32.mxu0 %vm3402_vm0, %v12767_v58  ;;  %v1860_v47 = vld [vmem:[#allocation6 + $0x680] sm:$0xff] }
 0x216   : > { %v943_v13 = vsel %vm928_vm3, %v897_v6, %v12762_v46  ;;  %v944_v43 = vsel %vm928_vm3, %v12593_v20, %v897_v6  ;;  %v2122_v6 = vld [vmem:[#allocation6 + $0x788] sm:$0xff] }
 0x217   : > { %9444 = vmatpush1.bf16.msra.mxu0 %v12633_v56  ;;  %9422 = vmatprep.subr.bf16.mxu1 %v12765_v37  ;;  %v1010_v11 = vmul.f32 %v978_v54, %v943_v13 }
 0x218   : > { %2317 = vrot.lane.b32.xlu1 %v12699_v2, %s11009_s11  ;;  %2315 = vrot.lane.b32.xlu0 %v12617_v23, %s11009_s11  ;;  %v1009_v23 = vmul.f32 %v977_v55, %v944_v43 }
 0x219   : > { %9446 = vmatprep.subr.bf16.mxu0 %v12665_v49  ;;  %9424 = vmatpush1.bf16.msra.mxu1 %v12759_v30  ;;  %v12785_v56 = vpop.permute.xlu1 %1159  ;;  %v1158_v59 = vpop.permute.xlu0 %1157  ;;  %v9457_v5 = vpack.c.bf16 %v1010_v11, %v12750_v29 }
 0x21a   : > { %v1204_v20 = vsel %vm1189_vm4, %v1158_v59, %v12785_v56  ;;  %v1205_v33 = vsel %vm1189_vm4, %v12614_v63, %v1158_v59  ;;  %v9459_v55 = vpack.c.bf16 %v1009_v23, %v12748_v62 }
 0x21b   : > { %v12796_v16 = vmul.f32 %v1238_v22, %v1205_v33  ;;  %v1271_v49 = vmul.f32 %v1239_v18, %v1204_v20  ;;  %9448 = vmatpush1.bf16.msra.mxu0 %v12659_v39  ;;  %v2383_v20 = vld [vmem:[#allocation6 + $0x888] sm:$0xff] }
 0x21c   : > { %390 = vrot.lane.b32.xlu1 %v12788_v57, %s11003_s29  ;;  %388 = vrot.lane.b32.xlu0 %v12699_v2, %s11003_s29 }
 0x21d   : > { %v12804_v31 = vpack.c.bf16 %v12796_v16, %v1009_v23  ;;  %9450 = vmatprep.subr.bf16.mxu0 %v12701_v36  ;;  %v12807_v63 = vpop.permute.xlu1 %1522  ;;  %v1521_v34 = vpop.permute.xlu0 %1520  ;;  %v12809_v19 = vpack.c.bf16 %v1271_v49, %v1010_v11  ;;  %v9453_v36 = vpack.c.bf16 %v488_v7, %v12710_v28  ;;  %v10749_v28 = vld [vmem:[%s11244_s12 + $0x88] sm:$0xff]  ;;  %v2121_v7 = vld [vmem:[#allocation6 + $0x780] sm:$0xff]  ;;  %v9463_v33 = vpack.c.bf16 %v10748_v17, %v12796_v16 }
 0x21e   : > { %v1564_v39 = vsel %vm1550_vm5, %v1521_v34, %v12807_v63  ;;  %v1565_v14 = vsel %vm1550_vm5, %v12636_v48, %v1521_v34  ;;  %v9461_v43 = vpack.c.bf16 %v10749_v28, %v1271_v49  ;;  %v12870_v49 = vld [vmem:[%s11244_s12 + $0xd0] sm:$0xff] }
 0x21f   : > { %v12817_v10 = vmul.f32 %v1599_v38, %v1565_v14  ;;  %v1632_v41 = vmul.f32 %v1600_v45, %v1564_v39  ;;  %9452 = vmatpush1.bf16.msra.mxu0 %v12694_v35  ;;  %9426 = vmatprep.subr.bf16.mxu1 %v12809_v19  ;;  %v2382_v45 = vld [vmem:[#allocation6 + $0x880] sm:$0xff] }
 0x220   : > { %653 = vrot.lane.b32.xlu1 %v12788_v57, %s11002_s27  ;;  %651 = vrot.lane.b32.xlu0 %v12699_v2, %s11002_s27 }
 0x221   : > { %v12830_v48 = vpack.c.bf16 %v12817_v10, %v10748_v17  ;;  %9454 = vmatprep.subr.bf16.mxu0 %v9453_v36  ;;  %9428 = vmatpush1.bf16.msra.mxu1 %v12804_v31  ;;  %v12833_v35 = vpop.permute.xlu1 %1783  ;;  %v1782_v53 = vpop.permute.xlu0 %1781  ;;  %v12836_v3 = vpack.c.bf16 %v1632_v41, %v10749_v28  ;;  %v457_v17 = vld [vmem:[#allocation6 + $0x90] sm:$0xff]  ;;  %v458_v28 = vld [vmem:[#allocation6 + $0x98] sm:$0xff] }
 0x222   : > { %v1825_v9 = vsel %vm1811_vm6, %v1782_v53, %v12833_v35  ;;  %v1826_v44 = vsel %vm1811_vm6, %v12662_v52, %v1782_v53 }
 0x223   : > { %9456 = vmatpush1.bf16.msra.mxu0 %v9455_v24  ;;  %9430 = vmatprep.subr.bf16.mxu1 %v12836_v3  ;;  %v1892_v22 = vmul.f32 %v1860_v47, %v1826_v44  ;;  %v1893_v18 = vmul.f32 %v1861_v61, %v1825_v9  ;;  %v718_v47 = vld [vmem:[#allocation6 + $0x190] sm:$0xff] }
 0x224   : > { %914 = vrot.lane.b32.xlu1 %v12788_v57, %s11004_s16  ;;  %912 = vrot.lane.b32.xlu0 %v12699_v2, %s11004_s16 }
 0x225   : > { %9458 = vmatprep.subr.bf16.mxu0 %v9457_v5  ;;  %9432 = vmatpush1.bf16.msra.mxu1 %v12830_v48  ;;  %v12852_v29 = vpop.permute.xlu1 %2044  ;;  %v2043_v54 = vpop.permute.xlu0 %2042  ;;  %v9465_v16 = vpack.c.bf16 %v1893_v18, %v1632_v41  ;;  %v9467_v14 = vpack.c.bf16 %v1892_v22, %v12817_v10  ;;  %v719_v5 = vld [vmem:[#allocation6 + $0x198] sm:$0xff] }
 0x226   : > { %v2086_v52 = vsel %vm2072_vm7, %v2043_v54, %v12852_v29  ;;  %v2087_v13 = vsel %vm2072_vm7, %v12681_v8, %v2043_v54 }
 0x227   : > { %v2153_v59 = vmul.f32 %v2121_v7, %v2087_v13  ;;  %v2154_v62 = vmul.f32 %v2122_v6, %v2086_v52  ;;  %9460 = vmatpush1.bf16.msra.mxu0 %v9459_v55 }
 0x228   : > { %1175 = vrot.lane.b32.xlu1 %v12788_v57, %s11005_s19  ;;  %1173 = vrot.lane.b32.xlu0 %v12699_v2, %s11005_s19 }
 0x229   : > { %v12865_v23 = vpack.c.bf16 %v2153_v59, %v1892_v22  ;;  %9462 = vmatprep.subr.bf16.mxu0 %v9461_v43  ;;  %v12867_v11 = vpop.permute.xlu1 %2305  ;;  %v2304_v8 = vpop.permute.xlu0 %2303  ;;  %v12872_v38 = vpack.c.bf16 %v2154_v62, %v1893_v18  ;;  %v980_v43 = vld [vmem:[#allocation6 + $0x298] sm:$0xff]  ;;  %v1240_v18 = vld [vmem:[#allocation6 + $0x390] sm:$0xff] }
 0x22a   : > { %v2347_v34 = vsel %vm2333_vm8, %v2304_v8, %v12867_v11  ;;  %v2348_v2 = vsel %vm2333_vm8, %v12696_v40, %v2304_v8 }
 0x22b   : > { %9464 = vmatpush1.bf16.msra.mxu0 %v9463_v33  ;;  %9434 = vmatprep.subr.bf16.mxu1 %v12872_v38  ;;  %v12881_v39 = vmul.f32 %v2383_v20, %v2347_v34  ;;  %v12888_v36 = vmul.f32 %v2382_v45, %v2348_v2  ;;  %v12957_v20 = vld [vmem:[%s11244_s12 + $0xd8] sm:$0xff]  ;;  %v1601_v34 = vld [vmem:[#allocation6 + $0x590] sm:$0xff] }
 0x22c   : > { %1538 = vrot.lane.b32.xlu1 %v12870_v49, %s11006_s20  ;;  %1536 = vrot.lane.b32.xlu0 %v12788_v57, %s11006_s20  ;;  %v1602_v2 = vld [vmem:[#allocation6 + $0x598] sm:$0xff] }
 0x22d   : > { %9466 = vmatprep.subr.bf16.mxu0 %v9465_v16  ;;  %9436 = vmatpush1.bf16.msra.mxu1 %v12865_v23  ;;  %v12891_v40 = vpop.permute.xlu1 %378  ;;  %v377_v24 = vpop.permute.xlu0 %376  ;;  %v9469_v41 = vpack.c.bf16 %v12881_v39, %v2154_v62  ;;  %v9471_v9 = vpack.c.bf16 %v12888_v36, %v2153_v59  ;;  %v1241_v59 = vld [vmem:[#allocation6 + $0x398] sm:$0xff] }
 0x22e   : > { %3955 = vmatprep.subr.mxu1 %v12881_v39  ;;  %v420_v53 = vsel %vm406_vm1, %v12720_v4, %v377_v24  ;;  %v419_v10 = vsel %vm406_vm1, %v377_v24, %v12891_v40 }
 0x22f   : > { %9468 = vmatpush1.bf16.msra.mxu0 %v9467_v14  ;;  %v12909_v44 = vmul.f32 %v457_v17, %v420_v53  ;;  %v490_v55 = vmul.f32 %v458_v28, %v419_v10  ;;  %v10750_v10 = vld [vmem:[%s11244_s12 + $0x90] sm:$0xff] }
 0x230   : > { %1799 = vrot.lane.b32.xlu1 %v12870_v49, %s11007_s10  ;;  %1797 = vrot.lane.b32.xlu0 %v12788_v57, %s11007_s10 }
 0x231   : > { %9470 = vmatprep.subr.bf16.mxu0 %v9469_v41  ;;  %3956 = vmatpush1.msra.mxu1 %v12888_v36  ;;  %v12906_v61 = vpop.permute.xlu1 %641  ;;  %v640_v4 = vpop.permute.xlu0 %639  ;;  %v9507_v28 = vpack.c.bf16 %v12909_v44, %v12888_v36 }
 0x232   : > { %9490 = vmatprep.subr.bf16.mxu1 %v12765_v37  ;;  %v680_v7 = vsel %vm667_vm2, %v640_v4, %v12906_v61  ;;  %v681_v6 = vsel %vm667_vm2, %v12735_v1, %v640_v4  ;;  %3968 = vmatmul.mubr.f32.vlgmr.msra.gmra.mrb[6].mxu1 %v12407_v21 }
 0x233   : > { %v12919_v54 = vmul.f32 %v718_v47, %v681_v6  ;;  %v12921_v52 = vmul.f32 %v719_v5, %v680_v7  ;;  %9472 = vmatpush1.bf16.msra.mxu0 %v9471_v9  ;;  %9492 = vmatpush1.bf16.msra.mxu1 %v12759_v30  ;;  %v979_v30 = vld [vmem:[#allocation6 + $0x290] sm:$0xff]  ;;  %v1863_v9 = vld [vmem:[#allocation6 + $0x698] sm:$0xff] }
 0x234   : > { %2060 = vrot.lane.b32.xlu1 %v12870_v49, %s11008_s14  ;;  %2058 = vrot.lane.b32.xlu0 %v12788_v57, %s11008_s14  ;;  %v1862_v6 = vld [vmem:[#allocation6 + $0x690] sm:$0xff] }
 0x235   : > { %v12930_v37 = vpack.c.bf16 %v12919_v54, %v12909_v44  ;;  %9494 = vmatprep.subr.bf16.mxu1 %v12809_v19  ;;  %v12933_v21 = vpop.permute.xlu1 %902  ;;  %v901_v1 = vpop.permute.xlu0 %900  ;;  %v12936_v13 = vpack.c.bf16 %v12921_v52, %v490_v55  ;;  %8999 = vmatprep.mubr.msk.f32.mxu1 %vm3402_vm0, %v12767_v58 }
 0x236   : > { %v941_v19 = vsel %vm928_vm3, %v901_v1, %v12933_v21  ;;  %v942_v22 = vsel %vm928_vm3, %v12762_v46, %v901_v1  ;;  %v2124_v1 = vld [vmem:[#allocation6 + $0x798] sm:$0xff] }
 0x237   : > { %9496 = vmatpush1.bf16.msra.mxu1 %v12804_v31  ;;  %9474 = vmatprep.subr.bf16.mxu0 %v12936_v13  ;;  %v1012_v8 = vmul.f32 %v980_v43, %v941_v19 }
 0x238   : > { %2321 = vrot.lane.b32.xlu1 %v12870_v49, %s11009_s11  ;;  %2319 = vrot.lane.b32.xlu0 %v12788_v57, %s11009_s11  ;;  %v1011_v57 = vmul.f32 %v979_v30, %v942_v22 }
 0x239   : > { %9498 = vmatprep.subr.bf16.mxu1 %v12836_v3  ;;  %9476 = vmatpush1.bf16.msra.mxu0 %v12930_v37  ;;  %v12954_v31 = vpop.permute.xlu1 %1163  ;;  %v1162_v62 = vpop.permute.xlu0 %1161  ;;  %v9509_v4 = vpack.c.bf16 %v1012_v8, %v12921_v52  ;;  %v2123_v52 = vld [vmem:[#allocation6 + $0x790] sm:$0xff] }
 0x23a   : > { %v1202_v46 = vsel %vm1189_vm4, %v1162_v62, %v12954_v31  ;;  %v1203_v33 = vsel %vm1189_vm4, %v12785_v56, %v1162_v62  ;;  %v9511_v7 = vpack.c.bf16 %v1011_v57, %v12919_v54 }
 0x23b   : > { %v12965_v45 = vmul.f32 %v1240_v18, %v1203_v33  ;;  %v1273_v3 = vmul.f32 %v1241_v59, %v1202_v46  ;;  %9500 = vmatpush1.bf16.msra.mxu1 %v12830_v48 }
 0x23c   : > { %394 = vrot.lane.b32.xlu1 %v12957_v20, %s11003_s29  ;;  %392 = vrot.lane.b32.xlu0 %v12870_v49, %s11003_s29 }
 0x23d   : > { %v12973_v16 = vpack.c.bf16 %v12965_v45, %v1011_v57  ;;  %9502 = vmatprep.subr.bf16.mxu1 %v12872_v38  ;;  %v12976_v56 = vpop.permute.xlu1 %1526  ;;  %v1525_v14 = vpop.permute.xlu0 %1524  ;;  %v12978_v24 = vpack.c.bf16 %v1273_v3, %v1012_v8  ;;  %v9505_v38 = vpack.c.bf16 %v490_v55, %v12881_v39  ;;  %v10751_v39 = vld [vmem:[%s11244_s12 + $0x98] sm:$0xff]  ;;  %v9515_v33 = vpack.c.bf16 %v10750_v10, %v12965_v45  ;;  %v13039_v57 = vld [vmem:[%s11244_s12 + $0xe0] sm:$0xff] }
 0x23e   : > { %v1562_v48 = vsel %vm1550_vm5, %v1525_v14, %v12976_v56  ;;  %v1563_v41 = vsel %vm1550_vm5, %v12807_v63, %v1525_v14  ;;  %v9513_v18 = vpack.c.bf16 %v10751_v39, %v1273_v3  ;;  %v2385_v8 = vld [vmem:[#allocation6 + $0x898] sm:$0xff]  ;;  %v2384_v14 = vld [vmem:[#allocation6 + $0x890] sm:$0xff] }
 0x23f   : > { %v12986_v17 = vmul.f32 %v1601_v34, %v1563_v41  ;;  %v1634_v53 = vmul.f32 %v1602_v2, %v1562_v48  ;;  %9504 = vmatpush1.bf16.msra.mxu1 %v12865_v23  ;;  %9478 = vmatprep.subr.bf16.mxu0 %v12978_v24 }
 0x240   : > { %657 = vrot.lane.b32.xlu1 %v12957_v20, %s11002_s27  ;;  %655 = vrot.lane.b32.xlu0 %v12870_v49, %s11002_s27 }
 0x241   : > { %v12999_v63 = vpack.c.bf16 %v12986_v17, %v10750_v10  ;;  %9506 = vmatprep.subr.bf16.mxu1 %v9505_v38  ;;  %9480 = vmatpush1.bf16.msra.mxu0 %v12973_v16  ;;  %v13002_v23 = vpop.permute.xlu1 %1787  ;;  %v1786_v47 = vpop.permute.xlu0 %1785  ;;  %v13005_v5 = vpack.c.bf16 %v1634_v53, %v10751_v39  ;;  %v460_v39 = vld [vmem:[#allocation6 + $0xa8] sm:$0xff] }
 0x242   : > { %v1823_v36 = vsel %vm1811_vm6, %v1786_v47, %v13002_v23  ;;  %v1824_v55 = vsel %vm1811_vm6, %v12833_v35, %v1786_v47  ;;  %v459_v47 = vld [vmem:[#allocation6 + $0xa0] sm:$0xff] }
 0x243   : > { %9508 = vmatpush1.bf16.msra.mxu1 %v9507_v28  ;;  %9482 = vmatprep.subr.bf16.mxu0 %v13005_v5  ;;  %v13016_v44 = vpop.f32.mrb[0].mxu1  ;;  %v1895_v22 = vmul.f32 %v1863_v9, %v1823_v36  ;;  %v1894_v59 = vmul.f32 %v1862_v6, %v1824_v55  ;;  %v720_v9 = vld [vmem:[#allocation6 + $0x1a0] sm:$0xff]  ;;  %v721_v36 = vld [vmem:[#allocation6 + $0x1a8] sm:$0xff] }
 0x244   : > { %918 = vrot.lane.b32.xlu1 %v12957_v20, %s11004_s16  ;;  %916 = vrot.lane.b32.xlu0 %v12870_v49, %s11004_s16  ;;  %v13023_v30 = vpop.f32.mrb[1].mxu1 }
 0x245   : > { %9510 = vmatprep.subr.bf16.mxu1 %v9509_v4  ;;  %9484 = vmatpush1.bf16.msra.mxu0 %v12999_v63  ;;  %v13025_v43 = vpop.permute.xlu1 %2048  ;;  %v2047_v19 = vpop.permute.xlu0 %2046  ;;  %v9517_v45 = vpack.c.bf16 %v1895_v22, %v1634_v53  ;;  %v9519_v38 = vpack.c.bf16 %v1894_v59, %v12986_v17 }
 0x246   : > { %v2084_v54 = vsel %vm2072_vm7, %v2047_v19, %v13025_v43  ;;  %v2085_v35 = vsel %vm2072_vm7, %v12852_v29, %v2047_v19  ;;  %v13091_v19 = vld [vmem:[#allocation8] sm:$0xff] }
 0x247   : > { %9512 = vmatpush1.bf16.msra.mxu1 %v9511_v7  ;;  %v2155_v62 = vmul.f32 %v2123_v52, %v2085_v35  ;;  %v2156_v46 = vmul.f32 %v2124_v1, %v2084_v54 }
 0x248   : > { %1179 = vrot.lane.b32.xlu1 %v12957_v20, %s11005_s19  ;;  %1177 = vrot.lane.b32.xlu0 %v12870_v49, %s11005_s19 }
 0x249   : > { %9514 = vmatprep.subr.bf16.mxu1 %v9513_v18  ;;  %v13041_v34 = vpack.c.bf16 %v2155_v62, %v1894_v59  ;;  %v13043_v29 = vpop.permute.xlu1 %2309  ;;  %v2308_v3 = vpop.permute.xlu0 %2307  ;;  %v13045_v2 = vpack.c.bf16 %v2156_v46, %v1895_v22 }
 0x24a   : > { %v2345_v48 = vsel %vm2333_vm8, %v2308_v3, %v13043_v29  ;;  %v2346_v49 = vsel %vm2333_vm8, %v12867_v11, %v2308_v3 }
 0x24b   : > { %9516 = vmatpush1.bf16.msra.mxu1 %v9515_v33  ;;  %v13057_v41 = vmul.f32 %v2385_v8, %v2345_v48  ;;  %9486 = vmatprep.subr.bf16.mxu0 %v13045_v2  ;;  %v13061_v28 = vmul.f32 %v2384_v14, %v2346_v49  ;;  %v1242_v33 = vld [vmem:[#allocation6 + $0x3a0] sm:$0xff]  ;;  %v1243_v8 = vld [vmem:[#allocation6 + $0x3a8] sm:$0xff] }
 0x24c   : > { %1542 = vrot.lane.b32.xlu1 %v13039_v57, %s11006_s20  ;;  %1540 = vrot.lane.b32.xlu0 %v12957_v20, %s11006_s20  ;;  %v13132_v14 = vld [vmem:[%s11244_s12 + $0xe8] sm:$0xff] }
 0x24d   : > { %9518 = vmatprep.subr.bf16.mxu1 %v9517_v45  ;;  %9488 = vmatpush1.bf16.msra.mxu0 %v13041_v34  ;;  %v13064_v11 = vpop.permute.xlu1 %382  ;;  %v381_v53 = vpop.permute.xlu0 %380  ;;  %v9521_v10 = vpack.c.bf16 %v13057_v41, %v2156_v46 }
 0x24e   : > { %4026 = vmatprep.subr.mxu0 %v13057_v41  ;;  %v418_v17 = vsel %vm406_vm1, %v12891_v40, %v381_v53  ;;  %v417_v4 = vsel %vm406_vm1, %v381_v53, %v13064_v11  ;;  %v9523_v40 = vpack.c.bf16 %v13061_v28, %v2155_v62  ;;  %v982_v62 = vld [vmem:[#allocation6 + $0x2a8] sm:$0xff] }
 0x24f   : > { %9520 = vmatpush1.bf16.msra.mxu1 %v9519_v38  ;;  %v13082_v55 = vmul.f32 %v459_v47, %v418_v17  ;;  %v492_v22 = vmul.f32 %v460_v39, %v417_v4  ;;  %v1603_v38 = vld [vmem:[#allocation6 + $0x5a0] sm:$0xff]  ;;  %v1604_v53 = vld [vmem:[#allocation6 + $0x5a8] sm:$0xff] }
 0x250   : > { %1803 = vrot.lane.b32.xlu1 %v13039_v57, %s11007_s10  ;;  %1801 = vrot.lane.b32.xlu0 %v12957_v20, %s11007_s10 }
 0x251   : > { %9522 = vmatprep.subr.bf16.mxu1 %v9521_v10  ;;  %4027 = vmatpush1.msra.mxu0 %v13061_v28  ;;  %v13079_v7 = vpop.permute.xlu1 %645  ;;  %v644_v6 = vpop.permute.xlu0 %643 }
 0x252   : > { %9542 = vmatprep.subr.bf16.mxu0 %v12936_v13  ;;  %v678_v52 = vsel %vm667_vm2, %v644_v6, %v13079_v7  ;;  %v679_v1 = vsel %vm667_vm2, %v12906_v61, %v644_v6  ;;  %4039 = vmatmul.mubr.f32.vlgmr.msra.gmra.mrb[8].mxu0 %v13091_v19  ;;  %v10753_v6 = vld [vmem:[%s11244_s12 + $0xa0] sm:$0xff] }
 0x253   : > { %v13094_v54 = vmul.f32 %v720_v9, %v679_v1  ;;  %v13096_v35 = vmul.f32 %v721_v36, %v678_v52  ;;  %9524 = vmatpush1.bf16.msra.mxu1 %v9523_v40  ;;  %9544 = vmatpush1.bf16.msra.mxu0 %v12930_v37  ;;  %v981_v37 = vld [vmem:[#allocation6 + $0x2a0] sm:$0xff]  ;;  %v9559_v36 = vpack.c.bf16 %v13082_v55, %v13061_v28  ;;  %v1865_v28 = vld [vmem:[#allocation6 + $0x6a8] sm:$0xff] }
 0x254   : > { %2064 = vrot.lane.b32.xlu1 %v13039_v57, %s11008_s14  ;;  %2062 = vrot.lane.b32.xlu0 %v12957_v20, %s11008_s14  ;;  %v1864_v1 = vld [vmem:[#allocation6 + $0x6a0] sm:$0xff] }
 0x255   : > { %v13105_v61 = vpack.c.bf16 %v13094_v54, %v13082_v55  ;;  %9546 = vmatprep.subr.bf16.mxu0 %v12978_v24  ;;  %v13108_v13 = vpop.permute.xlu1 %906  ;;  %v905_v18 = vpop.permute.xlu0 %904  ;;  %v13111_v59 = vpack.c.bf16 %v13096_v35, %v492_v22  ;;  %9000 = vmatprep.mubr.msk.f32.mxu0 %vm3402_vm0, %v12767_v58 }
 0x256   : > { %v939_v24 = vsel %vm928_vm3, %v905_v18, %v13108_v13  ;;  %v940_v46 = vsel %vm928_vm3, %v12933_v21, %v905_v18 }
 0x257   : > { %9548 = vmatpush1.bf16.msra.mxu0 %v12973_v16  ;;  %9526 = vmatprep.subr.bf16.mxu1 %v13111_v59  ;;  %v1014_v49 = vmul.f32 %v982_v62, %v939_v24  ;;  %v2126_v62 = vld [vmem:[#allocation6 + $0x7a8] sm:$0xff] }
 0x258   : > { %2325 = vrot.lane.b32.xlu1 %v13039_v57, %s11009_s11  ;;  %2323 = vrot.lane.b32.xlu0 %v12957_v20, %s11009_s11  ;;  %v1013_v20 = vmul.f32 %v981_v37, %v940_v46  ;;  %v2125_v37 = vld [vmem:[#allocation6 + $0x7a0] sm:$0xff] }
 0x259   : > { %9550 = vmatprep.subr.bf16.mxu0 %v13005_v5  ;;  %9528 = vmatpush1.bf16.msra.mxu1 %v13105_v61  ;;  %v13129_v16 = vpop.permute.xlu1 %1167  ;;  %v1166_v3 = vpop.permute.xlu0 %1165 }
 0x25a   : > { %v1200_v21 = vsel %vm1189_vm4, %v1166_v3, %v13129_v16  ;;  %v1201_v48 = vsel %vm1189_vm4, %v12954_v31, %v1166_v3  ;;  %v9563_v24 = vpack.c.bf16 %v1013_v20, %v13094_v54 }
 0x25b   : > { %v13140_v45 = vmul.f32 %v1242_v33, %v1201_v48  ;;  %v1275_v5 = vmul.f32 %v1243_v8, %v1200_v21  ;;  %9552 = vmatpush1.bf16.msra.mxu0 %v12999_v63 }
 0x25c   : > { %398 = vrot.lane.b32.xlu1 %v13132_v14, %s11003_s29  ;;  %396 = vrot.lane.b32.xlu0 %v13039_v57, %s11003_s29 }
 0x25d   : > { %v13148_v10 = vpack.c.bf16 %v13140_v45, %v1013_v20  ;;  %9554 = vmatprep.subr.bf16.mxu0 %v13045_v2  ;;  %v13151_v31 = vpop.permute.xlu1 %1530  ;;  %v1529_v47 = vpop.permute.xlu0 %1528  ;;  %v13153_v17 = vpack.c.bf16 %v1275_v5, %v1014_v49  ;;  %v9557_v2 = vpack.c.bf16 %v492_v22, %v13057_v41  ;;  %v10754_v41 = vld [vmem:[%s11244_s12 + $0xa8] sm:$0xff]  ;;  %v9561_v22 = vpack.c.bf16 %v1014_v49, %v13096_v35 }
 0x25e   : > { %v1560_v63 = vsel %vm1550_vm5, %v1529_v47, %v13151_v31  ;;  %v1561_v39 = vsel %vm1550_vm5, %v12976_v56, %v1529_v47  ;;  %v9565_v8 = vpack.c.bf16 %v10754_v41, %v1275_v5  ;;  %v2387_v20 = vld [vmem:[#allocation6 + $0x8a8] sm:$0xff]  ;;  %v9567_v49 = vpack.c.bf16 %v10753_v6, %v13140_v45  ;;  %v13214_v5 = vld [vmem:[%s11244_s12 + $0xf0] sm:$0xff] }
 0x25f   : > { %v13161_v4 = vmul.f32 %v1603_v38, %v1561_v39  ;;  %v1636_v9 = vmul.f32 %v1604_v53, %v1560_v63  ;;  %9556 = vmatpush1.bf16.msra.mxu0 %v13041_v34  ;;  %9530 = vmatprep.subr.bf16.mxu1 %v13153_v17  ;;  %v2386_v63 = vld [vmem:[#allocation6 + $0x8a0] sm:$0xff] }
 0x260   : > { %661 = vrot.lane.b32.xlu1 %v13132_v14, %s11002_s27  ;;  %659 = vrot.lane.b32.xlu0 %v13039_v57, %s11002_s27 }
 0x261   : > { %v13174_v56 = vpack.c.bf16 %v13161_v4, %v10753_v6  ;;  %9558 = vmatprep.subr.bf16.mxu0 %v9557_v2  ;;  %9532 = vmatpush1.bf16.msra.mxu1 %v13148_v10  ;;  %v13177_v34 = vpop.permute.xlu1 %1791  ;;  %v1790_v40 = vpop.permute.xlu0 %1789  ;;  %v13180_v52 = vpack.c.bf16 %v1636_v9, %v10754_v41  ;;  %v461_v41 = vld [vmem:[#allocation6 + $0xb0] sm:$0xff] }
 0x262   : > { %v1821_v55 = vsel %vm1811_vm6, %v1790_v40, %v13177_v34  ;;  %v1822_v18 = vsel %vm1811_vm6, %v13002_v23, %v1790_v40 }
 0x263   : > { %9560 = vmatpush1.bf16.msra.mxu0 %v9559_v36  ;;  %9534 = vmatprep.subr.bf16.mxu1 %v13180_v52  ;;  %v1896_v3 = vmul.f32 %v1864_v1, %v1822_v18  ;;  %v1897_v21 = vmul.f32 %v1865_v28, %v1821_v55  ;;  %v722_v28 = vld [vmem:[#allocation6 + $0x1b0] sm:$0xff]  ;;  %v723_v55 = vld [vmem:[#allocation6 + $0x1b8] sm:$0xff] }
 0x264   : > { %922 = vrot.lane.b32.xlu1 %v13132_v14, %s11004_s16  ;;  %920 = vrot.lane.b32.xlu0 %v13039_v57, %s11004_s16 }
 0x265   : > { %9562 = vmatprep.subr.bf16.mxu0 %v9561_v22  ;;  %9536 = vmatpush1.bf16.msra.mxu1 %v13174_v56  ;;  %v13196_v35 = vpop.permute.xlu1 %2052  ;;  %v2051_v46 = vpop.permute.xlu0 %2050  ;;  %v9569_v45 = vpack.c.bf16 %v1897_v21, %v1636_v9  ;;  %v9571_v36 = vpack.c.bf16 %v1896_v3, %v13161_v4  ;;  %v462_v22 = vld [vmem:[#allocation6 + $0xb8] sm:$0xff] }
 0x266   : > { %v2082_v23 = vsel %vm2072_vm7, %v2051_v46, %v13196_v35  ;;  %v2083_v33 = vsel %vm2072_vm7, %v13025_v43, %v2051_v46 }
 0x267   : > { %v2157_v48 = vmul.f32 %v2125_v37, %v2083_v33  ;;  %v2158_v54 = vmul.f32 %v2126_v62, %v2082_v23  ;;  %9564 = vmatpush1.bf16.msra.mxu0 %v9563_v24 }
 0x268   : > { %1183 = vrot.lane.b32.xlu1 %v13132_v14, %s11005_s19  ;;  %1181 = vrot.lane.b32.xlu0 %v13039_v57, %s11005_s19 }
 0x269   : > { %v13209_v38 = vpack.c.bf16 %v2157_v48, %v1896_v3  ;;  %9566 = vmatprep.subr.bf16.mxu0 %v9565_v8  ;;  %v13211_v53 = vpop.permute.xlu1 %2313  ;;  %v13216_v47 = vpack.c.bf16 %v2158_v54, %v1897_v21 }
 0x26a   : > { %v2312_v43 = vpop.permute.xlu0 %2311 }
 0x26b   : > { %v2343_v39 = vsel %vm2333_vm8, %v2312_v43, %v13211_v53  ;;  %v2344_v57 = vsel %vm2333_vm8, %v13043_v29, %v2312_v43  ;;  %9568 = vmatpush1.bf16.msra.mxu0 %v9567_v49  ;;  %9538 = vmatprep.subr.bf16.mxu1 %v13216_v47 }
 0x26c   : > { %v13225_v2 = vmul.f32 %v2387_v20, %v2343_v39  ;;  %1546 = vrot.lane.b32.xlu1 %v13214_v5, %s11006_s20  ;;  %1544 = vrot.lane.b32.xlu0 %v13132_v14, %s11006_s20  ;;  %v13232_v6 = vmul.f32 %v2386_v63, %v2344_v57  ;;  %v1245_v20 = vld [vmem:[#allocation6 + $0x3b8] sm:$0xff] }
 0x26d   : > { %9570 = vmatprep.subr.bf16.mxu0 %v9569_v45  ;;  %9540 = vmatpush1.bf16.msra.mxu1 %v13209_v38  ;;  %v13235_v29 = vpop.permute.xlu1 %386 }
 0x26e   : > { %v385_v40 = vpop.permute.xlu0 %384  ;;  %v9573_v9 = vpack.c.bf16 %v13225_v2, %v2158_v54  ;;  %4097 = vmatprep.subr.mxu1 %v13225_v2  ;;  %v9575_v37 = vpack.c.bf16 %v13232_v6, %v2157_v48  ;;  %v984_v48 = vld [vmem:[#allocation6 + $0x2b8] sm:$0xff] }
 0x26f   : > { %v416_v1 = vsel %vm406_vm1, %v13064_v11, %v385_v40  ;;  %9572 = vmatpush1.bf16.msra.mxu0 %v9571_v36  ;;  %v415_v4 = vsel %vm406_vm1, %v385_v40, %v13235_v29  ;;  %v1606_v36 = vld [vmem:[#allocation6 + $0x5b8] sm:$0xff] }
 0x270   : > { %1807 = vrot.lane.b32.xlu1 %v13214_v5, %s11007_s10  ;;  %1805 = vrot.lane.b32.xlu0 %v13132_v14, %s11007_s10  ;;  %v13253_v62 = vmul.f32 %v461_v41, %v416_v1  ;;  %v494_v23 = vmul.f32 %v462_v22, %v415_v4 }
 0x271   : > { %9574 = vmatprep.subr.bf16.mxu0 %v9573_v9  ;;  %4098 = vmatpush1.msra.mxu1 %v13232_v6  ;;  %v13250_v18 = vpop.permute.xlu1 %649 }
 0x272   : > { %v648_v11 = vpop.permute.xlu0 %647  ;;  %9594 = vmatprep.subr.bf16.mxu1 %v13111_v59  ;;  %4110 = vmatmul.mubr.f32.vlgmr.msra.gmra.mrb[8].mxu1 %v13091_v19 }
 0x273   : > { %v676_v24 = vsel %vm667_vm2, %v648_v11, %v13250_v18  ;;  %v677_v46 = vsel %vm667_vm2, %v13079_v7, %v648_v11  ;;  %9576 = vmatpush1.bf16.msra.mxu0 %v9575_v37  ;;  %9596 = vmatpush1.bf16.msra.mxu1 %v13105_v61  ;;  %v983_v61 = vld [vmem:[#allocation6 + $0x2b0] sm:$0xff]  ;;  %v10756_v11 = vld [vmem:[%s11244_s12 + $0xb8] sm:$0xff] }
 0x274   : > { %v13263_v33 = vmul.f32 %v722_v28, %v677_v46  ;;  %v13265_v8 = vmul.f32 %v723_v55, %v676_v24  ;;  %2068 = vrot.lane.b32.xlu1 %v13214_v5, %s11008_s14  ;;  %2066 = vrot.lane.b32.xlu0 %v13132_v14, %s11008_s14  ;;  %v9611_v28 = vpack.c.bf16 %v13253_v62, %v13232_v6  ;;  %v10755_v55 = vld [vmem:[%s11244_s12 + $0xb0] sm:$0xff]  ;;  %v1867_v24 = vld [vmem:[#allocation6 + $0x6b8] sm:$0xff] }
 0x275   : > { %9598 = vmatprep.subr.bf16.mxu1 %v13153_v17  ;;  %v13277_v7 = vpop.permute.xlu1 %910  ;;  %9001 = vmatprep.mubr.msk.f32.mxu1 %vm3402_vm0, %v12767_v58  ;;  %v1244_v58 = vld [vmem:[#allocation6 + $0x3b0] sm:$0xff] }
 0x276   : > { %v13274_v59 = vpack.c.bf16 %v13263_v33, %v13253_v62  ;;  %v909_v3 = vpop.permute.xlu0 %908  ;;  %v13280_v21 = vpack.c.bf16 %v13265_v8, %v494_v23  ;;  %v1866_v46 = vld [vmem:[#allocation6 + $0x6b0] sm:$0xff] }
 0x277   : > { %9600 = vmatpush1.bf16.msra.mxu1 %v13148_v10  ;;  %v937_v54 = vsel %vm928_vm3, %v909_v3, %v13277_v7  ;;  %v938_v17 = vsel %vm928_vm3, %v13108_v13, %v909_v3  ;;  %v13359_v3 = vld [vmem:[%s11244_s12 + $0xf8] sm:$0xff] }
 0x278   : > { %9578 = vmatprep.subr.bf16.mxu0 %v13280_v21  ;;  %2329 = vrot.lane.b32.xlu1 %v13214_v5, %s11009_s11  ;;  %v1015_v63 = vmul.f32 %v983_v61, %v938_v17  ;;  %v1016_v39 = vmul.f32 %v984_v48, %v937_v54  ;;  %v2127_v61 = vld [vmem:[#allocation6 + $0x7b0] sm:$0xff]  ;;  %v2128_v48 = vld [vmem:[#allocation6 + $0x7b8] sm:$0xff] }
 0x279   : > { %2327 = vrot.lane.b32.xlu0 %v13132_v14, %s11009_s11  ;;  %9602 = vmatprep.subr.bf16.mxu1 %v13180_v52  ;;  %v13298_v10 = vpop.permute.xlu1 %1171  ;;  %v1605_v52 = vld [vmem:[#allocation6 + $0x5b0] sm:$0xff] }
 0x27a   : > { %9580 = vmatpush1.bf16.msra.mxu0 %v13274_v59  ;;  %v1170_v49 = vpop.permute.xlu0 %1169  ;;  %v9613_v6 = vpack.c.bf16 %v1016_v39, %v13265_v8  ;;  %v9615_v8 = vpack.c.bf16 %v1015_v63, %v13263_v33 }
 0x27b   : > { %v1198_v43 = vsel %vm1189_vm4, %v1170_v49, %v13298_v10  ;;  %v1199_v13 = vsel %vm1189_vm4, %v13129_v16, %v1170_v49  ;;  %9604 = vmatpush1.bf16.msra.mxu1 %v13174_v56 }
 0x27c   : > { %v13306_v57 = vmul.f32 %v1244_v58, %v1199_v13  ;;  %v1277_v45 = vmul.f32 %v1245_v20, %v1198_v43  ;;  %663 = vrot.lane.b32.xlu1 %v13214_v5, %s11002_s27  ;;  %9606 = vmatprep.subr.bf16.mxu1 %v13216_v47  ;;  %v9609_v47 = vpack.c.bf16 %v494_v23, %v13225_v2 }
 0x27d   : > { %400 = vrot.lane.b32.xlu0 %v13214_v5, %s11003_s29  ;;  %v13317_v16 = vpop.permute.xlu1 %1534 }
 0x27e   : > { %v13314_v40 = vpack.c.bf16 %v13306_v57, %v1015_v63  ;;  %v1533_v9 = vpop.permute.xlu0 %1532  ;;  %v13319_v41 = vpack.c.bf16 %v1277_v45, %v1016_v39  ;;  %v9617_v33 = vpack.c.bf16 %v10756_v11, %v1277_v45  ;;  %v2389_v63 = vld [vmem:[#allocation6 + $0x8b8] sm:$0xff] }
 0x27f   : > { %v1558_v56 = vsel %vm1550_vm5, %v1533_v9, %v13317_v16  ;;  %v1559_v1 = vsel %vm1550_vm5, %v13151_v31, %v1533_v9  ;;  %9608 = vmatpush1.bf16.msra.mxu1 %v13209_v38 }
 0x280   : > { %v13327_v22 = vmul.f32 %v1605_v52, %v1559_v1  ;;  %v1638_v4 = vmul.f32 %v1606_v36, %v1558_v56  ;;  %9582 = vmatprep.subr.bf16.mxu0 %v13319_v41  ;;  %1185 = vrot.lane.b32.xlu1 %v13214_v5, %s11005_s19  ;;  %v9619_v52 = vpack.c.bf16 %v10755_v55, %v13306_v57  ;;  %v3396_v56 = vld [vmem:[%s17311_s4] sm:$0xff]  ;;  %v2388_v1 = vld [vmem:[#allocation6 + $0x8b0] sm:$0xff] }
 0x281   : > { %924 = vrot.lane.b32.xlu0 %v13214_v5, %s11004_s16  ;;  %9610 = vmatprep.subr.bf16.mxu1 %v9609_v47  ;;  %v13343_v38 = vpop.permute.xlu1 %1795 }
 0x282   : > { %v13340_v31 = vpack.c.bf16 %v13327_v22, %v10755_v55  ;;  %9584 = vmatpush1.bf16.msra.mxu0 %v13314_v40  ;;  %v1794_v2 = vpop.permute.xlu0 %1793  ;;  %v13346_v37 = vpack.c.bf16 %v1638_v4, %v10756_v11  ;;  %v13397_v55 = vpop.f32.mrb[0].mxu0 }
 0x283   : > { %v1819_v5 = vsel %vm1811_vm6, %v1794_v2, %v13343_v38  ;;  %9612 = vmatpush1.bf16.msra.mxu1 %v9611_v28  ;;  %v1820_v23 = vsel %vm1811_vm6, %v13177_v34, %v1794_v2  ;;  %v13402_v11 = vpop.f32.mrb[1].mxu0 }
 0x284   : > { %9586 = vmatprep.subr.bf16.mxu0 %v13346_v37  ;;  %v13353_v62 = vpop.f32.mrb[2].mxu1  ;;  %1809 = vrot.lane.b32.xlu1 %v13359_v3, %s11007_s10  ;;  %v1899_v58 = vmul.f32 %v1867_v24, %v1819_v5  ;;  %v1898_v43 = vmul.f32 %v1866_v46, %v1820_v23  ;;  %v463_v46 = vld [vmem:[#allocation6 + $0xc0] sm:$0xff] }
 0x285   : > { %1548 = vrot.lane.b32.xlu0 %v13359_v3, %s11006_s20  ;;  %v13365_v54 = vpop.f32.mrb[3].mxu1  ;;  %9614 = vmatprep.subr.bf16.mxu1 %v9613_v6 }
 0x286   : > { %9588 = vmatpush1.bf16.msra.mxu0 %v13340_v31  ;;  %v13369_v17 = vpop.permute.xlu1 %2056  ;;  %v2055_v34 = vpop.permute.xlu0 %2054  ;;  %v9621_v28 = vpack.c.bf16 %v1899_v58, %v1638_v4  ;;  %v9623_v24 = vpack.c.bf16 %v1898_v43, %v13327_v22 }
 0x287   : > { %v2080_v20 = vsel %vm2072_vm7, %v2055_v34, %v13369_v17  ;;  %v2081_v49 = vsel %vm2072_vm7, %v13196_v35, %v2055_v34  ;;  %9616 = vmatpush1.bf16.msra.mxu1 %v9615_v8  ;;  %v725_v8 = vld [vmem:[#allocation6 + $0x1c8] sm:$0xff] }
 0x288   : > { %v2159_v13 = vmul.f32 %v2127_v61, %v2081_v49  ;;  %v2160_v39 = vmul.f32 %v2128_v48, %v2080_v20  ;;  %2331 = vrot.lane.b32.xlu1 %v13359_v3, %s11009_s11  ;;  %9618 = vmatprep.subr.bf16.mxu1 %v9617_v33  ;;  %v464_v61 = vld [vmem:[#allocation6 + $0xc8] sm:$0xff]  ;;  %v724_v48 = vld [vmem:[#allocation6 + $0x1c0] sm:$0xff] }
 0x289   : > { %2070 = vrot.lane.b32.xlu0 %v13359_v3, %s11008_s14 }
 0x28a   : > { %v13382_v36 = vpack.c.bf16 %v2159_v13, %v1898_v43  ;;  %v13384_v9 = vpop.permute.xlu1 %2317  ;;  %v2316_v35 = vpop.permute.xlu0 %2315  ;;  %v13389_v45 = vpack.c.bf16 %v2160_v39, %v1899_v58 }
 0x28b   : > { %v2341_v47 = vsel %vm2333_vm8, %v2316_v35, %v13384_v9  ;;  %v2342_v57 = vsel %vm2333_vm8, %v13211_v53, %v2316_v35  ;;  %9620 = vmatpush1.bf16.msra.mxu1 %v9619_v52 }
 0x28c   : > { %9590 = vmatprep.subr.bf16.mxu0 %v13389_v45  ;;  %v13400_v2 = vmul.f32 %v2389_v63, %v2341_v47  ;;  %9622 = vmatprep.subr.bf16.mxu1 %v9621_v28  ;;  %v13405_v5 = vmul.f32 %v2388_v1, %v2342_v57  ;;  %v1246_v47 = vld [vmem:[#allocation6 + $0x3c0] sm:$0xff]  ;;  %v1247_v57 = vld [vmem:[#allocation6 + $0x3c8] sm:$0xff] }
 0x28d   : > { %3399 = vperm.xlu0 %10735, %v3396_v56   ;;  %9592 = vmatpush1.bf16.msra.mxu0 %v13382_v36  ;;  %v985_v56 = vld [vmem:[#allocation6 + $0x2c0] sm:$0xff] }
 0x28e   : > { %v13408_v6 = vpop.permute.xlu1 %390  ;;  %v389_v53 = vpop.permute.xlu0 %388  ;;  %v9625_v4 = vpack.c.bf16 %v13400_v2, %v2160_v39  ;;  %4168 = vmatprep.subr.mxu0 %v13400_v2  ;;  %v9627_v20 = vpack.c.bf16 %v13405_v5, %v2159_v13 }
 0x28f   : > { %v414_v23 = vsel %vm406_vm1, %v13235_v29, %v389_v53  ;;  %9624 = vmatpush1.bf16.msra.mxu1 %v9623_v24  ;;  %v413_v22 = vsel %vm406_vm1, %v389_v53, %v13408_v6 }
 0x290   : > { %9626 = vmatprep.subr.bf16.mxu1 %v9625_v4  ;;  %v13422_v49 = vmul.f32 %v463_v46, %v414_v23  ;;  %v496_v39 = vmul.f32 %v464_v61, %v413_v22  ;;  %v1608_v61 = vld [vmem:[#allocation6 + $0x5c8] sm:$0xff] }
 0x291   : > { %4169 = vmatpush1.msra.mxu0 %v13405_v5 }
 0x292   : > { %v13419_v34 = vpop.permute.xlu1 %653  ;;  %v652_v58 = vpop.permute.xlu0 %651  ;;  %9646 = vmatprep.subr.bf16.mxu0 %v13280_v21  ;;  %4181 = vmatmul.mubr.f32.vlgmr.msra.gmra.mrb[10].mxu0 %v13091_v19  ;;  %v13436_v21 = vld [vmem:[#allocation8 + $0x8] sm:$0xff] }
 0x293   : > { %v674_v29 = vsel %vm667_vm2, %v652_v58, %v13419_v34  ;;  %v675_v43 = vsel %vm667_vm2, %v13250_v18, %v652_v58  ;;  %9628 = vmatpush1.bf16.msra.mxu1 %v9627_v20  ;;  %9648 = vmatpush1.bf16.msra.mxu0 %v13274_v59  ;;  %v986_v59 = vld [vmem:[#allocation6 + $0x2c8] sm:$0xff] }
 0x294   : > { %v13432_v33 = vmul.f32 %v724_v48, %v675_v43  ;;  %v757_v63 = vmul.f32 %v725_v8, %v674_v29  ;;  %9650 = vmatprep.subr.bf16.mxu0 %v13319_v41  ;;  %9002 = vmatprep.mubr.msk.f32.mxu0 %vm3402_vm0, %v13436_v21  ;;  %v9663_v43 = vpack.c.bf16 %v13422_v49, %v13405_v5 }
 0x296   : > { %v13442_v13 = vpack.c.bf16 %v13432_v33, %v13422_v49  ;;  %v13444_v18 = vpop.permute.xlu1 %914  ;;  %v913_v52 = vpop.permute.xlu0 %912  ;;  %v13446_v35 = vpack.c.bf16 %v757_v63, %v496_v39  ;;  %v2129_v49 = vld [vmem:[#allocation6 + $0x7c0] sm:$0xff] }
 0x297   : > { %9652 = vmatpush1.bf16.msra.mxu0 %v13314_v40  ;;  %v935_v41 = vsel %vm928_vm3, %v913_v52, %v13444_v18  ;;  %v936_v1 = vsel %vm928_vm3, %v13277_v7, %v913_v52  ;;  %v10759_v52 = vld [vmem:[%s11244_s12 + $0xc0] sm:$0xff] }
 0x298   : > { %9630 = vmatprep.subr.bf16.mxu1 %v13446_v35  ;;  %9654 = vmatprep.subr.bf16.mxu0 %v13346_v37  ;;  %v1017_v4 = vmul.f32 %v985_v56, %v936_v1  ;;  %v1018_v46 = vmul.f32 %v986_v59, %v935_v41  ;;  %v1607_v37 = vld [vmem:[#allocation6 + $0x5c0] sm:$0xff]  ;;  %v10760_v41 = vld [vmem:[%s11244_s12 + $0xc8] sm:$0xff] }
 0x299   : > { %9632 = vmatpush1.bf16.msra.mxu1 %v13442_v13  ;;  %v1869_v1 = vld [vmem:[#allocation6 + $0x6c8] sm:$0xff] }
 0x29a   : > { %v13458_v28 = vpop.permute.xlu1 %1175  ;;  %v1174_v40 = vpop.permute.xlu0 %1173 }
 0x29b   : > { %v1196_v24 = vsel %vm1189_vm4, %v1174_v40, %v13458_v28  ;;  %v1197_v53 = vsel %vm1189_vm4, %v13298_v10, %v1174_v40  ;;  %9656 = vmatpush1.bf16.msra.mxu0 %v13340_v31 }
 0x29c   : > { %v1278_v7 = vmul.f32 %v1246_v47, %v1197_v53  ;;  %v1279_v23 = vmul.f32 %v1247_v57, %v1196_v24  ;;  %9658 = vmatprep.subr.bf16.mxu0 %v13389_v45  ;;  %v9661_v45 = vpack.c.bf16 %v496_v39, %v13400_v2  ;;  %v9665_v39 = vpack.c.bf16 %v1018_v46, %v757_v63  ;;  %v1868_v47 = vld [vmem:[#allocation6 + $0x6c0] sm:$0xff]  ;;  %v2130_v57 = vld [vmem:[#allocation6 + $0x7c8] sm:$0xff] }
 0x29d   : > { %v9667_v63 = vpack.c.bf16 %v1017_v4, %v13432_v33 }
 0x29e   : > { %v13468_v22 = vpack.c.bf16 %v1278_v7, %v1017_v4  ;;  %v13470_v48 = vpop.permute.xlu1 %1538  ;;  %v1537_v8 = vpop.permute.xlu0 %1536  ;;  %v13472_v58 = vpack.c.bf16 %v1279_v23, %v1018_v46  ;;  %v9671_v33 = vpack.c.bf16 %v10759_v52, %v1278_v7 }
 0x29f   : > { %v1556_v10 = vsel %vm1550_vm5, %v1537_v8, %v13470_v48  ;;  %v1557_v31 = vsel %vm1550_vm5, %v13317_v16, %v1537_v8  ;;  %9660 = vmatpush1.bf16.msra.mxu0 %v13382_v36 }
 0x2a0   : > { %v1639_v20 = vmul.f32 %v1607_v37, %v1557_v31  ;;  %v1640_v29 = vmul.f32 %v1608_v61, %v1556_v10  ;;  %9634 = vmatprep.subr.bf16.mxu1 %v13472_v58  ;;  %9662 = vmatprep.subr.bf16.mxu0 %v9661_v45  ;;  %v2391_v31 = vld [vmem:[#allocation6 + $0x8c8] sm:$0xff] }
 0x2a1   : > { %9636 = vmatpush1.bf16.msra.mxu1 %v13468_v22 }
 0x2a2   : > { %v13487_v56 = vpack.c.bf16 %v1639_v20, %v10759_v52  ;;  %v13489_v59 = vpop.permute.xlu1 %1799  ;;  %v1798_v16 = vpop.permute.xlu0 %1797  ;;  %v13492_v2 = vpack.c.bf16 %v1640_v29, %v10760_v41 }
 0x2a3   : > { %v1817_v36 = vsel %vm1811_vm6, %v1798_v16, %v13489_v59  ;;  %9664 = vmatpush1.bf16.msra.mxu0 %v9663_v43  ;;  %v1818_v5 = vsel %vm1811_vm6, %v13343_v38, %v1798_v16  ;;  %v9669_v38 = vpack.c.bf16 %v10760_v41, %v1279_v23 }
 0x2a4   : > { %9638 = vmatprep.subr.bf16.mxu1 %v13492_v2  ;;  %9666 = vmatprep.subr.bf16.mxu0 %v9665_v39  ;;  %v1901_v53 = vmul.f32 %v1869_v1, %v1817_v36  ;;  %v1900_v61 = vmul.f32 %v1868_v47, %v1818_v5  ;;  %v2390_v39 = vld [vmem:[#allocation6 + $0x8c0] sm:$0xff] }
 0x2a5   : > { %9640 = vmatpush1.bf16.msra.mxu1 %v13487_v56 }
 0x2a6   : > { %v13503_v40 = vpop.permute.xlu1 %2060  ;;  %v2059_v24 = vpop.permute.xlu0 %2058  ;;  %v9673_v41 = vpack.c.bf16 %v1901_v53, %v1640_v29  ;;  %v9675_v52 = vpack.c.bf16 %v1900_v61, %v1639_v20 }
 0x2a7   : > { %v2078_v46 = vsel %vm2072_vm7, %v2059_v24, %v13503_v40  ;;  %v2079_v37 = vsel %vm2072_vm7, %v13369_v17, %v2059_v24  ;;  %9668 = vmatpush1.bf16.msra.mxu0 %v9667_v63  ;;  %v727_v63 = vld [vmem:[#allocation6 + $0x1d8] sm:$0xff] }
 0x2a8   : > { %v2161_v8 = vmul.f32 %v2129_v49, %v2079_v37  ;;  %v2162_v10 = vmul.f32 %v2130_v57, %v2078_v46  ;;  %9670 = vmatprep.subr.bf16.mxu0 %v9669_v38  ;;  %v466_v49 = vld [vmem:[#allocation6 + $0xd8] sm:$0xff]  ;;  %v726_v57 = vld [vmem:[#allocation6 + $0x1d0] sm:$0xff] }
 0x2aa   : > { %v13511_v4 = vpack.c.bf16 %v2161_v8, %v1900_v61  ;;  %v13513_v45 = vpop.permute.xlu1 %2321  ;;  %v2320_v43 = vpop.permute.xlu0 %2319  ;;  %v13515_v16 = vpack.c.bf16 %v2162_v10, %v1901_v53 }
 0x2ab   : > { %v2339_v17 = vsel %vm2333_vm8, %v2320_v43, %v13513_v45  ;;  %v2340_v23 = vsel %vm2333_vm8, %v13384_v9, %v2320_v43  ;;  %9672 = vmatpush1.bf16.msra.mxu0 %v9671_v33  ;;  %v465_v9 = vld [vmem:[#allocation6 + $0xd0] sm:$0xff] }
 0x2ac   : > { %9642 = vmatprep.subr.bf16.mxu1 %v13515_v16  ;;  %v13524_v7 = vmul.f32 %v2391_v31, %v2339_v17  ;;  %9674 = vmatprep.subr.bf16.mxu0 %v9673_v41  ;;  %v13527_v1 = vmul.f32 %v2390_v39, %v2340_v23  ;;  %v1248_v17 = vld [vmem:[#allocation6 + $0x3d0] sm:$0xff]  ;;  %v1249_v23 = vld [vmem:[#allocation6 + $0x3d8] sm:$0xff] }
 0x2ad   : > { %9644 = vmatpush1.bf16.msra.mxu1 %v13511_v4 }
 0x2ae   : > { %v13529_v36 = vpop.permute.xlu1 %394  ;;  %4239 = vmatprep.subr.mxu1 %v13524_v7  ;;  %v393_v47 = vpop.permute.xlu0 %392  ;;  %v9677_v5 = vpack.c.bf16 %v13524_v7, %v2162_v10 }
 0x2af   : > { %v412_v29 = vsel %vm406_vm1, %v13408_v6, %v393_v47  ;;  %9676 = vmatpush1.bf16.msra.mxu0 %v9675_v52  ;;  %v411_v20 = vsel %vm406_vm1, %v393_v47, %v13529_v36  ;;  %v9679_v6 = vpack.c.bf16 %v13527_v1, %v2161_v8 }
 0x2b0   : > { %9678 = vmatprep.subr.bf16.mxu0 %v9677_v5  ;;  %v497_v46 = vmul.f32 %v465_v9, %v412_v29  ;;  %v498_v61 = vmul.f32 %v466_v49, %v411_v20  ;;  %v1609_v29 = vld [vmem:[#allocation6 + $0x5d0] sm:$0xff]  ;;  %v1610_v49 = vld [vmem:[#allocation6 + $0x5d8] sm:$0xff] }
 0x2b1   : > { %4240 = vmatpush1.msra.mxu1 %v13527_v1 }
 0x2b2   : > { %v13540_v24 = vpop.permute.xlu1 %657  ;;  %4252 = vmatmul.mubr.f32.vlgmr.msra.gmra.mrb[10].mxu1 %v13091_v19  ;;  %9698 = vmatprep.subr.bf16.mxu1 %v13446_v35  ;;  %v656_v53 = vpop.permute.xlu0 %655 }
 0x2b3   : > { %v672_v37 = vsel %vm667_vm2, %v656_v53, %v13540_v24  ;;  %v673_v38 = vsel %vm667_vm2, %v13419_v34, %v656_v53  ;;  %9700 = vmatpush1.bf16.msra.mxu1 %v13442_v13  ;;  %9003 = vmatprep.mubr.msk.f32.mxu1 %vm3402_vm0, %v13436_v21  ;;  %v987_v34 = vld [vmem:[#allocation6 + $0x2d0] sm:$0xff]  ;;  %v988_v13 = vld [vmem:[#allocation6 + $0x2d8] sm:$0xff] }
 0x2b4   : > { %v13554_v10 = vmul.f32 %v726_v57, %v673_v38  ;;  %v759_v35 = vmul.f32 %v727_v63, %v672_v37  ;;  %9680 = vmatpush1.bf16.msra.mxu0 %v9679_v6  ;;  %9702 = vmatprep.subr.bf16.mxu1 %v13472_v58  ;;  %v9715_v38 = vpack.c.bf16 %v497_v46, %v13527_v1 }
 0x2b6   : > { %v13558_v8 = vpack.c.bf16 %v13554_v10, %v497_v46  ;;  %v13560_v31 = vpop.permute.xlu1 %918  ;;  %v917_v33 = vpop.permute.xlu0 %916  ;;  %v13562_v43 = vpack.c.bf16 %v759_v35, %v498_v61 }
 0x2b7   : > { %9704 = vmatpush1.bf16.msra.mxu1 %v13468_v22  ;;  %v933_v58 = vsel %vm928_vm3, %v917_v33, %v13560_v31  ;;  %v934_v39 = vsel %vm928_vm3, %v13444_v18, %v917_v33 }
 0x2b8   : > { %9682 = vmatprep.subr.bf16.mxu0 %v13562_v43  ;;  %9706 = vmatprep.subr.bf16.mxu1 %v13492_v2  ;;  %v1019_v47 = vmul.f32 %v987_v34, %v934_v39  ;;  %v1020_v5 = vmul.f32 %v988_v13, %v933_v58  ;;  %v10762_v13 = vld [vmem:[%s11244_s12 + $0xd8] sm:$0xff] }
 0x2b9   : > { %9684 = vmatpush1.bf16.msra.mxu0 %v13558_v8 }
 0x2ba   : > { %v13574_v41 = vpop.permute.xlu1 %1179  ;;  %v1178_v22 = vpop.permute.xlu0 %1177  ;;  %v9719_v1 = vpack.c.bf16 %v1019_v47, %v13554_v10 }
 0x2bb   : > { %v1194_v2 = vsel %vm1189_vm4, %v1178_v22, %v13574_v41  ;;  %v1195_v52 = vsel %vm1189_vm4, %v13458_v28, %v1178_v22  ;;  %9708 = vmatpush1.bf16.msra.mxu1 %v13487_v56  ;;  %v9713_v28 = vpack.c.bf16 %v498_v61, %v13524_v7  ;;  %v10761_v7 = vld [vmem:[%s11244_s12 + $0xd0] sm:$0xff] }
 0x2bc   : > { %v1280_v18 = vmul.f32 %v1248_v17, %v1195_v52  ;;  %v1281_v9 = vmul.f32 %v1249_v23, %v1194_v2  ;;  %9710 = vmatprep.subr.bf16.mxu1 %v13515_v16  ;;  %v1870_v17 = vld [vmem:[#allocation6 + $0x6d0] sm:$0xff]  ;;  %v2132_v2 = vld [vmem:[#allocation6 + $0x7d8] sm:$0xff] }
 0x2bd   : > { %v2131_v22 = vld [vmem:[#allocation6 + $0x7d0] sm:$0xff] }
 0x2be   : > { %v13584_v20 = vpack.c.bf16 %v1280_v18, %v1019_v47  ;;  %v13586_v57 = vpop.permute.xlu1 %1542  ;;  %v1541_v63 = vpop.permute.xlu0 %1540  ;;  %v13588_v53 = vpack.c.bf16 %v1281_v9, %v1020_v5  ;;  %v9721_v52 = vpack.c.bf16 %v10762_v13, %v1281_v9 }
 0x2bf   : > { %v1554_v56 = vsel %vm1550_vm5, %v1541_v63, %v13586_v57  ;;  %v1555_v16 = vsel %vm1550_vm5, %v13470_v48, %v1541_v63  ;;  %9712 = vmatpush1.bf16.msra.mxu1 %v13511_v4  ;;  %v9717_v48 = vpack.c.bf16 %v1020_v5, %v759_v35  ;;  %v1871_v4 = vld [vmem:[#allocation6 + $0x6d8] sm:$0xff]  ;;  %v9723_v63 = vpack.c.bf16 %v10761_v7, %v1280_v18 }
 0x2c0   : > { %v1641_v6 = vmul.f32 %v1609_v29, %v1555_v16  ;;  %v1642_v37 = vmul.f32 %v1610_v49, %v1554_v56  ;;  %9686 = vmatprep.subr.bf16.mxu0 %v13588_v53  ;;  %9714 = vmatprep.subr.bf16.mxu1 %v9713_v28  ;;  %v13622_v29 = vpop.f32.mrb[2].mxu0 }
 0x2c1   : > { %9688 = vmatpush1.bf16.msra.mxu0 %v13584_v20 }
 0x2c2   : > { %v13602_v61 = vpack.c.bf16 %v1641_v6, %v10761_v7  ;;  %v13604_v33 = vpop.permute.xlu1 %1803  ;;  %v1802_v34 = vpop.permute.xlu0 %1801  ;;  %v13607_v58 = vpack.c.bf16 %v1642_v37, %v10762_v13 }
 0x2c3   : > { %v1815_v39 = vsel %vm1811_vm6, %v1802_v34, %v13604_v33  ;;  %9716 = vmatpush1.bf16.msra.mxu1 %v9715_v38  ;;  %v1816_v35 = vsel %vm1811_vm6, %v13489_v59, %v1802_v34  ;;  %v2393_v38 = vld [vmem:[#allocation6 + $0x8d8] sm:$0xff] }
 0x2c4   : > { %9690 = vmatprep.subr.bf16.mxu0 %v13607_v58  ;;  %9718 = vmatprep.subr.bf16.mxu1 %v9717_v48  ;;  %v13615_v46 = vpop.f32.mrb[4].mxu1  ;;  %v1903_v23 = vmul.f32 %v1871_v4, %v1815_v39  ;;  %v1902_v28 = vmul.f32 %v1870_v17, %v1816_v35  ;;  %v2392_v48 = vld [vmem:[#allocation6 + $0x8d0] sm:$0xff] }
 0x2c5   : > { %9692 = vmatpush1.bf16.msra.mxu0 %v13602_v61  ;;  %v13620_v5 = vpop.f32.mrb[5].mxu1 }
 0x2c6   : > { %v13624_v49 = vpop.permute.xlu1 %2064  ;;  %v2063_v10 = vpop.permute.xlu0 %2062  ;;  %v9725_v16 = vpack.c.bf16 %v1903_v23, %v1642_v37  ;;  %v9727_v18 = vpack.c.bf16 %v1902_v28, %v1641_v6  ;;  %v468_v6 = vld [vmem:[#allocation6 + $0xe8] sm:$0xff] }
 0x2c7   : > { %9720 = vmatpush1.bf16.msra.mxu1 %v9719_v1  ;;  %v2076_v47 = vsel %vm2072_vm7, %v2063_v10, %v13624_v49  ;;  %v2077_v59 = vsel %vm2072_vm7, %v13503_v40, %v2063_v10  ;;  %v729_v10 = vld [vmem:[#allocation6 + $0x1e8] sm:$0xff] }
 0x2c8   : > { %9722 = vmatprep.subr.bf16.mxu1 %v9721_v52  ;;  %v2163_v9 = vmul.f32 %v2131_v22, %v2077_v59  ;;  %v2164_v56 = vmul.f32 %v2132_v2, %v2076_v47  ;;  %v467_v22 = vld [vmem:[#allocation6 + $0xe0] sm:$0xff] }
 0x2c9   : > { %v728_v52 = vld [vmem:[#allocation6 + $0x1e0] sm:$0xff] }
 0x2ca   : > { %v13632_v34 = vpack.c.bf16 %v2163_v9, %v1902_v28  ;;  %v13634_v13 = vpop.permute.xlu1 %2325  ;;  %v2324_v4 = vpop.permute.xlu0 %2323  ;;  %v9693_v39 = vpack.c.bf16 %v2164_v56, %v1903_v23 }
 0x2cb   : > { %9724 = vmatpush1.bf16.msra.mxu1 %v9723_v63  ;;  %v2337_v1 = vsel %vm2333_vm8, %v2324_v4, %v13634_v13  ;;  %v2338_v40 = vsel %vm2333_vm8, %v13513_v45, %v2324_v4 }
 0x2cc   : > { %9726 = vmatprep.subr.bf16.mxu1 %v9725_v16  ;;  %9694 = vmatprep.subr.bf16.mxu0 %v9693_v39  ;;  %v13642_v37 = vmul.f32 %v2393_v38, %v2337_v1  ;;  %v13644_v7 = vmul.f32 %v2392_v48, %v2338_v40 }
 0x2cd   : > { %9696 = vmatpush1.bf16.msra.mxu0 %v13632_v34 }
 0x2ce   : > { %v13647_v17 = vpop.permute.xlu1 %398  ;;  %4310 = vmatprep.subr.mxu0 %v13642_v37  ;;  %v397_v35 = vpop.permute.xlu0 %396  ;;  %v9729_v23 = vpack.c.bf16 %v13642_v37, %v2164_v56  ;;  %v9731_v47 = vpack.c.bf16 %v13644_v7, %v2163_v9 }
 0x2cf   : > { %9728 = vmatpush1.bf16.msra.mxu1 %v9727_v18  ;;  %v410_v45 = vsel %vm406_vm1, %v13529_v36, %v397_v35  ;;  %v409_v2 = vsel %vm406_vm1, %v397_v35, %v13647_v17  ;;  %v1250_v18 = vld [vmem:[#allocation6 + $0x3e0] sm:$0xff]  ;;  %v1251_v35 = vld [vmem:[#allocation6 + $0x3e8] sm:$0xff] }
 0x2d0   : > { %9730 = vmatprep.subr.bf16.mxu1 %v9729_v23  ;;  %v499_v36 = vmul.f32 %v467_v22, %v410_v45  ;;  %v500_v9 = vmul.f32 %v468_v6, %v409_v2 }
 0x2d1   : > { %4311 = vmatpush1.msra.mxu0 %v13644_v7 }
 0x2d2   : > { %v13659_v59 = vpop.permute.xlu1 %661  ;;  %4323 = vmatmul.mubr.f32.vlgmr.msra.gmra.mrb[12].mxu0 %v13091_v19  ;;  %9750 = vmatprep.subr.bf16.mxu0 %v13562_v43  ;;  %v660_v63 = vpop.permute.xlu0 %659 }
 0x2d3   : > { %v670_v28 = vsel %vm667_vm2, %v660_v63, %v13659_v59  ;;  %v671_v56 = vsel %vm667_vm2, %v13540_v24, %v660_v63  ;;  %9732 = vmatpush1.bf16.msra.mxu1 %v9731_v47  ;;  %9752 = vmatpush1.bf16.msra.mxu0 %v13558_v8  ;;  %v13675_v19 = vpop.f32.mrb[3].mxu0  ;;  %v989_v8 = vld [vmem:[#allocation6 + $0x2e0] sm:$0xff] }
 0x2d4   : > { %v13670_v16 = vmul.f32 %v728_v52, %v671_v56  ;;  %v761_v38 = vmul.f32 %v729_v10, %v670_v28  ;;  %9754 = vmatprep.subr.bf16.mxu0 %v13588_v53  ;;  %9004 = vmatprep.mubr.msk.f32.mxu0 %vm3402_vm0, %v13436_v21  ;;  %v990_v53 = vld [vmem:[#allocation6 + $0x2e8] sm:$0xff]  ;;  %v1611_v52 = vld [vmem:[#allocation6 + $0x5e0] sm:$0xff] }
 0x2d5   : > { %v1612_v10 = vld [vmem:[#allocation6 + $0x5e8] sm:$0xff] }
 0x2d6   : > { %v13678_v43 = vpack.c.bf16 %v13670_v16, %v499_v36  ;;  %v13680_v48 = vpop.permute.xlu1 %922  ;;  %v921_v24 = vpop.permute.xlu0 %920  ;;  %v13682_v4 = vpack.c.bf16 %v761_v38, %v500_v9 }
 0x2d7   : > { %9756 = vmatpush1.bf16.msra.mxu0 %v13584_v20  ;;  %v931_v1 = vsel %vm928_vm3, %v921_v24, %v13680_v48  ;;  %v932_v40 = vsel %vm928_vm3, %v13560_v31, %v921_v24  ;;  %v9765_v24 = vpack.c.bf16 %v500_v9, %v13642_v37  ;;  %v10763_v37 = vld [vmem:[%s11244_s12 + $0xe0] sm:$0xff] }
 0x2d8   : > { %9734 = vmatprep.subr.bf16.mxu1 %v13682_v4  ;;  %9758 = vmatprep.subr.bf16.mxu0 %v13607_v58  ;;  %v1021_v45 = vmul.f32 %v989_v8, %v932_v40  ;;  %v1022_v6 = vmul.f32 %v990_v53, %v931_v1  ;;  %v9767_v53 = vpack.c.bf16 %v499_v36, %v13644_v7  ;;  %v1872_v36 = vld [vmem:[#allocation6 + $0x6e0] sm:$0xff] }
 0x2d9   : > { %9736 = vmatpush1.bf16.msra.mxu1 %v13678_v43 }
 0x2da   : > { %v13694_v23 = vpop.permute.xlu1 %1183  ;;  %v1182_v20 = vpop.permute.xlu0 %1181  ;;  %v9771_v7 = vpack.c.bf16 %v1021_v45, %v13670_v16 }
 0x2db   : > { %v1192_v58 = vsel %vm1189_vm4, %v1182_v20, %v13694_v23  ;;  %v1193_v22 = vsel %vm1189_vm4, %v13574_v41, %v1182_v20  ;;  %9760 = vmatpush1.bf16.msra.mxu0 %v13602_v61 }
 0x2dc   : > { %v1282_v31 = vmul.f32 %v1250_v18, %v1193_v22  ;;  %v1283_v2 = vmul.f32 %v1251_v35, %v1192_v58  ;;  %9762 = vmatprep.subr.bf16.mxu0 %v9693_v39  ;;  %v1873_v18 = vld [vmem:[#allocation6 + $0x6e8] sm:$0xff] }
 0x2de   : > { %v13703_v47 = vpack.c.bf16 %v1282_v31, %v1021_v45  ;;  %v13705_v63 = vpop.permute.xlu1 %1546  ;;  %v1545_v28 = vpop.permute.xlu0 %1544  ;;  %v13707_v56 = vpack.c.bf16 %v1283_v2, %v1022_v6 }
 0x2df   : > { %v1552_v41 = vsel %vm1550_vm5, %v1545_v28, %v13705_v63  ;;  %v1553_v61 = vsel %vm1550_vm5, %v13586_v57, %v1545_v28  ;;  %9764 = vmatpush1.bf16.msra.mxu0 %v13632_v34  ;;  %v9769_v34 = vpack.c.bf16 %v1022_v6, %v761_v38  ;;  %v2134_v38 = vld [vmem:[#allocation6 + $0x7e8] sm:$0xff] }
 0x2e0   : > { %v13717_v39 = vmul.f32 %v1611_v52, %v1553_v61  ;;  %v1644_v8 = vmul.f32 %v1612_v10, %v1552_v41  ;;  %9738 = vmatprep.subr.bf16.mxu1 %v13707_v56  ;;  %9766 = vmatprep.subr.bf16.mxu0 %v9765_v24  ;;  %v10764_v52 = vld [vmem:[%s11244_s12 + $0xe8] sm:$0xff]  ;;  %v9775_v41 = vpack.c.bf16 %v10763_v37, %v1282_v31 }
 0x2e1   : > { %9740 = vmatpush1.bf16.msra.mxu1 %v13703_v47  ;;  %v9773_v10 = vpack.c.bf16 %v10764_v52, %v1283_v2  ;;  %v2395_v61 = vld [vmem:[#allocation6 + $0x8e8] sm:$0xff]  ;;  %v2394_v2 = vld [vmem:[#allocation6 + $0x8e0] sm:$0xff] }
 0x2e2   : > { %v13724_v9 = vpack.c.bf16 %v13717_v39, %v10763_v37  ;;  %v13726_v1 = vpop.permute.xlu1 %1807  ;;  %v1806_v40 = vpop.permute.xlu0 %1805  ;;  %v13729_v57 = vpack.c.bf16 %v1644_v8, %v13132_v14  ;;  %v2133_v14 = vld [vmem:[#allocation6 + $0x7e0] sm:$0xff] }
 0x2e3   : > { %v1813_v35 = vsel %vm1811_vm6, %v1806_v40, %v13726_v1  ;;  %9768 = vmatpush1.bf16.msra.mxu0 %v9767_v53  ;;  %v1814_v20 = vsel %vm1811_vm6, %v13604_v33, %v1806_v40 }
 0x2e4   : > { %9742 = vmatprep.subr.bf16.mxu1 %v13729_v57  ;;  %9770 = vmatprep.subr.bf16.mxu0 %v9769_v34  ;;  %v1905_v58 = vmul.f32 %v1873_v18, %v1813_v35  ;;  %v1904_v33 = vmul.f32 %v1872_v36, %v1814_v20  ;;  %v470_v20 = vld [vmem:[#allocation6 + $0xf8] sm:$0xff] }
 0x2e5   : > { %9744 = vmatpush1.bf16.msra.mxu1 %v13724_v9 }
 0x2e6   : > { %v13740_v22 = vpop.permute.xlu1 %2068  ;;  %v2067_v6 = vpop.permute.xlu0 %2066  ;;  %v9777_v35 = vpack.c.bf16 %v1905_v58, %v1644_v8  ;;  %v9779_v37 = vpack.c.bf16 %v1904_v33, %v13717_v39  ;;  %v731_v8 = vld [vmem:[#allocation6 + $0x1f8] sm:$0xff] }
 0x2e7   : > { %v2074_v28 = vsel %vm2072_vm7, %v2067_v6, %v13740_v22  ;;  %v2075_v16 = vsel %vm2072_vm7, %v13624_v49, %v2067_v6  ;;  %9772 = vmatpush1.bf16.msra.mxu0 %v9771_v7  ;;  %v469_v6 = vld [vmem:[#allocation6 + $0xf0] sm:$0xff] }
 0x2e8   : > { %v2165_v45 = vmul.f32 %v2133_v14, %v2075_v16  ;;  %v2166_v24 = vmul.f32 %v2134_v38, %v2074_v28  ;;  %9774 = vmatprep.subr.bf16.mxu0 %v9773_v10  ;;  %v13768_v14 = vpop.f32.mrb[4].mxu0  ;;  %v730_v38 = vld [vmem:[#allocation6 + $0x1f0] sm:$0xff] }
 0x2ea   : > { %v13749_v53 = vpack.c.bf16 %v2165_v45, %v1904_v33  ;;  %v13751_v40 = vpop.permute.xlu1 %2329  ;;  %v13753_v18 = vpack.c.bf16 %v2166_v24, %v1905_v58  ;;  %v13784_v33 = vpop.f32.mrb[5].mxu0 }
 0x2eb   : > { %v2328_v34 = vpop.permute.xlu0 %2327  ;;  %9776 = vmatpush1.bf16.msra.mxu0 %v9775_v41 }
 0x2ec   : > { %v2335_v49 = vsel %vm2333_vm8, %v2328_v34, %v13751_v40  ;;  %v2336_v7 = vsel %vm2333_vm8, %v13634_v13, %v2328_v34  ;;  %9746 = vmatprep.subr.bf16.mxu1 %v13753_v18  ;;  %9778 = vmatprep.subr.bf16.mxu0 %v9777_v35  ;;  %v13796_v34 = vpop.f32.mrb[6].mxu0 }
 0x2ed   : > { %v13762_v31 = vmul.f32 %v2395_v61, %v2335_v49  ;;  %v13765_v36 = vmul.f32 %v2394_v2, %v2336_v7  ;;  %9748 = vmatpush1.bf16.msra.mxu1 %v13749_v53  ;;  %v13798_v49 = vld [vmem:[#allocation8] sm:$0xff]  ;;  %v991_v7 = vld [vmem:[#allocation6 + $0x2f0] sm:$0xff] }
 0x2ee   : > { %v664_v58 = vpop.permute.xlu1 %663 }
 0x2ef   : > { %v401_v13 = vpop.permute.xlu0 %400  ;;  %4381 = vmatprep.subr.mxu1 %v13762_v31  ;;  %v9781_v52 = vpack.c.bf16 %v13762_v31, %v2166_v24  ;;  %v668_v39 = vsel %vm667_vm2, %v664_v58, %v11431_v25  ;;  %v669_v10 = vsel %vm667_vm2, %v13659_v59, %v664_v58  ;;  %9780 = vmatpush1.bf16.msra.mxu0 %v9779_v37  ;;  %v1253_v59 = vld [vmem:[#allocation6 + $0x3f8] sm:$0xff]  ;;  %v13816_v58 = vpop.f32.mrb[7].mxu0 }
 0x2f0   : > { %v407_v28 = vsel %vm406_vm1, %v401_v13, %v11433_v26  ;;  %v408_v16 = vsel %vm406_vm1, %v13647_v17, %v401_v13  ;;  %v13786_v24 = vmul.f32 %v731_v8, %v668_v39  ;;  %v13790_v25 = vmul.f32 %v730_v38, %v669_v10  ;;  %v992_v26 = vld [vmem:[#allocation6 + $0x2f8] sm:$0xff]  ;;  %v1252_v17 = vld [vmem:[#allocation6 + $0x3f0] sm:$0xff] }
 0x2f1   : > { %v13788_v41 = vmul.f32 %v470_v20, %v407_v28  ;;  %9782 = vmatprep.subr.bf16.mxu0 %v9781_v52  ;;  %v13792_v61 = vmul.f32 %v469_v6, %v408_v16  ;;  %4382 = vmatpush1.msra.mxu1 %v13765_v36  ;;  %v9783_v2 = vpack.c.bf16 %v13765_v36, %v2165_v45  ;;  %v1613_v39 = vld [vmem:[#allocation6 + $0x5f0] sm:$0xff] }
 0x2f2   : > { %v1186_v35 = vpop.permute.xlu1 %1185  ;;  %4394 = vmatmul.mubr.f32.vlgmr.msra.gmra.mrb[12].mxu1 %v13798_v49  ;;  %9802 = vmatprep.subr.bf16.mxu1 %v13682_v4 }
 0x2f3   : > { %v925_v37 = vpop.permute.xlu0 %924  ;;  %v9785_v8 = vpack.c.bf16 %v13786_v24, %v13788_v41  ;;  %v1190_v20 = vsel %vm1189_vm4, %v1186_v35, %v11470_v50  ;;  %v1191_v45 = vsel %vm1189_vm4, %v13694_v23, %v1186_v35  ;;  %9784 = vmatpush1.bf16.msra.mxu0 %v9783_v2  ;;  %9804 = vmatpush1.bf16.msra.mxu1 %v13678_v43 }
 0x2f4   : > { %v929_v38 = vsel %vm928_vm3, %v925_v37, %v11472_v51  ;;  %v930_v4 = vsel %vm928_vm3, %v13680_v48, %v925_v37  ;;  %v13818_v6 = vmul.f32 %v1253_v59, %v1190_v20  ;;  %v9787_v50 = vpack.c.bf16 %v13790_v25, %v13792_v61  ;;  %9806 = vmatprep.subr.bf16.mxu1 %v13707_v56  ;;  %v1614_v51 = vld [vmem:[#allocation6 + $0x5f8] sm:$0xff] }
 0x2f5   : > { %v1024_v13 = vmul.f32 %v992_v26, %v929_v38  ;;  %v13823_v23 = vmul.f32 %v1252_v17, %v1191_v45  ;;  %v13825_v52 = vmul.f32 %v991_v7, %v930_v4  ;;  %9786 = vmatprep.subr.bf16.mxu0 %v9785_v8  ;;  %9005 = vmatprep.mubr.msk.f32.mxu1 %vm3402_vm0, %v13436_v21  ;;  %v1875_v26 = vld [vmem:[#allocation6 + $0x6f8] sm:$0xff]  ;;  %v2135_v17 = vld [vmem:[#allocation6 + $0x7f0] sm:$0xff] }
 0x2f6   : > { %v1810_v48 = vpop.permute.xlu1 %1809  ;;  %v10766_v45 = vld [vmem:[%s11244_s12 + $0xf0] sm:$0xff] }
 0x2f7   : > { %v1549_v10 = vpop.permute.xlu0 %1548  ;;  %v9789_v28 = vpack.c.bf16 %v13818_v6, %v1024_v13  ;;  %9788 = vmatpush1.bf16.msra.mxu0 %v9787_v50  ;;  %9808 = vmatpush1.bf16.msra.mxu1 %v13703_v47  ;;  %v9791_v56 = vpack.c.bf16 %v13823_v23, %v13825_v52  ;;  %v1843_v21 = vsel %vm1811_vm6, %v1810_v48, %v11521_v32  ;;  %v1874_v32 = vld [vmem:[#allocation6 + $0x6f0] sm:$0xff] }
 0x2f8   : > { %v1551_v43 = vsel %vm1550_vm5, %v13705_v63, %v1549_v10  ;;  %v1582_v16 = vsel %vm1550_vm5, %v1549_v10, %v11498_v15  ;;  %9810 = vmatprep.subr.bf16.mxu1 %v13729_v57  ;;  %v2136_v63 = vld [vmem:[#allocation6 + $0x7f8] sm:$0xff]  ;;  %v1812_v37 = vsel %vm1811_vm6, %v13726_v1, %v1810_v48  ;;  %v1907_v57 = vmul.f32 %v1875_v26, %v1843_v21 }
 0x2f9   : > { %v1646_v59 = vmul.f32 %v1614_v51, %v1582_v16  ;;  %v1645_v2 = vmul.f32 %v1613_v39, %v1551_v43  ;;  %9790 = vmatprep.subr.bf16.mxu0 %v9789_v28  ;;  %v1906_v50 = vmul.f32 %v1874_v32, %v1812_v37  ;;  %v9817_v1 = vpack.c.bf16 %v13788_v41, %v13762_v31  ;;  %v2397_v51 = vld [vmem:[#allocation6 + $0x8f8] sm:$0xff] }
 0x2fa   : > { %v2332_v8 = vpop.permute.xlu1 %2331  ;;  %v9819_v48 = vpack.c.bf16 %v13792_v61, %v13765_v36  ;;  %v9823_v36 = vpack.c.bf16 %v13825_v52, %v13790_v25  ;;  %v9825_v61 = vpack.c.bf16 %v13359_v3, %v13818_v6 }
 0x2fb   : > { %v2071_v15 = vpop.permute.xlu0 %2070  ;;  %v9793_v35 = vpack.c.bf16 %v1646_v59, %v13359_v3  ;;  %9792 = vmatpush1.bf16.msra.mxu0 %v9791_v56  ;;  %9812 = vmatpush1.bf16.msra.mxu1 %v13724_v9  ;;  %v9795_v38 = vpack.c.bf16 %v1645_v2, %v10766_v45  ;;  %v2334_v39 = vsel %vm2333_vm8, %v13751_v40, %v2332_v8 }
 0x2fc   : > { %v2073_v47 = vsel %vm2072_vm7, %v13740_v22, %v2071_v15  ;;  %v2104_v7 = vsel %vm2072_vm7, %v2071_v15, %v11535_v42  ;;  %9814 = vmatprep.subr.bf16.mxu1 %v13753_v18  ;;  %v2365_v42 = vsel %vm2333_vm8, %v2332_v8, %v11560_v60  ;;  %v2396_v18 = vld [vmem:[#allocation6 + $0x8f0] sm:$0xff]  ;;  %v9821_v60 = vpack.c.bf16 %v1024_v13, %v13786_v24  ;;  %v4931_v8 = vld [vmem:[#allocation6 + $0x108] sm:$0xff] }
 0x2fd   : > { %v2168_v20 = vmul.f32 %v2136_v63, %v2104_v7  ;;  %9794 = vmatprep.subr.bf16.mxu0 %v9793_v35  ;;  %v2167_v4 = vmul.f32 %v2135_v17, %v2073_v47  ;;  %v2429_v10 = vmul.f32 %v2397_v51, %v2365_v42  ;;  %v9827_v40 = vpack.c.bf16 %v10766_v45, %v13823_v23 }
 0x2fe   : > { %v9829_v13 = vpack.c.bf16 %v1907_v57, %v1646_v59  ;;  %v9831_v52 = vpack.c.bf16 %v1906_v50, %v1645_v2 }
 0x2ff   : > { %v9797_v22 = vpack.c.bf16 %v2168_v20, %v1907_v57  ;;  %9796 = vmatpush1.bf16.msra.mxu0 %v9795_v38  ;;  %9816 = vmatpush1.bf16.msra.mxu1 %v13749_v53  ;;  %v9799_v9 = vpack.c.bf16 %v2167_v4, %v1906_v50  ;;  %v2428_v53 = vmul.f32 %v2396_v18, %v2334_v39 }
 0x300   : > { %9818 = vmatprep.subr.bf16.mxu1 %v9817_v1  ;;  %v9833_v6 = vpack.c.bf16 %v2429_v10, %v2168_v20 }
 0x301   : > { %9798 = vmatprep.subr.bf16.mxu0 %v9797_v22  ;;  %v9835_v23 = vpack.c.bf16 %v2428_v53, %v2167_v4 }
 0x303   : > { %9800 = vmatpush1.bf16.msra.mxu0 %v9799_v9  ;;  %9820 = vmatpush1.bf16.msra.mxu1 %v9819_v48 }
 0x304   : > { %4452 = vmatprep.subr.mxu0 %v2429_v10  ;;  %9822 = vmatprep.subr.bf16.mxu1 %v9821_v60 }
 0x305   : > { %v13869_v31 = vpop.f32.mrb[6].mxu1 }
 0x306   : > { %v13871_v41 = vpop.f32.mrb[7].mxu1 }
 0x307   : > { %4453 = vmatpush1.msra.mxu0 %v2428_v53  ;;  %9824 = vmatpush1.bf16.msra.mxu1 %v9823_v36 }
 0x308   : > { %4465 = vmatmul.mubr.f32.vlgmr.msra.gmra.mrb[14].mxu0 %v13798_v49  ;;  %9826 = vmatprep.subr.bf16.mxu1 %v9825_v61 }
 0x30b   : > { %9828 = vmatpush1.bf16.msra.mxu1 %v9827_v40 }
 0x30c   : > { %v13879_v24 = vpop.permute.xlu0 %3399  ;;  %9830 = vmatprep.subr.bf16.mxu1 %v9829_v13 }
 0x30d   : > { %v3475_v28 = vadd.f32 %v13402_v11, %v13879_v24  ;;  %v3473_v25 = vadd.f32 %v13397_v55, %v13879_v24  ;;  %v3544_v55 = vadd.f32 %v13016_v44, %v13879_v24  ;;  %v3686_v63 = vadd.f32 %v13353_v62, %v13879_v24 }
 0x30e   : > { %v3688_v62 = vadd.f32 %v13365_v54, %v13879_v24  ;;  %v4671_v54 = vld [vmem:[#allocation6 + $0x8] sm:$0xff] }
 0x30f   : > { %v13885_v43 = vmax.f32 %v3475_v28, 0.0  ;;  %v13887_v3 = vmax.f32 %v3473_v25, 0.0  ;;  %9832 = vmatpush1.bf16.msra.mxu1 %v9831_v52  ;;  %v13919_v11 = vmax.f32 %v3544_v55, 0.0  ;;  %v14020_v17 = vmax.f32 %v3686_v63, 0.0 }
 0x310   : > { %9834 = vmatprep.subr.bf16.mxu1 %v9833_v6  ;;  %v14040_v15 = vmax.f32 %v3688_v62, 0.0 }
 0x311   : > { %4836 = vrot.lane.b32.xlu0 %v13885_v43, %s11002_s27  ;;  %4574 = vrot.lane.b32.xlu1 %v13887_v3, %s11003_s29  ;;  %17447 = vst [vmem:[#allocation23_spill] sm:$0xff] %v14020_v17 }
 0x312   : > { %17448 = vst [vmem:[#allocation24_spill] sm:$0xff] %v14040_v15 }
 0x313   : > { %9836 = vmatpush1.bf16.msra.mxu1 %v9835_v23 }
 0x314   : > { %9837 = vmatprep.subr.bf16.mxu1 %v11001_v0 }
 0x315   : > { %5094 = vrot.lane.b32.xlu0 %v13887_v3, %s11004_s16  ;;  %4576 = vrot.lane.b32.xlu1 %v13885_v43, %s11003_s29 }
 0x316   : > { %4536 = vmatmul.mubr.f32.vlgmr.msra.gmra.mrb[14].mxu1 %v13798_v49 }
 0x317   : > { %9838 = vmatpush1.bf16.msra.mxu1 %v11001_v0 }
 0x318   : > { %9839 = vmatprep.subr.bf16.mxu1 %v11001_v0 }
 0x319   : > { %5356 = vrot.lane.b32.xlu0 %v13885_v43, %s11005_s19  ;;  %4834 = vrot.lane.b32.xlu1 %v13887_v3, %s11002_s27 }
 0x31b   : > { %9840 = vmatpush1.bf16.msra.mxu1 %v11001_v0 }
 0x31c   : > { %9841 = vmatprep.subr.bf16.mxu1 %v11001_v0 }
 0x31d   : > { %5716 = vrot.lane.b32.xlu0 %v13885_v43, %s11006_s20  ;;  %5096 = vrot.lane.b32.xlu1 %v13885_v43, %s11004_s16 }
 0x31f   : > { %9842 = vmatpush1.bf16.msra.mxu1 %v11001_v0 }
 0x320   : > { %9843 = vmatprep.subr.bf16.mxu1 %v11001_v0 }
 0x321   : > { %5714 = vrot.lane.b32.xlu0 %v13887_v3, %s11006_s20  ;;  %5354 = vrot.lane.b32.xlu1 %v13887_v3, %s11005_s19 }
 0x323   : > { %9844 = vmatpush1.bf16.msra.mxu1 %v11001_v0  ;;  %v3546_v0 = vadd.f32 %v13023_v30, %v13879_v24  ;;  %v3615_v30 = vadd.f32 %v13622_v29, %v13879_v24  ;;  %v3617_v29 = vadd.f32 %v13675_v19, %v13879_v24 }
 0x325   : > { %5978 = vrot.lane.b32.xlu0 %v13919_v11, %s11007_s10  ;;  %5718 = vrot.lane.b32.xlu1 %v13919_v11, %s11006_s20  ;;  %v13926_v44 = vpop.f32.mrb[8].mxu0  ;;  %v13952_v16 = vmax.f32 %v3546_v0, 0.0  ;;  %v13974_v26 = vmax.f32 %v3615_v30, 0.0  ;;  %v13994_v21 = vmax.f32 %v3617_v29, 0.0 }
 0x326   : > { %v13928_v49 = vpop.f32.mrb[9].mxu0 }
 0x327   : > { %17440 = vst [vmem:[#allocation16_spill] sm:$0xff] %v13928_v49  ;;  %17443 = vst [vmem:[#allocation19_spill] sm:$0xff] %v13974_v26 }
 0x328   : > { %17444 = vst [vmem:[#allocation20_spill] sm:$0xff] %v13994_v21 }
 0x329   : > { %6236 = vrot.lane.b32.xlu0 %v13885_v43, %s11008_s14  ;;  %5976 = vrot.lane.b32.xlu1 %v13885_v43, %s11007_s10 }
 0x32d   : > { %6234 = vrot.lane.b32.xlu0 %v13887_v3, %s11008_s14  ;;  %5974 = vrot.lane.b32.xlu1 %v13887_v3, %s11007_s10 }
 0x331   : > { %6498 = vrot.lane.b32.xlu0 %v13919_v11, %s11009_s11  ;;  %6238 = vrot.lane.b32.xlu1 %v13919_v11, %s11008_s14 }
 0x335   : > { %4578 = vrot.lane.b32.xlu0 %v13919_v11, %s11003_s29  ;;  %6496 = vrot.lane.b32.xlu1 %v13885_v43, %s11009_s11 }
 0x339   : > { %4838 = vrot.lane.b32.xlu0 %v13919_v11, %s11002_s27  ;;  %6494 = vrot.lane.b32.xlu1 %v13887_v3, %s11009_s11 }
 0x33d   : > { %5098 = vrot.lane.b32.xlu0 %v13919_v11, %s11004_s16  ;;  %4580 = vrot.lane.b32.xlu1 %v13952_v16, %s11003_s29 }
 0x341   : > { %5358 = vrot.lane.b32.xlu0 %v13919_v11, %s11005_s19  ;;  %4840 = vrot.lane.b32.xlu1 %v13952_v16, %s11002_s27 }
 0x345   : > { %5720 = vrot.lane.b32.xlu0 %v13952_v16, %s11006_s20  ;;  %5100 = vrot.lane.b32.xlu1 %v13952_v16, %s11004_s16  ;;  %v13968_v59 = vpop.f32.mrb[8].mxu1 }
 0x346   : > { %17441 = vst [vmem:[#allocation17_spill] sm:$0xff] %v13968_v59  ;;  %v13970_v56 = vpop.f32.mrb[9].mxu1 }
 0x347   : > { %17442 = vst [vmem:[#allocation18_spill] sm:$0xff] %v13970_v56 }
 0x349   : > { %5980 = vrot.lane.b32.xlu0 %v13952_v16, %s11007_s10  ;;  %5360 = vrot.lane.b32.xlu1 %v13952_v16, %s11005_s19 }
 0x34d   : > { %6240 = vrot.lane.b32.xlu0 %v13952_v16, %s11008_s14  ;;  %5722 = vrot.lane.b32.xlu1 %v13974_v26, %s11006_s20 }
 0x351   : > { %6500 = vrot.lane.b32.xlu0 %v13952_v16, %s11009_s11  ;;  %5982 = vrot.lane.b32.xlu1 %v13974_v26, %s11007_s10 }
 0x355   : > { %4582 = vrot.lane.b32.xlu0 %v13974_v26, %s11003_s29  ;;  %6242 = vrot.lane.b32.xlu1 %v13974_v26, %s11008_s14 }
 0x359   : > { %4842 = vrot.lane.b32.xlu0 %v13974_v26, %s11002_s27  ;;  %6502 = vrot.lane.b32.xlu1 %v13974_v26, %s11009_s11 }
 0x35d   : > { %5102 = vrot.lane.b32.xlu0 %v13974_v26, %s11004_s16  ;;  %4584 = vrot.lane.b32.xlu1 %v13994_v21, %s11003_s29 }
 0x361   : > { %5362 = vrot.lane.b32.xlu0 %v13974_v26, %s11005_s19  ;;  %4844 = vrot.lane.b32.xlu1 %v13994_v21, %s11002_s27 }
 0x365   : > { %5724 = vrot.lane.b32.xlu0 %v13994_v21, %s11006_s20  ;;  %5104 = vrot.lane.b32.xlu1 %v13994_v21, %s11004_s16  ;;  %v14010_v19 = vpop.f32.mrb[10].mxu0 }
 0x366   : > { %17445 = vst [vmem:[#allocation21_spill] sm:$0xff] %v14010_v19  ;;  %v14012_v2 = vpop.f32.mrb[11].mxu0 }
 0x367   : > { %17446 = vst [vmem:[#allocation22_spill] sm:$0xff] %v14012_v2 }
 0x369   : > { %5984 = vrot.lane.b32.xlu0 %v13994_v21, %s11007_s10  ;;  %5364 = vrot.lane.b32.xlu1 %v13994_v21, %s11005_s19 }
 0x36d   : > { %6244 = vrot.lane.b32.xlu0 %v13994_v21, %s11008_s14  ;;  %5726 = vrot.lane.b32.xlu1 %v14020_v17, %s11006_s20 }
 0x371   : > { %6504 = vrot.lane.b32.xlu0 %v13994_v21, %s11009_s11  ;;  %5986 = vrot.lane.b32.xlu1 %v14020_v17, %s11007_s10 }
 0x375   : > { %4586 = vrot.lane.b32.xlu0 %v14020_v17, %s11003_s29  ;;  %6246 = vrot.lane.b32.xlu1 %v14020_v17, %s11008_s14 }
 0x379   : > { %4846 = vrot.lane.b32.xlu0 %v14020_v17, %s11002_s27  ;;  %6506 = vrot.lane.b32.xlu1 %v14020_v17, %s11009_s11 }
 0x37d   : > { %4588 = vrot.lane.b32.xlu1 %v14040_v15, %s11003_s29 }
 0x381   : > { %4848 = vrot.lane.b32.xlu1 %v14040_v15, %s11002_s27 }
 0x383   : > { %v14046_v35 = vpop.permute.xlu1 %4574  ;;  %v14058_v20 = vpop.permute.xlu0 %4836 }
 0x385   : > { %v14048_v47 = vpop.f32.mrb[10].mxu1 }
 0x386   : > { %17449 = vst [vmem:[#allocation25_spill] sm:$0xff] %v14048_v47  ;;  %v14050_v7 = vpop.f32.mrb[11].mxu1 }
 0x387   : > { %17450 = vst [vmem:[#allocation26_spill] sm:$0xff] %v14050_v7  ;;  %v14052_v32 = vpop.permute.xlu1 %4576  ;;  %v14078_v48 = vpop.permute.xlu0 %5094 }
 0x388   : > { %v4668_v37 = vsel %vm406_vm1, %v14046_v35, %v14052_v32 }
 0x389   : > { %v4703_v57 = vmul.f32 %v4671_v54, %v4668_v37 }
 0x38b   : > { %v14060_v45 = vpop.permute.xlu1 %4834  ;;  %v9845_v38 = vpack.c.bf16 %v4703_v57, %v17317_v27  ;;  %v14082_v39 = vpop.permute.xlu0 %5356 }
 0x38c   : > { %v4928_v4 = vsel %vm667_vm2, %v14060_v45, %v14058_v20 }
 0x38d   : > { %v14067_v22 = vmul.f32 %v4931_v8, %v4928_v4  ;;  %9846 = vmatprep.subr.bf16.mxu1 %v9845_v38  ;;  %v3757_v8 = vadd.f32 %v13768_v14, %v13879_v24 }
 0x38f   : > { %v9881_v50 = vpack.c.bf16 %v14067_v22, %v4703_v57  ;;  %v14080_v18 = vpop.permute.xlu1 %5096  ;;  %v14086_v60 = vpop.permute.xlu0 %5716  ;;  %v14141_v38 = vmax.f32 %v3757_v8, 0.0 }
 0x391   : > { %9882 = vmatprep.subr.bf16.mxu0 %v9881_v50  ;;  %17463 = vst [vmem:[#allocation39_spill] sm:$0xff] %v14141_v38 }
 0x393   : > { %v14084_v10 = vpop.permute.xlu1 %5354  ;;  %v14090_v36 = vpop.permute.xlu0 %5714 }
 0x394   : > { %17455 = vst [vmem:[#allocation31_spill] sm:$0xff] %v14090_v36 }
 0x397   : > { %v14088_v53 = vpop.permute.xlu1 %5718  ;;  %v14098_v28 = vpop.permute.xlu0 %5978 }
 0x39b   : > { %v14092_v61 = vpop.permute.xlu1 %5976  ;;  %v14102_v52 = vpop.permute.xlu0 %6236 }
 0x39f   : > { %v14100_v25 = vpop.permute.xlu1 %5974  ;;  %v14108_v0 = vpop.permute.xlu0 %6234 }
 0x3a0   : > { %17458 = vst [vmem:[#allocation34_spill] sm:$0xff] %v14100_v25  ;;  %17460 = vst [vmem:[#allocation36_spill] sm:$0xff] %v14108_v0 }
 0x3a3   : > { %v14104_v6 = vpop.permute.xlu1 %6238  ;;  %v14119_v62 = vpop.permute.xlu0 %6498 }
 0x3a5   : > { %v14070_v42 = vpop.f32.mrb[12].mxu0 }
 0x3a6   : > { %17451 = vst [vmem:[#allocation27_spill] sm:$0xff] %v14070_v42  ;;  %v14072_v1 = vpop.f32.mrb[13].mxu0 }
 0x3a7   : > { %17452 = vst [vmem:[#allocation28_spill] sm:$0xff] %v14072_v1  ;;  %v14110_v30 = vpop.permute.xlu1 %6496  ;;  %v14127_v37 = vpop.permute.xlu0 %4578 }
 0x3ab   : > { %v14121_v54 = vpop.permute.xlu1 %6494  ;;  %v14143_v4 = vpop.permute.xlu0 %4838 }
 0x3ac   : > { %17462 = vst [vmem:[#allocation38_spill] sm:$0xff] %v14121_v54 }
 0x3af   : > { %v14129_v57 = vpop.permute.xlu1 %4580 }
 0x3b3   : > { %v14145_v50 = vpop.permute.xlu1 %4840 }
 0x3b7   : > { %v14153_v14 = vpop.permute.xlu1 %5100 }
 0x3bb   : > { %v14167_v27 = vpop.permute.xlu1 %5360 }
 0x3c5   : > { %v14074_v51 = vpop.f32.mrb[12].mxu1 }
 0x3c6   : > { %17453 = vst [vmem:[#allocation29_spill] sm:$0xff] %v14074_v51  ;;  %v14076_v9 = vpop.f32.mrb[13].mxu1 }
 0x3c7   : > { %17454 = vst [vmem:[#allocation30_spill] sm:$0xff] %v14076_v9  ;;  %v3828_v9 = vadd.f32 %v13615_v46, %v13879_v24 }
 0x3c9   : > { %v14211_v42 = vmax.f32 %v3828_v9, 0.0 }
 0x3cb   : > { %17466 = vst [vmem:[#allocation42_spill] sm:$0xff] %v14211_v42 }
 0x3db   : > { %v14094_v40 = vpop.f32.mrb[14].mxu0 }
 0x3dc   : > { %17456 = vst [vmem:[#allocation32_spill] sm:$0xff] %v14094_v40  ;;  %v14096_v13 = vpop.f32.mrb[15].mxu0 }
 0x3dd   : > { %17457 = vst [vmem:[#allocation33_spill] sm:$0xff] %v14096_v13  ;;  %v14183_v13 = vpop.permute.xlu1 %5722 }
 0x3e1   : > { %v14195_v40 = vpop.permute.xlu1 %5982 }
 0x3e5   : > { %v14205_v1 = vpop.permute.xlu1 %6242 }
 0x3e9   : > { %v14106_v23 = vpop.f32.mrb[14].mxu1  ;;  %v14219_v46 = vpop.permute.xlu1 %6502 }
 0x3ea   : > { %17459 = vst [vmem:[#allocation35_spill] sm:$0xff] %v14106_v23  ;;  %v4539_v55 = vpop.f32.mrb[15].mxu1  ;;  %v14175_v23 = vld [vmem:[#allocation9 + $0x8] sm:$0xff] }
 0x3eb   : > { %v4540_v29 = vadd.f32 %v4539_v55, %v13879_v24  ;;  %v14151_v55 = vpop.permute.xlu0 %5098  ;;  %17465 = vst [vmem:[#allocation41_spill] sm:$0xff] %v14175_v23  ;;  %9006 = vmatprep.mubr.msk.f32.mxu1 %vm3402_vm0, %v14175_v23  ;;  %9007 = vmatprep.mubr.msk.f32.mxu0 %vm3402_vm0, %v14175_v23 }
 0x3ed   : > { %v14113_v63 = vmax.f32 %v4540_v29, 0.0  ;;  %v3759_v29 = vadd.f32 %v13784_v33, %v13879_v24  ;;  %v14227_v9 = vpop.permute.xlu1 %4584 }
 0x3ee   : > { %17468 = vst [vmem:[#allocation44_spill] sm:$0xff] %v14227_v9 }
 0x3ef   : > { %17461 = vst [vmem:[#allocation37_spill] sm:$0xff] %v14113_v63  ;;  %4636 = vrot.lane.b32.xlu0 %v14113_v63, %s11003_s29  ;;  %4896 = vrot.lane.b32.xlu1 %v14113_v63, %s11002_s27  ;;  %v14165_v8 = vpop.permute.xlu0 %5358 }
 0x3f1   : > { %v14241_v19 = vpop.permute.xlu1 %4844 }
 0x3f2   : > { %17470 = vst [vmem:[#allocation46_spill] sm:$0xff] %v14241_v19 }
 0x3f3   : > { %5156 = vrot.lane.b32.xlu0 %v14113_v63, %s11004_s16  ;;  %5108 = vrot.lane.b32.xlu1 %v14040_v15, %s11004_s16  ;;  %v14181_v33 = vpop.permute.xlu0 %5720 }
 0x3f7   : > { %5106 = vrot.lane.b32.xlu0 %v14020_v17, %s11004_s16  ;;  %5416 = vrot.lane.b32.xlu1 %v14113_v63, %s11005_s19  ;;  %v14173_v63 = vmax.f32 %v3759_v29, 0.0  ;;  %v14193_v29 = vpop.permute.xlu0 %5980 }
 0x3f9   : > { %17464 = vst [vmem:[#allocation40_spill] sm:$0xff] %v14173_v63 }
 0x3fb   : > { %5366 = vrot.lane.b32.xlu0 %v14020_v17, %s11005_s19  ;;  %5368 = vrot.lane.b32.xlu1 %v14040_v15, %s11005_s19  ;;  %v14203_v51 = vpop.permute.xlu0 %6240 }
 0x3ff   : > { %5728 = vrot.lane.b32.xlu0 %v14040_v15, %s11006_s20  ;;  %5730 = vrot.lane.b32.xlu1 %v14141_v38, %s11006_s20  ;;  %v14217_v7 = vpop.permute.xlu0 %6500 }
 0x403   : > { %5988 = vrot.lane.b32.xlu0 %v14040_v15, %s11007_s10  ;;  %5990 = vrot.lane.b32.xlu1 %v14141_v38, %s11007_s10  ;;  %v14225_v47 = vpop.permute.xlu0 %4582 }
 0x404   : > { %17467 = vst [vmem:[#allocation43_spill] sm:$0xff] %v14225_v47  ;;  %v17493_v47 = vmov 0.0  }
 0x407   : > { %6248 = vrot.lane.b32.xlu0 %v14040_v15, %s11008_s14  ;;  %6250 = vrot.lane.b32.xlu1 %v14141_v38, %s11008_s14  ;;  %v14239_v2 = vpop.permute.xlu0 %4842 }
 0x408   : > { %17469 = vst [vmem:[#allocation45_spill] sm:$0xff] %v14239_v2 }
 0x40b   : > { %6508 = vrot.lane.b32.xlu0 %v14040_v15, %s11009_s11  ;;  %6510 = vrot.lane.b32.xlu1 %v14141_v38, %s11009_s11  ;;  %v14249_v15 = vpop.permute.xlu0 %5102 }
 0x40c   : > { %17472 = vst [vmem:[#allocation48_spill] sm:$0xff] %v14249_v15 }
 0x40f   : > { %4590 = vrot.lane.b32.xlu0 %v14141_v38, %s11003_s29  ;;  %4592 = vrot.lane.b32.xlu1 %v14173_v63, %s11003_s29 }
 0x413   : > { %4850 = vrot.lane.b32.xlu0 %v14141_v38, %s11002_s27  ;;  %4852 = vrot.lane.b32.xlu1 %v14173_v63, %s11002_s27 }
 0x417   : > { %5110 = vrot.lane.b32.xlu0 %v14141_v38, %s11004_s16  ;;  %5112 = vrot.lane.b32.xlu1 %v14173_v63, %s11004_s16 }
 0x41b   : > { %5370 = vrot.lane.b32.xlu0 %v14141_v38, %s11005_s19  ;;  %5372 = vrot.lane.b32.xlu1 %v14173_v63, %s11005_s19  ;;  %v3830_v38 = vadd.f32 %v13620_v5, %v13879_v24  ;;  %v14251_v5 = vpop.permute.xlu1 %5104 }
 0x41c   : > { %17473 = vst [vmem:[#allocation49_spill] sm:$0xff] %v14251_v5 }
 0x41d   : > { %v14243_v17 = vmax.f32 %v3830_v38, 0.0  ;;  %v3899_v38 = vadd.f32 %v13796_v34, %v13879_v24 }
 0x41f   : > { %5732 = vrot.lane.b32.xlu0 %v14173_v63, %s11006_s20  ;;  %5734 = vrot.lane.b32.xlu1 %v14211_v42, %s11006_s20  ;;  %17471 = vst [vmem:[#allocation47_spill] sm:$0xff] %v14243_v17  ;;  %v14265_v56 = vpop.permute.xlu1 %5364  ;;  %v14271_v59 = vmax.f32 %v3899_v38, 0.0 }
 0x420   : > { %17475 = vst [vmem:[#allocation51_spill] sm:$0xff] %v14265_v56  ;;  %v5448_v56 = vsel %vm1189_vm4, %v14084_v10, %v14082_v39 }
 0x421   : > { %17476 = vst [vmem:[#allocation52_spill] sm:$0xff] %v14271_v59 }
 0x423   : > { %5992 = vrot.lane.b32.xlu0 %v14173_v63, %s11007_s10  ;;  %5994 = vrot.lane.b32.xlu1 %v14211_v42, %s11007_s10  ;;  %v14275_v21 = vpop.permute.xlu1 %5726 }
 0x424   : > { %17478 = vst [vmem:[#allocation54_spill] sm:$0xff] %v14275_v21 }
 0x427   : > { %6252 = vrot.lane.b32.xlu0 %v14173_v63, %s11008_s14  ;;  %6254 = vrot.lane.b32.xlu1 %v14211_v42, %s11008_s14  ;;  %v14287_v38 = vpop.permute.xlu1 %5986 }
 0x428   : > { %17480 = vst [vmem:[#allocation56_spill] sm:$0xff] %v14287_v38 }
 0x42b   : > { %6512 = vrot.lane.b32.xlu0 %v14173_v63, %s11009_s11  ;;  %6514 = vrot.lane.b32.xlu1 %v14211_v42, %s11009_s11  ;;  %v14263_v63 = vpop.permute.xlu0 %5362 }
 0x42c   : > { %17474 = vst [vmem:[#allocation50_spill] sm:$0xff] %v14263_v63 }
 0x42f   : > { %4594 = vrot.lane.b32.xlu0 %v14211_v42, %s11003_s29  ;;  %4596 = vrot.lane.b32.xlu1 %v14243_v17, %s11003_s29  ;;  %v14273_v26 = vpop.permute.xlu0 %5724 }
 0x430   : > { %17477 = vst [vmem:[#allocation53_spill] sm:$0xff] %v14273_v26  ;;  %v14297_v26 = vpop.permute.xlu1 %6246 }
 0x431   : > { %17482 = vst [vmem:[#allocation58_spill] sm:$0xff] %v14297_v26  ;;  %v5188_v26 = vsel %vm928_vm3, %v14078_v48, %v14080_v18 }
 0x433   : > { %4854 = vrot.lane.b32.xlu0 %v14211_v42, %s11002_s27  ;;  %4856 = vrot.lane.b32.xlu1 %v14243_v17, %s11002_s27  ;;  %v14285_v34 = vpop.permute.xlu0 %5984 }
 0x434   : > { %17479 = vst [vmem:[#allocation55_spill] sm:$0xff] %v14285_v34 }
 0x437   : > { %5114 = vrot.lane.b32.xlu0 %v14211_v42, %s11004_s16  ;;  %5116 = vrot.lane.b32.xlu1 %v14243_v17, %s11004_s16  ;;  %v14295_v23 = vpop.permute.xlu0 %6244 }
 0x438   : > { %17481 = vst [vmem:[#allocation57_spill] sm:$0xff] %v14295_v23  ;;  %v5191_v23 = vld [vmem:[#allocation6 + $0x208] sm:$0xff] }
 0x43b   : > { %5374 = vrot.lane.b32.xlu0 %v14211_v42, %s11005_s19  ;;  %5376 = vrot.lane.b32.xlu1 %v14243_v17, %s11005_s19  ;;  %v3901_v42 = vadd.f32 %v13816_v58, %v13879_v24  ;;  %v14309_v34 = vpop.permute.xlu0 %6504  ;;  %v14311_v58 = vpop.permute.xlu1 %6506 }
 0x43c   : > { %17484 = vst [vmem:[#allocation60_spill] sm:$0xff] %v14309_v34  ;;  %17485 = vst [vmem:[#allocation61_spill] sm:$0xff] %v14311_v58  ;;  %v3970_v34 = vadd.f32 %v13869_v31, %v13879_v24  ;;  %v4670_v31 = vld [vmem:[#allocation6] sm:$0xff] }
 0x43d   : > { %v14303_v38 = vmax.f32 %v3901_v42, 0.0 }
 0x43e   : > { %v14331_v58 = vmax.f32 %v3970_v34, 0.0 }
 0x43f   : > { %5736 = vrot.lane.b32.xlu0 %v14243_v17, %s11006_s20  ;;  %5738 = vrot.lane.b32.xlu1 %v14271_v59, %s11006_s20  ;;  %17483 = vst [vmem:[#allocation59_spill] sm:$0xff] %v14303_v38  ;;  %v14319_v42 = vpop.permute.xlu1 %4588 }
 0x440   : > { %17487 = vst [vmem:[#allocation63_spill] sm:$0xff] %v14319_v42  ;;  %17488 = vst [vmem:[#allocation64_spill] sm:$0xff] %v14331_v58 }
 0x443   : > { %5996 = vrot.lane.b32.xlu0 %v14243_v17, %s11007_s10  ;;  %5998 = vrot.lane.b32.xlu1 %v14271_v59, %s11007_s10  ;;  %v14335_v42 = vpop.permute.xlu1 %4848 }
 0x444   : > { %17490 = vst [vmem:[#allocation66_spill] sm:$0xff] %v14335_v42  ;;  %v5451_v42 = vld [vmem:[#allocation6 + $0x308] sm:$0xff] }
 0x447   : > { %6256 = vrot.lane.b32.xlu0 %v14243_v17, %s11008_s14  ;;  %6258 = vrot.lane.b32.xlu1 %v14271_v59, %s11008_s14 }
 0x44b   : > { %6516 = vrot.lane.b32.xlu0 %v14243_v17, %s11009_s11  ;;  %6518 = vrot.lane.b32.xlu1 %v14271_v59, %s11009_s11  ;;  %v14317_v17 = vpop.permute.xlu0 %4586 }
 0x44c   : > { %17486 = vst [vmem:[#allocation62_spill] sm:$0xff] %v14317_v17 }
 0x44f   : > { %4598 = vrot.lane.b32.xlu0 %v14271_v59, %s11003_s29  ;;  %4600 = vrot.lane.b32.xlu1 %v14303_v38, %s11003_s29  ;;  %v14333_v17 = vpop.permute.xlu0 %4846 }
 0x450   : > { %17489 = vst [vmem:[#allocation65_spill] sm:$0xff] %v14333_v17  ;;  %v5223_v17 = vmul.f32 %v5191_v23, %v5188_v26  ;;  %v5190_v26 = vld [vmem:[#allocation6 + $0x200] sm:$0xff]  ;;  %v5483_v23 = vmul.f32 %v5451_v42, %v5448_v56  ;;  %v5807_v56 = vsel %vm1550_vm5, %v14086_v60, %v14088_v53  ;;  %v3972_v42 = vadd.f32 %v13871_v41, %v13879_v24 }
 0x451   : > { %v6068_v41 = vsel %vm1811_vm6, %v14100_v25, %v14092_v61  ;;  %v6330_v25 = vld [vmem:[#allocation6 + $0x700] sm:$0xff] }
 0x453   : > { %4858 = vrot.lane.b32.xlu0 %v14271_v59, %s11002_s27  ;;  %4860 = vrot.lane.b32.xlu1 %v14303_v38, %s11002_s27 }
 0x457   : > { %5118 = vrot.lane.b32.xlu0 %v14271_v59, %s11004_s16  ;;  %5120 = vrot.lane.b32.xlu1 %v14303_v38, %s11004_s16 }
 0x45b   : > { %5378 = vrot.lane.b32.xlu0 %v14271_v59, %s11005_s19  ;;  %5380 = vrot.lane.b32.xlu1 %v14303_v38, %s11005_s19  ;;  %v4930_v59 = vld [vmem:[#allocation6 + $0x100] sm:$0xff] }
 0x45f   : > { %5740 = vrot.lane.b32.xlu0 %v14303_v38, %s11006_s20  ;;  %5742 = vrot.lane.b32.xlu1 %v14331_v58, %s11006_s20 }
 0x461   : > { %v14345_v34 = vpop.permute.xlu0 %4636  ;;  %v14347_v21 = vpop.permute.xlu1 %4896 }
 0x462   : > { %17491 = vst [vmem:[#allocation67_spill] sm:$0xff] %v14345_v34  ;;  %17492 = vst [vmem:[#allocation68_spill] sm:$0xff] %v14347_v21  ;;  %v4669_v63 = vsel %vm406_vm1, %v14345_v34, %v14046_v35  ;;  %v4929_v49 = vsel %vm667_vm2, %v14347_v21, %v14060_v45  ;;  %v5811_v45 = vld [vmem:[#allocation6 + $0x508] sm:$0xff]  ;;  %v6070_v21 = vld [vmem:[#allocation6 + $0x600] sm:$0xff] }
 0x463   : > { %v4702_v15 = vmul.f32 %v4670_v31, %v4669_v63  ;;  %v4962_v5 = vmul.f32 %v4930_v59, %v4929_v49  ;;  %6000 = vrot.lane.b32.xlu0 %v14303_v38, %s11007_s10  ;;  %6002 = vrot.lane.b32.xlu1 %v14331_v58, %s11007_s10  ;;  %v9849_v59 = vpack.c.bf16 %v5223_v17, %v14067_v22  ;;  %v5450_v22 = vld [vmem:[#allocation6 + $0x300] sm:$0xff]  ;;  %v17510_v34 = vld [vmem:[#allocation51_spill] sm:$0xff] }
 0x465   : > { %v9847_v9 = vpack.c.bf16 %v4702_v15, %v17493_v47  ;;  %v9883_v2 = vpack.c.bf16 %v4962_v5, %v4702_v15  ;;  %v14366_v19 = vpop.permute.xlu0 %5156  ;;  %v14368_v35 = vpop.permute.xlu1 %5108  ;;  %v9885_v15 = vpack.c.bf16 %v5483_v23, %v5223_v17  ;;  %v6071_v47 = vld [vmem:[#allocation6 + $0x608] sm:$0xff] }
 0x466   : > { %17494 = vst [vmem:[#allocation69_spill] sm:$0xff] %v14366_v19  ;;  %v5189_v49 = vsel %vm928_vm3, %v14366_v19, %v14078_v48  ;;  %v6067_v48 = vsel %vm1811_vm6, %v14092_v61, %v14098_v28  ;;  %v5843_v19 = vmul.f32 %v5811_v45, %v5807_v56  ;;  %v6327_v45 = vsel %vm2072_vm7, %v14102_v52, %v14104_v6  ;;  %v6591_v61 = vld [vmem:[#allocation6 + $0x808] sm:$0xff] }
 0x467   : > { %v5222_v63 = vmul.f32 %v5190_v26, %v5189_v49  ;;  %6260 = vrot.lane.b32.xlu0 %v14303_v38, %s11008_s14  ;;  %9848 = vmatpush1.bf16.msra.mxu1 %v9847_v9  ;;  %v5808_v9 = vsel %vm1550_vm5, %v14090_v36, %v14086_v60  ;;  %v5810_v49 = vld [vmem:[#allocation6 + $0x500] sm:$0xff]  ;;  %v9853_v60 = vpack.c.bf16 %v13885_v43, %v5483_v23 }
 0x468   : > { %6262 = vrot.lane.b32.xlu1 %v14331_v58, %s11008_s14  ;;  %9884 = vmatpush1.bf16.msra.mxu0 %v9883_v2  ;;  %v5842_v23 = vmul.f32 %v5810_v49, %v5808_v9  ;;  %v6328_v36 = vsel %vm2072_vm7, %v14108_v0, %v14102_v52  ;;  %v9889_v9 = vpack.c.bf16 %v5843_v19, %v13885_v43  ;;  %v4673_v49 = vld [vmem:[#allocation6 + $0x18] sm:$0xff]  ;;  %v5455_v0 = vld [vmem:[#allocation6 + $0x328] sm:$0xff] }
 0x469   : > { %v9851_v17 = vpack.c.bf16 %v5222_v63, %v4962_v5  ;;  %9850 = vmatprep.subr.bf16.mxu1 %v9849_v59  ;;  %9886 = vmatprep.subr.bf16.mxu0 %v9885_v15  ;;  %v14393_v31 = vpop.permute.xlu0 %5106  ;;  %v14395_v26 = vpop.permute.xlu1 %5416  ;;  %v6103_v5 = vmul.f32 %v6071_v47, %v6067_v48  ;;  %v6331_v59 = vld [vmem:[#allocation6 + $0x708] sm:$0xff]  ;;  %v14418_v15 = vmul.f32 %v6070_v21, %v6068_v41  ;;  %v6590_v41 = vld [vmem:[#allocation6 + $0x800] sm:$0xff] }
 0x46a   : > { %17495 = vst [vmem:[#allocation70_spill] sm:$0xff] %v14395_v26  ;;  %v5449_v2 = vsel %vm1189_vm4, %v14395_v26, %v14084_v10  ;;  %v6587_v10 = vsel %vm2333_vm8, %v14110_v30, %v14119_v62  ;;  %v6363_v26 = vmul.f32 %v6331_v59, %v6327_v45  ;;  %v6588_v52 = vsel %vm2333_vm8, %v14121_v54, %v14110_v30  ;;  %v17509_v54 = vld [vmem:[#allocation50_spill] sm:$0xff] }
 0x46b   : > { %v5482_v56 = vmul.f32 %v5450_v22, %v5449_v2  ;;  %6520 = vrot.lane.b32.xlu0 %v14303_v38, %s11009_s11  ;;  %9852 = vmatpush1.bf16.msra.mxu1 %v9851_v17  ;;  %v14425_v17 = vmax.f32 %v3972_v42, 0.0  ;;  %v6623_v21 = vmul.f32 %v6591_v61, %v6587_v10  ;;  %v9857_v42 = vpack.c.bf16 %v6103_v5, %v5843_v19  ;;  %v4932_v10 = vld [vmem:[#allocation6 + $0x110] sm:$0xff] }
 0x46c   : > { %6522 = vrot.lane.b32.xlu1 %v14331_v58, %s11009_s11  ;;  %9854 = vmatprep.subr.bf16.mxu1 %v9853_v60  ;;  %v4933_v60 = vld [vmem:[#allocation6 + $0x118] sm:$0xff]  ;;  %v4926_v43 = vsel %vm667_vm2, %v14143_v4, %v14145_v50  ;;  %v9891_v59 = vpack.c.bf16 %v5842_v23, %v13887_v3  ;;  %v6362_v45 = vmul.f32 %v6330_v25, %v6328_v36 }
 0x46d   : > { %v9855_v47 = vpack.c.bf16 %v13887_v3, %v5482_v56  ;;  %v9887_v48 = vpack.c.bf16 %v5482_v56, %v5222_v63  ;;  %v14421_v22 = vpop.permute.xlu0 %5366  ;;  %v14423_v2 = vpop.permute.xlu1 %5368  ;;  %17496 = vst [vmem:[#allocation71_spill] sm:$0xff] %v14425_v17  ;;  %v4666_v63 = vsel %vm406_vm1, %v14127_v37, %v14129_v57  ;;  %v9859_v19 = vpack.c.bf16 %v14418_v15, %v5842_v23  ;;  %v4672_v23 = vld [vmem:[#allocation6 + $0x10] sm:$0xff] }
 0x46e   : > { %v4667_v61 = vsel %vm406_vm1, %v14052_v32, %v14127_v37  ;;  %v4927_v3 = vsel %vm667_vm2, %v14058_v20, %v14143_v4  ;;  %v4705_v36 = vmul.f32 %v4673_v49, %v4666_v63  ;;  %v9893_v25 = vpack.c.bf16 %v6363_v26, %v6103_v5  ;;  %v5453_v37 = vld [vmem:[#allocation6 + $0x318] sm:$0xff] }
 0x46f   : > { %4602 = vrot.lane.b32.xlu0 %v14331_v58, %s11003_s29  ;;  %9856 = vmatpush1.bf16.msra.mxu1 %v9855_v47  ;;  %v6622_v47 = vmul.f32 %v6590_v41, %v6588_v52  ;;  %v5186_v32 = vsel %vm928_vm3, %v14151_v55, %v14153_v14  ;;  %v5446_v20 = vsel %vm1189_vm4, %v14165_v8, %v14167_v27 }
 0x470   : > { %4604 = vrot.lane.b32.xlu1 %v14425_v17, %s11003_s29  ;;  %9888 = vmatpush1.bf16.msra.mxu0 %v9887_v48  ;;  %v4965_v48 = vmul.f32 %v4933_v60, %v4926_v43  ;;  %v9895_v4 = vpack.c.bf16 %v6362_v45, %v14418_v15  ;;  %v14475_v5 = vmul.f32 %v4932_v10, %v4927_v3  ;;  %v5452_v60 = vld [vmem:[#allocation6 + $0x310] sm:$0xff]  ;;  %v5813_v10 = vld [vmem:[#allocation6 + $0x518] sm:$0xff] }
 0x471   : > { %9858 = vmatprep.subr.bf16.mxu1 %v9857_v42  ;;  %9890 = vmatprep.subr.bf16.mxu0 %v9889_v9  ;;  %v14450_v56 = vpop.permute.xlu0 %5728  ;;  %v14452_v30 = vpop.permute.xlu1 %5730  ;;  %v9861_v9 = vpack.c.bf16 %v6623_v21, %v6363_v26  ;;  %v5193_v42 = vld [vmem:[#allocation6 + $0x218] sm:$0xff]  ;;  %v9863_v26 = vpack.c.bf16 %v6622_v47, %v6362_v45  ;;  %v4704_v41 = vmul.f32 %v4672_v23, %v4667_v61  ;;  %v5812_v23 = vld [vmem:[#allocation6 + $0x510] sm:$0xff] }
 0x472   : > { %v5187_v52 = vsel %vm928_vm3, %v14080_v18, %v14151_v55  ;;  %v5447_v15 = vsel %vm1189_vm4, %v14082_v39, %v14165_v8  ;;  %v9897_v43 = vpack.c.bf16 %v4705_v36, %v6623_v21  ;;  %v5225_v45 = vmul.f32 %v5193_v42, %v5186_v32 }
 0x473   : > { %4862 = vrot.lane.b32.xlu0 %v14331_v58, %s11002_s27  ;;  %9860 = vmatpush1.bf16.msra.mxu1 %v9859_v19  ;;  %v5485_v19 = vmul.f32 %v5453_v37, %v5446_v20  ;;  %v14491_v61 = vpack.c.bf16 %v4965_v48, %v4705_v36  ;;  %v5805_v18 = vsel %vm1550_vm5, %v14181_v33, %v14183_v13  ;;  %v6073_v37 = vld [vmem:[#allocation6 + $0x618] sm:$0xff] }
 0x474   : > { %4864 = vrot.lane.b32.xlu1 %v14425_v17, %s11002_s27  ;;  %9892 = vmatpush1.bf16.msra.mxu0 %v9891_v59  ;;  %v5192_v59 = vld [vmem:[#allocation6 + $0x210] sm:$0xff]  ;;  %v4041_v39 = vadd.f32 %v13926_v44, %v13879_v24  ;;  %v14502_v55 = vpack.c.bf16 %v14475_v5, %v4704_v41  ;;  %v5484_v8 = vmul.f32 %v5452_v60, %v5447_v15  ;;  %v6333_v20 = vld [vmem:[#allocation6 + $0x718] sm:$0xff] }
 0x475   : > { %9862 = vmatprep.subr.bf16.mxu1 %v9861_v9  ;;  %9894 = vmatprep.subr.bf16.mxu0 %v9893_v25  ;;  %v14477_v49 = vpop.permute.xlu0 %5988  ;;  %v14479_v63 = vpop.permute.xlu1 %5990  ;;  %v9899_v36 = vpack.c.bf16 %v4704_v41, %v6622_v47  ;;  %v5224_v25 = vmul.f32 %v5192_v59, %v5187_v52  ;;  %v5806_v9 = vsel %vm1550_vm5, %v14088_v53, %v14181_v33  ;;  %v6332_v15 = vld [vmem:[#allocation6 + $0x710] sm:$0xff] }
 0x476   : > { %v5845_v44 = vmul.f32 %v5813_v10, %v5805_v18  ;;  %v14516_v42 = vpack.c.bf16 %v5485_v19, %v5225_v45  ;;  %v9901_v32 = vpack.c.bf16 %v5225_v45, %v4965_v48  ;;  %v6065_v47 = vsel %vm1811_vm6, %v14193_v29, %v14195_v40  ;;  %v6072_v45 = vld [vmem:[#allocation6 + $0x610] sm:$0xff] }
 0x477   : > { %5122 = vrot.lane.b32.xlu0 %v14331_v58, %s11004_s16  ;;  %9864 = vmatpush1.bf16.msra.mxu1 %v9863_v26  ;;  %v6325_v53 = vsel %vm2072_vm7, %v14203_v51, %v14205_v1  ;;  %v14528_v33 = vmax.f32 %v4041_v39, 0.0  ;;  %v5844_v48 = vmul.f32 %v5812_v23, %v5806_v9  ;;  %v9903_v52 = vpack.c.bf16 %v5224_v25, %v14475_v5  ;;  %v6592_v23 = vld [vmem:[#allocation6 + $0x810] sm:$0xff] }
 0x478   : > { %5124 = vrot.lane.b32.xlu1 %v14425_v17, %s11004_s16  ;;  %9896 = vmatpush1.bf16.msra.mxu0 %v9895_v4  ;;  %v14530_v4 = vpack.c.bf16 %v5484_v8, %v5224_v25  ;;  %v6066_v60 = vsel %vm1811_vm6, %v14098_v28, %v14193_v29  ;;  %v9905_v59 = vpack.c.bf16 %v13952_v16, %v5485_v19 }
 0x479   : > { %9866 = vmatprep.subr.bf16.mxu1 %v14491_v61  ;;  %9898 = vmatprep.subr.bf16.mxu0 %v9897_v43  ;;  %v14505_v21 = vpop.permute.xlu0 %6248  ;;  %v14507_v3 = vpop.permute.xlu1 %6250  ;;  %17497 = vst [vmem:[#allocation72_spill] sm:$0xff] %v14528_v33  ;;  %v6326_v43 = vsel %vm2072_vm7, %v14104_v6, %v14203_v51  ;;  %v6105_v10 = vmul.f32 %v6073_v37, %v6065_v47  ;;  %v6593_v51 = vld [vmem:[#allocation6 + $0x818] sm:$0xff]  ;;  %v4935_v47 = vld [vmem:[#allocation6 + $0x128] sm:$0xff] }
 0x47a   : > { %v6365_v18 = vmul.f32 %v6333_v20, %v6325_v53  ;;  %v14551_v5 = vpack.c.bf16 %v5845_v44, %v13952_v16  ;;  %v6585_v28 = vsel %vm2333_vm8, %v14217_v7, %v14219_v46  ;;  %v14560_v6 = vpack.c.bf16 %v5844_v48, %v13919_v11  ;;  %v17500_v20 = vld [vmem:[#allocation46_spill] sm:$0xff] }
 0x47b   : > { %5382 = vrot.lane.b32.xlu0 %v14331_v58, %s11005_s19  ;;  %9868 = vmatpush1.bf16.msra.mxu1 %v14502_v55  ;;  %v6364_v29 = vmul.f32 %v6332_v15, %v6326_v43  ;;  %v9907_v39 = vpack.c.bf16 %v13919_v11, %v5484_v8  ;;  %v6586_v25 = vsel %vm2333_vm8, %v14119_v62, %v14217_v7  ;;  %v17501_v11 = vld [vmem:[#allocation45_spill] sm:$0xff]  ;;  %v17502_v15 = vld [vmem:[#allocation44_spill] sm:$0xff]  ;;  %v17503_v43 = vld [vmem:[#allocation43_spill] sm:$0xff] }
 0x47c   : > { %5384 = vrot.lane.b32.xlu1 %v14425_v17, %s11005_s19  ;;  %9900 = vmatpush1.bf16.msra.mxu0 %v9899_v36  ;;  %v6104_v36 = vmul.f32 %v6072_v45, %v6066_v60  ;;  %v14575_v9 = vpack.c.bf16 %v6365_v18, %v6105_v10  ;;  %v14577_v37 = vmul.f32 %v6593_v51, %v6585_v28  ;;  %v4675_v60 = vld [vmem:[#allocation6 + $0x28] sm:$0xff]  ;;  %v4934_v45 = vld [vmem:[#allocation6 + $0x120] sm:$0xff]  ;;  %v17511_v58 = vld [vmem:[#allocation54_spill] sm:$0xff] }
 0x47d   : > { %9870 = vmatprep.subr.bf16.mxu1 %v14516_v42  ;;  %9902 = vmatprep.subr.bf16.mxu0 %v9901_v32  ;;  %v14533_v26 = vpop.permute.xlu0 %6508  ;;  %v14535_v41 = vpop.permute.xlu1 %6510  ;;  %v9909_v32 = vpack.c.bf16 %v6105_v10, %v5845_v44  ;;  %v4924_v8 = vsel %vm667_vm2, %v17501_v11, %v17500_v20  ;;  %v4925_v10 = vsel %vm667_vm2, %v14145_v50, %v17501_v11  ;;  %v4674_v11 = vld [vmem:[#allocation6 + $0x20] sm:$0xff] }
 0x47e   : > { %v14585_v7 = vpack.c.bf16 %v6364_v29, %v6104_v36  ;;  %v9911_v53 = vpack.c.bf16 %v6104_v36, %v5844_v48  ;;  %v14602_v28 = vmul.f32 %v4935_v47, %v4924_v8  ;;  %v9913_v48 = vpack.c.bf16 %v14577_v37, %v6365_v18  ;;  %v17504_v36 = vld [vmem:[#allocation49_spill] sm:$0xff]  ;;  %v17508_v18 = vld [vmem:[#allocation16_spill] sm:$0xff] }
 0x47f   : > { %5744 = vrot.lane.b32.xlu0 %v14425_v17, %s11006_s20  ;;  %9872 = vmatpush1.bf16.msra.mxu1 %v14530_v4  ;;  %v4043_v47 = vadd.f32 %v17508_v18, %v13879_v24  ;;  %v4665_v8 = vsel %vm406_vm1, %v14129_v57, %v17503_v43  ;;  %v5444_v18 = vsel %vm1189_vm4, %v17509_v54, %v17510_v34 }
 0x480   : > { %5746 = vrot.lane.b32.xlu1 %v14528_v33, %s11006_s20  ;;  %9904 = vmatpush1.bf16.msra.mxu0 %v9903_v52  ;;  %v14592_v52 = vmul.f32 %v6592_v23, %v6586_v25  ;;  %v17505_v25 = vld [vmem:[#allocation48_spill] sm:$0xff] }
 0x481   : > { %9874 = vmatprep.subr.bf16.mxu1 %v14551_v5  ;;  %9906 = vmatprep.subr.bf16.mxu0 %v9905_v59  ;;  %v14563_v19 = vpop.permute.xlu0 %4590  ;;  %v14565_v16 = vpop.permute.xlu1 %4592  ;;  %v4664_v59 = vsel %vm406_vm1, %v17503_v43, %v17502_v15  ;;  %v5184_v50 = vsel %vm928_vm3, %v17505_v25, %v17504_v36  ;;  %v5194_v43 = vld [vmem:[#allocation6 + $0x220] sm:$0xff] }
 0x482   : > { %17498 = vst [vmem:[#allocation73_spill] sm:$0xff] %v14563_v19  ;;  %17499 = vst [vmem:[#allocation74_spill] sm:$0xff] %v14565_v16  ;;  %v14610_v51 = vmul.f32 %v4675_v60, %v4664_v59  ;;  %v9915_v60 = vpack.c.bf16 %v14592_v52, %v6364_v29  ;;  %v5454_v59 = vld [vmem:[#allocation6 + $0x320] sm:$0xff]  ;;  %v14645_v29 = vld [vmem:[#allocation9] sm:$0xff] }
 0x483   : > { %6004 = vrot.lane.b32.xlu0 %v14425_v17, %s11007_s10  ;;  %9876 = vmatpush1.bf16.msra.mxu1 %v14560_v6 }
 0x484   : > { %6006 = vrot.lane.b32.xlu1 %v14528_v33, %s11007_s10  ;;  %9908 = vmatpush1.bf16.msra.mxu0 %v9907_v39  ;;  %v5195_v39 = vld [vmem:[#allocation6 + $0x228] sm:$0xff]  ;;  %v14643_v57 = vpack.c.bf16 %v14602_v28, %v14610_v51 }
 0x485   : > { %9878 = vmatprep.subr.bf16.mxu1 %v14575_v9  ;;  %9910 = vmatprep.subr.bf16.mxu0 %v9909_v32  ;;  %v14588_v62 = vpop.permute.xlu0 %4850  ;;  %v14590_v44 = vpop.permute.xlu1 %4852 }
 0x487   : > { %6264 = vrot.lane.b32.xlu0 %v14425_v17, %s11008_s14  ;;  %9880 = vmatpush1.bf16.msra.mxu1 %v14585_v7 }
 0x488   : > { %6266 = vrot.lane.b32.xlu1 %v14528_v33, %s11008_s14  ;;  %9912 = vmatpush1.bf16.msra.mxu0 %v9911_v53  ;;  %v14627_v53 = vmul.f32 %v4934_v45, %v4925_v10  ;;  %v14651_v45 = vmul.f32 %v5195_v39, %v5184_v50  ;;  %v5815_v10 = vld [vmem:[#allocation6 + $0x528] sm:$0xff]  ;;  %v14667_v39 = vmax.f32 %v4043_v47, 0.0  ;;  %v14671_v50 = vmul.f32 %v5455_v0, %v5444_v18 }
 0x489   : > { %7681 = vmatprep.subr.mxu1 %v14577_v37  ;;  %9914 = vmatprep.subr.bf16.mxu0 %v9913_v48  ;;  %v14617_v23 = vpop.permute.xlu0 %5110  ;;  %v14619_v32 = vpop.permute.xlu1 %5112  ;;  %v5445_v48 = vsel %vm1189_vm4, %v14167_v27, %v17509_v54  ;;  %v5185_v27 = vsel %vm928_vm3, %v14153_v14, %v17505_v25  ;;  %v14655_v54 = vmul.f32 %v4674_v11, %v4665_v8 }
 0x48a   : > { %17506 = vst [vmem:[#allocation46_spill] sm:$0xff] %v14617_v23  ;;  %17507 = vst [vmem:[#allocation45_spill] sm:$0xff] %v14619_v32  ;;  %v14669_v25 = vmul.f32 %v5454_v59, %v5445_v48  ;;  %v14678_v8 = vmul.f32 %v5194_v43, %v5185_v27  ;;  %v17516_v59 = vld [vmem:[#allocation58_spill] sm:$0xff]  ;;  %v17517_v48 = vld [vmem:[#allocation57_spill] sm:$0xff] }
 0x48b   : > { %6524 = vrot.lane.b32.xlu0 %v14425_v17, %s11009_s11  ;;  %7682 = vmatpush1.msra.mxu1 %v14592_v52  ;;  %v17512_v17 = vld [vmem:[#allocation53_spill] sm:$0xff]  ;;  %17515 = vst [vmem:[#allocation49_spill] sm:$0xff] %v14667_v39  ;;  %v14676_v11 = vpack.c.bf16 %v14627_v53, %v14655_v54  ;;  %v6323_v18 = vsel %vm2072_vm7, %v17517_v48, %v17516_v59  ;;  %v17521_v27 = vld [vmem:[#allocation55_spill] sm:$0xff] }
 0x48c   : > { %6526 = vrot.lane.b32.xlu1 %v14528_v33, %s11009_s11  ;;  %9916 = vmatpush1.bf16.msra.mxu0 %v9915_v60  ;;  %v5803_v38 = vsel %vm1550_vm5, %v17512_v17, %v17511_v58  ;;  %v5804_v0 = vsel %vm1550_vm5, %v14183_v13, %v17512_v17  ;;  %v14694_v60 = vpack.c.bf16 %v14671_v50, %v14651_v45  ;;  %v17520_v17 = vld [vmem:[#allocation41_spill] sm:$0xff] }
 0x48d   : > { %9918 = vmatprep.subr.bf16.mxu0 %v14643_v57  ;;  %9934 = vmatprep.subr.bf16.mxu1 %v14491_v61  ;;  %v14663_v23 = vpop.permute.xlu0 %5370  ;;  %v14665_v14 = vpop.permute.xlu1 %5372  ;;  %v5814_v61 = vld [vmem:[#allocation6 + $0x520] sm:$0xff]  ;;  %v14687_v47 = vmul.f32 %v5815_v10, %v5803_v38  ;;  %v6064_v10 = vsel %vm1811_vm6, %v14195_v40, %v17521_v27  ;;  %v6075_v32 = vld [vmem:[#allocation6 + $0x628] sm:$0xff] }
 0x48e   : > { %17513 = vst [vmem:[#allocation44_spill] sm:$0xff] %v14663_v23  ;;  %17514 = vst [vmem:[#allocation43_spill] sm:$0xff] %v14665_v14  ;;  %7694 = vmatmul.mubr.f32.vlgmr.msra.gmra.mrb[16].mxu1 %v14645_v29  ;;  %v14712_v43 = vmul.f32 %v5814_v61, %v5804_v0  ;;  %v6074_v23 = vld [vmem:[#allocation6 + $0x620] sm:$0xff]  ;;  %v6324_v61 = vsel %vm2072_vm7, %v14205_v1, %v17517_v48  ;;  %v17526_v1 = vld [vmem:[#allocation19_spill] sm:$0xff] }
 0x48f   : > { %9936 = vmatpush1.bf16.msra.mxu1 %v14502_v55  ;;  %4606 = vrot.lane.b32.xlu0 %v14528_v33, %s11003_s29  ;;  %v6335_v55 = vld [vmem:[#allocation6 + $0x728] sm:$0xff]  ;;  %v6334_v14 = vld [vmem:[#allocation6 + $0x720] sm:$0xff] }
 0x490   : > { %9938 = vmatprep.subr.bf16.mxu1 %v14516_v42  ;;  %4608 = vrot.lane.b32.xlu1 %v14667_v39, %s11003_s29  ;;  %v14709_v42 = vpack.c.bf16 %v14669_v25, %v14678_v8  ;;  %v14729_v0 = vmul.f32 %v6335_v55, %v6323_v18  ;;  %v17523_v40 = vld [vmem:[#allocation20_spill] sm:$0xff]  ;;  %v14746_v55 = vpack.c.bf16 %v14712_v43, %v17526_v1  ;;  %v17527_v18 = vld [vmem:[#allocation61_spill] sm:$0xff] }
 0x491   : > { %9920 = vmatpush1.bf16.msra.mxu0 %v14676_v11  ;;  %v14701_v13 = vpop.permute.xlu0 %5732  ;;  %v14703_v38 = vpop.permute.xlu1 %5734  ;;  %9008 = vmatprep.mubr.msk.f32.mxu1 %vm3402_vm0, %v17520_v17  ;;  %v14750_v48 = vmul.f32 %v6334_v14, %v6324_v61 }
 0x492   : > { %17518 = vst [vmem:[#allocation48_spill] sm:$0xff] %v14701_v13  ;;  %17519 = vst [vmem:[#allocation16_spill] sm:$0xff] %v14703_v38  ;;  %9922 = vmatprep.subr.bf16.mxu0 %v14694_v60  ;;  %v17522_v13 = vld [vmem:[#allocation56_spill] sm:$0xff] }
 0x493   : > { %v6063_v38 = vsel %vm1811_vm6, %v17521_v27, %v17522_v13  ;;  %9940 = vmatpush1.bf16.msra.mxu1 %v14530_v4  ;;  %4866 = vrot.lane.b32.xlu0 %v14528_v33, %s11002_s27  ;;  %v14736_v4 = vpack.c.bf16 %v14687_v47, %v17523_v40 }
 0x494   : > { %9942 = vmatprep.subr.bf16.mxu1 %v14551_v5  ;;  %4868 = vrot.lane.b32.xlu1 %v14667_v39, %s11002_s27  ;;  %v6107_v16 = vmul.f32 %v6075_v32, %v6063_v38  ;;  %v14748_v5 = vmul.f32 %v6074_v23, %v6064_v10  ;;  %v17528_v38 = vld [vmem:[#allocation60_spill] sm:$0xff]  ;;  %v6595_v10 = vld [vmem:[#allocation6 + $0x828] sm:$0xff] }
 0x495   : > { %9924 = vmatpush1.bf16.msra.mxu0 %v14709_v42  ;;  %v14739_v27 = vpop.permute.xlu0 %5992  ;;  %v14741_v19 = vpop.permute.xlu1 %5994  ;;  %v6583_v23 = vsel %vm2333_vm8, %v17528_v38, %v17527_v18 }
 0x496   : > { %17524 = vst [vmem:[#allocation50_spill] sm:$0xff] %v14739_v27  ;;  %17525 = vst [vmem:[#allocation51_spill] sm:$0xff] %v14741_v19  ;;  %9926 = vmatprep.subr.bf16.mxu0 %v14736_v4  ;;  %v14759_v32 = vpack.c.bf16 %v14729_v0, %v6107_v16  ;;  %v9949_v27 = vpack.c.bf16 %v14610_v51, %v14577_v37  ;;  %v14777_v19 = vpack.c.bf16 %v14750_v48, %v14748_v5 }
 0x497   : > { %9944 = vmatpush1.bf16.msra.mxu1 %v14560_v6  ;;  %5126 = vrot.lane.b32.xlu0 %v14528_v33, %s11004_s16  ;;  %v14788_v37 = vmul.f32 %v6595_v10, %v6583_v23  ;;  %v9951_v51 = vpack.c.bf16 %v14655_v54, %v14592_v52  ;;  %v9955_v52 = vpack.c.bf16 %v14678_v8, %v14627_v53  ;;  %v17533_v8 = vld [vmem:[#allocation63_spill] sm:$0xff]  ;;  %v17536_v23 = vld [vmem:[#allocation65_spill] sm:$0xff] }
 0x498   : > { %9946 = vmatprep.subr.bf16.mxu1 %v14575_v9  ;;  %5128 = vrot.lane.b32.xlu1 %v14667_v39, %s11004_s16  ;;  %v17531_v9 = vld [vmem:[#allocation17_spill] sm:$0xff]  ;;  %v9959_v53 = vpack.c.bf16 %v17526_v1, %v14669_v25  ;;  %v17535_v1 = vld [vmem:[#allocation66_spill] sm:$0xff] }
 0x499   : > { %9928 = vmatpush1.bf16.msra.mxu0 %v14746_v55  ;;  %v14766_v14 = vpop.permute.xlu0 %6252  ;;  %v14768_v6 = vpop.permute.xlu1 %6254  ;;  %v4112_v61 = vadd.f32 %v17531_v9, %v13879_v24  ;;  %v6584_v9 = vsel %vm2333_vm8, %v14219_v46, %v17528_v38  ;;  %v9953_v46 = vpack.c.bf16 %v14651_v45, %v14602_v28  ;;  %v9957_v28 = vpack.c.bf16 %v17523_v40, %v14671_v50  ;;  %v4937_v40 = vld [vmem:[#allocation6 + $0x138] sm:$0xff] }
 0x49a   : > { %17529 = vst [vmem:[#allocation54_spill] sm:$0xff] %v14766_v14  ;;  %17530 = vst [vmem:[#allocation53_spill] sm:$0xff] %v14768_v6  ;;  %9930 = vmatprep.subr.bf16.mxu0 %v14759_v32  ;;  %v6594_v14 = vld [vmem:[#allocation6 + $0x820] sm:$0xff]  ;;  %v9961_v50 = vpack.c.bf16 %v6107_v16, %v14687_v47  ;;  %v9963_v16 = vpack.c.bf16 %v14748_v5, %v14712_v43  ;;  %v4676_v47 = vld [vmem:[#allocation6 + $0x30] sm:$0xff]  ;;  %v4923_v43 = vsel %vm667_vm2, %v17500_v20, %v17536_v23 }
 0x49b   : > { %9948 = vmatpush1.bf16.msra.mxu1 %v14585_v7  ;;  %5386 = vrot.lane.b32.xlu0 %v14528_v33, %s11005_s19  ;;  %v14797_v6 = vmax.f32 %v4112_v61, 0.0  ;;  %v5442_v20 = vsel %vm1189_vm4, %v14421_v22, %v14423_v2 }
 0x49c   : > { %9950 = vmatprep.subr.bf16.mxu1 %v9949_v27  ;;  %5388 = vrot.lane.b32.xlu1 %v14667_v39, %s11005_s19  ;;  %v14802_v27 = vmul.f32 %v6594_v14, %v6584_v9  ;;  %v4922_v14 = vsel %vm667_vm2, %v17536_v23, %v17535_v1  ;;  %v17537_v9 = vld [vmem:[#allocation18_spill] sm:$0xff] }
 0x49d   : > { %9932 = vmatpush1.bf16.msra.mxu0 %v14777_v19  ;;  %v14793_v7 = vpop.permute.xlu0 %6512  ;;  %v14795_v33 = vpop.permute.xlu1 %6514  ;;  %17532 = vst [vmem:[#allocation58_spill] sm:$0xff] %v14797_v6  ;;  %v4969_v61 = vmul.f32 %v4937_v40, %v4922_v14 }
 0x49e   : > { %7752 = vmatprep.subr.mxu0 %v14788_v37 }
 0x49f   : > { %9952 = vmatpush1.bf16.msra.mxu1 %v9951_v51  ;;  %5748 = vrot.lane.b32.xlu0 %v14667_v39, %s11006_s20  ;;  %v4114_v51 = vadd.f32 %v17537_v9, %v13879_v24 }
 0x4a0   : > { %9954 = vmatprep.subr.bf16.mxu1 %v9953_v46  ;;  %5750 = vrot.lane.b32.xlu1 %v14797_v6, %s11006_s20  ;;  %v5197_v46 = vld [vmem:[#allocation6 + $0x238] sm:$0xff] }
 0x4a1   : > { %7753 = vmatpush1.msra.mxu0 %v14802_v27  ;;  %v14811_v54 = vpop.permute.xlu0 %4594  ;;  %v14813_v38 = vpop.permute.xlu1 %4596 }
 0x4a2   : > { %9986 = vmatprep.subr.bf16.mxu0 %v14643_v57  ;;  %7765 = vmatmul.mubr.f32.vlgmr.msra.gmra.mrb[16].mxu0 %v14645_v29 }
 0x4a3   : > { %9956 = vmatpush1.bf16.msra.mxu1 %v9955_v52  ;;  %9988 = vmatpush1.bf16.msra.mxu0 %v14676_v11  ;;  %v4677_v11 = vld [vmem:[#allocation6 + $0x38] sm:$0xff]  ;;  %v5182_v52 = vsel %vm928_vm3, %v14393_v31, %v14368_v35 }
 0x4a4   : > { %9958 = vmatprep.subr.bf16.mxu1 %v9957_v28  ;;  %9990 = vmatprep.subr.bf16.mxu0 %v14694_v60  ;;  %v17534_v60 = vld [vmem:[#allocation62_spill] sm:$0xff]  ;;  %v5457_v28 = vld [vmem:[#allocation6 + $0x338] sm:$0xff]  ;;  %v5229_v40 = vmul.f32 %v5197_v46, %v5182_v52  ;;  %v6061_v46 = vsel %vm1811_vm6, %v14477_v49, %v14479_v63 }
 0x4a5   : > { %6008 = vrot.lane.b32.xlu0 %v14667_v39, %s11007_s10  ;;  %6010 = vrot.lane.b32.xlu1 %v14797_v6, %s11007_s10  ;;  %v14827_v57 = vpop.permute.xlu0 %4854  ;;  %v14829_v45 = vpop.permute.xlu1 %4856  ;;  %v4662_v25 = vsel %vm406_vm1, %v17534_v60, %v17533_v8  ;;  %v5489_v23 = vmul.f32 %v5457_v28, %v5442_v20  ;;  %v6337_v52 = vld [vmem:[#allocation6 + $0x738] sm:$0xff]  ;;  %v6321_v28 = vsel %vm2072_vm7, %v14505_v21, %v14507_v3  ;;  %v6076_v20 = vld [vmem:[#allocation6 + $0x630] sm:$0xff] }
 0x4a6   : > { %9009 = vmatprep.mubr.msk.f32.mxu0 %vm3402_vm0, %v17520_v17  ;;  %v4663_v17 = vsel %vm406_vm1, %v17502_v15, %v17534_v60  ;;  %v4709_v5 = vmul.f32 %v4677_v11, %v4662_v25  ;;  %v9965_v15 = vpack.c.bf16 %v14788_v37, %v14729_v0  ;;  %v9967_v0 = vpack.c.bf16 %v14802_v27, %v14750_v48  ;;  %v5196_v11 = vld [vmem:[#allocation6 + $0x230] sm:$0xff] }
 0x4a7   : > { %9960 = vmatpush1.bf16.msra.mxu1 %v9959_v53  ;;  %9992 = vmatpush1.bf16.msra.mxu0 %v14709_v42  ;;  %v4708_v53 = vmul.f32 %v4676_v47, %v4663_v17  ;;  %v5183_v60 = vsel %vm928_vm3, %v17504_v36, %v14393_v31  ;;  %v5456_v25 = vld [vmem:[#allocation6 + $0x330] sm:$0xff]  ;;  %v14897_v36 = vmax.f32 %v4114_v51, 0.0  ;;  %v10005_v9 = vpack.c.bf16 %v5229_v40, %v4969_v61  ;;  %v6077_v51 = vld [vmem:[#allocation6 + $0x638] sm:$0xff] }
 0x4a8   : > { %9962 = vmatprep.subr.bf16.mxu1 %v9961_v50  ;;  %9994 = vmatprep.subr.bf16.mxu0 %v14736_v4  ;;  %v4936_v4 = vld [vmem:[#allocation6 + $0x130] sm:$0xff]  ;;  %v14894_v14 = vpack.c.bf16 %v4969_v61, %v4709_v5  ;;  %v10001_v31 = vpack.c.bf16 %v4709_v5, %v14788_v37  ;;  %v5802_v5 = vsel %vm1550_vm5, %v17511_v58, %v14450_v56 }
 0x4a9   : > { %6268 = vrot.lane.b32.xlu0 %v14667_v39, %s11008_s14  ;;  %6270 = vrot.lane.b32.xlu1 %v14797_v6, %s11008_s14  ;;  %v14854_v10 = vpop.permute.xlu0 %5114  ;;  %v14856_v42 = vpop.permute.xlu1 %5116  ;;  %v4968_v50 = vmul.f32 %v4936_v4, %v4923_v43  ;;  %17538 = vst [vmem:[#allocation57_spill] sm:$0xff] %v14897_v36  ;;  %v10003_v17 = vpack.c.bf16 %v4708_v53, %v14802_v27 }
 0x4aa   : > { %v14920_v27 = vpack.c.bf16 %v5489_v23, %v5229_v40  ;;  %v6322_v40 = vsel %vm2072_vm7, %v17516_v59, %v14505_v21 }
 0x4ab   : > { %9964 = vmatpush1.bf16.msra.mxu1 %v9963_v16  ;;  %9996 = vmatpush1.bf16.msra.mxu0 %v14746_v55  ;;  %v5443_v55 = vsel %vm1189_vm4, %v17510_v34, %v14421_v22  ;;  %v5817_v16 = vld [vmem:[#allocation6 + $0x538] sm:$0xff]  ;;  %v5801_v34 = vsel %vm1550_vm5, %v14450_v56, %v14452_v30  ;;  %v5228_v22 = vmul.f32 %v5196_v11, %v5183_v60  ;;  %v17539_v11 = vld [vmem:[#allocation24_spill] sm:$0xff] }
 0x4ac   : > { %9966 = vmatprep.subr.bf16.mxu1 %v9965_v15  ;;  %9998 = vmatprep.subr.bf16.mxu0 %v14759_v32  ;;  %v5488_v47 = vmul.f32 %v5456_v25, %v5443_v55  ;;  %v14906_v4 = vpack.c.bf16 %v4968_v50, %v4708_v53  ;;  %v5849_v15 = vmul.f32 %v5817_v16, %v5801_v34  ;;  %v6336_v55 = vld [vmem:[#allocation6 + $0x730] sm:$0xff]  ;;  %v17540_v34 = vld [vmem:[#allocation23_spill] sm:$0xff] }
 0x4ad   : > { %6528 = vrot.lane.b32.xlu0 %v14667_v39, %s11009_s11  ;;  %6530 = vrot.lane.b32.xlu1 %v14797_v6, %s11009_s11  ;;  %v14890_v48 = vpop.permute.xlu0 %5374  ;;  %v14892_v32 = vpop.permute.xlu1 %5376  ;;  %v10007_v58 = vpack.c.bf16 %v5228_v22, %v4968_v50  ;;  %v6062_v53 = vsel %vm1811_vm6, %v17522_v13, %v14477_v49  ;;  %v10009_v60 = vpack.c.bf16 %v17539_v11, %v5489_v23  ;;  %v6597_v23 = vld [vmem:[#allocation6 + $0x838] sm:$0xff]  ;;  %v5819_v39 = vld [vmem:[#allocation6 + $0x548] sm:$0xff] }
 0x4ae   : > { %v14931_v56 = vpack.c.bf16 %v5488_v47, %v5228_v22  ;;  %v6109_v25 = vmul.f32 %v6077_v51, %v6061_v46  ;;  %v6369_v49 = vmul.f32 %v6337_v52, %v6321_v28  ;;  %v14952_v13 = vpack.c.bf16 %v5849_v15, %v17539_v11  ;;  %v17542_v52 = vld [vmem:[#allocation21_spill] sm:$0xff]  ;;  %v17543_v11 = vld [vmem:[#allocation74_spill] sm:$0xff] }
 0x4af   : > { %9968 = vmatpush1.bf16.msra.mxu1 %v9967_v0  ;;  %10000 = vmatpush1.bf16.msra.mxu0 %v14777_v19  ;;  %v5816_v19 = vld [vmem:[#allocation6 + $0x530] sm:$0xff]  ;;  %v6108_v16 = vmul.f32 %v6076_v20, %v6062_v53  ;;  %v10011_v22 = vpack.c.bf16 %v17540_v34, %v5488_v47  ;;  %v6368_v59 = vmul.f32 %v6336_v55, %v6322_v40  ;;  %v4938_v40 = vld [vmem:[#allocation6 + $0x140] sm:$0xff] }
 0x4b0   : > { %9970 = vmatprep.subr.bf16.mxu1 %v14894_v14  ;;  %10002 = vmatprep.subr.bf16.mxu0 %v10001_v31  ;;  %v5848_v61 = vmul.f32 %v5816_v19, %v5802_v5  ;;  %v6581_v31 = vsel %vm2333_vm8, %v14533_v26, %v14535_v41  ;;  %v6596_v5 = vld [vmem:[#allocation6 + $0x830] sm:$0xff]  ;;  %v6582_v47 = vsel %vm2333_vm8, %v17527_v18, %v14533_v26 }
 0x4b1   : > { %4610 = vrot.lane.b32.xlu0 %v14797_v6, %s11003_s29  ;;  %4612 = vrot.lane.b32.xlu1 %v14897_v36, %s11003_s29  ;;  %v14912_v37 = vpop.permute.xlu0 %5736  ;;  %v14914_v43 = vpop.permute.xlu1 %5738  ;;  %v10013_v51 = vpack.c.bf16 %v6109_v25, %v5849_v15  ;;  %v14978_v46 = vmul.f32 %v6597_v23, %v6581_v31  ;;  %v4183_v28 = vadd.f32 %v17542_v52, %v13879_v24  ;;  %v4679_v15 = vld [vmem:[#allocation6 + $0x48] sm:$0xff]  ;;  %v4678_v52 = vld [vmem:[#allocation6 + $0x40] sm:$0xff] }
 0x4b2   : > { %v14962_v21 = vpack.c.bf16 %v5848_v61, %v17540_v34  ;;  %v4920_v20 = vsel %vm667_vm2, %v14588_v62, %v14590_v44  ;;  %v10015_v53 = vpack.c.bf16 %v6108_v16, %v5848_v61  ;;  %v14988_v26 = vpack.c.bf16 %v6368_v59, %v6108_v16 }
 0x4b3   : > { %9972 = vmatpush1.bf16.msra.mxu1 %v14906_v4  ;;  %10004 = vmatpush1.bf16.msra.mxu0 %v10003_v17  ;;  %v14990_v18 = vmul.f32 %v6596_v5, %v6582_v47  ;;  %v4921_v31 = vsel %vm667_vm2, %v17535_v1, %v14588_v62  ;;  %v10017_v16 = vpack.c.bf16 %v14978_v46, %v6369_v49  ;;  %v15011_v34 = vmax.f32 %v4183_v28, 0.0  ;;  %v17548_v5 = vld [vmem:[#allocation43_spill] sm:$0xff]  ;;  %v17549_v47 = vld [vmem:[#allocation44_spill] sm:$0xff]  ;;  %v5199_v28 = vld [vmem:[#allocation6 + $0x248] sm:$0xff] }
 0x4b4   : > { %9974 = vmatprep.subr.bf16.mxu1 %v14920_v27  ;;  %10006 = vmatprep.subr.bf16.mxu0 %v10005_v9  ;;  %v14976_v9 = vpack.c.bf16 %v6369_v49, %v6109_v25  ;;  %v15025_v49 = vmul.f32 %v4938_v40, %v4921_v31 }
 0x4b5   : > { %4870 = vrot.lane.b32.xlu0 %v14797_v6, %s11002_s27  ;;  %4872 = vrot.lane.b32.xlu1 %v14897_v36, %s11002_s27  ;;  %v14942_v0 = vpop.permute.xlu0 %5996  ;;  %v14944_v50 = vpop.permute.xlu1 %5998  ;;  %17547 = vst [vmem:[#allocation20_spill] sm:$0xff] %v15011_v34 }
 0x4b7   : > { %9976 = vmatpush1.bf16.msra.mxu1 %v14931_v56  ;;  %10008 = vmatpush1.bf16.msra.mxu0 %v10007_v58  ;;  %v4939_v58 = vld [vmem:[#allocation6 + $0x148] sm:$0xff] }
 0x4b8   : > { %9978 = vmatprep.subr.bf16.mxu1 %v14952_v13  ;;  %10010 = vmatprep.subr.bf16.mxu0 %v10009_v60  ;;  %v17544_v60 = vld [vmem:[#allocation73_spill] sm:$0xff]  ;;  %v15008_v23 = vmul.f32 %v4939_v58, %v4920_v20  ;;  %v17551_v20 = vld [vmem:[#allocation46_spill] sm:$0xff] }
 0x4b9   : > { %5130 = vrot.lane.b32.xlu0 %v14797_v6, %s11004_s16  ;;  %5132 = vrot.lane.b32.xlu1 %v14897_v36, %s11004_s16  ;;  %v14968_v17 = vpop.permute.xlu0 %6256  ;;  %v14970_v19 = vpop.permute.xlu1 %6258  ;;  %v4660_v25 = vsel %vm406_vm1, %v17544_v60, %v17543_v11  ;;  %v4661_v62 = vsel %vm406_vm1, %v17533_v8, %v17544_v60  ;;  %v17550_v58 = vld [vmem:[#allocation45_spill] sm:$0xff]  ;;  %v5458_v60 = vld [vmem:[#allocation6 + $0x340] sm:$0xff] }
 0x4ba   : > { %17541 = vst [vmem:[#allocation41_spill] sm:$0xff] %v14968_v17  ;;  %v15022_v1 = vmul.f32 %v4679_v15, %v4660_v25  ;;  %v5441_v25 = vsel %vm1189_vm4, %v14423_v2, %v17549_v47  ;;  %v5181_v2 = vsel %vm928_vm3, %v14368_v35, %v17551_v20  ;;  %v6078_v17 = vld [vmem:[#allocation6 + $0x640] sm:$0xff] }
 0x4bb   : > { %9980 = vmatpush1.bf16.msra.mxu1 %v14962_v21  ;;  %10012 = vmatpush1.bf16.msra.mxu0 %v10011_v22  ;;  %v5459_v22 = vld [vmem:[#allocation6 + $0x348] sm:$0xff] }
 0x4bc   : > { %9982 = vmatprep.subr.bf16.mxu1 %v14976_v9  ;;  %10014 = vmatprep.subr.bf16.mxu0 %v10013_v51  ;;  %v5440_v51 = vsel %vm1189_vm4, %v17549_v47, %v17548_v5  ;;  %v15048_v31 = vpack.c.bf16 %v15008_v23, %v15022_v1 }
 0x4bd   : > { %5390 = vrot.lane.b32.xlu0 %v14797_v6, %s11005_s19  ;;  %5392 = vrot.lane.b32.xlu1 %v14897_v36, %s11005_s19  ;;  %v15000_v61 = vpop.permute.xlu0 %6516  ;;  %v15002_v55 = vpop.permute.xlu1 %6518  ;;  %v5180_v6 = vsel %vm928_vm3, %v17551_v20, %v17550_v58  ;;  %v15044_v40 = vmul.f32 %v5459_v22, %v5440_v51  ;;  %v15069_v51 = vmul.f32 %v5458_v60, %v5441_v25  ;;  %v17558_v60 = vld [vmem:[#allocation53_spill] sm:$0xff]  ;;  %v17559_v25 = vld [vmem:[#allocation54_spill] sm:$0xff] }
 0x4be   : > { %17545 = vst [vmem:[#allocation55_spill] sm:$0xff] %v15000_v61  ;;  %17546 = vst [vmem:[#allocation56_spill] sm:$0xff] %v15002_v55  ;;  %v17555_v61 = vld [vmem:[#allocation48_spill] sm:$0xff]  ;;  %v15061_v22 = vmul.f32 %v5199_v28, %v5180_v6 }
 0x4bf   : > { %9984 = vmatpush1.bf16.msra.mxu1 %v14988_v26  ;;  %10016 = vmatpush1.bf16.msra.mxu0 %v10015_v53  ;;  %v10019_v53 = vpack.c.bf16 %v14990_v18, %v6368_v59  ;;  %v5818_v6 = vld [vmem:[#allocation6 + $0x540] sm:$0xff] }
 0x4c0   : > { %7823 = vmatprep.subr.mxu1 %v14978_v46  ;;  %10018 = vmatprep.subr.bf16.mxu0 %v10017_v16  ;;  %v15050_v16 = vmul.f32 %v4678_v52, %v4661_v62  ;;  %v15088_v28 = vpack.c.bf16 %v15044_v40, %v15061_v22  ;;  %v17564_v55 = vld [vmem:[#allocation40_spill] sm:$0xff] }
 0x4c1   : > { %5752 = vrot.lane.b32.xlu0 %v14897_v36, %s11006_s20  ;;  %5754 = vrot.lane.b32.xlu1 %v15011_v34, %s11006_s20  ;;  %v15035_v8 = vpop.permute.xlu0 %4598  ;;  %v15038_v15 = vpop.permute.xlu1 %4600 }
 0x4c2   : > { %17552 = vst [vmem:[#allocation19_spill] sm:$0xff] %v15035_v8  ;;  %17553 = vst [vmem:[#allocation61_spill] sm:$0xff] %v15038_v15  ;;  %v17554_v8 = vld [vmem:[#allocation16_spill] sm:$0xff]  ;;  %v15067_v47 = vpack.c.bf16 %v15025_v49, %v15050_v16 }
 0x4c3   : > { %v5799_v59 = vsel %vm1550_vm5, %v17555_v61, %v17554_v8  ;;  %7824 = vmatpush1.msra.mxu1 %v14990_v18  ;;  %10020 = vmatpush1.bf16.msra.mxu0 %v10019_v53  ;;  %v5198_v15 = vld [vmem:[#allocation6 + $0x240] sm:$0xff]  ;;  %v6339_v53 = vld [vmem:[#allocation6 + $0x748] sm:$0xff] }
 0x4c4   : > { %10022 = vmatprep.subr.bf16.mxu0 %v15048_v31  ;;  %10038 = vmatprep.subr.bf16.mxu1 %v14894_v14  ;;  %v5800_v14 = vsel %vm1550_vm5, %v14452_v30, %v17555_v61  ;;  %v15083_v62 = vmul.f32 %v5819_v39, %v5799_v59  ;;  %v15090_v20 = vmul.f32 %v5198_v15, %v5181_v2  ;;  %v6079_v61 = vld [vmem:[#allocation6 + $0x648] sm:$0xff]  ;;  %v17560_v15 = vld [vmem:[#allocation51_spill] sm:$0xff]  ;;  %v17561_v59 = vld [vmem:[#allocation50_spill] sm:$0xff] }
 0x4c5   : > { %6012 = vrot.lane.b32.xlu0 %v14897_v36, %s11007_s10  ;;  %6014 = vrot.lane.b32.xlu1 %v15011_v34, %s11007_s10  ;;  %v15075_v52 = vpop.permute.xlu0 %4858  ;;  %v15077_v35 = vpop.permute.xlu1 %4860  ;;  %v15104_v39 = vmul.f32 %v5818_v6, %v5800_v14  ;;  %v6059_v2 = vsel %vm1811_vm6, %v17561_v59, %v17560_v15  ;;  %v6320_v6 = vsel %vm2072_vm7, %v14507_v3, %v17559_v25  ;;  %v15128_v15 = vld [vmem:[#allocation9 + $0x8] sm:$0xff] }
 0x4c6   : > { %17556 = vst [vmem:[#allocation60_spill] sm:$0xff] %v15075_v52  ;;  %17557 = vst [vmem:[#allocation17_spill] sm:$0xff] %v15077_v35  ;;  %7836 = vmatmul.mubr.f32.vlgmr.msra.gmra.mrb[18].mxu1 %v14645_v29  ;;  %v6319_v52 = vsel %vm2072_vm7, %v17559_v25, %v17558_v60  ;;  %v15102_v30 = vpack.c.bf16 %v15069_v51, %v15090_v20  ;;  %v6338_v35 = vld [vmem:[#allocation6 + $0x740] sm:$0xff]  ;;  %v15126_v60 = vpack.c.bf16 %v15083_v62, %v17564_v55 }
 0x4c7   : > { %10040 = vmatpush1.bf16.msra.mxu1 %v14906_v4  ;;  %10024 = vmatpush1.bf16.msra.mxu0 %v15067_v47  ;;  %v15122_v14 = vmul.f32 %v6339_v53, %v6319_v52  ;;  %v6060_v3 = vsel %vm1811_vm6, %v14479_v63, %v17561_v59  ;;  %v15140_v52 = vmul.f32 %v6079_v61, %v6059_v2  ;;  %v17566_v53 = vld [vmem:[#allocation39_spill] sm:$0xff]  ;;  %v6599_v2 = vld [vmem:[#allocation6 + $0x848] sm:$0xff] }
 0x4c8   : > { %10042 = vmatprep.subr.bf16.mxu1 %v14920_v27  ;;  %10026 = vmatprep.subr.bf16.mxu0 %v15088_v28  ;;  %v15146_v25 = vpack.c.bf16 %v15104_v39, %v17566_v53  ;;  %v15164_v59 = vmul.f32 %v6078_v17, %v6060_v3  ;;  %v10053_v3 = vpack.c.bf16 %v15022_v1, %v14978_v46 }
 0x4c9   : > { %6272 = vrot.lane.b32.xlu0 %v14897_v36, %s11008_s14  ;;  %6274 = vrot.lane.b32.xlu1 %v15011_v34, %s11008_s14  ;;  %v15114_v4 = vpop.permute.xlu0 %5118  ;;  %v15116_v27 = vpop.permute.xlu1 %5120  ;;  %v10057_v46 = vpack.c.bf16 %v15061_v22, %v15008_v23  ;;  %v10061_v23 = vpack.c.bf16 %v17564_v55, %v15044_v40  ;;  %v10065_v55 = vpack.c.bf16 %v15140_v52, %v15083_v62 }
 0x4ca   : > { %17562 = vst [vmem:[#allocation63_spill] sm:$0xff] %v15114_v4  ;;  %17563 = vst [vmem:[#allocation62_spill] sm:$0xff] %v15116_v27  ;;  %9010 = vmatprep.mubr.msk.f32.mxu1 %vm3402_vm0, %v15128_v15  ;;  %v17565_v4 = vld [vmem:[#allocation22_spill] sm:$0xff]  ;;  %v10067_v62 = vpack.c.bf16 %v15164_v59, %v15104_v39 }
 0x4cb   : > { %v4185_v27 = vadd.f32 %v17565_v4, %v13879_v24  ;;  %10044 = vmatpush1.bf16.msra.mxu1 %v14931_v56  ;;  %10028 = vmatpush1.bf16.msra.mxu0 %v15102_v30  ;;  %v15148_v4 = vmul.f32 %v6338_v35, %v6320_v6  ;;  %v6579_v35 = vsel %vm2333_vm8, %v14793_v7, %v14795_v33  ;;  %v6598_v6 = vld [vmem:[#allocation6 + $0x840] sm:$0xff] }
 0x4cc   : > { %10046 = vmatprep.subr.bf16.mxu1 %v14952_v13  ;;  %10030 = vmatprep.subr.bf16.mxu0 %v15126_v60  ;;  %v15160_v13 = vpack.c.bf16 %v15122_v14, %v15140_v52  ;;  %v4680_v52 = vld [vmem:[#allocation6 + $0x50] sm:$0xff] }
 0x4cd   : > { %6532 = vrot.lane.b32.xlu0 %v14897_v36, %s11009_s11  ;;  %6534 = vrot.lane.b32.xlu1 %v15011_v34, %s11009_s11  ;;  %v15154_v56 = vpop.permute.xlu0 %5378  ;;  %v15156_v63 = vpop.permute.xlu1 %5380  ;;  %v15162_v61 = vmax.f32 %v4185_v27, 0.0  ;;  %v15176_v27 = vpack.c.bf16 %v15148_v4, %v15164_v59  ;;  %v15192_v36 = vmul.f32 %v6599_v2, %v6579_v35  ;;  %v4940_v2 = vld [vmem:[#allocation6 + $0x150] sm:$0xff] }
 0x4cf   : > { %17567 = vst [vmem:[#allocation66_spill] sm:$0xff] %v15162_v61  ;;  %10048 = vmatpush1.bf16.msra.mxu1 %v14962_v21  ;;  %10032 = vmatpush1.bf16.msra.mxu0 %v15146_v25  ;;  %v10069_v59 = vpack.c.bf16 %v15192_v36, %v15122_v14 }
 0x4d0   : > { %10050 = vmatprep.subr.bf16.mxu1 %v14976_v9  ;;  %10034 = vmatprep.subr.bf16.mxu0 %v15160_v13  ;;  %v6580_v9 = vsel %vm2333_vm8, %v14535_v41, %v14793_v7 }
 0x4d1   : > { %4614 = vrot.lane.b32.xlu0 %v15011_v34, %s11003_s29  ;;  %4616 = vrot.lane.b32.xlu1 %v15162_v61, %s11003_s29  ;;  %v15182_v17 = vpop.permute.xlu0 %5740  ;;  %v15184_v21 = vpop.permute.xlu1 %5742 }
 0x4d2   : > { %17568 = vst [vmem:[#allocation65_spill] sm:$0xff] %v15182_v17  ;;  %17569 = vst [vmem:[#allocation18_spill] sm:$0xff] %v15184_v21  ;;  %v10055_v17 = vpack.c.bf16 %v15050_v16, %v14990_v18  ;;  %v15199_v21 = vmul.f32 %v6598_v6, %v6580_v9  ;;  %v5461_v6 = vld [vmem:[#allocation6 + $0x358] sm:$0xff]  ;;  %v5438_v9 = vsel %vm1189_vm4, %v14890_v48, %v14892_v32 }
 0x4d3   : > { %10052 = vmatpush1.bf16.msra.mxu1 %v14988_v26  ;;  %10036 = vmatpush1.bf16.msra.mxu0 %v15176_v27  ;;  %v10059_v26 = vpack.c.bf16 %v15090_v20, %v15025_v49  ;;  %v10063_v49 = vpack.c.bf16 %v17566_v53, %v15069_v51  ;;  %v4658_v51 = vsel %vm406_vm1, %v14811_v54, %v14813_v38 }
 0x4d4   : > { %10054 = vmatprep.subr.bf16.mxu1 %v10053_v3  ;;  %7894 = vmatprep.subr.mxu0 %v15192_v36  ;;  %v4918_v20 = vsel %vm667_vm2, %v14827_v57, %v14829_v45  ;;  %v4659_v53 = vsel %vm406_vm1, %v17543_v11, %v14811_v54  ;;  %v5201_v11 = vld [vmem:[#allocation6 + $0x258] sm:$0xff]  ;;  %v5200_v3 = vld [vmem:[#allocation6 + $0x250] sm:$0xff] }
 0x4d5   : > { %4874 = vrot.lane.b32.xlu0 %v15011_v34, %s11002_s27  ;;  %4876 = vrot.lane.b32.xlu1 %v15162_v61, %s11002_s27  ;;  %v15205_v41 = vpop.permute.xlu0 %6000  ;;  %v15207_v7 = vpop.permute.xlu1 %6002 }
 0x4d7   : > { %10056 = vmatpush1.bf16.msra.mxu1 %v10055_v17  ;;  %7895 = vmatpush1.msra.mxu0 %v15199_v21  ;;  %v5178_v17 = vsel %vm928_vm3, %v14854_v10, %v14856_v42 }
 0x4d8   : > { %10058 = vmatprep.subr.bf16.mxu1 %v10057_v46  ;;  %10090 = vmatprep.subr.bf16.mxu0 %v15048_v31  ;;  %v17570_v31 = vld [vmem:[#allocation25_spill] sm:$0xff]  ;;  %v5179_v46 = vsel %vm928_vm3, %v17550_v58, %v14854_v10 }
 0x4d9   : > { %5134 = vrot.lane.b32.xlu0 %v15011_v34, %s11004_s16  ;;  %5136 = vrot.lane.b32.xlu1 %v15162_v61, %s11004_s16  ;;  %v15219_v18 = vpop.permute.xlu0 %6260  ;;  %v4254_v16 = vadd.f32 %v17570_v31, %v13879_v24 }
 0x4da   : > { %7907 = vmatmul.mubr.f32.vlgmr.msra.gmra.mrb[18].mxu0 %v14645_v29  ;;  %v15224_v1 = vpop.permute.xlu1 %6262 }
 0x4db   : > { %10060 = vmatpush1.bf16.msra.mxu1 %v10059_v26  ;;  %10092 = vmatpush1.bf16.msra.mxu0 %v15067_v47  ;;  %v15244_v22 = vmax.f32 %v4254_v16, 0.0  ;;  %v4681_v47 = vld [vmem:[#allocation6 + $0x58] sm:$0xff]  ;;  %v5460_v26 = vld [vmem:[#allocation6 + $0x350] sm:$0xff] }
 0x4dc   : > { %10062 = vmatprep.subr.bf16.mxu1 %v10061_v23  ;;  %10094 = vmatprep.subr.bf16.mxu0 %v15088_v28  ;;  %v4941_v28 = vld [vmem:[#allocation6 + $0x158] sm:$0xff]  ;;  %v5493_v23 = vmul.f32 %v5461_v6, %v5438_v9 }
 0x4dd   : > { %5394 = vrot.lane.b32.xlu0 %v15011_v34, %s11005_s19  ;;  %5396 = vrot.lane.b32.xlu1 %v15162_v61, %s11005_s19  ;;  %v15236_v29 = vpop.permute.xlu0 %6520  ;;  %17571 = vst [vmem:[#allocation24_spill] sm:$0xff] %v15244_v22  ;;  %v4973_v39 = vmul.f32 %v4941_v28, %v4918_v20  ;;  %v5821_v16 = vld [vmem:[#allocation6 + $0x558] sm:$0xff] }
 0x4de   : > { %v15240_v40 = vpop.permute.xlu1 %6522  ;;  %9011 = vmatprep.mubr.msk.f32.mxu0 %vm3402_vm0, %v15128_v15  ;;  %v17574_v6 = vld [vmem:[#allocation51_spill] sm:$0xff] }
 0x4df   : > { %10064 = vmatpush1.bf16.msra.mxu1 %v10063_v49  ;;  %10096 = vmatpush1.bf16.msra.mxu0 %v15102_v30  ;;  %v4713_v30 = vmul.f32 %v4681_v47, %v4658_v51  ;;  %v5820_v51 = vld [vmem:[#allocation6 + $0x550] sm:$0xff]  ;;  %v6058_v9 = vsel %vm1811_vm6, %v17574_v6, %v14942_v0  ;;  %v17581_v6 = vld [vmem:[#allocation17_spill] sm:$0xff] }
 0x4e0   : > { %10066 = vmatprep.subr.bf16.mxu1 %v10065_v55  ;;  %10098 = vmatprep.subr.bf16.mxu0 %v15126_v60  ;;  %v4919_v60 = vsel %vm667_vm2, %v14590_v44, %v14827_v57  ;;  %v4712_v44 = vmul.f32 %v4680_v52, %v4659_v53  ;;  %v10071_v57 = vpack.c.bf16 %v15199_v21, %v15148_v4  ;;  %v17572_v52 = vld [vmem:[#allocation26_spill] sm:$0xff] }
 0x4e1   : > { %5756 = vrot.lane.b32.xlu0 %v15162_v61, %s11006_s20  ;;  %5758 = vrot.lane.b32.xlu1 %v15244_v22, %s11006_s20  ;;  %v15266_v35 = vpop.permute.xlu0 %4602  ;;  %v4972_v14 = vmul.f32 %v4940_v2, %v4919_v60  ;;  %v15302_v31 = vpack.c.bf16 %v4973_v39, %v4713_v30  ;;  %v10105_v10 = vpack.c.bf16 %v4713_v30, %v15192_v36  ;;  %v6081_v30 = vld [vmem:[#allocation6 + $0x658] sm:$0xff] }
 0x4e2   : > { %v15274_v54 = vpop.permute.xlu1 %4604  ;;  %v10107_v55 = vpack.c.bf16 %v4712_v44, %v15199_v21  ;;  %v4256_v53 = vadd.f32 %v17572_v52, %v13879_v24  ;;  %v6057_v2 = vsel %vm1811_vm6, %v14942_v0, %v14944_v50  ;;  %v6341_v60 = vld [vmem:[#allocation6 + $0x758] sm:$0xff] }
 0x4e3   : > { %10068 = vmatpush1.bf16.msra.mxu1 %v10067_v62  ;;  %10100 = vmatpush1.bf16.msra.mxu0 %v15146_v25  ;;  %v5439_v25 = vsel %vm1189_vm4, %v17548_v5, %v14890_v48  ;;  %v5797_v48 = vsel %vm1550_vm5, %v14912_v37, %v14914_v43  ;;  %v5232_v5 = vmul.f32 %v5200_v3, %v5179_v46  ;;  %v6340_v46 = vld [vmem:[#allocation6 + $0x750] sm:$0xff] }
 0x4e4   : > { %10070 = vmatprep.subr.bf16.mxu1 %v10069_v59  ;;  %10102 = vmatprep.subr.bf16.mxu0 %v15160_v13  ;;  %v5233_v13 = vmul.f32 %v5201_v11, %v5178_v17  ;;  %v5492_v49 = vmul.f32 %v5460_v26, %v5439_v25  ;;  %v15314_v47 = vpack.c.bf16 %v4972_v14, %v4712_v44  ;;  %v17573_v59 = vld [vmem:[#allocation41_spill] sm:$0xff]  ;;  %v6080_v17 = vld [vmem:[#allocation6 + $0x650] sm:$0xff]  ;;  %v17575_v44 = vld [vmem:[#allocation47_spill] sm:$0xff] }
 0x4e5   : > { %6016 = vrot.lane.b32.xlu0 %v15162_v61, %s11007_s10  ;;  %6018 = vrot.lane.b32.xlu1 %v15244_v22, %s11007_s10  ;;  %v15300_v4 = vpop.permute.xlu0 %4862  ;;  %v5853_v28 = vmul.f32 %v5821_v16, %v5797_v48  ;;  %v6113_v3 = vmul.f32 %v6081_v30, %v6057_v2  ;;  %v17576_v26 = vld [vmem:[#allocation53_spill] sm:$0xff]  ;;  %v15364_v16 = vmax.f32 %v4256_v53, 0.0  ;;  %v17578_v48 = vld [vmem:[#allocation56_spill] sm:$0xff]  ;;  %v6600_v2 = vld [vmem:[#allocation6 + $0x850] sm:$0xff] }
 0x4e6   : > { %v15305_v58 = vpop.permute.xlu1 %4864  ;;  %v15326_v20 = vpack.c.bf16 %v5493_v23, %v5233_v13  ;;  %v10109_v21 = vpack.c.bf16 %v5233_v13, %v4973_v39  ;;  %v15341_v39 = vpack.c.bf16 %v5492_v49, %v5232_v5  ;;  %v6318_v25 = vsel %vm2072_vm7, %v17576_v26, %v17573_v59  ;;  %v17584_v26 = vld [vmem:[#allocation19_spill] sm:$0xff] }
 0x4e7   : > { %10072 = vmatpush1.bf16.msra.mxu1 %v10071_v57  ;;  %10104 = vmatpush1.bf16.msra.mxu0 %v15176_v27  ;;  %v5798_v27 = vsel %vm1550_vm5, %v17554_v8, %v14912_v37  ;;  %v6317_v37 = vsel %vm2072_vm7, %v17573_v59, %v14970_v19  ;;  %v10111_v8 = vpack.c.bf16 %v5232_v5, %v4972_v14  ;;  %v17579_v5 = vld [vmem:[#allocation55_spill] sm:$0xff] }
 0x4e8   : > { %10074 = vmatprep.subr.bf16.mxu1 %v15302_v31  ;;  %10106 = vmatprep.subr.bf16.mxu0 %v10105_v10  ;;  %v5852_v11 = vmul.f32 %v5820_v51, %v5798_v27  ;;  %v10113_v57 = vpack.c.bf16 %v17575_v44, %v5493_v23  ;;  %v6373_v13 = vmul.f32 %v6341_v60, %v6317_v37  ;;  %v17580_v27 = vld [vmem:[#allocation42_spill] sm:$0xff] }
 0x4e9   : > { %6276 = vrot.lane.b32.xlu0 %v15162_v61, %s11008_s14  ;;  %6278 = vrot.lane.b32.xlu1 %v15244_v22, %s11008_s14  ;;  %v15320_v36 = vpop.permute.xlu0 %5122  ;;  %v15360_v0 = vpack.c.bf16 %v5853_v28, %v17575_v44  ;;  %17577 = vst [vmem:[#allocation23_spill] sm:$0xff] %v15364_v16  ;;  %v6577_v23 = vsel %vm2333_vm8, %v17579_v5, %v17578_v48 }
 0x4ea   : > { %v15328_v62 = vpop.permute.xlu1 %5124  ;;  %v6112_v51 = vmul.f32 %v6080_v17, %v6058_v9  ;;  %v15374_v52 = vpack.c.bf16 %v5852_v11, %v17580_v27  ;;  %v6372_v53 = vmul.f32 %v6340_v46, %v6318_v25  ;;  %v6578_v60 = vsel %vm2333_vm8, %v14795_v33, %v17579_v5  ;;  %v4943_v17 = vld [vmem:[#allocation6 + $0x168] sm:$0xff]  ;;  %v17582_v9 = vld [vmem:[#allocation60_spill] sm:$0xff] }
 0x4eb   : > { %10076 = vmatpush1.bf16.msra.mxu1 %v15314_v47  ;;  %10108 = vmatpush1.bf16.msra.mxu0 %v10107_v55  ;;  %v6601_v55 = vld [vmem:[#allocation6 + $0x858] sm:$0xff]  ;;  %v15386_v59 = vpack.c.bf16 %v6373_v13, %v6113_v3  ;;  %v4916_v44 = vsel %vm667_vm2, %v17582_v9, %v17581_v6  ;;  %v17583_v46 = vld [vmem:[#allocation61_spill] sm:$0xff]  ;;  %v4942_v5 = vld [vmem:[#allocation6 + $0x160] sm:$0xff] }
 0x4ec   : > { %10078 = vmatprep.subr.bf16.mxu1 %v15326_v20  ;;  %10110 = vmatprep.subr.bf16.mxu0 %v10109_v21  ;;  %v10115_v21 = vpack.c.bf16 %v17580_v27, %v5492_v49  ;;  %v10117_v49 = vpack.c.bf16 %v6113_v3, %v5853_v28  ;;  %v15398_v33 = vpack.c.bf16 %v6372_v53, %v6112_v51  ;;  %v4683_v3 = vld [vmem:[#allocation6 + $0x68] sm:$0xff] }
 0x4ed   : > { %6536 = vrot.lane.b32.xlu0 %v15162_v61, %s11009_s11  ;;  %6538 = vrot.lane.b32.xlu1 %v15244_v22, %s11009_s11  ;;  %v15353_v14 = vpop.permute.xlu0 %5382  ;;  %v15400_v28 = vmul.f32 %v6600_v2, %v6578_v60  ;;  %v4656_v25 = vsel %vm406_vm1, %v17584_v26, %v17583_v46  ;;  %v5436_v2 = vsel %vm1189_vm4, %v15154_v56, %v15156_v63  ;;  %v4682_v60 = vld [vmem:[#allocation6 + $0x60] sm:$0xff]  ;;  %v5823_v61 = vld [vmem:[#allocation6 + $0x568] sm:$0xff] }
 0x4ee   : > { %v15362_v10 = vpop.permute.xlu1 %5384 }
 0x4ef   : > { %10080 = vmatpush1.bf16.msra.mxu1 %v15341_v39  ;;  %10112 = vmatpush1.bf16.msra.mxu0 %v10111_v8  ;;  %v15390_v8 = vmul.f32 %v6601_v55, %v6577_v23  ;;  %v4917_v23 = vsel %vm667_vm2, %v14829_v45, %v17582_v9  ;;  %v15416_v55 = vmul.f32 %v4943_v17, %v4916_v44  ;;  %v5203_v17 = vld [vmem:[#allocation6 + $0x268] sm:$0xff]  ;;  %v17586_v9 = vld [vmem:[#allocation62_spill] sm:$0xff]  ;;  %v17587_v44 = vld [vmem:[#allocation63_spill] sm:$0xff] }
 0x4f0   : > { %10082 = vmatprep.subr.bf16.mxu1 %v15360_v0  ;;  %10114 = vmatprep.subr.bf16.mxu0 %v10113_v57  ;;  %v10119_v57 = vpack.c.bf16 %v6112_v51, %v5852_v11  ;;  %v4657_v45 = vsel %vm406_vm1, %v14813_v38, %v17584_v26  ;;  %v5176_v34 = vsel %vm928_vm3, %v17587_v44, %v17586_v9 }
 0x4f1   : > { %4618 = vrot.lane.b32.xlu0 %v15244_v22, %s11003_s29  ;;  %4620 = vrot.lane.b32.xlu1 %v15364_v16, %s11003_s29  ;;  %v15380_v30 = vpop.permute.xlu0 %5744  ;;  %v10121_v51 = vpack.c.bf16 %v15390_v8, %v6373_v13  ;;  %v15433_v13 = vmul.f32 %v4942_v5, %v4917_v23  ;;  %v10123_v38 = vpack.c.bf16 %v15400_v28, %v6372_v53  ;;  %v17590_v53 = vld [vmem:[#allocation18_spill] sm:$0xff] }
 0x4f2   : > { %v15388_v37 = vpop.permute.xlu1 %5746  ;;  %v5437_v26 = vsel %vm1189_vm4, %v14892_v32, %v15154_v56  ;;  %v17592_v32 = vld [vmem:[#allocation27_spill] sm:$0xff] }
 0x4f3   : > { %10084 = vmatpush1.bf16.msra.mxu1 %v15374_v52  ;;  %10116 = vmatpush1.bf16.msra.mxu0 %v10115_v21  ;;  %v5463_v21 = vld [vmem:[#allocation6 + $0x368] sm:$0xff]  ;;  %v4325_v56 = vadd.f32 %v17592_v32, %v13879_v24 }
 0x4f4   : > { %10086 = vmatprep.subr.bf16.mxu1 %v15386_v59  ;;  %10118 = vmatprep.subr.bf16.mxu0 %v10117_v49  ;;  %v15430_v49 = vmul.f32 %v4683_v3, %v4656_v25  ;;  %v5462_v3 = vld [vmem:[#allocation6 + $0x360] sm:$0xff]  ;;  %v15450_v25 = vmul.f32 %v5463_v21, %v5436_v2  ;;  %v5177_v2 = vsel %vm928_vm3, %v14856_v42, %v17587_v44  ;;  %v6343_v32 = vld [vmem:[#allocation6 + $0x768] sm:$0xff] }
 0x4f5   : > { %4878 = vrot.lane.b32.xlu0 %v15244_v22, %s11002_s27  ;;  %4880 = vrot.lane.b32.xlu1 %v15364_v16, %s11002_s27  ;;  %v15410_v11 = vpop.permute.xlu0 %6004  ;;  %v5202_v21 = vld [vmem:[#allocation6 + $0x260] sm:$0xff] }
 0x4f6   : > { %17585 = vst [vmem:[#allocation21_spill] sm:$0xff] %v15410_v11  ;;  %v15419_v27 = vpop.permute.xlu1 %6006  ;;  %v15454_v5 = vpack.c.bf16 %v15416_v55, %v15430_v49  ;;  %v17591_v11 = vld [vmem:[#allocation65_spill] sm:$0xff] }
 0x4f7   : > { %10088 = vmatpush1.bf16.msra.mxu1 %v15398_v33  ;;  %10120 = vmatpush1.bf16.msra.mxu0 %v10119_v57 }
 0x4f8   : > { %7965 = vmatprep.subr.mxu1 %v15390_v8  ;;  %10122 = vmatprep.subr.bf16.mxu0 %v10121_v51  ;;  %v15458_v51 = vmul.f32 %v4682_v60, %v4657_v45  ;;  %v15471_v60 = vmul.f32 %v5203_v17, %v5176_v34  ;;  %v5822_v34 = vld [vmem:[#allocation6 + $0x560] sm:$0xff] }
 0x4f9   : > { %5138 = vrot.lane.b32.xlu0 %v15244_v22, %s11004_s16  ;;  %5140 = vrot.lane.b32.xlu1 %v15364_v16, %s11004_s16  ;;  %v15444_v57 = vpop.permute.xlu0 %6264 }
 0x4fa   : > { %17588 = vst [vmem:[#allocation74_spill] sm:$0xff] %v15444_v57  ;;  %v15456_v23 = vpop.permute.xlu1 %6266  ;;  %v5795_v57 = vsel %vm1550_vm5, %v17591_v11, %v17590_v53  ;;  %v15477_v45 = vpack.c.bf16 %v15433_v13, %v15458_v51  ;;  %v15499_v44 = vpack.c.bf16 %v15450_v25, %v15471_v60 }
 0x4fb   : > { %17589 = vst [vmem:[#allocation73_spill] sm:$0xff] %v15456_v23  ;;  %7966 = vmatpush1.msra.mxu1 %v15400_v28  ;;  %10124 = vmatpush1.bf16.msra.mxu0 %v10123_v38  ;;  %v15479_v38 = vmul.f32 %v5462_v3, %v5437_v26  ;;  %v15481_v23 = vld [vmem:[#allocation9] sm:$0xff]  ;;  %v15492_v17 = vmul.f32 %v5823_v61, %v5795_v57  ;;  %v15511_v61 = vmax.f32 %v4325_v56, 0.0  ;;  %v6083_v57 = vld [vmem:[#allocation6 + $0x668] sm:$0xff] }
 0x4fc   : > { %10126 = vmatprep.subr.bf16.mxu0 %v15454_v5  ;;  %10142 = vmatprep.subr.bf16.mxu1 %v15302_v31  ;;  %v5796_v31 = vsel %vm1550_vm5, %v14914_v43, %v17591_v11  ;;  %v15503_v26 = vmul.f32 %v5202_v21, %v5177_v2  ;;  %v6315_v43 = vsel %vm2072_vm7, %v15219_v18, %v15224_v1  ;;  %v6342_v21 = vld [vmem:[#allocation6 + $0x760] sm:$0xff] }
 0x4fd   : > { %7978 = vmatmul.mubr.f32.vlgmr.msra.gmra.mrb[20].mxu1 %v15481_v23  ;;  %5398 = vrot.lane.b32.xlu0 %v15244_v22, %s11005_s19  ;;  %v15486_v42 = vpop.permute.xlu0 %6524  ;;  %17594 = vst [vmem:[#allocation44_spill] sm:$0xff] %v15511_v61  ;;  %v15520_v11 = vmul.f32 %v5822_v34, %v5796_v31  ;;  %v6316_v2 = vsel %vm2072_vm7, %v14970_v19, %v15219_v18  ;;  %v17596_v34 = vld [vmem:[#allocation59_spill] sm:$0xff] }
 0x4fe   : > { %17593 = vst [vmem:[#allocation43_spill] sm:$0xff] %v15486_v42  ;;  %10144 = vmatpush1.bf16.msra.mxu1 %v15314_v47  ;;  %5400 = vrot.lane.b32.xlu1 %v15364_v16, %s11005_s19  ;;  %v15501_v3 = vpop.permute.xlu1 %6526  ;;  %v15518_v47 = vpack.c.bf16 %v15479_v38, %v15503_v26  ;;  %v15534_v22 = vmul.f32 %v6343_v32, %v6315_v43 }
 0x4ff   : > { %10146 = vmatprep.subr.bf16.mxu1 %v15326_v20  ;;  %10128 = vmatpush1.bf16.msra.mxu0 %v15477_v45  ;;  %v6055_v20 = vsel %vm1811_vm6, %v15205_v41, %v15207_v7  ;;  %v15541_v31 = vpack.c.bf16 %v15492_v17, %v17596_v34  ;;  %v6056_v19 = vsel %vm1811_vm6, %v14944_v50, %v15205_v41 }
 0x500   : > { %10130 = vmatprep.subr.bf16.mxu0 %v15499_v44  ;;  %9012 = vmatprep.mubr.msk.f32.mxu1 %vm3402_vm0, %v15128_v15  ;;  %v15551_v18 = vmul.f32 %v6083_v57, %v6055_v20  ;;  %v15558_v43 = vmul.f32 %v6342_v21, %v6316_v2  ;;  %v6575_v20 = vsel %vm2333_vm8, %v15236_v29, %v15240_v40 }
 0x501   : > { %5760 = vrot.lane.b32.xlu0 %v15364_v16, %s11006_s20  ;;  %v15528_v56 = vpop.permute.xlu0 %4606 }
 0x502   : > { %17595 = vst [vmem:[#allocation45_spill] sm:$0xff] %v15528_v56  ;;  %10148 = vmatpush1.bf16.msra.mxu1 %v15341_v39  ;;  %5762 = vrot.lane.b32.xlu1 %v15511_v61, %s11006_s20  ;;  %v15543_v42 = vpop.permute.xlu1 %4608  ;;  %v6082_v56 = vld [vmem:[#allocation6 + $0x660] sm:$0xff]  ;;  %v15569_v50 = vpack.c.bf16 %v15534_v22, %v15551_v18 }
 0x503   : > { %17597 = vst [vmem:[#allocation46_spill] sm:$0xff] %v15543_v42  ;;  %10150 = vmatprep.subr.bf16.mxu1 %v15360_v0  ;;  %10132 = vmatpush1.bf16.msra.mxu0 %v15518_v47  ;;  %v17598_v39 = vld [vmem:[#allocation52_spill] sm:$0xff]  ;;  %v15573_v57 = vmul.f32 %v6082_v56, %v6056_v19  ;;  %v10157_v56 = vpack.c.bf16 %v15430_v49, %v15390_v8 }
 0x504   : > { %10134 = vmatprep.subr.bf16.mxu0 %v15541_v31  ;;  %v15556_v32 = vpack.c.bf16 %v15520_v11, %v17598_v39  ;;  %v6602_v19 = vld [vmem:[#allocation6 + $0x860] sm:$0xff]  ;;  %v10159_v8 = vpack.c.bf16 %v15458_v51, %v15400_v28  ;;  %v10163_v51 = vpack.c.bf16 %v15503_v26, %v15433_v13  ;;  %v4945_v26 = vld [vmem:[#allocation6 + $0x178] sm:$0xff] }
 0x505   : > { %6020 = vrot.lane.b32.xlu0 %v15364_v16, %s11007_s10  ;;  %v15562_v0 = vpop.permute.xlu0 %4866  ;;  %v15584_v21 = vpack.c.bf16 %v15558_v43, %v15573_v57  ;;  %v17600_v49 = vld [vmem:[#allocation28_spill] sm:$0xff] }
 0x506   : > { %17599 = vst [vmem:[#allocation16_spill] sm:$0xff] %v15562_v0  ;;  %10152 = vmatpush1.bf16.msra.mxu1 %v15374_v52  ;;  %6022 = vrot.lane.b32.xlu1 %v15511_v61, %s11007_s10  ;;  %v15571_v41 = vpop.permute.xlu1 %4868  ;;  %v6603_v52 = vld [vmem:[#allocation6 + $0x868] sm:$0xff] }
 0x507   : > { %10154 = vmatprep.subr.bf16.mxu1 %v15386_v59  ;;  %10136 = vmatpush1.bf16.msra.mxu0 %v15556_v32  ;;  %v6576_v59 = vsel %vm2333_vm8, %v17578_v48, %v15236_v29  ;;  %v15599_v42 = vmul.f32 %v6603_v52, %v6575_v20  ;;  %v4327_v29 = vadd.f32 %v17600_v49, %v13879_v24  ;;  %v5205_v49 = vld [vmem:[#allocation6 + $0x278] sm:$0xff] }
 0x508   : > { %10138 = vmatprep.subr.bf16.mxu0 %v15569_v50  ;;  %v15609_v48 = vmul.f32 %v6602_v19, %v6576_v59  ;;  %v4944_v19 = vld [vmem:[#allocation6 + $0x170] sm:$0xff]  ;;  %v4915_v59 = vsel %vm667_vm2, %v17581_v6, %v15300_v4 }
 0x509   : > { %6280 = vrot.lane.b32.xlu0 %v15364_v16, %s11008_s14  ;;  %v15590_v2 = vpop.permute.xlu0 %5126 }
 0x50a   : > { %10156 = vmatpush1.bf16.msra.mxu1 %v15398_v33  ;;  %6282 = vrot.lane.b32.xlu1 %v15511_v61, %s11008_s14  ;;  %v15601_v0 = vpop.permute.xlu1 %5128  ;;  %v10161_v33 = vpack.c.bf16 %v15471_v60, %v15416_v55  ;;  %v15626_v55 = vmax.f32 %v4327_v29, 0.0  ;;  %v10165_v60 = vpack.c.bf16 %v17596_v34, %v15450_v25  ;;  %v4654_v25 = vsel %vm406_vm1, %v15266_v35, %v15274_v54 }
 0x50b   : > { %10158 = vmatprep.subr.bf16.mxu1 %v10157_v56  ;;  %10140 = vmatpush1.bf16.msra.mxu0 %v15584_v21  ;;  %v4655_v56 = vsel %vm406_vm1, %v17583_v46, %v15266_v35  ;;  %v5465_v46 = vld [vmem:[#allocation6 + $0x378] sm:$0xff] }
 0x50c   : > { %8036 = vmatprep.subr.mxu0 %v15599_v42  ;;  %17601 = vst [vmem:[#allocation48_spill] sm:$0xff] %v15626_v55 }
 0x50d   : > { %6540 = vrot.lane.b32.xlu0 %v15364_v16, %s11009_s11  ;;  %v15615_v20 = vpop.permute.xlu0 %5386  ;;  %v6606_v16 = vld [vmem:[#allocation6 + $0x880] sm:$0xff] }
 0x50e   : > { %10160 = vmatpush1.bf16.msra.mxu1 %v10159_v8  ;;  %6542 = vrot.lane.b32.xlu1 %v15511_v61, %s11009_s11  ;;  %v15619_v28 = vpop.permute.xlu1 %5388 }
 0x50f   : > { %10162 = vmatprep.subr.bf16.mxu1 %v10161_v33  ;;  %8037 = vmatpush1.msra.mxu0 %v15609_v48 }
 0x510   : > { %10194 = vmatprep.subr.bf16.mxu0 %v15454_v5  ;;  %8049 = vmatmul.mubr.f32.vlgmr.msra.gmra.mrb[20].mxu0 %v15481_v23  ;;  %v10167_v5 = vpack.c.bf16 %v17598_v39, %v15479_v38  ;;  %v4914_v38 = vsel %vm667_vm2, %v15300_v4, %v15305_v58  ;;  %v4684_v39 = vld [vmem:[#allocation6 + $0x70] sm:$0xff]  ;;  %v5434_v4 = vsel %vm1189_vm4, %v15353_v14, %v15362_v10 }
 0x511   : > { %10196 = vmatpush1.bf16.msra.mxu0 %v15477_v45  ;;  %4622 = vrot.lane.b32.xlu0 %v15511_v61, %s11003_s29  ;;  %v15633_v52 = vpop.permute.xlu0 %5748  ;;  %v4685_v45 = vld [vmem:[#allocation6 + $0x78] sm:$0xff]  ;;  %v4977_v8 = vmul.f32 %v4945_v26, %v4914_v38  ;;  %v4716_v6 = vmul.f32 %v4684_v39, %v4655_v56 }
 0x512   : > { %10164 = vmatpush1.bf16.msra.mxu1 %v10163_v51  ;;  %10198 = vmatprep.subr.bf16.mxu0 %v15499_v44  ;;  %v15636_v13 = vpop.permute.xlu1 %5750  ;;  %v10169_v44 = vpack.c.bf16 %v15551_v18, %v15492_v17  ;;  %v4717_v34 = vmul.f32 %v4685_v45, %v4654_v25  ;;  %v10171_v18 = vpack.c.bf16 %v15573_v57, %v15520_v11  ;;  %v5464_v45 = vld [vmem:[#allocation6 + $0x370] sm:$0xff] }
 0x513   : > { %10166 = vmatprep.subr.bf16.mxu1 %v10165_v60  ;;  %4624 = vrot.lane.b32.xlu1 %v15626_v55, %s11003_s29  ;;  %v5174_v11 = vsel %vm928_vm3, %v15320_v36, %v15328_v62  ;;  %v10175_v57 = vpack.c.bf16 %v15609_v48, %v15558_v43  ;;  %v4976_v51 = vmul.f32 %v4944_v19, %v4915_v59  ;;  %v5204_v60 = vld [vmem:[#allocation6 + $0x270] sm:$0xff]  ;;  %v5825_v43 = vld [vmem:[#allocation6 + $0x578] sm:$0xff]  ;;  %v17604_v19 = vld [vmem:[#allocation21_spill] sm:$0xff] }
 0x514   : > { %9013 = vmatprep.mubr.msk.f32.mxu0 %vm3402_vm0, %v15128_v15  ;;  %v10209_v33 = vpack.c.bf16 %v4717_v34, %v15599_v42  ;;  %v5435_v25 = vsel %vm1189_vm4, %v15156_v63, %v15353_v14  ;;  %v15712_v26 = vpack.c.bf16 %v4977_v8, %v4717_v34  ;;  %v5824_v34 = vld [vmem:[#allocation6 + $0x570] sm:$0xff]  ;;  %v6053_v59 = vsel %vm1811_vm6, %v17604_v19, %v15419_v27 }
 0x515   : > { %10200 = vmatpush1.bf16.msra.mxu0 %v15518_v47  ;;  %4882 = vrot.lane.b32.xlu0 %v15511_v61, %s11002_s27  ;;  %v5496_v63 = vmul.f32 %v5464_v45, %v5435_v25  ;;  %v6344_v45 = vld [vmem:[#allocation6 + $0x770] sm:$0xff] }
 0x516   : > { %10168 = vmatpush1.bf16.msra.mxu1 %v10167_v5  ;;  %10202 = vmatprep.subr.bf16.mxu0 %v15541_v31  ;;  %v10173_v31 = vpack.c.bf16 %v15599_v42, %v15534_v22  ;;  %v17602_v22 = vld [vmem:[#allocation29_spill] sm:$0xff]  ;;  %v5237_v5 = vmul.f32 %v5205_v49, %v5174_v11  ;;  %v5793_v42 = vsel %vm1550_vm5, %v15380_v30, %v15388_v37  ;;  %v6345_v11 = vld [vmem:[#allocation6 + $0x778] sm:$0xff] }
 0x517   : > { %10170 = vmatprep.subr.bf16.mxu1 %v10169_v44  ;;  %4884 = vrot.lane.b32.xlu1 %v15626_v55, %s11002_s27  ;;  %v15660_v47 = vpop.permute.xlu0 %6008  ;;  %v15662_v17 = vpop.permute.xlu1 %6010  ;;  %v4396_v35 = vadd.f32 %v17602_v22, %v13879_v24  ;;  %v5497_v44 = vmul.f32 %v5465_v46, %v5434_v4  ;;  %v17605_v22 = vld [vmem:[#allocation73_spill] sm:$0xff]  ;;  %v17606_v46 = vld [vmem:[#allocation74_spill] sm:$0xff] }
 0x518   : > { %v10213_v39 = vpack.c.bf16 %v5237_v5, %v4977_v8  ;;  %v6314_v25 = vsel %vm2072_vm7, %v15224_v1, %v17606_v46 }
 0x519   : > { %10204 = vmatpush1.bf16.msra.mxu0 %v15556_v32  ;;  %5142 = vrot.lane.b32.xlu0 %v15511_v61, %s11004_s16  ;;  %v15730_v56 = vmax.f32 %v4396_v35, 0.0  ;;  %v15736_v49 = vpack.c.bf16 %v5497_v44, %v5237_v5 }
 0x51a   : > { %10172 = vmatpush1.bf16.msra.mxu1 %v10171_v18  ;;  %10206 = vmatprep.subr.bf16.mxu0 %v15569_v50  ;;  %v5175_v50 = vsel %vm928_vm3, %v17586_v9, %v15320_v36  ;;  %v10211_v36 = vpack.c.bf16 %v4716_v6, %v15609_v48  ;;  %v5794_v18 = vsel %vm1550_vm5, %v17590_v53, %v15380_v30 }
 0x51b   : > { %10174 = vmatprep.subr.bf16.mxu1 %v10173_v31  ;;  %5144 = vrot.lane.b32.xlu1 %v15626_v55, %s11004_s16  ;;  %v15692_v32 = vpop.permute.xlu0 %6268  ;;  %v15696_v29 = vpop.permute.xlu1 %6270  ;;  %v5236_v9 = vmul.f32 %v5204_v60, %v5175_v50  ;;  %v5857_v48 = vmul.f32 %v5825_v43, %v5793_v42  ;;  %17603 = vst [vmem:[#allocation54_spill] sm:$0xff] %v15730_v56  ;;  %v6085_v31 = vld [vmem:[#allocation6 + $0x678] sm:$0xff] }
 0x51c   : > { %v6313_v30 = vsel %vm2072_vm7, %v17606_v46, %v17605_v22  ;;  %v5856_v35 = vmul.f32 %v5824_v34, %v5794_v18  ;;  %v6117_v60 = vmul.f32 %v6085_v31, %v6053_v59  ;;  %v17608_v42 = vld [vmem:[#allocation43_spill] sm:$0xff]  ;;  %v6376_v31 = vmul.f32 %v6344_v45, %v6314_v25  ;;  %v4947_v46 = vld [vmem:[#allocation6 + $0x188] sm:$0xff] }
 0x51d   : > { %10208 = vmatpush1.bf16.msra.mxu0 %v15584_v21  ;;  %5402 = vrot.lane.b32.xlu0 %v15511_v61, %s11005_s19  ;;  %v15724_v21 = vpack.c.bf16 %v4976_v51, %v4716_v6  ;;  %v10215_v53 = vpack.c.bf16 %v5236_v9, %v4976_v51  ;;  %v15745_v8 = vpack.c.bf16 %v5496_v63, %v5236_v9  ;;  %v17607_v51 = vld [vmem:[#allocation71_spill] sm:$0xff] }
 0x51e   : > { %10176 = vmatpush1.bf16.msra.mxu1 %v10175_v57  ;;  %10210 = vmatprep.subr.bf16.mxu0 %v10209_v33  ;;  %v6084_v57 = vld [vmem:[#allocation6 + $0x670] sm:$0xff]  ;;  %v6054_v33 = vsel %vm1811_vm6, %v15207_v7, %v17604_v19  ;;  %v15759_v50 = vpack.c.bf16 %v5857_v48, %v17607_v51  ;;  %v10217_v5 = vpack.c.bf16 %v17607_v51, %v5497_v44  ;;  %v6605_v7 = vld [vmem:[#allocation6 + $0x878] sm:$0xff]  ;;  %v17609_v44 = vld [vmem:[#allocation64_spill] sm:$0xff] }
 0x51f   : > { %10178 = vmatprep.subr.bf16.mxu1 %v15712_v26  ;;  %5404 = vrot.lane.b32.xlu1 %v15626_v55, %s11005_s19  ;;  %v15720_v14 = vpop.permute.xlu0 %6528  ;;  %v15722_v38 = vpop.permute.xlu1 %6530  ;;  %v6377_v43 = vmul.f32 %v6345_v11, %v6313_v30  ;;  %v10219_v9 = vpack.c.bf16 %v17609_v44, %v5496_v63  ;;  %v15775_v34 = vpack.c.bf16 %v5856_v35, %v17609_v44  ;;  %v6604_v19 = vld [vmem:[#allocation6 + $0x870] sm:$0xff]  ;;  %v17610_v30 = vld [vmem:[#allocation16_spill] sm:$0xff] }
 0x520   : > { %v6116_v1 = vmul.f32 %v6084_v57, %v6054_v33  ;;  %v6574_v63 = vsel %vm2333_vm8, %v15240_v40, %v17608_v42  ;;  %v10221_v59 = vpack.c.bf16 %v6117_v60, %v5857_v48  ;;  %v4687_v48 = vld [vmem:[#allocation6 + $0x88] sm:$0xff]  ;;  %v17611_v51 = vld [vmem:[#allocation46_spill] sm:$0xff] }
 0x521   : > { %10212 = vmatpush1.bf16.msra.mxu0 %v10211_v36  ;;  %5764 = vrot.lane.b32.xlu0 %v15626_v55, %s11006_s20  ;;  %v6573_v36 = vsel %vm2333_vm8, %v17608_v42, %v15501_v3  ;;  %v15794_v57 = vpack.c.bf16 %v6377_v43, %v6117_v60  ;;  %v15799_v40 = vmul.f32 %v6604_v19, %v6574_v63 }
 0x522   : > { %10180 = vmatpush1.bf16.msra.mxu1 %v15724_v21  ;;  %10214 = vmatprep.subr.bf16.mxu0 %v10213_v39  ;;  %v15788_v11 = vmul.f32 %v6605_v7, %v6573_v36  ;;  %v10223_v33 = vpack.c.bf16 %v6116_v1, %v5856_v35  ;;  %v15812_v42 = vpack.c.bf16 %v6376_v31, %v6116_v1  ;;  %v4946_v35 = vld [vmem:[#allocation6 + $0x180] sm:$0xff]  ;;  %v17613_v1 = vld [vmem:[#allocation30_spill] sm:$0xff] }
 0x523   : > { %10182 = vmatprep.subr.bf16.mxu1 %v15736_v49  ;;  %5766 = vrot.lane.b32.xlu1 %v15730_v56, %s11006_s20  ;;  %v15750_v4 = vpop.permute.xlu0 %4610  ;;  %v15752_v6 = vpop.permute.xlu1 %4612  ;;  %v4913_v36 = vsel %vm667_vm2, %v15305_v58, %v17610_v30  ;;  %v5432_v19 = vsel %vm1189_vm4, %v15615_v20, %v15619_v28  ;;  %v4398_v63 = vadd.f32 %v17613_v1, %v13879_v24  ;;  %v5827_v1 = vld [vmem:[#allocation6 + $0x588] sm:$0xff] }
 0x524   : > { %v10225_v44 = vpack.c.bf16 %v15788_v11, %v6377_v43 }
 0x525   : > { %10216 = vmatpush1.bf16.msra.mxu0 %v10215_v53  ;;  %6024 = vrot.lane.b32.xlu0 %v15626_v55, %s11007_s10  ;;  %v4912_v53 = vsel %vm667_vm2, %v17610_v30, %v15571_v41  ;;  %v5207_v30 = vld [vmem:[#allocation6 + $0x288] sm:$0xff]  ;;  %v15868_v61 = vmax.f32 %v4398_v63, 0.0 }
 0x526   : > { %10184 = vmatpush1.bf16.msra.mxu1 %v15745_v8  ;;  %10218 = vmatprep.subr.bf16.mxu0 %v10217_v5  ;;  %v17612_v5 = vld [vmem:[#allocation45_spill] sm:$0xff]  ;;  %v15818_v7 = vmul.f32 %v4947_v46, %v4912_v53  ;;  %v15836_v46 = vmul.f32 %v4946_v35, %v4913_v36  ;;  %v5172_v53 = vsel %vm928_vm3, %v15590_v2, %v15601_v0 }
 0x527   : > { %10186 = vmatprep.subr.bf16.mxu1 %v15759_v50  ;;  %6026 = vrot.lane.b32.xlu1 %v15730_v56, %s11007_s10  ;;  %v15780_v18 = vpop.permute.xlu0 %4870  ;;  %v15782_v39 = vpop.permute.xlu1 %4872  ;;  %v4652_v45 = vsel %vm406_vm1, %v17612_v5, %v17611_v51  ;;  %v4653_v58 = vsel %vm406_vm1, %v15274_v54, %v17612_v5  ;;  %v10227_v54 = vpack.c.bf16 %v15799_v40, %v6376_v31  ;;  %v5466_v5 = vld [vmem:[#allocation6 + $0x380] sm:$0xff] }
 0x528   : > { %v15833_v43 = vmul.f32 %v4687_v48, %v4652_v45  ;;  %v5433_v45 = vsel %vm1189_vm4, %v15362_v10, %v15615_v20  ;;  %v5791_v31 = vsel %vm1550_vm5, %v15633_v52, %v15636_v13  ;;  %v5206_v10 = vld [vmem:[#allocation6 + $0x280] sm:$0xff]  ;;  %v5173_v20 = vsel %vm928_vm3, %v15328_v62, %v15590_v2 }
 0x529   : > { %10220 = vmatpush1.bf16.msra.mxu0 %v10219_v9  ;;  %6284 = vrot.lane.b32.xlu0 %v15626_v55, %s11008_s14  ;;  %v5467_v9 = vld [vmem:[#allocation6 + $0x388] sm:$0xff]  ;;  %v5826_v62 = vld [vmem:[#allocation6 + $0x580] sm:$0xff]  ;;  %v5792_v2 = vsel %vm1550_vm5, %v15388_v37, %v15633_v52 }
 0x52a   : > { %10188 = vmatpush1.bf16.msra.mxu1 %v15775_v34  ;;  %10222 = vmatprep.subr.bf16.mxu0 %v10221_v59  ;;  %v4686_v59 = vld [vmem:[#allocation6 + $0x80] sm:$0xff]  ;;  %v15854_v35 = vmul.f32 %v5467_v9, %v5432_v19  ;;  %v15858_v36 = vpack.c.bf16 %v15818_v7, %v15833_v43  ;;  %v15874_v9 = vmul.f32 %v5207_v30, %v5172_v53 }
 0x52b   : > { %10190 = vmatprep.subr.bf16.mxu1 %v15794_v57  ;;  %6286 = vrot.lane.b32.xlu1 %v15730_v56, %s11008_s14  ;;  %v15808_v60 = vpop.permute.xlu0 %5130  ;;  %v15810_v25 = vpop.permute.xlu1 %5132  ;;  %v15894_v30 = vmul.f32 %v5827_v1, %v5791_v31  ;;  %v15903_v53 = vmul.f32 %v5206_v10, %v5173_v20  ;;  %v15918_v52 = vmul.f32 %v5826_v62, %v5792_v2  ;;  %v6346_v31 = vld [vmem:[#allocation6 + $0x780] sm:$0xff]  ;;  %v17614_v62 = vld [vmem:[#allocation49_spill] sm:$0xff] }
 0x52c   : > { %v6312_v10 = vsel %vm2072_vm7, %v17605_v22, %v15692_v32 }
 0x52d   : > { %10224 = vmatpush1.bf16.msra.mxu0 %v10223_v33  ;;  %6544 = vrot.lane.b32.xlu0 %v15626_v55, %s11009_s11  ;;  %v15941_v2 = vpack.c.bf16 %v15894_v30, %v17614_v62 }
 0x52e   : > { %10192 = vmatpush1.bf16.msra.mxu1 %v15812_v42  ;;  %10226 = vmatprep.subr.bf16.mxu0 %v10225_v44  ;;  %v15860_v44 = vmul.f32 %v4686_v59, %v4653_v58  ;;  %v15882_v59 = vmul.f32 %v5466_v5, %v5433_v45  ;;  %v6311_v5 = vsel %vm2072_vm7, %v15692_v32, %v15696_v29 }
 0x52f   : > { %8107 = vmatprep.subr.mxu1 %v15788_v11  ;;  %6546 = vrot.lane.b32.xlu1 %v15730_v56, %s11009_s11  ;;  %v15845_v33 = vpop.permute.xlu0 %5390  ;;  %v15848_v48 = vpop.permute.xlu1 %5392  ;;  %v6051_v45 = vsel %vm1811_vm6, %v15660_v47, %v15662_v17  ;;  %v6052_v32 = vsel %vm1811_vm6, %v15419_v27, %v15660_v47 }
 0x530   : > { %v15880_v19 = vpack.c.bf16 %v15836_v46, %v15860_v44  ;;  %v15916_v37 = vpack.c.bf16 %v15882_v59, %v15903_v53 }
 0x531   : > { %10228 = vmatpush1.bf16.msra.mxu0 %v10227_v54  ;;  %4626 = vrot.lane.b32.xlu0 %v15730_v56, %s11003_s29  ;;  %v6347_v54 = vld [vmem:[#allocation6 + $0x788] sm:$0xff] }
 0x532   : > { %8108 = vmatpush1.msra.mxu1 %v15799_v40  ;;  %10230 = vmatprep.subr.bf16.mxu0 %v15858_v36  ;;  %v15934_v20 = vmul.f32 %v6347_v54, %v6311_v5 }
 0x533   : > { %8120 = vmatmul.mubr.f32.vlgmr.msra.gmra.mrb[22].mxu1 %v15481_v23  ;;  %10246 = vmatprep.subr.bf16.mxu1 %v15712_v26  ;;  %v15886_v63 = vpop.permute.xlu0 %5752  ;;  %v15888_v58 = vpop.permute.xlu1 %5754  ;;  %v15901_v26 = vpack.c.bf16 %v15854_v35, %v15874_v9 }
 0x534   : > { %4628 = vrot.lane.b32.xlu1 %v15868_v61, %s11003_s29  ;;  %10248 = vmatpush1.bf16.msra.mxu1 %v15724_v21  ;;  %v6087_v21 = vld [vmem:[#allocation6 + $0x688] sm:$0xff] }
 0x535   : > { %10250 = vmatprep.subr.bf16.mxu1 %v15736_v49  ;;  %10232 = vmatpush1.bf16.msra.mxu0 %v15880_v19  ;;  %v15949_v22 = vmul.f32 %v6087_v21, %v6051_v45  ;;  %v6571_v21 = vsel %vm2333_vm8, %v15720_v14, %v15722_v38  ;;  %v6607_v45 = vld [vmem:[#allocation6 + $0x888] sm:$0xff] }
 0x536   : > { %10234 = vmatprep.subr.bf16.mxu0 %v15901_v26  ;;  %4886 = vrot.lane.b32.xlu0 %v15730_v56, %s11002_s27 }
 0x537   : > { %v15924_v49 = vpop.permute.xlu0 %6012  ;;  %v15926_v1 = vpop.permute.xlu1 %6014  ;;  %9014 = vmatprep.mubr.msk.f32.mxu1 %vm3402_vm0, %v15128_v15  ;;  %v6086_v15 = vld [vmem:[#allocation6 + $0x680] sm:$0xff]  ;;  %v15969_v27 = vpack.c.bf16 %v15934_v20, %v15949_v22 }
 0x538   : > { %4888 = vrot.lane.b32.xlu1 %v15868_v61, %s11002_s27  ;;  %10252 = vmatpush1.bf16.msra.mxu1 %v15745_v8  ;;  %v17615_v8 = vld [vmem:[#allocation72_spill] sm:$0xff]  ;;  %v15971_v47 = vmul.f32 %v6086_v15, %v6052_v32  ;;  %v10261_v15 = vpack.c.bf16 %v15833_v43, %v15788_v11  ;;  %v10263_v43 = vpack.c.bf16 %v15860_v44, %v15799_v40 }
 0x539   : > { %10254 = vmatprep.subr.bf16.mxu1 %v15759_v50  ;;  %10236 = vmatpush1.bf16.msra.mxu0 %v15916_v37  ;;  %v15956_v54 = vpack.c.bf16 %v15918_v52, %v17615_v8  ;;  %v15958_v50 = vmul.f32 %v6346_v31, %v6312_v10  ;;  %v17616_v31 = vld [vmem:[#allocation32_spill] sm:$0xff]  ;;  %v10267_v40 = vpack.c.bf16 %v15903_v53, %v15836_v46 }
 0x53a   : > { %10238 = vmatprep.subr.bf16.mxu0 %v15941_v2  ;;  %5146 = vrot.lane.b32.xlu0 %v15730_v56, %s11004_s16  ;;  %v4467_v10 = vadd.f32 %v17616_v31, %v13879_v24  ;;  %v6572_v31 = vsel %vm2333_vm8, %v15501_v3, %v15720_v14  ;;  %v10265_v14 = vpack.c.bf16 %v15874_v9, %v15818_v7  ;;  %v16044_v9 = vld [vmem:[#allocation9 + $0x8] sm:$0xff] }
 0x53b   : > { %v15960_v5 = vpop.permute.xlu0 %6272  ;;  %v15962_v55 = vpop.permute.xlu1 %6274  ;;  %v16011_v3 = vmul.f32 %v6606_v16, %v6572_v31  ;;  %v10269_v16 = vpack.c.bf16 %v17614_v62, %v15854_v35  ;;  %v10271_v46 = vpack.c.bf16 %v17615_v8, %v15882_v59  ;;  %v4650_v35 = vsel %vm406_vm1, %v15750_v4, %v15752_v6  ;;  %v17617_v8 = vld [vmem:[#allocation33_spill] sm:$0xff]  ;;  %v4948_v31 = vld [vmem:[#allocation6 + $0x190] sm:$0xff] }
 0x53c   : > { %5148 = vrot.lane.b32.xlu1 %v15868_v61, %s11004_s16  ;;  %10256 = vmatpush1.bf16.msra.mxu1 %v15775_v34  ;;  %v15986_v34 = vpack.c.bf16 %v15958_v50, %v15971_v47  ;;  %v16004_v11 = vmax.f32 %v4467_v10, 0.0  ;;  %v10273_v59 = vpack.c.bf16 %v15949_v22, %v15894_v30  ;;  %v4651_v30 = vsel %vm406_vm1, %v17611_v51, %v15750_v4  ;;  %v5209_v4 = vld [vmem:[#allocation6 + $0x298] sm:$0xff] }
 0x53d   : > { %10258 = vmatprep.subr.bf16.mxu1 %v15794_v57  ;;  %10240 = vmatpush1.bf16.msra.mxu0 %v15956_v54  ;;  %v5170_v51 = vsel %vm928_vm3, %v15808_v60, %v15810_v25 }
 0x53e   : > { %10242 = vmatprep.subr.bf16.mxu0 %v15969_v27  ;;  %5406 = vrot.lane.b32.xlu0 %v15730_v56, %s11005_s19  ;;  %v16001_v56 = vmul.f32 %v6607_v45, %v6571_v21  ;;  %v4469_v45 = vadd.f32 %v17617_v8, %v13879_v24 }
 0x53f   : > { %v15990_v32 = vpop.permute.xlu0 %6532  ;;  %v15992_v57 = vpop.permute.xlu1 %6534 }
 0x540   : > { %5408 = vrot.lane.b32.xlu1 %v15868_v61, %s11005_s19  ;;  %10260 = vmatpush1.bf16.msra.mxu1 %v15812_v42 }
 0x541   : > { %10262 = vmatprep.subr.bf16.mxu1 %v10261_v15  ;;  %10244 = vmatpush1.bf16.msra.mxu0 %v15986_v34  ;;  %v4688_v15 = vld [vmem:[#allocation6 + $0x90] sm:$0xff] }
 0x542   : > { %8178 = vmatprep.subr.mxu0 %v16001_v56  ;;  %5768 = vrot.lane.b32.xlu0 %v15868_v61, %s11006_s20 }
 0x543   : > { %v16015_v42 = vpop.permute.xlu0 %4614  ;;  %v16017_v21 = vpop.permute.xlu1 %4616 }
 0x544   : > { %5770 = vrot.lane.b32.xlu1 %v16004_v11, %s11006_s20  ;;  %10264 = vmatpush1.bf16.msra.mxu1 %v10263_v43  ;;  %v4911_v43 = vsel %vm667_vm2, %v15571_v41, %v15780_v18  ;;  %v5430_v41 = vsel %vm1189_vm4, %v15845_v33, %v15848_v48 }
 0x545   : > { %10266 = vmatprep.subr.bf16.mxu1 %v10265_v14  ;;  %8179 = vmatpush1.msra.mxu0 %v16011_v3  ;;  %v5469_v14 = vld [vmem:[#allocation6 + $0x398] sm:$0xff] }
 0x546   : > { %8191 = vmatmul.mubr.f32.vlgmr.msra.gmra.mrb[22].mxu0 %v15481_v23  ;;  %10298 = vmatprep.subr.bf16.mxu0 %v15858_v36  ;;  %v4689_v36 = vld [vmem:[#allocation6 + $0x98] sm:$0xff] }
 0x547   : > { %6028 = vrot.lane.b32.xlu0 %v15868_v61, %s11007_s10  ;;  %10300 = vmatpush1.bf16.msra.mxu0 %v15880_v19  ;;  %v16031_v7 = vpop.permute.xlu0 %4874  ;;  %v16033_v44 = vpop.permute.xlu1 %4876  ;;  %v4949_v19 = vld [vmem:[#allocation6 + $0x198] sm:$0xff]  ;;  %v4721_v10 = vmul.f32 %v4689_v36, %v4650_v35  ;;  %v5171_v36 = vsel %vm928_vm3, %v15601_v0, %v15808_v60  ;;  %v5468_v35 = vld [vmem:[#allocation6 + $0x390] sm:$0xff] }
 0x548   : > { %6030 = vrot.lane.b32.xlu1 %v16004_v11, %s11007_s10  ;;  %10268 = vmatpush1.bf16.msra.mxu1 %v10267_v40 }
 0x549   : > { %10270 = vmatprep.subr.bf16.mxu1 %v10269_v16  ;;  %10302 = vmatprep.subr.bf16.mxu0 %v15901_v26  ;;  %v4910_v26 = vsel %vm667_vm2, %v15780_v18, %v15782_v39  ;;  %v16095_v18 = vmax.f32 %v4469_v45, 0.0  ;;  %v10313_v40 = vpack.c.bf16 %v4721_v10, %v16001_v56  ;;  %v4980_v16 = vmul.f32 %v4948_v31, %v4911_v43  ;;  %v6089_v43 = vld [vmem:[#allocation6 + $0x698] sm:$0xff] }
 0x54a   : > { %9015 = vmatprep.mubr.msk.f32.mxu0 %vm3402_vm0, %v16044_v9  ;;  %v4981_v22 = vmul.f32 %v4949_v19, %v4910_v26  ;;  %v5431_v19 = vsel %vm1189_vm4, %v15619_v28, %v15845_v33 }
 0x54b   : > { %6288 = vrot.lane.b32.xlu0 %v15868_v61, %s11008_s14  ;;  %10304 = vmatpush1.bf16.msra.mxu0 %v15916_v37  ;;  %v16057_v53 = vpop.permute.xlu0 %5134  ;;  %v16059_v62 = vpop.permute.xlu1 %5136  ;;  %v10275_v37 = vpack.c.bf16 %v15971_v47, %v15918_v52  ;;  %v10277_v52 = vpack.c.bf16 %v16001_v56, %v15934_v20  ;;  %v4720_v20 = vmul.f32 %v4688_v15, %v4651_v30 }
 0x54c   : > { %6290 = vrot.lane.b32.xlu1 %v16004_v11, %s11008_s14  ;;  %10272 = vmatpush1.bf16.msra.mxu1 %v10271_v46  ;;  %v5208_v46 = vld [vmem:[#allocation6 + $0x290] sm:$0xff]  ;;  %v16109_v26 = vpack.c.bf16 %v4981_v22, %v4721_v10  ;;  %v5789_v56 = vsel %vm1550_vm5, %v15886_v63, %v15888_v58  ;;  %v5500_v8 = vmul.f32 %v5468_v35, %v5431_v19 }
 0x54d   : > { %10274 = vmatprep.subr.bf16.mxu1 %v10273_v59  ;;  %10306 = vmatprep.subr.bf16.mxu0 %v15941_v2  ;;  %v5501_v59 = vmul.f32 %v5469_v14, %v5430_v41  ;;  %v10315_v28 = vpack.c.bf16 %v4720_v20, %v16011_v3  ;;  %v5240_v33 = vmul.f32 %v5208_v46, %v5171_v36  ;;  %v6088_v14 = vld [vmem:[#allocation6 + $0x690] sm:$0xff] }
 0x54e   : > { %v16126_v45 = vpack.c.bf16 %v4980_v16, %v4720_v20  ;;  %v6050_v41 = vsel %vm1811_vm6, %v15662_v17, %v15924_v49  ;;  %v17618_v20 = vld [vmem:[#allocation57_spill] sm:$0xff]  ;;  %v6348_v36 = vld [vmem:[#allocation6 + $0x790] sm:$0xff] }
 0x54f   : > { %6548 = vrot.lane.b32.xlu0 %v15868_v61, %s11009_s11  ;;  %10308 = vmatpush1.bf16.msra.mxu0 %v15956_v54  ;;  %v16081_v2 = vpop.permute.xlu0 %5394  ;;  %v16083_v47 = vpop.permute.xlu1 %5396  ;;  %v10279_v54 = vpack.c.bf16 %v16011_v3, %v15958_v50  ;;  %v5829_v50 = vld [vmem:[#allocation6 + $0x598] sm:$0xff] }
 0x550   : > { %6550 = vrot.lane.b32.xlu1 %v16004_v11, %s11009_s11  ;;  %10276 = vmatpush1.bf16.msra.mxu1 %v10275_v37  ;;  %v5861_v10 = vmul.f32 %v5829_v50, %v5789_v56  ;;  %v5828_v37 = vld [vmem:[#allocation6 + $0x590] sm:$0xff]  ;;  %v17620_v50 = vld [vmem:[#allocation35_spill] sm:$0xff] }
 0x551   : > { %10278 = vmatprep.subr.bf16.mxu1 %v10277_v52  ;;  %10310 = vmatprep.subr.bf16.mxu0 %v15969_v27  ;;  %v5241_v27 = vmul.f32 %v5209_v4, %v5170_v51  ;;  %v6049_v52 = vsel %vm1811_vm6, %v15924_v49, %v15926_v1  ;;  %v6349_v4 = vld [vmem:[#allocation6 + $0x798] sm:$0xff]  ;;  %v4538_v56 = vadd.f32 %v17620_v50, %v13879_v24  ;;  %v4690_v50 = vld [vmem:[#allocation6 + $0xa0] sm:$0xff] }
 0x552   : > { %v6121_v46 = vmul.f32 %v6089_v43, %v6049_v52  ;;  %v6609_v49 = vld [vmem:[#allocation6 + $0x898] sm:$0xff] }
 0x553   : > { %4630 = vrot.lane.b32.xlu0 %v16004_v11, %s11003_s29  ;;  %10312 = vmatpush1.bf16.msra.mxu0 %v15986_v34  ;;  %v16118_v0 = vpop.permute.xlu0 %5756  ;;  %v16120_v60 = vpop.permute.xlu1 %5758  ;;  %v5790_v34 = vsel %vm1550_vm5, %v15636_v13, %v15886_v63  ;;  %v16134_v15 = vpack.c.bf16 %v5501_v59, %v5241_v27  ;;  %v10317_v3 = vpack.c.bf16 %v5241_v27, %v4981_v22 }
 0x554   : > { %4632 = vrot.lane.b32.xlu1 %v16095_v18, %s11003_s29  ;;  %10280 = vmatpush1.bf16.msra.mxu1 %v10279_v54  ;;  %v6309_v13 = vsel %vm2072_vm7, %v15960_v5, %v15962_v55  ;;  %v10319_v63 = vpack.c.bf16 %v5240_v33, %v4980_v16  ;;  %v16151_v22 = vpack.c.bf16 %v5500_v8, %v5240_v33 }
 0x555   : > { %10282 = vmatprep.subr.bf16.mxu1 %v16109_v26  ;;  %10314 = vmatprep.subr.bf16.mxu0 %v10313_v40  ;;  %v5860_v51 = vmul.f32 %v5828_v37, %v5790_v34  ;;  %v16159_v54 = vpack.c.bf16 %v5861_v10, %v17618_v20  ;;  %v10321_v40 = vpack.c.bf16 %v17618_v20, %v5501_v59  ;;  %v6608_v37 = vld [vmem:[#allocation6 + $0x890] sm:$0xff] }
 0x556   : > { %v6310_v16 = vsel %vm2072_vm7, %v15696_v29, %v15960_v5  ;;  %v6381_v35 = vmul.f32 %v6349_v4, %v6309_v13  ;;  %v6569_v27 = vsel %vm2333_vm8, %v15990_v32, %v15992_v57  ;;  %v17619_v29 = vld [vmem:[#allocation58_spill] sm:$0xff]  ;;  %v6120_v59 = vmul.f32 %v6088_v14, %v6050_v41  ;;  %v4951_v4 = vld [vmem:[#allocation6 + $0x1a8] sm:$0xff] }
 0x557   : > { %4890 = vrot.lane.b32.xlu0 %v16004_v11, %s11002_s27  ;;  %10316 = vmatpush1.bf16.msra.mxu0 %v10315_v28  ;;  %v16136_v30 = vpop.permute.xlu0 %6016  ;;  %v16138_v31 = vpop.permute.xlu1 %6018  ;;  %v10323_v5 = vpack.c.bf16 %v17619_v29, %v5500_v8  ;;  %v16184_v28 = vpack.c.bf16 %v5860_v51, %v17619_v29  ;;  %v6380_v33 = vmul.f32 %v6348_v36, %v6310_v16  ;;  %v4691_v41 = vld [vmem:[#allocation6 + $0xa8] sm:$0xff] }
 0x558   : > { %4892 = vrot.lane.b32.xlu1 %v16095_v18, %s11002_s27  ;;  %10284 = vmatpush1.bf16.msra.mxu1 %v16126_v45  ;;  %v6570_v34 = vsel %vm2333_vm8, %v15722_v38, %v15990_v32  ;;  %v16194_v8 = vpack.c.bf16 %v6381_v35, %v6121_v46  ;;  %v10325_v43 = vpack.c.bf16 %v6121_v46, %v5861_v10 }
 0x559   : > { %10286 = vmatprep.subr.bf16.mxu1 %v16134_v15  ;;  %10318 = vmatprep.subr.bf16.mxu0 %v10317_v3  ;;  %v16190_v3 = vmul.f32 %v6609_v49, %v6569_v27  ;;  %v4908_v13 = vsel %vm667_vm2, %v16031_v7, %v16033_v44  ;;  %v10327_v38 = vpack.c.bf16 %v6120_v59, %v5860_v51  ;;  %v4950_v49 = vld [vmem:[#allocation6 + $0x1a0] sm:$0xff] }
 0x55a   : > { %v16207_v32 = vmul.f32 %v6608_v37, %v6570_v34  ;;  %v16214_v14 = vpack.c.bf16 %v6380_v33, %v6120_v59  ;;  %v4648_v20 = vsel %vm406_vm1, %v16015_v42, %v16017_v21  ;;  %v16222_v51 = vmul.f32 %v4951_v4, %v4908_v13 }
 0x55b   : > { %5150 = vrot.lane.b32.xlu0 %v16004_v11, %s11004_s16  ;;  %10320 = vmatpush1.bf16.msra.mxu0 %v10319_v63  ;;  %v16168_v19 = vpop.permute.xlu0 %6276  ;;  %v16170_v17 = vpop.permute.xlu1 %6278  ;;  %v16212_v63 = vmax.f32 %v4538_v56, 0.0  ;;  %v10329_v46 = vpack.c.bf16 %v16190_v3, %v6381_v35  ;;  %v4909_v27 = vsel %vm667_vm2, %v15782_v39, %v16031_v7  ;;  %v5471_v35 = vld [vmem:[#allocation6 + $0x3a8] sm:$0xff]  ;;  %v5428_v59 = vsel %vm1189_vm4, %v16081_v2, %v16083_v47 }
 0x55c   : > { %5152 = vrot.lane.b32.xlu1 %v16095_v18, %s11004_s16  ;;  %10288 = vmatpush1.bf16.msra.mxu1 %v16151_v22  ;;  %v10331_v29 = vpack.c.bf16 %v16207_v32, %v6380_v33  ;;  %v4649_v39 = vsel %vm406_vm1, %v15752_v6, %v16015_v42  ;;  %v16250_v7 = vmul.f32 %v4950_v49, %v4909_v27  ;;  %v5211_v56 = vld [vmem:[#allocation6 + $0x2a8] sm:$0xff]  ;;  %v5470_v6 = vld [vmem:[#allocation6 + $0x3a0] sm:$0xff] }
 0x55d   : > { %10290 = vmatprep.subr.bf16.mxu1 %v16159_v54  ;;  %10322 = vmatprep.subr.bf16.mxu0 %v10321_v40  ;;  %v5168_v33 = vsel %vm928_vm3, %v16057_v53, %v16059_v62  ;;  %v5429_v42 = vsel %vm1189_vm4, %v15848_v48, %v16081_v2  ;;  %v16270_v4 = vmul.f32 %v5471_v35, %v5428_v59  ;;  %v5210_v48 = vld [vmem:[#allocation6 + $0x2a0] sm:$0xff]  ;;  %v6351_v35 = vld [vmem:[#allocation6 + $0x7a8] sm:$0xff] }
 0x55e   : > { %v16275_v13 = vmul.f32 %v4690_v50, %v4649_v39  ;;  %v5169_v2 = vsel %vm928_vm3, %v15810_v25, %v16057_v53  ;;  %v5830_v53 = vld [vmem:[#allocation6 + $0x5a0] sm:$0xff]  ;;  %v6307_v59 = vsel %vm2072_vm7, %v16168_v19, %v16170_v17  ;;  %v6047_v50 = vsel %vm1811_vm6, %v16136_v30, %v16138_v31 }
 0x55f   : > { %5410 = vrot.lane.b32.xlu0 %v16004_v11, %s11005_s19  ;;  %10324 = vmatpush1.bf16.msra.mxu0 %v10323_v5  ;;  %v16196_v24 = vpop.permute.xlu0 %6536  ;;  %v16198_v52 = vpop.permute.xlu1 %6538  ;;  %v16239_v5 = vmul.f32 %v4691_v41, %v4648_v20  ;;  %v5787_v41 = vsel %vm1550_vm5, %v16118_v0, %v16120_v60  ;;  %v16287_v20 = vmul.f32 %v5211_v56, %v5168_v33  ;;  %v6350_v56 = vld [vmem:[#allocation6 + $0x7a0] sm:$0xff] }
 0x560   : > { %5412 = vrot.lane.b32.xlu1 %v16095_v18, %s11005_s19  ;;  %10292 = vmatpush1.bf16.msra.mxu1 %v16184_v28  ;;  %v6308_v33 = vsel %vm2072_vm7, %v15962_v55, %v16168_v19  ;;  %v6048_v55 = vsel %vm1811_vm6, %v15926_v1, %v16136_v30 }
 0x561   : > { %10294 = vmatprep.subr.bf16.mxu1 %v16194_v8  ;;  %10326 = vmatprep.subr.bf16.mxu0 %v10325_v43  ;;  %v16210_v10 = vpop.f32.mrb[16].mxu1  ;;  %v16260_v37 = vpack.c.bf16 %v16222_v51, %v16239_v5 }
 0x562   : > { %v16220_v40 = vpop.f32.mrb[17].mxu1 }
 0x563   : > { %5772 = vrot.lane.b32.xlu0 %v16095_v18, %s11006_s20  ;;  %10328 = vmatpush1.bf16.msra.mxu0 %v10327_v38  ;;  %v16227_v36 = vpop.permute.xlu0 %4618  ;;  %v16229_v16 = vpop.permute.xlu1 %4620  ;;  %v5831_v38 = vld [vmem:[#allocation6 + $0x5a8] sm:$0xff] }
 0x564   : > { %5774 = vrot.lane.b32.xlu1 %v16212_v63, %s11006_s20  ;;  %10296 = vmatpush1.bf16.msra.mxu1 %v16214_v14  ;;  %v16309_v27 = vmul.f32 %v5831_v38, %v5787_v41  ;;  %v6090_v41 = vld [vmem:[#allocation6 + $0x6a0] sm:$0xff] }
 0x565   : > { %8249 = vmatprep.subr.mxu1 %v16190_v3  ;;  %10330 = vmatprep.subr.bf16.mxu0 %v10329_v46  ;;  %v16294_v46 = vpack.c.bf16 %v16250_v7, %v16275_v13 }
 0x567   : > { %6032 = vrot.lane.b32.xlu0 %v16095_v18, %s11007_s10  ;;  %10332 = vmatpush1.bf16.msra.mxu0 %v10331_v29  ;;  %v16262_v34 = vpop.permute.xlu0 %4878  ;;  %v16264_v43 = vpop.permute.xlu1 %4880  ;;  %v16318_v29 = vmul.f32 %v5210_v48, %v5169_v2  ;;  %v16368_v2 = vmul.f32 %v6350_v56, %v6308_v33  ;;  %v6610_v33 = vld [vmem:[#allocation6 + $0x8a0] sm:$0xff] }
 0x568   : > { %6034 = vrot.lane.b32.xlu1 %v16212_v63, %s11007_s10  ;;  %8250 = vmatpush1.msra.mxu1 %v16207_v32 }
 0x569   : > { %8262 = vmatmul.mubr.f32.vlgmr.msra.gmra.mrb[24].mxu1 %v15481_v23  ;;  %10334 = vmatprep.subr.bf16.mxu0 %v16260_v37  ;;  %v16296_v23 = vmul.f32 %v5470_v6, %v5429_v42  ;;  %v16345_v6 = vmul.f32 %v6351_v35, %v6307_v59  ;;  %v17621_v42 = vld [vmem:[#allocation66_spill] sm:$0xff]  ;;  %v6611_v35 = vld [vmem:[#allocation6 + $0x8a8] sm:$0xff]  ;;  %v10365_v59 = vpack.c.bf16 %v16239_v5, %v16190_v3 }
 0x56a   : > { %10350 = vmatprep.subr.bf16.mxu1 %v16109_v26  ;;  %9016 = vmatprep.mubr.msk.f32.mxu1 %vm3402_vm0, %v16044_v9  ;;  %v5788_v26 = vsel %vm1550_vm5, %v15888_v58, %v16118_v0 }
 0x56b   : > { %10352 = vmatpush1.bf16.msra.mxu1 %v16126_v45  ;;  %6292 = vrot.lane.b32.xlu0 %v16095_v18, %s11008_s14  ;;  %v16301_v49 = vpop.permute.xlu0 %5138  ;;  %v16303_v25 = vpop.permute.xlu1 %5140  ;;  %v16316_v45 = vpack.c.bf16 %v16270_v4, %v16287_v20  ;;  %v16328_v58 = vpack.c.bf16 %v16296_v23, %v16318_v29  ;;  %v16330_v0 = vmul.f32 %v5830_v53, %v5788_v26 }
 0x56c   : > { %10354 = vmatprep.subr.bf16.mxu1 %v16134_v15  ;;  %6294 = vrot.lane.b32.xlu1 %v16212_v63, %s11008_s14  ;;  %v6091_v15 = vld [vmem:[#allocation6 + $0x6a8] sm:$0xff]  ;;  %v16384_v26 = vmul.f32 %v6090_v41, %v6048_v55  ;;  %v6568_v41 = vsel %vm2333_vm8, %v15992_v57, %v16196_v24  ;;  %v10369_v55 = vpack.c.bf16 %v16287_v20, %v16222_v51  ;;  %v16436_v51 = vld [vmem:[#allocation9] sm:$0xff] }
 0x56d   : > { %10336 = vmatpush1.bf16.msra.mxu0 %v16294_v46  ;;  %v16361_v19 = vmul.f32 %v6091_v15, %v6047_v50  ;;  %v17624_v57 = vld [vmem:[#allocation37_spill] sm:$0xff]  ;;  %v10373_v20 = vpack.c.bf16 %v17621_v42, %v16270_v4  ;;  %v4646_v4 = vsel %vm406_vm1, %v16227_v36, %v16229_v16 }
 0x56e   : > { %10338 = vmatprep.subr.bf16.mxu0 %v16316_v45  ;;  %v16400_v50 = vpack.c.bf16 %v16368_v2, %v16384_v26 }
 0x56f   : > { %10356 = vmatpush1.bf16.msra.mxu1 %v16151_v22  ;;  %6552 = vrot.lane.b32.xlu0 %v16095_v18, %s11009_s11  ;;  %v16339_v39 = vpop.permute.xlu0 %5398  ;;  %v16352_v22 = vpack.c.bf16 %v16309_v27, %v17621_v42  ;;  %v16380_v1 = vpack.c.bf16 %v16345_v6, %v16361_v19  ;;  %v4906_v42 = vsel %vm667_vm2, %v16262_v34, %v16264_v43 }
 0x570   : > { %10358 = vmatprep.subr.bf16.mxu1 %v16159_v54  ;;  %6554 = vrot.lane.b32.xlu1 %v16212_v63, %s11009_s11  ;;  %v16354_v38 = vpop.permute.xlu1 %5400  ;;  %v17622_v54 = vld [vmem:[#allocation20_spill] sm:$0xff] }
 0x571   : > { %10340 = vmatpush1.bf16.msra.mxu0 %v16328_v58  ;;  %v16366_v48 = vpack.c.bf16 %v16330_v0, %v17622_v54 }
 0x572   : > { %10342 = vmatprep.subr.bf16.mxu0 %v16352_v22 }
 0x573   : > { %10360 = vmatpush1.bf16.msra.mxu1 %v16184_v28  ;;  %4634 = vrot.lane.b32.xlu0 %v16212_v63, %s11003_s29  ;;  %v16373_v53 = vpop.permute.xlu0 %5760  ;;  %v6567_v28 = vsel %vm2333_vm8, %v16196_v24, %v16198_v52 }
 0x574   : > { %10362 = vmatprep.subr.bf16.mxu1 %v16194_v8  ;;  %4894 = vrot.lane.b32.xlu1 %v16212_v63, %s11002_s27  ;;  %v16382_v30 = vpop.permute.xlu1 %5762  ;;  %v16411_v3 = vmul.f32 %v6611_v35, %v6567_v28  ;;  %s17184_s27 = scalar_lea.vmem [#allocation11], %s8985_s8  ;;  %s9028_s8 = sshll.u32 %s11069_s25, 12 }
 0x575   : > { %10344 = vmatpush1.bf16.msra.mxu0 %v16366_v48  ;;  %v16391_v8 = vpop.f32.mrb[16].mxu0  ;;  %s8876_s29 = sshll.u32 %s17184_s27, 4  ;;  %s8862_s25 = scalar_lea.sflag [#allocation5], %s11238_s26  ;;  %s17262_s29 = int_to_ptr.vmem [resolvable:$true] %s8876_s29 }
 0x576   : > { %10346 = vmatprep.subr.bf16.mxu0 %v16380_v1  ;;  %v16396_v15 = vpop.f32.mrb[17].mxu0 }
 0x577   : > { %17623 = vst [vmem:[#allocation50_spill] sm:$0xff] %v16396_v15  ;;  %10364 = vmatpush1.bf16.msra.mxu1 %v16214_v14  ;;  %5154 = vrot.lane.b32.xlu0 %v16212_v63, %s11004_s16  ;;  %v16405_v56 = vpop.permute.xlu0 %6020  ;;  %v10367_v14 = vpack.c.bf16 %v16275_v13, %v16207_v32  ;;  %v16423_v15 = vmul.f32 %v6610_v33, %v6568_v41  ;;  %v4952_v41 = vld [vmem:[#allocation6 + $0x1b0] sm:$0xff] }
 0x578   : > { %10366 = vmatprep.subr.bf16.mxu1 %v10365_v59  ;;  %5414 = vrot.lane.b32.xlu1 %v16212_v63, %s11005_s19  ;;  %v16415_v5 = vpop.permute.xlu1 %6022  ;;  %v10371_v13 = vpack.c.bf16 %v16318_v29, %v16250_v7  ;;  %v10375_v29 = vpack.c.bf16 %v17622_v54, %v16296_v23  ;;  %v4953_v23 = vld [vmem:[#allocation6 + $0x1b8] sm:$0xff]  ;;  %v4692_v59 = vld [vmem:[#allocation6 + $0xb0] sm:$0xff]  ;;  %v4647_v33 = vsel %vm406_vm1, %v16017_v21, %v16227_v36 }
 0x579   : > { %10348 = vmatpush1.bf16.msra.mxu0 %v16400_v50  ;;  %v5426_v21 = vsel %vm1189_vm4, %v16339_v39, %v16354_v38  ;;  %v10383_v36 = vpack.c.bf16 %v16423_v15, %v16368_v2  ;;  %v5427_v2 = vsel %vm1189_vm4, %v16083_v47, %v16339_v39 }
 0x57a   : > { %8320 = vmatprep.subr.mxu0 %v16411_v3 }
 0x57b   : > { %10368 = vmatpush1.bf16.msra.mxu1 %v10367_v14  ;;  %5776 = vrot.lane.b32.xlu0 %v17624_v57, %s11006_s20  ;;  %v16427_v24 = vpop.permute.xlu0 %6280  ;;  %v5166_v14 = vsel %vm928_vm3, %v16301_v49, %v16303_v25  ;;  %s17260_s20 = scalar_lea.hbm %s17313_s6, %s9028_s8 }
 0x57c   : > { %10370 = vmatprep.subr.bf16.mxu1 %v10369_v55  ;;  %6036 = vrot.lane.b32.xlu1 %v17624_v57, %s11007_s10  ;;  %v16431_v32 = vpop.permute.xlu1 %6282  ;;  %v5473_v55 = vld [vmem:[#allocation6 + $0x3b8] sm:$0xff]  ;;  %s11012_s10 = smov [#allocation11]  }
 0x57d   : > { %8321 = vmatpush1.msra.mxu0 %v16423_v15 }
 0x57e   : > { %8333 = vmatmul.mubr.f32.vlgmr.msra.gmra.mrb[24].mxu0 %v16436_v51  ;;  %10402 = vmatprep.subr.bf16.mxu0 %v16260_v37  ;;  %v4693_v37 = vld [vmem:[#allocation6 + $0xb8] sm:$0xff] }
 0x57f   : > { %10372 = vmatpush1.bf16.msra.mxu1 %v10371_v13  ;;  %10404 = vmatpush1.bf16.msra.mxu0 %v16294_v46  ;;  %v16443_v35 = vpop.permute.xlu0 %6540  ;;  %v10377_v46 = vpack.c.bf16 %v16361_v19, %v16309_v27  ;;  %v10379_v27 = vpack.c.bf16 %v16384_v26, %v16330_v0  ;;  %v4725_v19 = vmul.f32 %v4693_v37, %v4646_v4  ;;  %v5213_v26 = vld [vmem:[#allocation6 + $0x2b8] sm:$0xff]  ;;  %v5212_v13 = vld [vmem:[#allocation6 + $0x2b0] sm:$0xff] }
 0x580   : > { %10374 = vmatprep.subr.bf16.mxu1 %v10373_v20  ;;  %10406 = vmatprep.subr.bf16.mxu0 %v16316_v45  ;;  %v16446_v7 = vpop.permute.xlu1 %6542  ;;  %v7620_v45 = vld [vmem:[%s17312_s5] sm:$0xff]  ;;  %v10381_v0 = vpack.c.bf16 %v16411_v3, %v16345_v6  ;;  %v5167_v20 = vsel %vm928_vm3, %v16059_v62, %v16301_v49  ;;  %v5245_v37 = vmul.f32 %v5213_v26, %v5166_v14  ;;  %v5472_v4 = vld [vmem:[#allocation6 + $0x3b0] sm:$0xff] }
 0x581   : > { %6296 = vrot.lane.b32.xlu0 %v17624_v57, %s11008_s14  ;;  %6556 = vrot.lane.b32.xlu1 %v17624_v57, %s11009_s11  ;;  %v5785_v62 = vsel %vm1550_vm5, %v16373_v53, %v16382_v30  ;;  %v6046_v14 = vsel %vm1811_vm6, %v16138_v31, %v16405_v56  ;;  %v6565_v31 = vsel %vm2333_vm8, %v16443_v35, %v16446_v7  ;;  %s10923_s14 = sshll.u32 %s11012_s10, 4  ;;  %s10924_s14 = int_to_ptr.vmem [resolvable:$false] %s10923_s14 }
 0x582   : > { %9017 = vmatprep.mubr.msk.f32.mxu0 %vm3402_vm0, %v16044_v9  ;;  %s10925_s11 = scalar_lea.vmem %s10924_s14, 8192  ;;  %p10926_p12 = scmp.lt.s32.totalorder %s17262_s29, %s10924_s14 }
 0x583   : > { %10376 = vmatpush1.bf16.msra.mxu1 %v10375_v29  ;;  %10408 = vmatpush1.bf16.msra.mxu0 %v16328_v58  ;;  %v16470_v54 = vpop.permute.xlu0 %4622  ;;  %v4907_v58 = vsel %vm667_vm2, %v16033_v44, %v16262_v34  ;;  %v4724_v34 = vmul.f32 %v4692_v59, %v4647_v33 }
 0x584   : > { %10378 = vmatprep.subr.bf16.mxu1 %v10377_v46  ;;  %10410 = vmatprep.subr.bf16.mxu0 %v16352_v22  ;;  %v4985_v22 = vmul.f32 %v4953_v23, %v4906_v42  ;;  %v4984_v6 = vmul.f32 %v4952_v41, %v4907_v58  ;;  %v5504_v23 = vmul.f32 %v5472_v4, %v5427_v2  ;;  %v6093_v41 = vld [vmem:[#allocation6 + $0x6b8] sm:$0xff]  ;;  %v17626_v2 = vld [vmem:[#allocation24_spill] sm:$0xff] }
 0x585   : > { %7623 = vperm.xlu0 %10735, %v7620_v45   ;;  %v16475_v28 = vpop.permute.xlu1 %4624  ;;  %v5833_v45 = vld [vmem:[#allocation6 + $0x5b8] sm:$0xff]  ;;  %v10419_v47 = vpack.c.bf16 %v4724_v34, %v16423_v15  ;;  %v6045_v15 = vsel %vm1811_vm6, %v16405_v56, %v16415_v5 }
 0x586   : > { %v16512_v46 = vpack.c.bf16 %v4985_v22, %v4725_v19  ;;  %v16523_v39 = vpack.c.bf16 %v4984_v6, %v4724_v34  ;;  %v10421_v33 = vpack.c.bf16 %v5245_v37, %v4985_v22  ;;  %v6353_v58 = vld [vmem:[#allocation6 + $0x7b8] sm:$0xff]  ;;  %v6092_v34 = vld [vmem:[#allocation6 + $0x6b0] sm:$0xff] }
 0x587   : > { %10380 = vmatpush1.bf16.msra.mxu1 %v10379_v27  ;;  %10412 = vmatpush1.bf16.msra.mxu0 %v16366_v48  ;;  %v16496_v44 = vpop.permute.xlu0 %4882  ;;  %v10417_v48 = vpack.c.bf16 %v4725_v19, %v16411_v3  ;;  %v5244_v3 = vmul.f32 %v5212_v13, %v5167_v20  ;;  %v5832_v27 = vld [vmem:[#allocation6 + $0x5b0] sm:$0xff]  ;;  %v5786_v19 = vsel %vm1550_vm5, %v16120_v60, %v16373_v53  ;;  %v6613_v4 = vld [vmem:[#allocation6 + $0x8b8] sm:$0xff] }
 0x588   : > { %10382 = vmatprep.subr.bf16.mxu1 %v10381_v0  ;;  %10414 = vmatprep.subr.bf16.mxu0 %v16380_v1  ;;  %v5505_v1 = vmul.f32 %v5473_v55, %v5426_v21  ;;  %v6305_v0 = vsel %vm2072_vm7, %v16427_v24, %v16431_v32  ;;  %v5864_v26 = vmul.f32 %v5832_v27, %v5786_v19  ;;  %v17625_v21 = vld [vmem:[#allocation23_spill] sm:$0xff]  ;;  %v6352_v20 = vld [vmem:[#allocation6 + $0x7b0] sm:$0xff] }
 0x589   : > { %v16505_v29 = vpop.permute.xlu1 %4884  ;;  %v10423_v53 = vpack.c.bf16 %v5244_v3, %v4984_v6  ;;  %v16545_v22 = vpack.c.bf16 %v5504_v23, %v5244_v3  ;;  %v6125_v13 = vmul.f32 %v6093_v41, %v6045_v15  ;;  %v6306_v6 = vsel %vm2072_vm7, %v16170_v17, %v16427_v24  ;;  %v6612_v3 = vld [vmem:[#allocation6 + $0x8b0] sm:$0xff]  ;;  %v4955_v41 = vld [vmem:[#allocation6 + $0x1c8] sm:$0xff] }
 0x58a   : > { %v16531_v59 = vpack.c.bf16 %v5505_v1, %v5245_v37  ;;  %v10427_v17 = vpack.c.bf16 %v17626_v2, %v5504_v23  ;;  %v16571_v24 = vpack.c.bf16 %v5864_v26, %v17626_v2  ;;  %v16579_v27 = vmul.f32 %v6613_v4, %v6565_v31  ;;  %v4694_v31 = vld [vmem:[#allocation6 + $0xc0] sm:$0xff] }
 0x58b   : > { %10384 = vmatpush1.bf16.msra.mxu1 %v10383_v36  ;;  %10416 = vmatpush1.bf16.msra.mxu0 %v16400_v50  ;;  %v16519_v49 = vpop.permute.xlu0 %5142  ;;  %v5865_v50 = vmul.f32 %v5833_v45, %v5785_v62  ;;  %v10425_v36 = vpack.c.bf16 %v17625_v21, %v5505_v1  ;;  %v6124_v1 = vmul.f32 %v6092_v34, %v6046_v14 }
 0x58c   : > { %10386 = vmatprep.subr.bf16.mxu1 %v16512_v46  ;;  %10418 = vmatprep.subr.bf16.mxu0 %v10417_v48  ;;  %v6385_v48 = vmul.f32 %v6353_v58, %v6305_v0  ;;  %v6384_v45 = vmul.f32 %v6352_v20, %v6306_v6  ;;  %v4904_v23 = vsel %vm667_vm2, %v16496_v44, %v16505_v29  ;;  %v5475_v20 = vld [vmem:[#allocation6 + $0x3c8] sm:$0xff] }
 0x58d   : > { %v16525_v42 = vpop.permute.xlu1 %5144  ;;  %v16559_v37 = vpack.c.bf16 %v5865_v50, %v17625_v21  ;;  %v4644_v0 = vsel %vm406_vm1, %v16470_v54, %v16475_v28  ;;  %v4954_v21 = vld [vmem:[#allocation6 + $0x1c0] sm:$0xff] }
 0x58e   : > { %v16581_v19 = vpack.c.bf16 %v6385_v48, %v6125_v13  ;;  %v10433_v34 = vpack.c.bf16 %v16579_v27, %v6385_v48 }
 0x58f   : > { %10388 = vmatpush1.bf16.msra.mxu1 %v16523_v39  ;;  %10420 = vmatpush1.bf16.msra.mxu0 %v10419_v47  ;;  %v16542_v60 = vpop.permute.xlu0 %5402  ;;  %v6566_v47 = vsel %vm2333_vm8, %v16198_v52, %v16443_v35  ;;  %v10431_v52 = vpack.c.bf16 %v6124_v1, %v5864_v26  ;;  %v16591_v35 = vpack.c.bf16 %v6384_v45, %v6124_v1 }
 0x590   : > { %10390 = vmatprep.subr.bf16.mxu1 %v16531_v59  ;;  %10422 = vmatprep.subr.bf16.mxu0 %v10421_v33  ;;  %v10429_v33 = vpack.c.bf16 %v6125_v13, %v5865_v50  ;;  %v16593_v58 = vmul.f32 %v6612_v3, %v6566_v47  ;;  %v4695_v50 = vld [vmem:[#allocation6 + $0xc8] sm:$0xff]  ;;  %v4905_v26 = vsel %vm667_vm2, %v16264_v43, %v16496_v44  ;;  %v5474_v47 = vld [vmem:[#allocation6 + $0x3c0] sm:$0xff] }
 0x591   : > { %v16551_v55 = vpop.permute.xlu1 %5404  ;;  %v4645_v43 = vsel %vm406_vm1, %v16229_v16, %v16470_v54  ;;  %v16621_v44 = vmul.f32 %v4695_v50, %v4644_v0  ;;  %v16625_v2 = vmul.f32 %v4954_v21, %v4905_v26  ;;  %v5164_v1 = vsel %vm928_vm3, %v16519_v49, %v16525_v42  ;;  %v5214_v50 = vld [vmem:[#allocation6 + $0x2c0] sm:$0xff] }
 0x592   : > { %v5424_v6 = vsel %vm1189_vm4, %v16542_v60, %v16551_v55  ;;  %v10435_v48 = vpack.c.bf16 %v16593_v58, %v6384_v45  ;;  %v5425_v16 = vsel %vm1189_vm4, %v16354_v38, %v16542_v60  ;;  %v5165_v38 = vsel %vm928_vm3, %v16303_v25, %v16519_v49  ;;  %v5834_v25 = vld [vmem:[#allocation6 + $0x5c0] sm:$0xff] }
 0x593   : > { %10392 = vmatpush1.bf16.msra.mxu1 %v16545_v22  ;;  %10424 = vmatpush1.bf16.msra.mxu0 %v10423_v53  ;;  %v16566_v56 = vpop.permute.xlu0 %5764  ;;  %v16637_v54 = vmul.f32 %v5475_v20, %v5424_v6  ;;  %v16662_v21 = vmul.f32 %v5474_v47, %v5425_v16  ;;  %v6355_v6 = vld [vmem:[#allocation6 + $0x7c8] sm:$0xff]  ;;  %v17627_v16 = vld [vmem:[#allocation48_spill] sm:$0xff] }
 0x594   : > { %10394 = vmatprep.subr.bf16.mxu1 %v16559_v37  ;;  %10426 = vmatprep.subr.bf16.mxu0 %v10425_v36  ;;  %v16607_v36 = vmul.f32 %v4955_v41, %v4904_v23  ;;  %v5835_v41 = vld [vmem:[#allocation6 + $0x5c8] sm:$0xff]  ;;  %v5784_v49 = vsel %vm1550_vm5, %v16382_v30, %v16566_v56 }
 0x595   : > { %v16573_v62 = vpop.permute.xlu1 %5766 }
 0x596   : > { %v16641_v45 = vpack.c.bf16 %v16607_v36, %v16621_v44  ;;  %v5783_v23 = vsel %vm1550_vm5, %v16566_v56, %v16573_v62  ;;  %v16694_v56 = vmul.f32 %v5834_v25, %v5784_v49 }
 0x597   : > { %10396 = vmatpush1.bf16.msra.mxu1 %v16571_v24  ;;  %10428 = vmatpush1.bf16.msra.mxu0 %v10427_v17  ;;  %v16588_v15 = vpop.permute.xlu0 %6024  ;;  %v5215_v17 = vld [vmem:[#allocation6 + $0x2c8] sm:$0xff] }
 0x598   : > { %10398 = vmatprep.subr.bf16.mxu1 %v16581_v19  ;;  %10430 = vmatprep.subr.bf16.mxu0 %v10429_v33  ;;  %v16643_v33 = vmul.f32 %v4694_v31, %v4645_v43  ;;  %v16654_v60 = vmul.f32 %v5215_v17, %v5164_v1  ;;  %v6095_v43 = vld [vmem:[#allocation6 + $0x6c8] sm:$0xff]  ;;  %v6354_v17 = vld [vmem:[#allocation6 + $0x7c0] sm:$0xff] }
 0x599   : > { %v16599_v53 = vpop.permute.xlu1 %6026  ;;  %v16601_v14 = vpop.f32.mrb[18].mxu1 }
 0x59a   : > { %v16610_v13 = vpop.f32.mrb[19].mxu1  ;;  %v16660_v0 = vpack.c.bf16 %v16625_v2, %v16643_v33  ;;  %v16678_v20 = vpack.c.bf16 %v16637_v54, %v16654_v60 }
 0x59b   : > { %10400 = vmatpush1.bf16.msra.mxu1 %v16591_v35  ;;  %10432 = vmatpush1.bf16.msra.mxu0 %v10431_v52  ;;  %v6285_v4 = vpop.permute.xlu0 %6284 }
 0x59c   : > { %8391 = vmatprep.subr.mxu1 %v16579_v27  ;;  %10434 = vmatprep.subr.bf16.mxu0 %v10433_v34  ;;  %v16673_v34 = vmul.f32 %v5835_v41, %v5783_v23  ;;  %v6094_v23 = vld [vmem:[#allocation6 + $0x6c0] sm:$0xff] }
 0x59d   : > { %v16631_v3 = vpop.permute.xlu1 %6286 }
 0x59e   : > { %v6303_v31 = vsel %vm2072_vm7, %v6285_v4, %v16631_v3  ;;  %v10445_v41 = vpack.c.bf16 %v16673_v34, %v17627_v16 }
 0x59f   : > { %8392 = vmatpush1.msra.mxu1 %v16593_v58  ;;  %10436 = vmatpush1.bf16.msra.mxu0 %v10435_v48  ;;  %v6545_v52 = vpop.permute.xlu0 %6544  ;;  %v6043_v48 = vsel %vm1811_vm6, %v16588_v15, %v16599_v53  ;;  %v16703_v1 = vmul.f32 %v6355_v6, %v6303_v31  ;;  %v6615_v31 = vld [vmem:[#allocation6 + $0x8c8] sm:$0xff] }
 0x5a0   : > { %8404 = vmatmul.mubr.f32.vlgmr.msra.gmra.mrb[26].mxu1 %v16436_v51  ;;  %10438 = vmatprep.subr.bf16.mxu0 %v16641_v45 }
 0x5a1   : > { %10454 = vmatprep.subr.bf16.mxu1 %v16512_v46  ;;  %v16665_v26 = vpop.permute.xlu1 %6546  ;;  %9018 = vmatprep.mubr.msk.f32.mxu1 %vm3402_vm0, %v16044_v9  ;;  %v16680_v46 = vmul.f32 %v5214_v50, %v5165_v38  ;;  %v6044_v50 = vsel %vm1811_vm6, %v16415_v5, %v16588_v15  ;;  %v17628_v38 = vld [vmem:[#allocation44_spill] sm:$0xff] }
 0x5a2   : > { %10456 = vmatpush1.bf16.msra.mxu1 %v16523_v39  ;;  %v16728_v6 = vmul.f32 %v6094_v23, %v6044_v50  ;;  %v6563_v5 = vsel %vm2333_vm8, %v6545_v52, %v16665_v26 }
 0x5a3   : > { %10458 = vmatprep.subr.bf16.mxu1 %v16531_v59  ;;  %10440 = vmatpush1.bf16.msra.mxu0 %v16660_v0  ;;  %v16687_v30 = vpop.permute.xlu0 %4626  ;;  %v16692_v39 = vpack.c.bf16 %v16662_v21, %v16680_v46  ;;  %v6304_v59 = vsel %vm2072_vm7, %v16431_v32, %v6285_v4  ;;  %v6127_v32 = vmul.f32 %v6095_v43, %v6043_v48 }
 0x5a4   : > { %10442 = vmatprep.subr.bf16.mxu0 %v16678_v20  ;;  %v16720_v25 = vmul.f32 %v6354_v17, %v6304_v59  ;;  %v10469_v43 = vpack.c.bf16 %v16621_v44, %v16579_v27  ;;  %v6614_v17 = vld [vmem:[#allocation6 + $0x8c0] sm:$0xff]  ;;  %v16749_v59 = vmul.f32 %v6615_v31, %v6563_v5  ;;  %v10471_v27 = vpack.c.bf16 %v16643_v33, %v16593_v58 }
 0x5a5   : > { %v16726_v49 = vpack.c.bf16 %v16703_v1, %v6127_v32 }
 0x5a6   : > { %10460 = vmatpush1.bf16.msra.mxu1 %v16545_v22  ;;  %v16706_v47 = vpop.permute.xlu1 %4628  ;;  %v16718_v22 = vpack.c.bf16 %v16694_v56, %v17628_v38 }
 0x5a7   : > { %10462 = vmatprep.subr.bf16.mxu1 %v16559_v37  ;;  %10444 = vmatpush1.bf16.msra.mxu0 %v16692_v39 }
 0x5a8   : > { %10446 = vmatprep.subr.bf16.mxu0 %v10445_v41  ;;  %v4887_v4 = vpop.permute.xlu0 %4886 }
 0x5aa   : > { %10464 = vmatpush1.bf16.msra.mxu1 %v16571_v24  ;;  %v16723_v37 = vpop.permute.xlu1 %4888  ;;  %v16740_v24 = vpack.c.bf16 %v16720_v25, %v16728_v6 }
 0x5ab   : > { %10466 = vmatprep.subr.bf16.mxu1 %v16581_v19  ;;  %10448 = vmatpush1.bf16.msra.mxu0 %v16718_v22  ;;  %v6564_v19 = vsel %vm2333_vm8, %v16446_v7, %v6545_v52  ;;  %v10473_v7 = vpack.c.bf16 %v16654_v60, %v16607_v36  ;;  %v10475_v52 = vpack.c.bf16 %v16680_v46, %v16625_v2 }
 0x5ac   : > { %10450 = vmatprep.subr.bf16.mxu0 %v16726_v49  ;;  %v16736_v15 = vpop.permute.xlu0 %5146  ;;  %v10477_v36 = vpack.c.bf16 %v17627_v16, %v16637_v54  ;;  %v10479_v2 = vpack.c.bf16 %v17628_v38, %v16662_v21  ;;  %v4642_v60 = vsel %vm406_vm1, %v16687_v30, %v16706_v47  ;;  %v10481_v54 = vpack.c.bf16 %v6127_v32, %v16673_v34  ;;  %v4696_v16 = vld [vmem:[#allocation6 + $0xd0] sm:$0xff] }
 0x5ad   : > { %v16744_v48 = vpop.f32.mrb[18].mxu0  ;;  %v10483_v46 = vpack.c.bf16 %v16728_v6, %v16694_v56  ;;  %v4643_v34 = vsel %vm406_vm1, %v16475_v28, %v16687_v30  ;;  %v4956_v32 = vld [vmem:[#allocation6 + $0x1d0] sm:$0xff]  ;;  %v4903_v38 = vsel %vm667_vm2, %v16505_v29, %v4887_v4  ;;  %v10485_v56 = vpack.c.bf16 %v16749_v59, %v16703_v1  ;;  %v5477_v28 = vld [vmem:[#allocation6 + $0x3d8] sm:$0xff] }
 0x5ae   : > { %17629 = vst [vmem:[#allocation40_spill] sm:$0xff] %v16744_v48  ;;  %10468 = vmatpush1.bf16.msra.mxu1 %v16591_v35  ;;  %v16752_v23 = vpop.permute.xlu1 %5148  ;;  %v16754_v50 = vpop.f32.mrb[19].mxu0  ;;  %v16760_v48 = vmul.f32 %v6614_v17, %v6564_v19  ;;  %v5216_v17 = vld [vmem:[#allocation6 + $0x2d0] sm:$0xff]  ;;  %v5163_v1 = vsel %vm928_vm3, %v16525_v42, %v16736_v15 }
 0x5af   : > { %10470 = vmatprep.subr.bf16.mxu1 %v10469_v43  ;;  %10452 = vmatpush1.bf16.msra.mxu0 %v16740_v24  ;;  %v5162_v5 = vsel %vm928_vm3, %v16736_v15, %v16752_v23  ;;  %v4728_v43 = vmul.f32 %v4696_v16, %v4643_v34  ;;  %v6357_v34 = vld [vmem:[#allocation6 + $0x7d8] sm:$0xff] }
 0x5b0   : > { %8462 = vmatprep.subr.mxu0 %v16749_v59  ;;  %v5407_v44 = vpop.permute.xlu0 %5406 }
 0x5b2   : > { %10472 = vmatpush1.bf16.msra.mxu1 %v10471_v27  ;;  %v16764_v35 = vpop.permute.xlu1 %5408 }
 0x5b3   : > { %10474 = vmatprep.subr.bf16.mxu1 %v10473_v7  ;;  %8463 = vmatpush1.msra.mxu0 %v16760_v48  ;;  %v5422_v30 = vsel %vm1189_vm4, %v5407_v44, %v16764_v35  ;;  %v5476_v7 = vld [vmem:[#allocation6 + $0x3d0] sm:$0xff] }
 0x5b4   : > { %8475 = vmatmul.mubr.f32.vlgmr.msra.gmra.mrb[26].mxu0 %v16436_v51  ;;  %10506 = vmatprep.subr.bf16.mxu0 %v16641_v45  ;;  %v16771_v58 = vpop.permute.xlu0 %5768  ;;  %v4697_v45 = vld [vmem:[#allocation6 + $0xd8] sm:$0xff] }
 0x5b5   : > { %10508 = vmatpush1.bf16.msra.mxu0 %v16660_v0  ;;  %9019 = vmatprep.mubr.msk.f32.mxu0 %vm3402_vm0, %v16044_v9  ;;  %v4957_v0 = vld [vmem:[#allocation6 + $0x1d8] sm:$0xff] }
 0x5b6   : > { %10476 = vmatpush1.bf16.msra.mxu1 %v10475_v52  ;;  %10510 = vmatprep.subr.bf16.mxu0 %v16678_v20  ;;  %v16779_v33 = vpop.permute.xlu1 %5770  ;;  %v4902_v20 = vsel %vm667_vm2, %v4887_v4, %v16723_v37  ;;  %v10487_v4 = vpack.c.bf16 %v16760_v48, %v16720_v25  ;;  %v5509_v52 = vmul.f32 %v5477_v28, %v5422_v30  ;;  %v6356_v28 = vld [vmem:[#allocation6 + $0x7d0] sm:$0xff] }
 0x5b7   : > { %10478 = vmatprep.subr.bf16.mxu1 %v10477_v36  ;;  %v4989_v31 = vmul.f32 %v4957_v0, %v4902_v20  ;;  %v5781_v42 = vsel %vm1550_vm5, %v16771_v58, %v16779_v33  ;;  %v6097_v20 = vld [vmem:[#allocation6 + $0x6d8] sm:$0xff] }
 0x5b9   : > { %10512 = vmatpush1.bf16.msra.mxu0 %v16692_v39  ;;  %v16789_v9 = vpop.permute.xlu0 %6028  ;;  %v4729_v39 = vmul.f32 %v4697_v45, %v4642_v60  ;;  %v5248_v45 = vmul.f32 %v5216_v17, %v5163_v1  ;;  %v5782_v60 = vsel %vm1550_vm5, %v16573_v62, %v16771_v58 }
 0x5ba   : > { %10480 = vmatpush1.bf16.msra.mxu1 %v10479_v2  ;;  %10514 = vmatprep.subr.bf16.mxu0 %v10445_v41  ;;  %v16794_v21 = vpop.permute.xlu1 %6030  ;;  %v5217_v41 = vld [vmem:[#allocation6 + $0x2d8] sm:$0xff] }
 0x5bb   : > { %10482 = vmatprep.subr.bf16.mxu1 %v10481_v54  ;;  %v5249_v19 = vmul.f32 %v5217_v41, %v5162_v5  ;;  %v10521_v27 = vpack.c.bf16 %v4729_v39, %v16749_v59  ;;  %v16829_v25 = vpack.c.bf16 %v4989_v31, %v4729_v39  ;;  %v5837_v2 = vld [vmem:[#allocation6 + $0x5d8] sm:$0xff]  ;;  %v10523_v59 = vpack.c.bf16 %v4728_v43, %v16760_v48 }
 0x5bc   : > { %v5869_v0 = vmul.f32 %v5837_v2, %v5781_v42  ;;  %v6041_v48 = vsel %vm1811_vm6, %v16789_v9, %v16794_v21  ;;  %v6042_v41 = vsel %vm1811_vm6, %v16599_v53, %v16789_v9  ;;  %v17630_v9 = vld [vmem:[#allocation54_spill] sm:$0xff]  ;;  %v4959_v2 = vld [vmem:[#allocation6 + $0x1e8] sm:$0xff] }
 0x5bd   : > { %10516 = vmatpush1.bf16.msra.mxu0 %v16718_v22  ;;  %v6289_v6 = vpop.permute.xlu0 %6288  ;;  %v4988_v22 = vmul.f32 %v4956_v32, %v4903_v38  ;;  %v10525_v54 = vpack.c.bf16 %v5249_v19, %v4989_v31  ;;  %v6096_v31 = vld [vmem:[#allocation6 + $0x6d0] sm:$0xff]  ;;  %v6129_v5 = vmul.f32 %v6097_v20, %v6041_v48 }
 0x5be   : > { %10484 = vmatpush1.bf16.msra.mxu1 %v10483_v46  ;;  %10518 = vmatprep.subr.bf16.mxu0 %v16726_v49  ;;  %v16816_v29 = vpop.permute.xlu1 %6290  ;;  %v5423_v49 = vsel %vm1189_vm4, %v16551_v55, %v5407_v44  ;;  %v5836_v44 = vld [vmem:[#allocation6 + $0x5d0] sm:$0xff]  ;;  %v16849_v46 = vpack.c.bf16 %v5509_v52, %v5249_v19  ;;  %v6302_v30 = vsel %vm2072_vm7, %v16631_v3, %v6289_v6 }
 0x5bf   : > { %10486 = vmatprep.subr.bf16.mxu1 %v10485_v56  ;;  %v16839_v55 = vpack.c.bf16 %v4988_v22, %v4728_v43  ;;  %v6301_v39 = vsel %vm2072_vm7, %v6289_v6, %v16816_v29  ;;  %v10527_v58 = vpack.c.bf16 %v5248_v45, %v4988_v22  ;;  %v5868_v32 = vmul.f32 %v5836_v44, %v5782_v60  ;;  %v6617_v43 = vld [vmem:[#allocation6 + $0x8d8] sm:$0xff] }
 0x5c0   : > { %v10529_v56 = vpack.c.bf16 %v15868_v61, %v5509_v52  ;;  %v16872_v17 = vpack.c.bf16 %v5869_v0, %v15868_v61  ;;  %v6128_v6 = vmul.f32 %v6096_v31, %v6042_v41  ;;  %v10533_v52 = vpack.c.bf16 %v6129_v5, %v5869_v0  ;;  %v4958_v0 = vld [vmem:[#allocation6 + $0x1e0] sm:$0xff]  ;;  %v5479_v41 = vld [vmem:[#allocation6 + $0x3e8] sm:$0xff] }
 0x5c1   : > { %10520 = vmatpush1.bf16.msra.mxu0 %v16740_v24  ;;  %v6549_v36 = vpop.permute.xlu0 %6548  ;;  %v5508_v24 = vmul.f32 %v5476_v7, %v5423_v49  ;;  %v16879_v3 = vpack.c.bf16 %v5868_v32, %v17630_v9  ;;  %v6616_v7 = vld [vmem:[#allocation6 + $0x8d0] sm:$0xff] }
 0x5c2   : > { %10488 = vmatpush1.bf16.msra.mxu1 %v10487_v4  ;;  %10522 = vmatprep.subr.bf16.mxu0 %v10521_v27  ;;  %v16835_v15 = vpop.permute.xlu1 %6550  ;;  %v6389_v4 = vmul.f32 %v6357_v34, %v6301_v39  ;;  %v6388_v27 = vmul.f32 %v6356_v28, %v6302_v30  ;;  %v6562_v61 = vsel %vm2333_vm8, %v16665_v26, %v6549_v36  ;;  %v4699_v26 = vld [vmem:[#allocation6 + $0xe8] sm:$0xff] }
 0x5c3   : > { %10490 = vmatprep.subr.bf16.mxu1 %v16829_v25  ;;  %v16858_v38 = vpack.c.bf16 %v5508_v24, %v5248_v45  ;;  %v6561_v22 = vsel %vm2333_vm8, %v6549_v36, %v16835_v15  ;;  %v10531_v19 = vpack.c.bf16 %v17630_v9, %v5508_v24  ;;  %v10535_v44 = vpack.c.bf16 %v6128_v6, %v5868_v32 }
 0x5c4   : > { %v16885_v49 = vmul.f32 %v6617_v43, %v6561_v22  ;;  %v16895_v60 = vmul.f32 %v6616_v7, %v6562_v61  ;;  %v5839_v7 = vld [vmem:[#allocation6 + $0x5e8] sm:$0xff]  ;;  %v5218_v61 = vld [vmem:[#allocation6 + $0x2e0] sm:$0xff] }
 0x5c5   : > { %10524 = vmatpush1.bf16.msra.mxu0 %v10523_v59  ;;  %v4631_v16 = vpop.permute.xlu0 %4630  ;;  %v16890_v59 = vpack.c.bf16 %v6389_v4, %v6129_v5 }
 0x5c6   : > { %10492 = vmatpush1.bf16.msra.mxu1 %v16839_v55  ;;  %10526 = vmatprep.subr.bf16.mxu0 %v10525_v54  ;;  %v16855_v62 = vpop.permute.xlu1 %4632  ;;  %v16901_v54 = vpack.c.bf16 %v6388_v27, %v6128_v6  ;;  %v10537_v34 = vpack.c.bf16 %v16885_v49, %v6389_v4  ;;  %v10539_v4 = vpack.c.bf16 %v16895_v60, %v6388_v27 }
 0x5c7   : > { %10494 = vmatprep.subr.bf16.mxu1 %v16849_v46  ;;  %v4640_v36 = vsel %vm406_vm1, %v4631_v16, %v16855_v62 }
 0x5c8   : > { %v16919_v28 = vmul.f32 %v4699_v26, %v4640_v36 }
 0x5c9   : > { %10528 = vmatpush1.bf16.msra.mxu0 %v10527_v58  ;;  %v4891_v1 = vpop.permute.xlu0 %4890  ;;  %v5219_v58 = vld [vmem:[#allocation6 + $0x2e8] sm:$0xff] }
 0x5ca   : > { %10496 = vmatpush1.bf16.msra.mxu1 %v16858_v38  ;;  %10530 = vmatprep.subr.bf16.mxu0 %v10529_v56  ;;  %v16875_v53 = vpop.permute.xlu1 %4892  ;;  %v4901_v20 = vsel %vm667_vm2, %v16723_v37, %v4891_v1  ;;  %v4698_v56 = vld [vmem:[#allocation6 + $0xe0] sm:$0xff]  ;;  %v4641_v37 = vsel %vm406_vm1, %v16706_v47, %v4631_v16 }
 0x5cb   : > { %10498 = vmatprep.subr.bf16.mxu1 %v16872_v17  ;;  %v4900_v42 = vsel %vm667_vm2, %v4891_v1, %v16875_v53  ;;  %v16925_v43 = vmul.f32 %v4958_v0, %v4901_v20  ;;  %v5478_v47 = vld [vmem:[#allocation6 + $0x3e0] sm:$0xff]  ;;  %v16942_v6 = vmul.f32 %v4698_v56, %v4641_v37  ;;  %v16972_v0 = vld [vmem:[#allocation9 + $0x8] sm:$0xff] }
 0x5cc   : > { %v16906_v48 = vmul.f32 %v4959_v2, %v4900_v42 }
 0x5cd   : > { %10532 = vmatpush1.bf16.msra.mxu0 %v10531_v19  ;;  %v5151_v45 = vpop.permute.xlu0 %5150  ;;  %v16957_v42 = vpack.c.bf16 %v16925_v43, %v16942_v6 }
 0x5ce   : > { %10500 = vmatpush1.bf16.msra.mxu1 %v16879_v3  ;;  %10534 = vmatprep.subr.bf16.mxu0 %v10533_v52  ;;  %v16893_v24 = vpop.permute.xlu1 %5152  ;;  %v16940_v19 = vpack.c.bf16 %v16906_v48, %v16919_v28  ;;  %v5161_v52 = vsel %vm928_vm3, %v16752_v23, %v5151_v45 }
 0x5cf   : > { %10502 = vmatprep.subr.bf16.mxu1 %v16890_v59  ;;  %v5160_v32 = vsel %vm928_vm3, %v5151_v45, %v16893_v24  ;;  %v5838_v45 = vld [vmem:[#allocation6 + $0x5e0] sm:$0xff]  ;;  %v5250_v20 = vmul.f32 %v5218_v61, %v5161_v52  ;;  %v6619_v52 = vld [vmem:[#allocation6 + $0x8e8] sm:$0xff] }
 0x5d0   : > { %v16909_v39 = vpop.f32.mrb[20].mxu1  ;;  %v16931_v1 = vmul.f32 %v5219_v58, %v5160_v32  ;;  %v6098_v32 = vld [vmem:[#allocation6 + $0x6e0] sm:$0xff] }
 0x5d1   : > { %10536 = vmatpush1.bf16.msra.mxu0 %v10535_v44  ;;  %v5411_v31 = vpop.permute.xlu0 %5410  ;;  %v16914_v5 = vpop.f32.mrb[21].mxu1 }
 0x5d2   : > { %10504 = vmatpush1.bf16.msra.mxu1 %v16901_v54  ;;  %10538 = vmatprep.subr.bf16.mxu0 %v10537_v34  ;;  %v16922_v30 = vpop.permute.xlu1 %5412  ;;  %v5421_v16 = vsel %vm1189_vm4, %v16764_v35, %v5411_v31 }
 0x5d3   : > { %8533 = vmatprep.subr.mxu1 %v16885_v49  ;;  %v5420_v22 = vsel %vm1189_vm4, %v5411_v31, %v16922_v30  ;;  %v16959_v44 = vmul.f32 %v5478_v47, %v5421_v16  ;;  %v6358_v31 = vld [vmem:[#allocation6 + $0x7e0] sm:$0xff] }
 0x5d4   : > { %v16936_v9 = vmul.f32 %v5479_v41, %v5420_v22  ;;  %v6099_v41 = vld [vmem:[#allocation6 + $0x6e8] sm:$0xff] }
 0x5d5   : > { %10540 = vmatpush1.bf16.msra.mxu0 %v10539_v4  ;;  %v5773_v27 = vpop.permute.xlu0 %5772  ;;  %v6359_v4 = vld [vmem:[#allocation6 + $0x7e8] sm:$0xff] }
 0x5d6   : > { %8534 = vmatpush1.msra.mxu1 %v16895_v60  ;;  %10542 = vmatprep.subr.bf16.mxu0 %v16940_v19  ;;  %v16949_v35 = vpop.permute.xlu1 %5774  ;;  %v16953_v2 = vpack.c.bf16 %v16936_v9, %v16931_v1  ;;  %v5780_v26 = vsel %vm1550_vm5, %v16779_v33, %v5773_v27 }
 0x5d7   : > { %8546 = vmatmul.mubr.f32.vlgmr.msra.gmra.mrb[28].mxu1 %v16436_v51  ;;  %10558 = vmatprep.subr.bf16.mxu1 %v16829_v25  ;;  %v5779_v23 = vsel %vm1550_vm5, %v5773_v27, %v16949_v35  ;;  %v16988_v58 = vmul.f32 %v5838_v45, %v5780_v26  ;;  %v10573_v26 = vpack.c.bf16 %v16919_v28, %v16885_v49 }
 0x5d8   : > { %10560 = vmatpush1.bf16.msra.mxu1 %v16839_v55  ;;  %v16970_v36 = vmul.f32 %v5839_v7, %v5779_v23  ;;  %9020 = vmatprep.mubr.msk.f32.mxu1 %vm3402_vm0, %v16972_v0  ;;  %v16986_v55 = vpack.c.bf16 %v16959_v44, %v5250_v20  ;;  %v10575_v49 = vpack.c.bf16 %v16942_v6, %v16895_v60  ;;  %v17631_v6 = vld [vmem:[#allocation67_spill] sm:$0xff] }
 0x5d9   : > { %10562 = vmatprep.subr.bf16.mxu1 %v16849_v46  ;;  %10544 = vmatpush1.bf16.msra.mxu0 %v16957_v42  ;;  %v6033_v25 = vpop.permute.xlu0 %6032  ;;  %v10581_v60 = vpack.c.bf16 %v16095_v18, %v16936_v9  ;;  %v4961_v9 = vld [vmem:[#allocation6 + $0x1f8] sm:$0xff] }
 0x5da   : > { %10546 = vmatprep.subr.bf16.mxu0 %v16953_v2  ;;  %v16979_v34 = vpop.permute.xlu1 %6034  ;;  %v16983_v33 = vpack.c.bf16 %v16970_v36, %v16095_v18  ;;  %v6040_v46 = vsel %vm1811_vm6, %v16794_v21, %v6033_v25 }
 0x5db   : > { %v6039_v56 = vsel %vm1811_vm6, %v6033_v25, %v16979_v34  ;;  %v17009_v47 = vmul.f32 %v6098_v32, %v6040_v46  ;;  %v6618_v32 = vld [vmem:[#allocation6 + $0x8e0] sm:$0xff] }
 0x5dc   : > { %10564 = vmatpush1.bf16.msra.mxu1 %v16858_v38  ;;  %v17007_v38 = vpack.c.bf16 %v16988_v58, %v16004_v11  ;;  %v6131_v27 = vmul.f32 %v6099_v41, %v6039_v56  ;;  %v10579_v56 = vpack.c.bf16 %v5250_v20, %v16925_v43  ;;  %v10583_v43 = vpack.c.bf16 %v16004_v11, %v16959_v44  ;;  %v4700_v44 = vld [vmem:[#allocation6 + $0xf0] sm:$0xff] }
 0x5dd   : > { %10566 = vmatprep.subr.bf16.mxu1 %v16872_v17  ;;  %10548 = vmatpush1.bf16.msra.mxu0 %v16986_v55  ;;  %v6293_v37 = vpop.permute.xlu0 %6292  ;;  %v10587_v11 = vpack.c.bf16 %v17009_v47, %v16988_v58  ;;  %v4960_v20 = vld [vmem:[#allocation6 + $0x1f0] sm:$0xff] }
 0x5de   : > { %10550 = vmatprep.subr.bf16.mxu0 %v16983_v33  ;;  %v6300_v21 = vsel %vm2072_vm7, %v16816_v29, %v6293_v37  ;;  %v17003_v22 = vpop.permute.xlu1 %6294  ;;  %v10585_v18 = vpack.c.bf16 %v6131_v27, %v16970_v36 }
 0x5df   : > { %v17011_v16 = vmul.f32 %v6358_v31, %v6300_v21  ;;  %v6299_v17 = vsel %vm2072_vm7, %v6293_v37, %v17003_v22  ;;  %v17633_v21 = vld [vmem:[#allocation69_spill] sm:$0xff] }
 0x5e0   : > { %10568 = vmatpush1.bf16.msra.mxu1 %v16879_v3  ;;  %v17017_v7 = vmul.f32 %v6359_v4, %v6299_v17  ;;  %v5221_v4 = vld [vmem:[#allocation6 + $0x2f8] sm:$0xff] }
 0x5e1   : > { %v17021_v29 = vpack.c.bf16 %v17011_v16, %v17009_v47  ;;  %10570 = vmatprep.subr.bf16.mxu1 %v16890_v59  ;;  %10552 = vmatpush1.bf16.msra.mxu0 %v17007_v38  ;;  %v6553_v61 = vpop.permute.xlu0 %6552  ;;  %v5481_v47 = vld [vmem:[#allocation6 + $0x3f8] sm:$0xff] }
 0x5e2   : > { %v17025_v23 = vpop.permute.xlu1 %6554  ;;  %v17028_v45 = vpack.c.bf16 %v17017_v7, %v6131_v27  ;;  %v6560_v59 = vsel %vm2333_vm8, %v16835_v15, %v6553_v61  ;;  %v10577_v15 = vpack.c.bf16 %v16931_v1, %v16906_v48 }
 0x5e3   : > { %v6559_v3 = vsel %vm2333_vm8, %v6553_v61, %v17025_v23  ;;  %v17035_v25 = vpop.f32.mrb[20].mxu0  ;;  %v17050_v28 = vmul.f32 %v6618_v32, %v6560_v59  ;;  %v5480_v59 = vld [vmem:[#allocation6 + $0x3f0] sm:$0xff] }
 0x5e4   : > { %10572 = vmatpush1.bf16.msra.mxu1 %v16901_v54  ;;  %v17041_v46 = vmul.f32 %v6619_v52, %v6559_v3  ;;  %10554 = vmatprep.subr.bf16.mxu0 %v17028_v45  ;;  %v17044_v31 = vpop.f32.mrb[21].mxu0 }
 0x5e5   : > { %10574 = vmatprep.subr.bf16.mxu1 %v10573_v26  ;;  %10556 = vmatpush1.bf16.msra.mxu0 %v17021_v29  ;;  %v4635_v41 = vpop.permute.xlu0 %4634  ;;  %v5220_v26 = vld [vmem:[#allocation6 + $0x2f0] sm:$0xff] }
 0x5e6   : > { %8604 = vmatprep.subr.mxu0 %v17041_v46  ;;  %v4895_v54 = vpop.permute.xlu1 %4894  ;;  %v10589_v58 = vpack.c.bf16 %v17041_v46, %v17017_v7 }
 0x5e8   : > { %10576 = vmatpush1.bf16.msra.mxu1 %v10575_v49 }
 0x5e9   : > { %10578 = vmatprep.subr.bf16.mxu1 %v10577_v15  ;;  %8605 = vmatpush1.msra.mxu0 %v17050_v28  ;;  %v5155_v48 = vpop.permute.xlu0 %5154  ;;  %v5841_v15 = vld [vmem:[#allocation6 + $0x5f8] sm:$0xff] }
 0x5ea   : > { %8617 = vmatmul.mubr.f32.vlgmr.msra.gmra.mrb[28].mxu0 %v16436_v51  ;;  %10610 = vmatprep.subr.bf16.mxu0 %v16940_v19  ;;  %v5415_v1 = vpop.permute.xlu1 %5414  ;;  %v4701_v51 = vld [vmem:[#allocation6 + $0xf8] sm:$0xff]  ;;  %v4638_v19 = vsel %vm406_vm1, %v4635_v41, %v17631_v6  ;;  %v5159_v7 = vsel %vm928_vm3, %v16893_v24, %v5155_v48 }
 0x5eb   : > { %10612 = vmatpush1.bf16.msra.mxu0 %v16957_v42  ;;  %9021 = vmatprep.mubr.msk.f32.mxu0 %vm3402_vm0, %v16972_v0  ;;  %v4639_v0 = vsel %vm406_vm1, %v16855_v62, %v4635_v41  ;;  %v4733_v36 = vmul.f32 %v4701_v51, %v4638_v19  ;;  %v17634_v62 = vld [vmem:[#allocation70_spill] sm:$0xff]  ;;  %v5419_v49 = vsel %vm1189_vm4, %v16922_v30, %v5415_v1  ;;  %v6101_v6 = vld [vmem:[#allocation6 + $0x6f8] sm:$0xff] }
 0x5ec   : > { %10580 = vmatpush1.bf16.msra.mxu1 %v10579_v56  ;;  %10614 = vmatprep.subr.bf16.mxu0 %v16953_v2  ;;  %v17632_v2 = vld [vmem:[#allocation68_spill] sm:$0xff]  ;;  %v5418_v27 = vsel %vm1189_vm4, %v5415_v1, %v17634_v62  ;;  %v4732_v52 = vmul.f32 %v4700_v44, %v4639_v0  ;;  %v5840_v1 = vld [vmem:[#allocation6 + $0x5f0] sm:$0xff] }
 0x5ed   : > { %10582 = vmatprep.subr.bf16.mxu1 %v10581_v60  ;;  %v4898_v42 = vsel %vm667_vm2, %v4895_v54, %v17632_v2  ;;  %v5777_v17 = vpop.permute.xlu0 %5776  ;;  %v5513_v41 = vmul.f32 %v5481_v47, %v5418_v27  ;;  %v17636_v19 = vld [vmem:[#allocation34_spill] sm:$0xff] }
 0x5ee   : > { %v4993_v37 = vmul.f32 %v4961_v9, %v4898_v42  ;;  %v6037_v61 = vpop.permute.xlu1 %6036  ;;  %v10627_v24 = vpack.c.bf16 %v4732_v52, %v17050_v28  ;;  %v6361_v42 = vld [vmem:[#allocation6 + $0x7f8] sm:$0xff]  ;;  %v6360_v0 = vld [vmem:[#allocation6 + $0x7f0] sm:$0xff] }
 0x5ef   : > { %10616 = vmatpush1.bf16.msra.mxu0 %v16986_v55  ;;  %v4899_v55 = vsel %vm667_vm2, %v16875_v53, %v4895_v54  ;;  %v10591_v53 = vpack.c.bf16 %v17050_v28, %v17011_v16  ;;  %v17635_v54 = vld [vmem:[#allocation31_spill] sm:$0xff]  ;;  %v6100_v28 = vld [vmem:[#allocation6 + $0x6f0] sm:$0xff]  ;;  %v6038_v2 = vsel %vm1811_vm6, %v16979_v34, %v6037_v61 }
 0x5f0   : > { %10584 = vmatpush1.bf16.msra.mxu1 %v10583_v43  ;;  %10618 = vmatprep.subr.bf16.mxu0 %v16983_v33  ;;  %v5158_v33 = vsel %vm928_vm3, %v5155_v48, %v17633_v21  ;;  %v4992_v3 = vmul.f32 %v4960_v20, %v4899_v55  ;;  %v10593_v16 = vpack.c.bf16 %v4993_v37, %v4733_v36  ;;  %v6620_v20 = vld [vmem:[#allocation6 + $0x8f0] sm:$0xff]  ;;  %v6621_v55 = vld [vmem:[#allocation6 + $0x8f8] sm:$0xff] }
 0x5f1   : > { %10586 = vmatprep.subr.bf16.mxu1 %v10585_v18  ;;  %v5253_v32 = vmul.f32 %v5221_v4, %v5158_v33  ;;  %v5809_v56 = vsel %vm1550_vm5, %v5777_v17, %v17635_v54  ;;  %v5512_v48 = vmul.f32 %v5480_v59, %v5419_v49  ;;  %v6069_v18 = vsel %vm1811_vm6, %v6037_v61, %v17636_v19  ;;  %v17638_v34 = vld [vmem:[#allocation38_spill] sm:$0xff] }
 0x5f2   : > { %v10595_v60 = vpack.c.bf16 %v4992_v3, %v4732_v52  ;;  %v5873_v51 = vmul.f32 %v5841_v15, %v5809_v56  ;;  %v6132_v47 = vmul.f32 %v6100_v28, %v6038_v2  ;;  %v10780_v28 = vld [vmem:[%s11244_s12 + $0x40] sm:$0xff] }
 0x5f3   : > { %10620 = vmatpush1.bf16.msra.mxu0 %v17007_v38  ;;  %v10625_v38 = vpack.c.bf16 %v4733_v36, %v17041_v46  ;;  %v6297_v46 = vpop.permute.xlu0 %6296  ;;  %v6557_v43 = vpop.permute.xlu1 %6556  ;;  %v10629_v30 = vpack.c.bf16 %v5253_v32, %v4993_v37  ;;  %v10597_v9 = vpack.c.bf16 %v5513_v41, %v5253_v32  ;;  %v10635_v12 = vpack.c.bf16 %v16212_v63, %v5512_v48 }
 0x5f4   : > { %10588 = vmatpush1.bf16.msra.mxu1 %v10587_v11  ;;  %10622 = vmatprep.subr.bf16.mxu0 %v17028_v45  ;;  %v5252_v45 = vmul.f32 %v5220_v26, %v5159_v7  ;;  %v17637_v11 = vld [vmem:[#allocation36_spill] sm:$0xff]  ;;  %v6298_v36 = vsel %vm2072_vm7, %v17003_v22, %v6297_v46  ;;  %v6558_v37 = vsel %vm2333_vm8, %v17025_v23, %v6557_v43 }
 0x5f5   : > { %10590 = vmatprep.subr.bf16.mxu1 %v10589_v58  ;;  %v6329_v44 = vsel %vm2072_vm7, %v6297_v46, %v17637_v11  ;;  %v6589_v4 = vsel %vm2333_vm8, %v6557_v43, %v17638_v34  ;;  %v10633_v58 = vpack.c.bf16 %v17624_v57, %v5513_v41  ;;  %v10601_v22 = vpack.c.bf16 %v5873_v51, %v17624_v57  ;;  %v17639_v41 = vld [vmem:[#allocation50_spill] sm:$0xff] }
 0x5f6   : > { %v10599_v21 = vpack.c.bf16 %v5512_v48, %v5252_v45  ;;  %v17129_v62 = vmul.f32 %v6361_v42, %v6329_v44  ;;  %v17132_v27 = vmul.f32 %v6360_v0, %v6298_v36  ;;  %v17134_v61 = vmul.f32 %v6620_v20, %v6558_v37  ;;  %v10773_v48 = vld [vmem:[%s11244_s12 + $0x8] sm:$0xff]  ;;  %v10782_v44 = vld [vmem:[%s11244_s12 + $0x50] sm:$0xff]  ;;  %v10783_v0 = vld [vmem:[%s11244_s12 + $0x58] sm:$0xff] }
 0x5f7   : > { %10624 = vmatpush1.bf16.msra.mxu0 %v17021_v29  ;;  %v5778_v29 = vsel %vm1550_vm5, %v16949_v35, %v5777_v17  ;;  %v10631_v35 = vpack.c.bf16 %v5252_v45, %v4992_v3  ;;  %v6133_v17 = vmul.f32 %v6101_v6, %v6069_v18  ;;  %v6653_v23 = vmul.f32 %v6621_v55, %v6589_v4  ;;  %v10778_v6 = vld [vmem:[%s11244_s12 + $0x30] sm:$0xff]  ;;  %v10779_v18 = vld [vmem:[%s11244_s12 + $0x38] sm:$0xff]  ;;  %v10781_v42 = vld [vmem:[%s11244_s12 + $0x48] sm:$0xff] }
 0x5f8   : > { %10592 = vmatpush1.bf16.msra.mxu1 %v10591_v53  ;;  %10626 = vmatprep.subr.bf16.mxu0 %v10625_v38  ;;  %v5872_v33 = vmul.f32 %v5840_v1, %v5778_v29  ;;  %v10607_v57 = vpack.c.bf16 %v17132_v27, %v6132_v47  ;;  %v10643_v7 = vpack.c.bf16 %v17134_v61, %v17132_v27  ;;  %v10784_v27 = vld [vmem:[#allocation9] sm:$0xff] }
 0x5f9   : > { %10594 = vmatprep.subr.bf16.mxu1 %v10593_v16  ;;  %v10637_v52 = vpack.c.bf16 %v6133_v17, %v5873_v51  ;;  %v10605_v26 = vpack.c.bf16 %v17129_v62, %v6133_v17  ;;  %v10641_v38 = vpack.c.bf16 %v6653_v23, %v17129_v62 }
 0x5fa   : > { %v10603_v53 = vpack.c.bf16 %v5872_v33, %v16212_v63  ;;  %v10639_v3 = vpack.c.bf16 %v6132_v47, %v5872_v33 }
 0x5fb   : > { %10628 = vmatpush1.bf16.msra.mxu0 %v10627_v24 }
 0x5fc   : > { %10596 = vmatpush1.bf16.msra.mxu1 %v10595_v60  ;;  %10630 = vmatprep.subr.bf16.mxu0 %v10629_v30 }
 0x5fd   : > { %10598 = vmatprep.subr.bf16.mxu1 %v10597_v9 }
 0x5ff   : > { %10632 = vmatpush1.bf16.msra.mxu0 %v10631_v35 }
 0x600   : > { %10600 = vmatpush1.bf16.msra.mxu1 %v10599_v21  ;;  %10634 = vmatprep.subr.bf16.mxu0 %v10633_v58 }
 0x601   : > { %10602 = vmatprep.subr.bf16.mxu1 %v10601_v22 }
 0x603   : > { %10636 = vmatpush1.bf16.msra.mxu0 %v10635_v12  ;;  %v10785_v12 = vld [vmem:[%s11244_s12 + $0x60] sm:$0xff] }
 0x604   : > { %10604 = vmatpush1.bf16.msra.mxu1 %v10603_v53  ;;  %v17142_v32 = vpop.permute.xlu0 %7623  ;;  %10638 = vmatprep.subr.bf16.mxu0 %v10637_v52  ;;  %v10786_v52 = vld [vmem:[%s11244_s12 + $0x68] sm:$0xff] }
 0x605   : > { %v7696_v59 = vadd.f32 %v16210_v10, %v17142_v32  ;;  %v7698_v63 = vadd.f32 %v16220_v40, %v17142_v32  ;;  %v7767_v49 = vadd.f32 %v16391_v8, %v17142_v32  ;;  %v7769_v16 = vadd.f32 %v17639_v41, %v17142_v32  ;;  %10606 = vmatprep.subr.bf16.mxu1 %v10605_v26  ;;  %v17640_v10 = vld [vmem:[#allocation40_spill] sm:$0xff] }
 0x606   : > { %v7838_v15 = vadd.f32 %v16601_v14, %v17142_v32  ;;  %v7840_v54 = vadd.f32 %v16610_v13, %v17142_v32  ;;  %v7909_v56 = vadd.f32 %v17640_v10, %v17142_v32  ;;  %v7911_v40 = vadd.f32 %v16754_v50, %v17142_v32  ;;  %v8121_v8 = vpop.f32.mrb[22].mxu1  ;;  %v10772_v50 = vld [vmem:[%s11244_s12] sm:$0xff] }
 0x607   : > { %v7980_v24 = vadd.f32 %v16909_v39, %v17142_v32  ;;  %v7982_v45 = vadd.f32 %v16914_v5, %v17142_v32  ;;  %v8051_v14 = vadd.f32 %v17035_v25, %v17142_v32  ;;  %v8053_v13 = vadd.f32 %v17044_v31, %v17142_v32  ;;  %v8123_v46 = vpop.f32.mrb[23].mxu1  ;;  %10640 = vmatpush1.bf16.msra.mxu0 %v10639_v3  ;;  %v10774_v39 = vld [vmem:[%s11244_s12 + $0x10] sm:$0xff]  ;;  %v10775_v5 = vld [vmem:[%s11244_s12 + $0x18] sm:$0xff]  ;;  %v10776_v25 = vld [vmem:[%s11244_s12 + $0x20] sm:$0xff] }
 0x608   : > { %v8765_v60 = vadd.f32 %v10772_v50, %v7696_v59  ;;  %v8766_v43 = vadd.f32 %v10773_v48, %v7698_v63  ;;  %v8767_v30 = vadd.f32 %v10774_v39, %v7767_v49  ;;  %v8768_v1 = vadd.f32 %v10775_v5, %v7769_v16  ;;  %10608 = vmatpush1.bf16.msra.mxu1 %v10607_v57  ;;  %v10777_v31 = vld [vmem:[%s11244_s12 + $0x28] sm:$0xff]  ;;  %v10787_v49 = vld [vmem:[%s11244_s12 + $0x70] sm:$0xff]  ;;  %v10788_v16 = vld [vmem:[%s11244_s12 + $0x78] sm:$0xff] }
 0x609   : > { %v8769_v29 = vadd.f32 %v10776_v25, %v7838_v15  ;;  %v8770_v51 = vadd.f32 %v10777_v31, %v7840_v54  ;;  %v8771_v19 = vadd.f32 %v10778_v6, %v7909_v56  ;;  %v8772_v9 = vadd.f32 %v10779_v18, %v7911_v40  ;;  %8675 = vmatprep.subr.mxu1 %v6653_v23  ;;  %v10791_v5 = vld [vmem:[%s11244_s12 + $0x90] sm:$0xff]  ;;  %v10792_v25 = vld [vmem:[%s11244_s12 + $0x98] sm:$0xff] }
 0x60a   : > { %v8773_v2 = vadd.f32 %v10780_v28, %v7980_v24  ;;  %v8774_v11 = vadd.f32 %v10781_v42, %v7982_v45  ;;  %v8775_v35 = vadd.f32 %v10782_v44, %v8051_v14  ;;  %v8776_v36 = vadd.f32 %v10783_v0, %v8053_v13  ;;  %10642 = vmatprep.subr.bf16.mxu0 %v10641_v38  ;;  %v10789_v45 = vld [vmem:[%s11244_s12 + $0x80] sm:$0xff]  ;;  %v10790_v13 = vld [vmem:[%s11244_s12 + $0x88] sm:$0xff] }
 0x60b   : > { %v8797_v20 = vmax.f32 %v8765_v60, 0.0  ;;  %v8798_v55 = vmax.f32 %v8766_v43, 0.0  ;;  %v8799_v37 = vmax.f32 %v8767_v30, 0.0  ;;  %v8800_v34 = vmax.f32 %v8768_v1, 0.0  ;;  %10644 = vmatpush1.bf16.msra.mxu0 %v10643_v7  ;;  %v10793_v28 = vld [vmem:[%s11244_s12 + $0xa0] sm:$0xff]  ;;  %v10794_v42 = vld [vmem:[%s11244_s12 + $0xa8] sm:$0xff] }
 0x60c   : > { %v8801_v4 = vmax.f32 %v8769_v29, 0.0  ;;  %v8802_v21 = vmax.f32 %v8770_v51, 0.0  ;;  %v8803_v33 = vmax.f32 %v8771_v19, 0.0  ;;  %v8804_v17 = vmax.f32 %v8772_v9, 0.0  ;;  %8676 = vmatpush1.msra.mxu1 %v17134_v61 }
 0x60d   : > { %v8805_v58 = vmax.f32 %v8773_v2, 0.0  ;;  %v8806_v47 = vmax.f32 %v8774_v11, 0.0  ;;  %v8807_v62 = vmax.f32 %v8775_v35, 0.0  ;;  %v8808_v22 = vmax.f32 %v8776_v36, 0.0  ;;  %8829 = vst [vmem:[%s17184_s27] sm:$0xff] %v8797_v20  ;;  %8830 = vst [vmem:[%s17184_s27 + $0x8] sm:$0xff] %v8798_v55  ;;  %8688 = vmatmul.mubr.f32.vlgmr.msra.gmra.mrb[30].mxu1 %v10784_v27 }
 0x60e   : > { %8831 = vst [vmem:[%s17184_s27 + $0x10] sm:$0xff] %v8799_v37  ;;  %8832 = vst [vmem:[%s17184_s27 + $0x18] sm:$0xff] %v8800_v34  ;;  %v8122_v61 = vadd.f32 %v8121_v8, %v17142_v32  ;;  %v8124_v23 = vadd.f32 %v8123_v46, %v17142_v32  ;;  %8759 = vmatmul.mubr.f32.vlgmr.msra.gmra.mrb[30].mxu0 %v10784_v27  ;;  %v10795_v37 = vld [vmem:[%s11244_s12 + $0xb0] sm:$0xff]  ;;  %v10797_v27 = vld [vmem:[%s11244_s12 + $0xc0] sm:$0xff] }
 0x60f   : > { %8833 = vst [vmem:[%s17184_s27 + $0x20] sm:$0xff] %v8801_v4  ;;  %8834 = vst [vmem:[%s17184_s27 + $0x28] sm:$0xff] %v8802_v21  ;;  %v10796_v4 = vld [vmem:[%s11244_s12 + $0xb8] sm:$0xff] }
 0x610   : > { %8835 = vst [vmem:[%s17184_s27 + $0x30] sm:$0xff] %v8803_v33  ;;  %8836 = vst [vmem:[%s17184_s27 + $0x38] sm:$0xff] %v8804_v17  ;;  %v8777_v53 = vadd.f32 %v10785_v12, %v8122_v61  ;;  %v8778_v3 = vadd.f32 %v10786_v52, %v8124_v23  ;;  %v10798_v23 = vld [vmem:[%s11244_s12 + $0xc8] sm:$0xff] }
 0x611   : > { %8837 = vst [vmem:[%s17184_s27 + $0x40] sm:$0xff] %v8805_v58  ;;  %8838 = vst [vmem:[%s17184_s27 + $0x48] sm:$0xff] %v8806_v47 }
 0x612   : > { %8839 = vst [vmem:[%s17184_s27 + $0x50] sm:$0xff] %v8807_v62  ;;  %8840 = vst [vmem:[%s17184_s27 + $0x58] sm:$0xff] %v8808_v22  ;;  %v8809_v26 = vmax.f32 %v8777_v53, 0.0  ;;  %v8810_v57 = vmax.f32 %v8778_v3, 0.0 }
 0x614   : > { %8841 = vst [vmem:[%s17184_s27 + $0x60] sm:$0xff] %v8809_v26  ;;  %8842 = vst [vmem:[%s17184_s27 + $0x68] sm:$0xff] %v8810_v57 }
 0x619   : > { %v8192_v7 = vpop.f32.mrb[22].mxu0 }
 0x61a   : > { %v8193_v38 = vadd.f32 %v8192_v7, %v17142_v32  ;;  %v8194_v59 = vpop.f32.mrb[23].mxu0 }
 0x61b   : > { %v8195_v63 = vadd.f32 %v8194_v59, %v17142_v32 }
 0x61c   : > { %v8779_v41 = vadd.f32 %v10787_v49, %v8193_v38  ;;  %v10799_v38 = vld [vmem:[%s11244_s12 + $0xd0] sm:$0xff] }
 0x61d   : > { %v8780_v15 = vadd.f32 %v10788_v16, %v8195_v63  ;;  %v10800_v63 = vld [vmem:[%s11244_s12 + $0xd8] sm:$0xff] }
 0x61e   : > { %v8811_v54 = vmax.f32 %v8779_v41, 0.0 }
 0x61f   : > { %v8812_v10 = vmax.f32 %v8780_v15, 0.0 }
 0x620   : > { %8843 = vst [vmem:[%s17184_s27 + $0x70] sm:$0xff] %v8811_v54 }
 0x621   : > { %8844 = vst [vmem:[%s17184_s27 + $0x78] sm:$0xff] %v8812_v10 }
 0x63c   : > { %v8263_v56 = vpop.f32.mrb[24].mxu1 }
 0x63d   : > { %v8264_v40 = vadd.f32 %v8263_v56, %v17142_v32  ;;  %v8265_v8 = vpop.f32.mrb[25].mxu1 }
 0x63e   : > { %v8266_v24 = vadd.f32 %v8265_v8, %v17142_v32 }
 0x63f   : > { %v8781_v14 = vadd.f32 %v10789_v45, %v8264_v40  ;;  %v10801_v45 = vld [vmem:[%s11244_s12 + $0xe0] sm:$0xff] }
 0x640   : > { %v8782_v46 = vadd.f32 %v10790_v13, %v8266_v24 }
 0x641   : > { %v8813_v50 = vmax.f32 %v8781_v14, 0.0 }
 0x642   : > { %v8814_v60 = vmax.f32 %v8782_v46, 0.0  ;;  %v10802_v46 = vld [vmem:[%s11244_s12 + $0xe8] sm:$0xff] }
 0x643   : > { %8845 = vst [vmem:[%s17184_s27 + $0x80] sm:$0xff] %v8813_v50 }
 0x644   : > { %8846 = vst [vmem:[%s17184_s27 + $0x88] sm:$0xff] %v8814_v60  ;;  %v10803_v60 = vld [vmem:[%s11244_s12 + $0xf0] sm:$0xff] }
 0x651   : > { %v8334_v48 = vpop.f32.mrb[24].mxu0 }
 0x652   : > { %v8335_v43 = vadd.f32 %v8334_v48, %v17142_v32  ;;  %v8336_v39 = vpop.f32.mrb[25].mxu0 }
 0x653   : > { %v8337_v30 = vadd.f32 %v8336_v39, %v17142_v32  ;;  %v10804_v39 = vld [vmem:[%s11244_s12 + $0xf8] sm:$0xff]  ;;  %s10919_s12 = scalar_lea.vmem %s17262_s29, 4096 }
 0x654   : > { %v8783_v1 = vadd.f32 %v10791_v5, %v8335_v43  ;;  %p10920_p10 = scmp.ne.s32.totalorder %s17262_s29, %s10919_s12  ;;  %p10927_p2 = scmp.lt.s32.totalorder %s10925_s11, %s10919_s12 }
 0x655   : > { %v8784_v29 = vadd.f32 %v10792_v25, %v8337_v30 }
 0x656   : > { %v8815_v31 = vmax.f32 %v8783_v1, 0.0  ;;  %p10921_p3 = pnand %p10920_p10, %p11193_p5  ;;  %p10928_p1 = por %p10927_p2, %p10926_p12 }
 0x657   : > { %v8816_v51 = vmax.f32 %v8784_v29, 0.0 }
 0x658   : > { %8847 = vst [vmem:[%s17184_s27 + $0x90] sm:$0xff] %v8815_v31  ;;  %p10922_p7 = pneg %p10921_p3 }
 0x659   : > { %8848 = vst [vmem:[%s17184_s27 + $0x98] sm:$0xff] %v8816_v51 }
 0x65a   : > { %p10929_p4 = pnand %p10928_p1, %p10922_p7 }
 0x673   : > { %v8405_v6 = vpop.f32.mrb[26].mxu1 }
 0x674   : > { %v8406_v19 = vadd.f32 %v8405_v6, %v17142_v32  ;;  %v8407_v18 = vpop.f32.mrb[27].mxu1 }
 0x675   : > { %v8408_v9 = vadd.f32 %v8407_v18, %v17142_v32 }
 0x676   : > { %v8785_v2 = vadd.f32 %v10793_v28, %v8406_v19 }
 0x677   : > { %v8786_v11 = vadd.f32 %v10794_v42, %v8408_v9 }
 0x678   : > { %v8817_v44 = vmax.f32 %v8785_v2, 0.0 }
 0x679   : > { %v8818_v35 = vmax.f32 %v8786_v11, 0.0 }
 0x67a   : > { %8849 = vst [vmem:[%s17184_s27 + $0xa0] sm:$0xff] %v8817_v44 }
 0x67b   : > { %8850 = vst [vmem:[%s17184_s27 + $0xa8] sm:$0xff] %v8818_v35 }
 0x687   : > { %v8476_v0 = vpop.f32.mrb[26].mxu0 }
 0x688   : > { %v8477_v36 = vadd.f32 %v8476_v0, %v17142_v32  ;;  %v8478_v20 = vpop.f32.mrb[27].mxu0 }
 0x689   : > { %v8479_v55 = vadd.f32 %v8478_v20, %v17142_v32 }
 0x68a   : > { %v8787_v34 = vadd.f32 %v10795_v37, %v8477_v36 }
 0x68b   : > { %v8788_v21 = vadd.f32 %v10796_v4, %v8479_v55 }
 0x68c   : > { %v8819_v33 = vmax.f32 %v8787_v34, 0.0 }
 0x68d   : > { %v8820_v17 = vmax.f32 %v8788_v21, 0.0 }
 0x68e   : > { %8851 = vst [vmem:[%s17184_s27 + $0xb0] sm:$0xff] %v8819_v33 }
 0x68f   : > { %8852 = vst [vmem:[%s17184_s27 + $0xb8] sm:$0xff] %v8820_v17 }
 0x6aa   : > { %v8547_v58 = vpop.f32.mrb[28].mxu1 }
 0x6ab   : > { %v8548_v47 = vadd.f32 %v8547_v58, %v17142_v32  ;;  %v8549_v62 = vpop.f32.mrb[29].mxu1 }
 0x6ac   : > { %v8550_v22 = vadd.f32 %v8549_v62, %v17142_v32 }
 0x6ad   : > { %v8789_v61 = vadd.f32 %v10797_v27, %v8548_v47 }
 0x6ae   : > { %v8790_v12 = vadd.f32 %v10798_v23, %v8550_v22 }
 0x6af   : > { %v8821_v53 = vmax.f32 %v8789_v61, 0.0 }
 0x6b0   : > { %v8822_v52 = vmax.f32 %v8790_v12, 0.0 }
 0x6b1   : > { %8853 = vst [vmem:[%s17184_s27 + $0xc0] sm:$0xff] %v8821_v53 }
 0x6b2   : > { %8854 = vst [vmem:[%s17184_s27 + $0xc8] sm:$0xff] %v8822_v52 }
 0x6bd   : > { %v8618_v3 = vpop.f32.mrb[28].mxu0 }
 0x6be   : > { %v8619_v26 = vadd.f32 %v8618_v3, %v17142_v32  ;;  %v8620_v57 = vpop.f32.mrb[29].mxu0 }
 0x6bf   : > { %v8621_v7 = vadd.f32 %v8620_v57, %v17142_v32 }
 0x6c0   : > { %v8791_v59 = vadd.f32 %v10799_v38, %v8619_v26 }
 0x6c1   : > { %v8792_v49 = vadd.f32 %v10800_v63, %v8621_v7 }
 0x6c2   : > { %v8823_v41 = vmax.f32 %v8791_v59, 0.0 }
 0x6c3   : > { %v8824_v16 = vmax.f32 %v8792_v49, 0.0 }
 0x6c4   : > { %8855 = vst [vmem:[%s17184_s27 + $0xd0] sm:$0xff] %v8823_v41 }
 0x6c5   : > { %8856 = vst [vmem:[%s17184_s27 + $0xd8] sm:$0xff] %v8824_v16 }
 0x6e0   : > { %v8689_v15 = vpop.f32.mrb[30].mxu1 }
 0x6e1   : > { %v8690_v54 = vadd.f32 %v8689_v15, %v17142_v32  ;;  %v8691_v10 = vpop.f32.mrb[31].mxu1  ;;  %v8760_v56 = vpop.f32.mrb[30].mxu0 }
 0x6e2   : > { %v8692_v40 = vadd.f32 %v8691_v10, %v17142_v32  ;;  %v8761_v8 = vadd.f32 %v8760_v56, %v17142_v32  ;;  %v8762_v24 = vpop.f32.mrb[31].mxu0 }
 0x6e3   : > { %v8793_v14 = vadd.f32 %v10801_v45, %v8690_v54  ;;  %v8763_v13 = vadd.f32 %v8762_v24, %v17142_v32 }
 0x6e4   : > { %v8794_v50 = vadd.f32 %v10802_v46, %v8692_v40  ;;  %v8795_v48 = vadd.f32 %v10803_v60, %v8761_v8 }
 0x6e5   : > { %v8825_v43 = vmax.f32 %v8793_v14, 0.0  ;;  %v8796_v30 = vadd.f32 %v10804_v39, %v8763_v13 }
 0x6e6   : > { %v8826_v5 = vmax.f32 %v8794_v50, 0.0  ;;  %v8827_v1 = vmax.f32 %v8795_v48, 0.0 }
 0x6e7   : > { %8857 = vst [vmem:[%s17184_s27 + $0xe0] sm:$0xff] %v8825_v43  ;;  %v8828_v25 = vmax.f32 %v8796_v30, 0.0 }
 0x6e8   : > { %8858 = vst [vmem:[%s17184_s27 + $0xe8] sm:$0xff] %v8826_v5  ;;  %8859 = vst [vmem:[%s17184_s27 + $0xf0] sm:$0xff] %v8827_v1 }
 0x6e9   : > { %8860 = vst [vmem:[%s17184_s27 + $0xf8] sm:$0xff] %v8828_v25 }
 0x6ea   : > { %10932 = shalt.err (!%p10929_p4)
}
 0x6eb   : > { %s10933_s26 = scalar_lea.hbm %s17260_s20, 4096  ;;  %s10937_s7 = scalar_lea.hbm %s17313_s6, 8192 }
 0x6ec   : > { %p10934_p0 = scmp.ne.s32.totalorder %s17260_s20, %s10933_s26  ;;  %p10938_p8 = scmp.lt.u32.totalorder %s17260_s20, %s17313_s6 }
 0x6ed   : > { %p10939_p13 = scmp.lt.u32.totalorder %s10937_s7, %s10933_s26  ;;  %p10941_p10 = scmp.lt.u32.totalorder %s10933_s26, %s17260_s20 }
 0x6ee   : > { %p10935_p9 = pnand %p10934_p0, %p11193_p5 }
 0x6ef   : > { %p10940_p6 = por %p10939_p13, %p10938_p8 }
 0x6f0   : > { %p10936_p11 = pneg %p10935_p9 }
 0x6f1   : > { %p10942_p3 = por %p10941_p10, %p10940_p6 }
 0x6f3   : > { %p10943_p7 = pnand %p10942_p3, %p10936_p11 }
 0x6f5   : > { %10946 = shalt.err (!%p10943_p7)
}
 0x6f6   : > { %10659 = dma.vmem_to_hbm [thread:$0]  (%p11193_p5), %s17262_s29, 4096, %s17260_s20, %s8862_s25  }
 0x6f7 PF: > { %s8888_s8 = sand.u32 1, %s10981_s21   ;;  %p17641_p12 = scmp.ne.s32.totalorder %s17427_s28, 0 }
 0x6f8   : > { %p17642_p2 = scmp.ge.s32.totalorder %s10993_s24, 2  ;;  %s8889_s16 = scalar_lea.sflag [#allocation5], %s8888_s8 }
 0x6fa   : > { %p10676_p1 = pnand %p17642_p2, %p17641_p12 }
 0x6fc   : > { %10976 = dma.done.wait (!%p10676_p1), %s8889_s16, 4096  }
 0x6fd   : > { %10978 = vsyncadd (!%p10676_p1), %s8889_s16, 4294963200  ;;  %p21_p4 = scmp.ge.s32.totalorder %s11179_s18, 4   ;;  %s17643_s21 = smov %s10985_s22 }
 0x6fe   : > { %s17644_s22 = smov %s10989_s23  ;;  %s17645_s23 = smov %s11189_s30 }
 0x6ff   : > { %s17646_s24 = smov %s11179_s18  ;;  %23 = sbr.rel (!%p21_p4) target bundleno = 7 (0x7), region = 101 }
 0x706   :  { %8894 = vsyncpa [#allocation4], 1 }
 0x707   :  { %8896 = vsyncpa [#allocation4 + $0x1], 1 }
 0x708   :  { %8897 = vsyncpa [#allocation7], 1 }
 0x709   :  { %8898 = vsyncpa [#allocation10], 1 }
 0x70a   :  { %8899 = vsyncpa [#allocation5], 1 }
 0x70b   :  { %8901 = vsyncpa [#allocation5 + $0x1], 1 }

</bundles_post_ra>
